<compile_context>
chip_gen: v7x
topology: tpu7x:2x2x1
jax: 0.10.0
libtpu: 0.0.40
codegen_flags: <defaults>
</compile_context>

<pallas_src>
import functools
import math

import jax
import jax.numpy as jnp
from jax.experimental import pallas as pl
from jax.experimental.pallas import tpu as pltpu


# ----------------------------- Pallas kernel --------------------------------

def _ds_conv2d_kernel(x_ref, w_ref, b_ref, o_ref, *, TH, W, K, dilations,
                      max_dil, groups):
    """Fused multi-dilation 3x3 conv + bias + SiLU + branch-sum, one row tile.

    x_ref: (1, Hp, Wp_pad, Cin)          bf16 padded image (full, grid-invariant
                                         along the row-tile axis -> VMEM resident)
    w_ref: (groups, K*K*cin_g, cout_g)   bf16, rows ordered (kh, kw, cin)
    b_ref: (1, Cout)                     f32 bias (zeros if bias=False)
    o_ref: (1, TH*W, Cout)               f32 output rows [rt*TH, rt*TH+TH) x W
    """
    row0 = pl.multiple_of(pl.program_id(1) * TH, TH)   # first output row of tile
    kkcg, cout_g = w_ref.shape[1], w_ref.shape[2]
    cin_g = kkcg // (K * K)

    for g in range(groups):                            # static unroll
        bias_g = b_ref[:, g * cout_g:(g + 1) * cout_g]          # (1, cout_g)
        out_g = jnp.zeros((TH * W, cout_g), jnp.float32)
        for d in dilations:                                      # static unroll
            pre = jnp.zeros((TH * W, cout_g), jnp.float32)
            for kh in range(K):
                h0 = max_dil - d + kh * d
                for kw in range(K):
                    w0 = max_dil - d + kw * d
                    tap = kh * K + kw
                    # Shifted window for this tap: no im2col buffer, the slice
                    # feeds the MXU directly (f32 accumulation across taps).
                    patch = x_ref[0, pl.ds(row0 + h0, TH), w0:w0 + W,
                                  g * cin_g:(g + 1) * cin_g]
                    pre = pre + jnp.dot(
                        patch.reshape(TH * W, cin_g),
                        w_ref[g, tap * cin_g:(tap + 1) * cin_g, :],
                        preferred_element_type=jnp.float32)
            pre = pre + bias_g
            # SiLU: sigmoid via EUP (exp + approx reciprocal), no f32 divide.
            out_g = out_g + pre * pl.reciprocal(1.0 + jnp.exp(-pre), approx=True)
        # TODO(synk): for groups > 1 with cout_g < 128 this store is lane-masked.
        o_ref[0, :, g * cout_g:(g + 1) * cout_g] = out_g


# ------------------------------- wrapper -------------------------------------

def _pick_row_tile(H, W, B, *, target_rows=2048, min_steps=4):
    """Largest row tile TH | H with TH*W <= target_rows, preferring enough grid
    steps (B * H/TH >= min_steps) so both v7x cores get pipelined work."""
    divs = sorted((d for d in range(1, H + 1) if H % d == 0), reverse=True)
    ok = [d for d in divs if d == H or (d * W) % 8 == 0]
    for th in ok:
        if th * W <= target_rows and B * (H // th) >= min_steps:
            return th
    for th in ok:
        if th * W <= target_rows:
            return th
    return H


def ds_conv2d_forward(x, weight, bias, *, kernel_size=3, stride=1,
                      dilation=(1, 3, 5), groups=1):
    """x: (B, Cin, H, W) f32, weight: (Cout, Cin//groups, K, K), bias: (Cout,) or None."""
    assert kernel_size == 3, "only support kernel size 3 (like the module)"
    assert stride == 1, "TODO(synk): stride > 1 not implemented"
    B, Cin, H, W = x.shape
    Cout = weight.shape[0]
    K = kernel_size
    dils = tuple(int(d) for d in dilation)
    max_dil = max(dils)

    # NHWC, cast to bf16 BEFORE padding (halves the pad-pass bytes), pad once
    # with the largest dilation.  Right-pad the padded width to a multiple of
    # the bf16 sublane tile (16) so per-tap window slices stay tile-friendly.
    xh = jnp.transpose(x, (0, 2, 3, 1)).astype(jnp.bfloat16)
    Hp = H + 2 * max_dil
    Wp = W + 2 * max_dil
    Wp_pad = ((Wp + 15) // 16) * 16
    xp = jnp.pad(xh, ((0, 0), (max_dil, max_dil),
                      (max_dil, max_dil + Wp_pad - Wp), (0, 0)))

    # Per-group matmul weights (no zero-padded block-diagonal):
    # (Cout, cin_g, K, K) -> (groups, K*K*cin_g, cout_g), rows ordered (kh, kw, cin).
    cin_g, cout_g = Cin // groups, Cout // groups
    wg = weight.reshape(groups, cout_g, cin_g, K, K)
    wg = jnp.transpose(wg, (0, 3, 4, 2, 1))            # (g, kh, kw, cin, cout)
    wmat = wg.reshape(groups, K * K * cin_g, cout_g).astype(jnp.bfloat16)

    b2 = (bias if bias is not None else jnp.zeros((Cout,), jnp.float32))
    b2 = b2.reshape(1, Cout).astype(jnp.float32)

    TH = _pick_row_tile(H, W, B)
    RT = H // TH

    out = pl.pallas_call(
        functools.partial(_ds_conv2d_kernel, TH=TH, W=W, K=K, dilations=dils,
                          max_dil=max_dil, groups=groups),
        out_shape=jax.ShapeDtypeStruct((B, H * W, Cout), jnp.float32),
        grid=(B, RT),
        in_specs=[
            # Full padded image, grid-invariant along the row-tile axis.
            pl.BlockSpec((1, Hp, Wp_pad, Cin), lambda b, r: (b, 0, 0, 0)),
            # Weights / bias grid-invariant: DMA'd once, stay resident.
            pl.BlockSpec((groups, K * K * cin_g, cout_g), lambda b, r: (0, 0, 0)),
            pl.BlockSpec((1, Cout), lambda b, r: (0, 0)),
        ],
        out_specs=pl.BlockSpec((1, TH * W, Cout), lambda b, r: (b, r, 0)),
        compiler_params=pltpu.CompilerParams(
            dimension_semantics=("parallel", "parallel")),
    )(xp, wmat, b2)

    return out.reshape(B, H, W, Cout).transpose(0, 3, 1, 2)   # back to NCHW


# --------------------------- pure-JAX reference ------------------------------

def _ds_conv2d_ref(x, weight, bias, *, dilation=(1, 3, 5), groups=1):
    out = 0.0
    for d in dilation:
        y = jax.lax.conv_general_dilated(
            x, weight, window_strides=(1, 1), padding=((d, d), (d, d)),
            rhs_dilation=(d, d), dimension_numbers=("NCHW", "OIHW", "NCHW"),
            feature_group_count=groups)
        if bias is not None:
            y = y + bias.reshape(1, -1, 1, 1)
        out = out + y * jax.nn.sigmoid(y)
    return out


# ------------------------------ parameters -----------------------------------

def init_ds_conv2d_params(key, in_planes, out_planes, kernel_size=3, groups=1):
    k1, k2 = jax.random.split(key)
    fan_in = (in_planes // groups) * kernel_size * kernel_size
    weight = jax.random.normal(k1, (out_planes, in_planes // groups,
                                    kernel_size, kernel_size),
                               jnp.float32) * math.sqrt(2.0 / fan_in)
    bound = math.sqrt(groups / (kernel_size ** 2 * in_planes))
    bias = jax.random.uniform(k2, (out_planes,), jnp.float32,
                              minval=-bound, maxval=bound)
    return weight, bias


# ---------------------------------- main --------------------------------------

if __name__ == "__main__":
    # Small demo, lane-dense: Cin = Cout = 128 fills the 128-lane axis exactly.
    B, C, H, W = 2, 128, 16, 16
    num_groups = 1

    key = jax.random.PRNGKey(0)
    kx, kp = jax.random.split(key)
    x = jax.random.normal(kx, (B, C, H, W), jnp.float32)
    weight, bias = init_ds_conv2d_params(kp, C, C, kernel_size=3, groups=num_groups)

    out = ds_conv2d_forward(x, weight, bias, kernel_size=3, stride=1,
                            dilation=(1, 3, 5), groups=num_groups)
    out = jax.block_until_ready(out)

    assert out.shape == (B, C, H, W), out.shape
    assert bool(jnp.all(jnp.isfinite(out)))

    # Correctness vs. pure-JAX f32 reference.  Kernel uses bf16 MXU operands
    # with f32 accumulation + approx reciprocal -> relative-error check.
    ref = jax.block_until_ready(_ds_conv2d_ref(x, weight, bias,
                                               dilation=(1, 3, 5),
                                               groups=num_groups))
    max_abs = float(jnp.max(jnp.abs(out - ref)))
    max_ref = float(jnp.max(jnp.abs(ref)))
    assert max_abs <= 1e-2 + 3e-2 * max_ref, (max_abs, max_ref)

    print("KERNEL_OK")
</pallas_src>

<mosaic_0001>
module attributes {stable_mosaic.version = 11 : i64} {
  func.func @_ds_conv2d_kernel(%arg0: i32, %arg1: i32, %arg2: memref<1x26x32x128xbf16, #tpu.memory_space<vmem>>, %arg3: memref<1x1152x128xbf16, #tpu.memory_space<vmem>>, %arg4: memref<1x128xf32, #tpu.memory_space<vmem>>, %arg5: memref<1x128x128xf32, #tpu.memory_space<vmem>>) attributes {dimension_semantics = [#tpu.dimension_semantics<parallel>, #tpu.dimension_semantics<parallel>], iteration_bounds = array<i64: 2, 2>, scalar_prefetch = 0 : i64, scratch_operands = 0 : i64, tpu.core_type = #tpu.core_type<tc>, window_params = [{transform_indices = @transform_0, window_bounds = array<i64: 1, 26, 32, 128>}, {pipeline_mode = #tpu.pipeline_mode<synchronous>, transform_indices = @transform_1, window_bounds = array<i64: 1, 1152, 128>}, {pipeline_mode = #tpu.pipeline_mode<synchronous>, transform_indices = @transform_2, window_bounds = array<i64: 1, 128>}, {transform_indices = @transform_3, window_bounds = array<i64: 1, 128, 128>}]} {
    %c8_i32 = arith.constant 8 : i32
    %0 = arith.muli %arg1, %c8_i32 : i32
    %1 = tpu.assume_multiple %0, 8 : i32
    %c0 = arith.constant 0 : index
    %c0_0 = arith.constant 0 : index
    %2 = vector.load %arg4[%c0, %c0_0] : memref<1x128xf32, #tpu.memory_space<vmem>>, vector<1x128xf32>
    %cst = arith.constant 0.000000e+00 : f32
    %3 = vector.broadcast %cst : f32 to vector<128x128xf32>
    %cst_1 = arith.constant 0.000000e+00 : f32
    %4 = vector.broadcast %cst_1 : f32 to vector<128x128xf32>
    %c4_i32 = arith.constant 4 : i32
    %5 = arith.addi %1, %c4_i32 : i32
    %c0_2 = arith.constant 0 : index
    %6 = arith.index_cast %5 : i32 to index
    %c4 = arith.constant 4 : index
    %c0_3 = arith.constant 0 : index
    %7 = vector.load %arg2[%c0_2, %6, %c4, %c0_3] : memref<1x26x32x128xbf16, #tpu.memory_space<vmem>>, vector<1x8x16x128xbf16>
    %8 = vector.shape_cast %7 : vector<1x8x16x128xbf16> to vector<8x16x128xbf16>
    %9 = vector.shape_cast %8 : vector<8x16x128xbf16> to vector<128x128xbf16>
    %c0_4 = arith.constant 0 : index
    %c0_5 = arith.constant 0 : index
    %c0_6 = arith.constant 0 : index
    %10 = vector.load %arg3[%c0_4, %c0_5, %c0_6] : memref<1x1152x128xbf16, #tpu.memory_space<vmem>>, vector<1x128x128xbf16>
    %11 = vector.shape_cast %10 : vector<1x128x128xbf16> to vector<128x128xbf16>
    %cst_7 = arith.constant dense<0.000000e+00> : vector<128x128xf32>
    %12 = tpu.matmul %9, %11, %cst_7 {dimension_numbers = #tpu.dot_dimension_numbers<[1], [0], [0], [1], [0, 0, 1, 1], [], []>} : vector<128x128xbf16>, vector<128x128xbf16>, vector<128x128xf32> -> vector<128x128xf32>
    %13 = arith.addf %4, %12 : vector<128x128xf32>
    %c4_i32_8 = arith.constant 4 : i32
    %14 = arith.addi %1, %c4_i32_8 : i32
    %c0_9 = arith.constant 0 : index
    %15 = arith.index_cast %14 : i32 to index
    %c5 = arith.constant 5 : index
    %c0_10 = arith.constant 0 : index
    %16 = vector.load %arg2[%c0_9, %15, %c5, %c0_10] : memref<1x26x32x128xbf16, #tpu.memory_space<vmem>>, vector<1x8x16x128xbf16>
    %17 = vector.shape_cast %16 : vector<1x8x16x128xbf16> to vector<8x16x128xbf16>
    %18 = vector.shape_cast %17 : vector<8x16x128xbf16> to vector<128x128xbf16>
    %c0_11 = arith.constant 0 : index
    %c128 = arith.constant 128 : index
    %c0_12 = arith.constant 0 : index
    %19 = vector.load %arg3[%c0_11, %c128, %c0_12] : memref<1x1152x128xbf16, #tpu.memory_space<vmem>>, vector<1x128x128xbf16>
    %20 = vector.shape_cast %19 : vector<1x128x128xbf16> to vector<128x128xbf16>
    %cst_13 = arith.constant dense<0.000000e+00> : vector<128x128xf32>
    %21 = tpu.matmul %18, %20, %cst_13 {dimension_numbers = #tpu.dot_dimension_numbers<[1], [0], [0], [1], [0, 0, 1, 1], [], []>} : vector<128x128xbf16>, vector<128x128xbf16>, vector<128x128xf32> -> vector<128x128xf32>
    %22 = arith.addf %13, %21 : vector<128x128xf32>
    %c4_i32_14 = arith.constant 4 : i32
    %23 = arith.addi %1, %c4_i32_14 : i32
    %c0_15 = arith.constant 0 : index
    %24 = arith.index_cast %23 : i32 to index
    %c6 = arith.constant 6 : index
    %c0_16 = arith.constant 0 : index
    %25 = vector.load %arg2[%c0_15, %24, %c6, %c0_16] : memref<1x26x32x128xbf16, #tpu.memory_space<vmem>>, vector<1x8x16x128xbf16>
    %26 = vector.shape_cast %25 : vector<1x8x16x128xbf16> to vector<8x16x128xbf16>
    %27 = vector.shape_cast %26 : vector<8x16x128xbf16> to vector<128x128xbf16>
    %c0_17 = arith.constant 0 : index
    %c256 = arith.constant 256 : index
    %c0_18 = arith.constant 0 : index
    %28 = vector.load %arg3[%c0_17, %c256, %c0_18] : memref<1x1152x128xbf16, #tpu.memory_space<vmem>>, vector<1x128x128xbf16>
    %29 = vector.shape_cast %28 : vector<1x128x128xbf16> to vector<128x128xbf16>
    %cst_19 = arith.constant dense<0.000000e+00> : vector<128x128xf32>
    %30 = tpu.matmul %27, %29, %cst_19 {dimension_numbers = #tpu.dot_dimension_numbers<[1], [0], [0], [1], [0, 0, 1, 1], [], []>} : vector<128x128xbf16>, vector<128x128xbf16>, vector<128x128xf32> -> vector<128x128xf32>
    %31 = arith.addf %22, %30 : vector<128x128xf32>
    %c5_i32 = arith.constant 5 : i32
    %32 = arith.addi %1, %c5_i32 : i32
    %c0_20 = arith.constant 0 : index
    %33 = arith.index_cast %32 : i32 to index
    %c4_21 = arith.constant 4 : index
    %c0_22 = arith.constant 0 : index
    %34 = vector.load %arg2[%c0_20, %33, %c4_21, %c0_22] : memref<1x26x32x128xbf16, #tpu.memory_space<vmem>>, vector<1x8x16x128xbf16>
    %35 = vector.shape_cast %34 : vector<1x8x16x128xbf16> to vector<8x16x128xbf16>
    %36 = vector.shape_cast %35 : vector<8x16x128xbf16> to vector<128x128xbf16>
    %c0_23 = arith.constant 0 : index
    %c384 = arith.constant 384 : index
    %c0_24 = arith.constant 0 : index
    %37 = vector.load %arg3[%c0_23, %c384, %c0_24] : memref<1x1152x128xbf16, #tpu.memory_space<vmem>>, vector<1x128x128xbf16>
    %38 = vector.shape_cast %37 : vector<1x128x128xbf16> to vector<128x128xbf16>
    %cst_25 = arith.constant dense<0.000000e+00> : vector<128x128xf32>
    %39 = tpu.matmul %36, %38, %cst_25 {dimension_numbers = #tpu.dot_dimension_numbers<[1], [0], [0], [1], [0, 0, 1, 1], [], []>} : vector<128x128xbf16>, vector<128x128xbf16>, vector<128x128xf32> -> vector<128x128xf32>
    %40 = arith.addf %31, %39 : vector<128x128xf32>
    %c5_i32_26 = arith.constant 5 : i32
    %41 = arith.addi %1, %c5_i32_26 : i32
    %c0_27 = arith.constant 0 : index
    %42 = arith.index_cast %41 : i32 to index
    %c5_28 = arith.constant 5 : index
    %c0_29 = arith.constant 0 : index
    %43 = vector.load %arg2[%c0_27, %42, %c5_28, %c0_29] : memref<1x26x32x128xbf16, #tpu.memory_space<vmem>>, vector<1x8x16x128xbf16>
    %44 = vector.shape_cast %43 : vector<1x8x16x128xbf16> to vector<8x16x128xbf16>
    %45 = vector.shape_cast %44 : vector<8x16x128xbf16> to vector<128x128xbf16>
    %c0_30 = arith.constant 0 : index
    %c512 = arith.constant 512 : index
    %c0_31 = arith.constant 0 : index
    %46 = vector.load %arg3[%c0_30, %c512, %c0_31] : memref<1x1152x128xbf16, #tpu.memory_space<vmem>>, vector<1x128x128xbf16>
    %47 = vector.shape_cast %46 : vector<1x128x128xbf16> to vector<128x128xbf16>
    %cst_32 = arith.constant dense<0.000000e+00> : vector<128x128xf32>
    %48 = tpu.matmul %45, %47, %cst_32 {dimension_numbers = #tpu.dot_dimension_numbers<[1], [0], [0], [1], [0, 0, 1, 1], [], []>} : vector<128x128xbf16>, vector<128x128xbf16>, vector<128x128xf32> -> vector<128x128xf32>
    %49 = arith.addf %40, %48 : vector<128x128xf32>
    %c5_i32_33 = arith.constant 5 : i32
    %50 = arith.addi %1, %c5_i32_33 : i32
    %c0_34 = arith.constant 0 : index
    %51 = arith.index_cast %50 : i32 to index
    %c6_35 = arith.constant 6 : index
    %c0_36 = arith.constant 0 : index
    %52 = vector.load %arg2[%c0_34, %51, %c6_35, %c0_36] : memref<1x26x32x128xbf16, #tpu.memory_space<vmem>>, vector<1x8x16x128xbf16>
    %53 = vector.shape_cast %52 : vector<1x8x16x128xbf16> to vector<8x16x128xbf16>
    %54 = vector.shape_cast %53 : vector<8x16x128xbf16> to vector<128x128xbf16>
    %c0_37 = arith.constant 0 : index
    %c640 = arith.constant 640 : index
    %c0_38 = arith.constant 0 : index
    %55 = vector.load %arg3[%c0_37, %c640, %c0_38] : memref<1x1152x128xbf16, #tpu.memory_space<vmem>>, vector<1x128x128xbf16>
    %56 = vector.shape_cast %55 : vector<1x128x128xbf16> to vector<128x128xbf16>
    %cst_39 = arith.constant dense<0.000000e+00> : vector<128x128xf32>
    %57 = tpu.matmul %54, %56, %cst_39 {dimension_numbers = #tpu.dot_dimension_numbers<[1], [0], [0], [1], [0, 0, 1, 1], [], []>} : vector<128x128xbf16>, vector<128x128xbf16>, vector<128x128xf32> -> vector<128x128xf32>
    %58 = arith.addf %49, %57 : vector<128x128xf32>
    %c6_i32 = arith.constant 6 : i32
    %59 = arith.addi %1, %c6_i32 : i32
    %c0_40 = arith.constant 0 : index
    %60 = arith.index_cast %59 : i32 to index
    %c4_41 = arith.constant 4 : index
    %c0_42 = arith.constant 0 : index
    %61 = vector.load %arg2[%c0_40, %60, %c4_41, %c0_42] : memref<1x26x32x128xbf16, #tpu.memory_space<vmem>>, vector<1x8x16x128xbf16>
    %62 = vector.shape_cast %61 : vector<1x8x16x128xbf16> to vector<8x16x128xbf16>
    %63 = vector.shape_cast %62 : vector<8x16x128xbf16> to vector<128x128xbf16>
    %c0_43 = arith.constant 0 : index
    %c768 = arith.constant 768 : index
    %c0_44 = arith.constant 0 : index
    %64 = vector.load %arg3[%c0_43, %c768, %c0_44] : memref<1x1152x128xbf16, #tpu.memory_space<vmem>>, vector<1x128x128xbf16>
    %65 = vector.shape_cast %64 : vector<1x128x128xbf16> to vector<128x128xbf16>
    %cst_45 = arith.constant dense<0.000000e+00> : vector<128x128xf32>
    %66 = tpu.matmul %63, %65, %cst_45 {dimension_numbers = #tpu.dot_dimension_numbers<[1], [0], [0], [1], [0, 0, 1, 1], [], []>} : vector<128x128xbf16>, vector<128x128xbf16>, vector<128x128xf32> -> vector<128x128xf32>
    %67 = arith.addf %58, %66 : vector<128x128xf32>
    %c6_i32_46 = arith.constant 6 : i32
    %68 = arith.addi %1, %c6_i32_46 : i32
    %c0_47 = arith.constant 0 : index
    %69 = arith.index_cast %68 : i32 to index
    %c5_48 = arith.constant 5 : index
    %c0_49 = arith.constant 0 : index
    %70 = vector.load %arg2[%c0_47, %69, %c5_48, %c0_49] : memref<1x26x32x128xbf16, #tpu.memory_space<vmem>>, vector<1x8x16x128xbf16>
    %71 = vector.shape_cast %70 : vector<1x8x16x128xbf16> to vector<8x16x128xbf16>
    %72 = vector.shape_cast %71 : vector<8x16x128xbf16> to vector<128x128xbf16>
    %c0_50 = arith.constant 0 : index
    %c896 = arith.constant 896 : index
    %c0_51 = arith.constant 0 : index
    %73 = vector.load %arg3[%c0_50, %c896, %c0_51] : memref<1x1152x128xbf16, #tpu.memory_space<vmem>>, vector<1x128x128xbf16>
    %74 = vector.shape_cast %73 : vector<1x128x128xbf16> to vector<128x128xbf16>
    %cst_52 = arith.constant dense<0.000000e+00> : vector<128x128xf32>
    %75 = tpu.matmul %72, %74, %cst_52 {dimension_numbers = #tpu.dot_dimension_numbers<[1], [0], [0], [1], [0, 0, 1, 1], [], []>} : vector<128x128xbf16>, vector<128x128xbf16>, vector<128x128xf32> -> vector<128x128xf32>
    %76 = arith.addf %67, %75 : vector<128x128xf32>
    %c6_i32_53 = arith.constant 6 : i32
    %77 = arith.addi %1, %c6_i32_53 : i32
    %c0_54 = arith.constant 0 : index
    %78 = arith.index_cast %77 : i32 to index
    %c6_55 = arith.constant 6 : index
    %c0_56 = arith.constant 0 : index
    %79 = vector.load %arg2[%c0_54, %78, %c6_55, %c0_56] : memref<1x26x32x128xbf16, #tpu.memory_space<vmem>>, vector<1x8x16x128xbf16>
    %80 = vector.shape_cast %79 : vector<1x8x16x128xbf16> to vector<8x16x128xbf16>
    %81 = vector.shape_cast %80 : vector<8x16x128xbf16> to vector<128x128xbf16>
    %c0_57 = arith.constant 0 : index
    %c1024 = arith.constant 1024 : index
    %c0_58 = arith.constant 0 : index
    %82 = vector.load %arg3[%c0_57, %c1024, %c0_58] : memref<1x1152x128xbf16, #tpu.memory_space<vmem>>, vector<1x128x128xbf16>
    %83 = vector.shape_cast %82 : vector<1x128x128xbf16> to vector<128x128xbf16>
    %cst_59 = arith.constant dense<0.000000e+00> : vector<128x128xf32>
    %84 = tpu.matmul %81, %83, %cst_59 {dimension_numbers = #tpu.dot_dimension_numbers<[1], [0], [0], [1], [0, 0, 1, 1], [], []>} : vector<128x128xbf16>, vector<128x128xbf16>, vector<128x128xf32> -> vector<128x128xf32>
    %85 = arith.addf %76, %84 : vector<128x128xf32>
    %86 = vector.broadcast %2 : vector<1x128xf32> to vector<128x128xf32>
    %87 = arith.addf %85, %86 : vector<128x128xf32>
    %cst_60 = arith.constant 0.000000e+00 : f32
    %88 = vector.broadcast %cst_60 : f32 to vector<128x128xf32>
    %89 = arith.subf %88, %87 : vector<128x128xf32>
    %90 = math.exp %89 : vector<128x128xf32>
    %cst_61 = arith.constant 1.000000e+00 : f32
    %91 = vector.broadcast %cst_61 : f32 to vector<128x128xf32>
    %92 = arith.addf %91, %90 : vector<128x128xf32>
    %93 = tpu.reciprocal %92 {approx = true} : vector<128x128xf32> -> vector<128x128xf32>
    %94 = arith.mulf %87, %93 : vector<128x128xf32>
    %95 = arith.addf %3, %94 : vector<128x128xf32>
    %cst_62 = arith.constant 0.000000e+00 : f32
    %96 = vector.broadcast %cst_62 : f32 to vector<128x128xf32>
    %c2_i32 = arith.constant 2 : i32
    %97 = arith.addi %1, %c2_i32 : i32
    %c0_63 = arith.constant 0 : index
    %98 = arith.index_cast %97 : i32 to index
    %c2 = arith.constant 2 : index
    %c0_64 = arith.constant 0 : index
    %99 = vector.load %arg2[%c0_63, %98, %c2, %c0_64] : memref<1x26x32x128xbf16, #tpu.memory_space<vmem>>, vector<1x8x16x128xbf16>
    %100 = vector.shape_cast %99 : vector<1x8x16x128xbf16> to vector<8x16x128xbf16>
    %101 = vector.shape_cast %100 : vector<8x16x128xbf16> to vector<128x128xbf16>
    %c0_65 = arith.constant 0 : index
    %c0_66 = arith.constant 0 : index
    %c0_67 = arith.constant 0 : index
    %102 = vector.load %arg3[%c0_65, %c0_66, %c0_67] : memref<1x1152x128xbf16, #tpu.memory_space<vmem>>, vector<1x128x128xbf16>
    %103 = vector.shape_cast %102 : vector<1x128x128xbf16> to vector<128x128xbf16>
    %cst_68 = arith.constant dense<0.000000e+00> : vector<128x128xf32>
    %104 = tpu.matmul %101, %103, %cst_68 {dimension_numbers = #tpu.dot_dimension_numbers<[1], [0], [0], [1], [0, 0, 1, 1], [], []>} : vector<128x128xbf16>, vector<128x128xbf16>, vector<128x128xf32> -> vector<128x128xf32>
    %105 = arith.addf %96, %104 : vector<128x128xf32>
    %c2_i32_69 = arith.constant 2 : i32
    %106 = arith.addi %1, %c2_i32_69 : i32
    %c0_70 = arith.constant 0 : index
    %107 = arith.index_cast %106 : i32 to index
    %c5_71 = arith.constant 5 : index
    %c0_72 = arith.constant 0 : index
    %108 = vector.load %arg2[%c0_70, %107, %c5_71, %c0_72] : memref<1x26x32x128xbf16, #tpu.memory_space<vmem>>, vector<1x8x16x128xbf16>
    %109 = vector.shape_cast %108 : vector<1x8x16x128xbf16> to vector<8x16x128xbf16>
    %110 = vector.shape_cast %109 : vector<8x16x128xbf16> to vector<128x128xbf16>
    %c0_73 = arith.constant 0 : index
    %c128_74 = arith.constant 128 : index
    %c0_75 = arith.constant 0 : index
    %111 = vector.load %arg3[%c0_73, %c128_74, %c0_75] : memref<1x1152x128xbf16, #tpu.memory_space<vmem>>, vector<1x128x128xbf16>
    %112 = vector.shape_cast %111 : vector<1x128x128xbf16> to vector<128x128xbf16>
    %cst_76 = arith.constant dense<0.000000e+00> : vector<128x128xf32>
    %113 = tpu.matmul %110, %112, %cst_76 {dimension_numbers = #tpu.dot_dimension_numbers<[1], [0], [0], [1], [0, 0, 1, 1], [], []>} : vector<128x128xbf16>, vector<128x128xbf16>, vector<128x128xf32> -> vector<128x128xf32>
    %114 = arith.addf %105, %113 : vector<128x128xf32>
    %c2_i32_77 = arith.constant 2 : i32
    %115 = arith.addi %1, %c2_i32_77 : i32
    %c0_78 = arith.constant 0 : index
    %116 = arith.index_cast %115 : i32 to index
    %c8 = arith.constant 8 : index
    %c0_79 = arith.constant 0 : index
    %117 = vector.load %arg2[%c0_78, %116, %c8, %c0_79] : memref<1x26x32x128xbf16, #tpu.memory_space<vmem>>, vector<1x8x16x128xbf16>
    %118 = vector.shape_cast %117 : vector<1x8x16x128xbf16> to vector<8x16x128xbf16>
    %119 = vector.shape_cast %118 : vector<8x16x128xbf16> to vector<128x128xbf16>
    %c0_80 = arith.constant 0 : index
    %c256_81 = arith.constant 256 : index
    %c0_82 = arith.constant 0 : index
    %120 = vector.load %arg3[%c0_80, %c256_81, %c0_82] : memref<1x1152x128xbf16, #tpu.memory_space<vmem>>, vector<1x128x128xbf16>
    %121 = vector.shape_cast %120 : vector<1x128x128xbf16> to vector<128x128xbf16>
    %cst_83 = arith.constant dense<0.000000e+00> : vector<128x128xf32>
    %122 = tpu.matmul %119, %121, %cst_83 {dimension_numbers = #tpu.dot_dimension_numbers<[1], [0], [0], [1], [0, 0, 1, 1], [], []>} : vector<128x128xbf16>, vector<128x128xbf16>, vector<128x128xf32> -> vector<128x128xf32>
    %123 = arith.addf %114, %122 : vector<128x128xf32>
    %c5_i32_84 = arith.constant 5 : i32
    %124 = arith.addi %1, %c5_i32_84 : i32
    %c0_85 = arith.constant 0 : index
    %125 = arith.index_cast %124 : i32 to index
    %c2_86 = arith.constant 2 : index
    %c0_87 = arith.constant 0 : index
    %126 = vector.load %arg2[%c0_85, %125, %c2_86, %c0_87] : memref<1x26x32x128xbf16, #tpu.memory_space<vmem>>, vector<1x8x16x128xbf16>
    %127 = vector.shape_cast %126 : vector<1x8x16x128xbf16> to vector<8x16x128xbf16>
    %128 = vector.shape_cast %127 : vector<8x16x128xbf16> to vector<128x128xbf16>
    %c0_88 = arith.constant 0 : index
    %c384_89 = arith.constant 384 : index
    %c0_90 = arith.constant 0 : index
    %129 = vector.load %arg3[%c0_88, %c384_89, %c0_90] : memref<1x1152x128xbf16, #tpu.memory_space<vmem>>, vector<1x128x128xbf16>
    %130 = vector.shape_cast %129 : vector<1x128x128xbf16> to vector<128x128xbf16>
    %cst_91 = arith.constant dense<0.000000e+00> : vector<128x128xf32>
    %131 = tpu.matmul %128, %130, %cst_91 {dimension_numbers = #tpu.dot_dimension_numbers<[1], [0], [0], [1], [0, 0, 1, 1], [], []>} : vector<128x128xbf16>, vector<128x128xbf16>, vector<128x128xf32> -> vector<128x128xf32>
    %132 = arith.addf %123, %131 : vector<128x128xf32>
    %c5_i32_92 = arith.constant 5 : i32
    %133 = arith.addi %1, %c5_i32_92 : i32
    %c0_93 = arith.constant 0 : index
    %134 = arith.index_cast %133 : i32 to index
    %c5_94 = arith.constant 5 : index
    %c0_95 = arith.constant 0 : index
    %135 = vector.load %arg2[%c0_93, %134, %c5_94, %c0_95] : memref<1x26x32x128xbf16, #tpu.memory_space<vmem>>, vector<1x8x16x128xbf16>
    %136 = vector.shape_cast %135 : vector<1x8x16x128xbf16> to vector<8x16x128xbf16>
    %137 = vector.shape_cast %136 : vector<8x16x128xbf16> to vector<128x128xbf16>
    %c0_96 = arith.constant 0 : index
    %c512_97 = arith.constant 512 : index
    %c0_98 = arith.constant 0 : index
    %138 = vector.load %arg3[%c0_96, %c512_97, %c0_98] : memref<1x1152x128xbf16, #tpu.memory_space<vmem>>, vector<1x128x128xbf16>
    %139 = vector.shape_cast %138 : vector<1x128x128xbf16> to vector<128x128xbf16>
    %cst_99 = arith.constant dense<0.000000e+00> : vector<128x128xf32>
    %140 = tpu.matmul %137, %139, %cst_99 {dimension_numbers = #tpu.dot_dimension_numbers<[1], [0], [0], [1], [0, 0, 1, 1], [], []>} : vector<128x128xbf16>, vector<128x128xbf16>, vector<128x128xf32> -> vector<128x128xf32>
    %141 = arith.addf %132, %140 : vector<128x128xf32>
    %c5_i32_100 = arith.constant 5 : i32
    %142 = arith.addi %1, %c5_i32_100 : i32
    %c0_101 = arith.constant 0 : index
    %143 = arith.index_cast %142 : i32 to index
    %c8_102 = arith.constant 8 : index
    %c0_103 = arith.constant 0 : index
    %144 = vector.load %arg2[%c0_101, %143, %c8_102, %c0_103] : memref<1x26x32x128xbf16, #tpu.memory_space<vmem>>, vector<1x8x16x128xbf16>
    %145 = vector.shape_cast %144 : vector<1x8x16x128xbf16> to vector<8x16x128xbf16>
    %146 = vector.shape_cast %145 : vector<8x16x128xbf16> to vector<128x128xbf16>
    %c0_104 = arith.constant 0 : index
    %c640_105 = arith.constant 640 : index
    %c0_106 = arith.constant 0 : index
    %147 = vector.load %arg3[%c0_104, %c640_105, %c0_106] : memref<1x1152x128xbf16, #tpu.memory_space<vmem>>, vector<1x128x128xbf16>
    %148 = vector.shape_cast %147 : vector<1x128x128xbf16> to vector<128x128xbf16>
    %cst_107 = arith.constant dense<0.000000e+00> : vector<128x128xf32>
    %149 = tpu.matmul %146, %148, %cst_107 {dimension_numbers = #tpu.dot_dimension_numbers<[1], [0], [0], [1], [0, 0, 1, 1], [], []>} : vector<128x128xbf16>, vector<128x128xbf16>, vector<128x128xf32> -> vector<128x128xf32>
    %150 = arith.addf %141, %149 : vector<128x128xf32>
    %c8_i32_108 = arith.constant 8 : i32
    %151 = arith.addi %1, %c8_i32_108 : i32
    %c0_109 = arith.constant 0 : index
    %152 = arith.index_cast %151 : i32 to index
    %c2_110 = arith.constant 2 : index
    %c0_111 = arith.constant 0 : index
    %153 = vector.load %arg2[%c0_109, %152, %c2_110, %c0_111] : memref<1x26x32x128xbf16, #tpu.memory_space<vmem>>, vector<1x8x16x128xbf16>
    %154 = vector.shape_cast %153 : vector<1x8x16x128xbf16> to vector<8x16x128xbf16>
    %155 = vector.shape_cast %154 : vector<8x16x128xbf16> to vector<128x128xbf16>
    %c0_112 = arith.constant 0 : index
    %c768_113 = arith.constant 768 : index
    %c0_114 = arith.constant 0 : index
    %156 = vector.load %arg3[%c0_112, %c768_113, %c0_114] : memref<1x1152x128xbf16, #tpu.memory_space<vmem>>, vector<1x128x128xbf16>
    %157 = vector.shape_cast %156 : vector<1x128x128xbf16> to vector<128x128xbf16>
    %cst_115 = arith.constant dense<0.000000e+00> : vector<128x128xf32>
    %158 = tpu.matmul %155, %157, %cst_115 {dimension_numbers = #tpu.dot_dimension_numbers<[1], [0], [0], [1], [0, 0, 1, 1], [], []>} : vector<128x128xbf16>, vector<128x128xbf16>, vector<128x128xf32> -> vector<128x128xf32>
    %159 = arith.addf %150, %158 : vector<128x128xf32>
    %c8_i32_116 = arith.constant 8 : i32
    %160 = arith.addi %1, %c8_i32_116 : i32
    %c0_117 = arith.constant 0 : index
    %161 = arith.index_cast %160 : i32 to index
    %c5_118 = arith.constant 5 : index
    %c0_119 = arith.constant 0 : index
    %162 = vector.load %arg2[%c0_117, %161, %c5_118, %c0_119] : memref<1x26x32x128xbf16, #tpu.memory_space<vmem>>, vector<1x8x16x128xbf16>
    %163 = vector.shape_cast %162 : vector<1x8x16x128xbf16> to vector<8x16x128xbf16>
    %164 = vector.shape_cast %163 : vector<8x16x128xbf16> to vector<128x128xbf16>
    %c0_120 = arith.constant 0 : index
    %c896_121 = arith.constant 896 : index
    %c0_122 = arith.constant 0 : index
    %165 = vector.load %arg3[%c0_120, %c896_121, %c0_122] : memref<1x1152x128xbf16, #tpu.memory_space<vmem>>, vector<1x128x128xbf16>
    %166 = vector.shape_cast %165 : vector<1x128x128xbf16> to vector<128x128xbf16>
    %cst_123 = arith.constant dense<0.000000e+00> : vector<128x128xf32>
    %167 = tpu.matmul %164, %166, %cst_123 {dimension_numbers = #tpu.dot_dimension_numbers<[1], [0], [0], [1], [0, 0, 1, 1], [], []>} : vector<128x128xbf16>, vector<128x128xbf16>, vector<128x128xf32> -> vector<128x128xf32>
    %168 = arith.addf %159, %167 : vector<128x128xf32>
    %c8_i32_124 = arith.constant 8 : i32
    %169 = arith.addi %1, %c8_i32_124 : i32
    %c0_125 = arith.constant 0 : index
    %170 = arith.index_cast %169 : i32 to index
    %c8_126 = arith.constant 8 : index
    %c0_127 = arith.constant 0 : index
    %171 = vector.load %arg2[%c0_125, %170, %c8_126, %c0_127] : memref<1x26x32x128xbf16, #tpu.memory_space<vmem>>, vector<1x8x16x128xbf16>
    %172 = vector.shape_cast %171 : vector<1x8x16x128xbf16> to vector<8x16x128xbf16>
    %173 = vector.shape_cast %172 : vector<8x16x128xbf16> to vector<128x128xbf16>
    %c0_128 = arith.constant 0 : index
    %c1024_129 = arith.constant 1024 : index
    %c0_130 = arith.constant 0 : index
    %174 = vector.load %arg3[%c0_128, %c1024_129, %c0_130] : memref<1x1152x128xbf16, #tpu.memory_space<vmem>>, vector<1x128x128xbf16>
    %175 = vector.shape_cast %174 : vector<1x128x128xbf16> to vector<128x128xbf16>
    %cst_131 = arith.constant dense<0.000000e+00> : vector<128x128xf32>
    %176 = tpu.matmul %173, %175, %cst_131 {dimension_numbers = #tpu.dot_dimension_numbers<[1], [0], [0], [1], [0, 0, 1, 1], [], []>} : vector<128x128xbf16>, vector<128x128xbf16>, vector<128x128xf32> -> vector<128x128xf32>
    %177 = arith.addf %168, %176 : vector<128x128xf32>
    %178 = vector.broadcast %2 : vector<1x128xf32> to vector<128x128xf32>
    %179 = arith.addf %177, %178 : vector<128x128xf32>
    %cst_132 = arith.constant 0.000000e+00 : f32
    %180 = vector.broadcast %cst_132 : f32 to vector<128x128xf32>
    %181 = arith.subf %180, %179 : vector<128x128xf32>
    %182 = math.exp %181 : vector<128x128xf32>
    %cst_133 = arith.constant 1.000000e+00 : f32
    %183 = vector.broadcast %cst_133 : f32 to vector<128x128xf32>
    %184 = arith.addf %183, %182 : vector<128x128xf32>
    %185 = tpu.reciprocal %184 {approx = true} : vector<128x128xf32> -> vector<128x128xf32>
    %186 = arith.mulf %179, %185 : vector<128x128xf32>
    %187 = arith.addf %95, %186 : vector<128x128xf32>
    %cst_134 = arith.constant 0.000000e+00 : f32
    %188 = vector.broadcast %cst_134 : f32 to vector<128x128xf32>
    %c0_i32 = arith.constant 0 : i32
    %189 = arith.addi %1, %c0_i32 : i32
    %c0_135 = arith.constant 0 : index
    %190 = arith.index_cast %189 : i32 to index
    %c0_136 = arith.constant 0 : index
    %c0_137 = arith.constant 0 : index
    %191 = vector.load %arg2[%c0_135, %190, %c0_136, %c0_137] : memref<1x26x32x128xbf16, #tpu.memory_space<vmem>>, vector<1x8x16x128xbf16>
    %192 = vector.shape_cast %191 : vector<1x8x16x128xbf16> to vector<8x16x128xbf16>
    %193 = vector.shape_cast %192 : vector<8x16x128xbf16> to vector<128x128xbf16>
    %c0_138 = arith.constant 0 : index
    %c0_139 = arith.constant 0 : index
    %c0_140 = arith.constant 0 : index
    %194 = vector.load %arg3[%c0_138, %c0_139, %c0_140] : memref<1x1152x128xbf16, #tpu.memory_space<vmem>>, vector<1x128x128xbf16>
    %195 = vector.shape_cast %194 : vector<1x128x128xbf16> to vector<128x128xbf16>
    %cst_141 = arith.constant dense<0.000000e+00> : vector<128x128xf32>
    %196 = tpu.matmul %193, %195, %cst_141 {dimension_numbers = #tpu.dot_dimension_numbers<[1], [0], [0], [1], [0, 0, 1, 1], [], []>} : vector<128x128xbf16>, vector<128x128xbf16>, vector<128x128xf32> -> vector<128x128xf32>
    %197 = arith.addf %188, %196 : vector<128x128xf32>
    %c0_i32_142 = arith.constant 0 : i32
    %198 = arith.addi %1, %c0_i32_142 : i32
    %c0_143 = arith.constant 0 : index
    %199 = arith.index_cast %198 : i32 to index
    %c5_144 = arith.constant 5 : index
    %c0_145 = arith.constant 0 : index
    %200 = vector.load %arg2[%c0_143, %199, %c5_144, %c0_145] : memref<1x26x32x128xbf16, #tpu.memory_space<vmem>>, vector<1x8x16x128xbf16>
    %201 = vector.shape_cast %200 : vector<1x8x16x128xbf16> to vector<8x16x128xbf16>
    %202 = vector.shape_cast %201 : vector<8x16x128xbf16> to vector<128x128xbf16>
    %c0_146 = arith.constant 0 : index
    %c128_147 = arith.constant 128 : index
    %c0_148 = arith.constant 0 : index
    %203 = vector.load %arg3[%c0_146, %c128_147, %c0_148] : memref<1x1152x128xbf16, #tpu.memory_space<vmem>>, vector<1x128x128xbf16>
    %204 = vector.shape_cast %203 : vector<1x128x128xbf16> to vector<128x128xbf16>
    %cst_149 = arith.constant dense<0.000000e+00> : vector<128x128xf32>
    %205 = tpu.matmul %202, %204, %cst_149 {dimension_numbers = #tpu.dot_dimension_numbers<[1], [0], [0], [1], [0, 0, 1, 1], [], []>} : vector<128x128xbf16>, vector<128x128xbf16>, vector<128x128xf32> -> vector<128x128xf32>
    %206 = arith.addf %197, %205 : vector<128x128xf32>
    %c0_i32_150 = arith.constant 0 : i32
    %207 = arith.addi %1, %c0_i32_150 : i32
    %c0_151 = arith.constant 0 : index
    %208 = arith.index_cast %207 : i32 to index
    %c10 = arith.constant 10 : index
    %c0_152 = arith.constant 0 : index
    %209 = vector.load %arg2[%c0_151, %208, %c10, %c0_152] : memref<1x26x32x128xbf16, #tpu.memory_space<vmem>>, vector<1x8x16x128xbf16>
    %210 = vector.shape_cast %209 : vector<1x8x16x128xbf16> to vector<8x16x128xbf16>
    %211 = vector.shape_cast %210 : vector<8x16x128xbf16> to vector<128x128xbf16>
    %c0_153 = arith.constant 0 : index
    %c256_154 = arith.constant 256 : index
    %c0_155 = arith.constant 0 : index
    %212 = vector.load %arg3[%c0_153, %c256_154, %c0_155] : memref<1x1152x128xbf16, #tpu.memory_space<vmem>>, vector<1x128x128xbf16>
    %213 = vector.shape_cast %212 : vector<1x128x128xbf16> to vector<128x128xbf16>
    %cst_156 = arith.constant dense<0.000000e+00> : vector<128x128xf32>
    %214 = tpu.matmul %211, %213, %cst_156 {dimension_numbers = #tpu.dot_dimension_numbers<[1], [0], [0], [1], [0, 0, 1, 1], [], []>} : vector<128x128xbf16>, vector<128x128xbf16>, vector<128x128xf32> -> vector<128x128xf32>
    %215 = arith.addf %206, %214 : vector<128x128xf32>
    %c5_i32_157 = arith.constant 5 : i32
    %216 = arith.addi %1, %c5_i32_157 : i32
    %c0_158 = arith.constant 0 : index
    %217 = arith.index_cast %216 : i32 to index
    %c0_159 = arith.constant 0 : index
    %c0_160 = arith.constant 0 : index
    %218 = vector.load %arg2[%c0_158, %217, %c0_159, %c0_160] : memref<1x26x32x128xbf16, #tpu.memory_space<vmem>>, vector<1x8x16x128xbf16>
    %219 = vector.shape_cast %218 : vector<1x8x16x128xbf16> to vector<8x16x128xbf16>
    %220 = vector.shape_cast %219 : vector<8x16x128xbf16> to vector<128x128xbf16>
    %c0_161 = arith.constant 0 : index
    %c384_162 = arith.constant 384 : index
    %c0_163 = arith.constant 0 : index
    %221 = vector.load %arg3[%c0_161, %c384_162, %c0_163] : memref<1x1152x128xbf16, #tpu.memory_space<vmem>>, vector<1x128x128xbf16>
    %222 = vector.shape_cast %221 : vector<1x128x128xbf16> to vector<128x128xbf16>
    %cst_164 = arith.constant dense<0.000000e+00> : vector<128x128xf32>
    %223 = tpu.matmul %220, %222, %cst_164 {dimension_numbers = #tpu.dot_dimension_numbers<[1], [0], [0], [1], [0, 0, 1, 1], [], []>} : vector<128x128xbf16>, vector<128x128xbf16>, vector<128x128xf32> -> vector<128x128xf32>
    %224 = arith.addf %215, %223 : vector<128x128xf32>
    %c5_i32_165 = arith.constant 5 : i32
    %225 = arith.addi %1, %c5_i32_165 : i32
    %c0_166 = arith.constant 0 : index
    %226 = arith.index_cast %225 : i32 to index
    %c5_167 = arith.constant 5 : index
    %c0_168 = arith.constant 0 : index
    %227 = vector.load %arg2[%c0_166, %226, %c5_167, %c0_168] : memref<1x26x32x128xbf16, #tpu.memory_space<vmem>>, vector<1x8x16x128xbf16>
    %228 = vector.shape_cast %227 : vector<1x8x16x128xbf16> to vector<8x16x128xbf16>
    %229 = vector.shape_cast %228 : vector<8x16x128xbf16> to vector<128x128xbf16>
    %c0_169 = arith.constant 0 : index
    %c512_170 = arith.constant 512 : index
    %c0_171 = arith.constant 0 : index
    %230 = vector.load %arg3[%c0_169, %c512_170, %c0_171] : memref<1x1152x128xbf16, #tpu.memory_space<vmem>>, vector<1x128x128xbf16>
    %231 = vector.shape_cast %230 : vector<1x128x128xbf16> to vector<128x128xbf16>
    %cst_172 = arith.constant dense<0.000000e+00> : vector<128x128xf32>
    %232 = tpu.matmul %229, %231, %cst_172 {dimension_numbers = #tpu.dot_dimension_numbers<[1], [0], [0], [1], [0, 0, 1, 1], [], []>} : vector<128x128xbf16>, vector<128x128xbf16>, vector<128x128xf32> -> vector<128x128xf32>
    %233 = arith.addf %224, %232 : vector<128x128xf32>
    %c5_i32_173 = arith.constant 5 : i32
    %234 = arith.addi %1, %c5_i32_173 : i32
    %c0_174 = arith.constant 0 : index
    %235 = arith.index_cast %234 : i32 to index
    %c10_175 = arith.constant 10 : index
    %c0_176 = arith.constant 0 : index
    %236 = vector.load %arg2[%c0_174, %235, %c10_175, %c0_176] : memref<1x26x32x128xbf16, #tpu.memory_space<vmem>>, vector<1x8x16x128xbf16>
    %237 = vector.shape_cast %236 : vector<1x8x16x128xbf16> to vector<8x16x128xbf16>
    %238 = vector.shape_cast %237 : vector<8x16x128xbf16> to vector<128x128xbf16>
    %c0_177 = arith.constant 0 : index
    %c640_178 = arith.constant 640 : index
    %c0_179 = arith.constant 0 : index
    %239 = vector.load %arg3[%c0_177, %c640_178, %c0_179] : memref<1x1152x128xbf16, #tpu.memory_space<vmem>>, vector<1x128x128xbf16>
    %240 = vector.shape_cast %239 : vector<1x128x128xbf16> to vector<128x128xbf16>
    %cst_180 = arith.constant dense<0.000000e+00> : vector<128x128xf32>
    %241 = tpu.matmul %238, %240, %cst_180 {dimension_numbers = #tpu.dot_dimension_numbers<[1], [0], [0], [1], [0, 0, 1, 1], [], []>} : vector<128x128xbf16>, vector<128x128xbf16>, vector<128x128xf32> -> vector<128x128xf32>
    %242 = arith.addf %233, %241 : vector<128x128xf32>
    %c10_i32 = arith.constant 10 : i32
    %243 = arith.addi %1, %c10_i32 : i32
    %c0_181 = arith.constant 0 : index
    %244 = arith.index_cast %243 : i32 to index
    %c0_182 = arith.constant 0 : index
    %c0_183 = arith.constant 0 : index
    %245 = vector.load %arg2[%c0_181, %244, %c0_182, %c0_183] : memref<1x26x32x128xbf16, #tpu.memory_space<vmem>>, vector<1x8x16x128xbf16>
    %246 = vector.shape_cast %245 : vector<1x8x16x128xbf16> to vector<8x16x128xbf16>
    %247 = vector.shape_cast %246 : vector<8x16x128xbf16> to vector<128x128xbf16>
    %c0_184 = arith.constant 0 : index
    %c768_185 = arith.constant 768 : index
    %c0_186 = arith.constant 0 : index
    %248 = vector.load %arg3[%c0_184, %c768_185, %c0_186] : memref<1x1152x128xbf16, #tpu.memory_space<vmem>>, vector<1x128x128xbf16>
    %249 = vector.shape_cast %248 : vector<1x128x128xbf16> to vector<128x128xbf16>
    %cst_187 = arith.constant dense<0.000000e+00> : vector<128x128xf32>
    %250 = tpu.matmul %247, %249, %cst_187 {dimension_numbers = #tpu.dot_dimension_numbers<[1], [0], [0], [1], [0, 0, 1, 1], [], []>} : vector<128x128xbf16>, vector<128x128xbf16>, vector<128x128xf32> -> vector<128x128xf32>
    %251 = arith.addf %242, %250 : vector<128x128xf32>
    %c10_i32_188 = arith.constant 10 : i32
    %252 = arith.addi %1, %c10_i32_188 : i32
    %c0_189 = arith.constant 0 : index
    %253 = arith.index_cast %252 : i32 to index
    %c5_190 = arith.constant 5 : index
    %c0_191 = arith.constant 0 : index
    %254 = vector.load %arg2[%c0_189, %253, %c5_190, %c0_191] : memref<1x26x32x128xbf16, #tpu.memory_space<vmem>>, vector<1x8x16x128xbf16>
    %255 = vector.shape_cast %254 : vector<1x8x16x128xbf16> to vector<8x16x128xbf16>
    %256 = vector.shape_cast %255 : vector<8x16x128xbf16> to vector<128x128xbf16>
    %c0_192 = arith.constant 0 : index
    %c896_193 = arith.constant 896 : index
    %c0_194 = arith.constant 0 : index
    %257 = vector.load %arg3[%c0_192, %c896_193, %c0_194] : memref<1x1152x128xbf16, #tpu.memory_space<vmem>>, vector<1x128x128xbf16>
    %258 = vector.shape_cast %257 : vector<1x128x128xbf16> to vector<128x128xbf16>
    %cst_195 = arith.constant dense<0.000000e+00> : vector<128x128xf32>
    %259 = tpu.matmul %256, %258, %cst_195 {dimension_numbers = #tpu.dot_dimension_numbers<[1], [0], [0], [1], [0, 0, 1, 1], [], []>} : vector<128x128xbf16>, vector<128x128xbf16>, vector<128x128xf32> -> vector<128x128xf32>
    %260 = arith.addf %251, %259 : vector<128x128xf32>
    %c10_i32_196 = arith.constant 10 : i32
    %261 = arith.addi %1, %c10_i32_196 : i32
    %c0_197 = arith.constant 0 : index
    %262 = arith.index_cast %261 : i32 to index
    %c10_198 = arith.constant 10 : index
    %c0_199 = arith.constant 0 : index
    %263 = vector.load %arg2[%c0_197, %262, %c10_198, %c0_199] : memref<1x26x32x128xbf16, #tpu.memory_space<vmem>>, vector<1x8x16x128xbf16>
    %264 = vector.shape_cast %263 : vector<1x8x16x128xbf16> to vector<8x16x128xbf16>
    %265 = vector.shape_cast %264 : vector<8x16x128xbf16> to vector<128x128xbf16>
    %c0_200 = arith.constant 0 : index
    %c1024_201 = arith.constant 1024 : index
    %c0_202 = arith.constant 0 : index
    %266 = vector.load %arg3[%c0_200, %c1024_201, %c0_202] : memref<1x1152x128xbf16, #tpu.memory_space<vmem>>, vector<1x128x128xbf16>
    %267 = vector.shape_cast %266 : vector<1x128x128xbf16> to vector<128x128xbf16>
    %cst_203 = arith.constant dense<0.000000e+00> : vector<128x128xf32>
    %268 = tpu.matmul %265, %267, %cst_203 {dimension_numbers = #tpu.dot_dimension_numbers<[1], [0], [0], [1], [0, 0, 1, 1], [], []>} : vector<128x128xbf16>, vector<128x128xbf16>, vector<128x128xf32> -> vector<128x128xf32>
    %269 = arith.addf %260, %268 : vector<128x128xf32>
    %270 = vector.broadcast %2 : vector<1x128xf32> to vector<128x128xf32>
    %271 = arith.addf %269, %270 : vector<128x128xf32>
    %cst_204 = arith.constant 0.000000e+00 : f32
    %272 = vector.broadcast %cst_204 : f32 to vector<128x128xf32>
    %273 = arith.subf %272, %271 : vector<128x128xf32>
    %274 = math.exp %273 : vector<128x128xf32>
    %cst_205 = arith.constant 1.000000e+00 : f32
    %275 = vector.broadcast %cst_205 : f32 to vector<128x128xf32>
    %276 = arith.addf %275, %274 : vector<128x128xf32>
    %277 = tpu.reciprocal %276 {approx = true} : vector<128x128xf32> -> vector<128x128xf32>
    %278 = arith.mulf %271, %277 : vector<128x128xf32>
    %279 = arith.addf %187, %278 : vector<128x128xf32>
    %c0_206 = arith.constant 0 : index
    %c0_207 = arith.constant 0 : index
    %c0_208 = arith.constant 0 : index
    %280 = vector.load %arg5[%c0_206, %c0_207, %c0_208] : memref<1x128x128xf32, #tpu.memory_space<vmem>>, vector<1x128x128xf32>
    %281 = vector.shape_cast %280 : vector<1x128x128xf32> to vector<128x128xf32>
    %282 = vector.shape_cast %279 : vector<128x128xf32> to vector<1x128x128xf32>
    tpu.vector_store %arg5[%c0_206, %c0_207, %c0_208], %282 {strides = array<i32>} : memref<1x128x128xf32, #tpu.memory_space<vmem>>, vector<1x128x128xf32>,
    return
  }
  func.func @transform_0(%arg0: i32, %arg1: i32) -> (i32, i32, i32, i32) {
    %c0_i32 = arith.constant 0 : i32
    %c0_i32_0 = arith.constant 0 : i32
    %c0_i32_1 = arith.constant 0 : i32
    %c0_i32_2 = arith.constant 0 : i32
    return %arg0, %c0_i32, %c0_i32_0, %c0_i32_1 : i32, i32, i32, i32
  }
  func.func @transform_1(%arg0: i32, %arg1: i32) -> (i32, i32, i32) {
    %c0_i32 = arith.constant 0 : i32
    %c0_i32_0 = arith.constant 0 : i32
    %c0_i32_1 = arith.constant 0 : i32
    %c0_i32_2 = arith.constant 0 : i32
    return %c0_i32, %c0_i32_0, %c0_i32_1 : i32, i32, i32
  }
  func.func @transform_2(%arg0: i32, %arg1: i32) -> (i32, i32) {
    %c0_i32 = arith.constant 0 : i32
    %c0_i32_0 = arith.constant 0 : i32
    %c0_i32_1 = arith.constant 0 : i32
    return %c0_i32, %c0_i32_0 : i32, i32
  }
  func.func @transform_3(%arg0: i32, %arg1: i32) -> (i32, i32, i32) {
    %c0_i32 = arith.constant 0 : i32
    %c0_i32_0 = arith.constant 0 : i32
    return %arg0, %arg1, %c0_i32 : i32, i32, i32
  }
}

</mosaic_0001>

<bundles_post_ra>
// kernel: tpu_custom_call.1
= control target key start
LH: loop header
LB: loop body
LE: loop exit
PB: predicated region body
PF: predicated region fallthrough
CT: control target
= control target key end

     0   :  { %s14389_s0 = inlined_call_operand.hbm [shape: bf16[2,26,32,128], index: 0, kind: input, shape index: {}]   ;;  %s14390_s1 = inlined_call_operand.hbm [shape: bf16[1,1152,128], index: 1, kind: input, shape index: {}]   ;;  %s14391_s2 = inlined_call_operand.vmem [shape: f32[1,128], index: 2, kind: input, shape index: {}]   ;;  %s14392_s3 = inlined_call_operand.hbm [shape: f32[2,256,128], index: 3, kind: output, shape index: {}]  }
   0x1   :  { %14474 = sst [smem:[#allocation64_spill]] %s14390_s1 }
   0x2   :  { %8 = vsyncpa [#allocation3], 0 }
   0x3   :  { %10 = vsyncpa [#allocation3 + $0x1], 0 }
   0x4   :  { %11 = vsyncpa [#allocation6], 0 }
   0x5   :  { %12 = vsyncpa [#allocation4], 0 }
   0x6   :  { %14 = vsyncpa [#allocation4 + $0x1], 0  ;;  %s11031_s12 = smov 0   ;;  %s11033_s13 = smov 0  }
   0x7   :  { %s11035_s14 = smov 0   ;;  %s11037_s15 = smov 0  }
   0x8   :  { %s11039_s16 = smov 0   ;;  %s11041_s17 = smov 0  }
   0x9   :  { %s11043_s18 = smov 0   ;;  %s11045_s19 = smov 0  }
   0xa   :  { %s11047_s20 = smov 0   ;;  %s11049_s21 = smov 0  }
   0xb   :  { %s11051_s22 = smov 0  }
   0xc LB: > { %14475 = sst [smem:[#allocation11_spill]] %s10962_s12  ;;  %s7911_s23 = sadd.s32 4294967295, %s11002_s22   ;;  %s11002_s22 = sphi %s11051_s22, %s20_s22   ;;  %s10998_s21 = sphi %s11049_s21, %s14683_s21   ;;  %s10994_s20 = sphi %s11047_s20, %s14674_s20   ;;  %s10990_s19 = sphi %s11045_s19, %s14682_s19   ;;  %s10986_s18 = sphi %s11043_s18, %s14673_s18   ;;  %s10982_s17 = sphi %s11041_s17, %s14681_s17   ;;  %s10978_s16 = sphi %s11039_s16, %s14680_s16   ;;  %s10974_s15 = sphi %s11037_s15, %s14679_s15   ;;  %s10970_s14 = sphi %s11035_s14, %s14678_s14   ;;  %s10966_s13 = sphi %s11033_s13, %s14677_s13   ;;  %s10962_s12 = sphi %s11031_s12, %s14676_s12  }
   0xd   : > { %14476 = sst [smem:[#allocation12_spill]] %s10994_s20  ;;  %s7912_s24 = sadd.s32 4294967294, %s11002_s22  }
   0xe   : > { %p52_p0 = scmp.ne.s32.totalorder %s10978_s16, %s10974_s15  ;;  %p11087_p1 = scmp.eq.s32.totalorder %s7911_s23, 0 }
   0xf   : > { %s109_s26 = sadd.s32 1, %s10970_s14  ;;  %p119_p2 = scmp.ne.s32.totalorder %s10970_s14, %s10966_s13 }
  0x10   : > { %s14477_s25 = scalar_select %p11087_p1, 1, 0 }
  0x11   : > { %p11096_p3 = por %p11087_p1, %p52_p0  ;;  %p120_p4 = scmp.eq.s32.totalorder %s7911_s23, 3 }
  0x12   : > { %p125_p5 = scmp.ne.s32.totalorder %s10966_s13, %s10962_s12  ;;  %p126_p6 = scmp.eq.s32.totalorder %s7912_s24, 3 }
  0x13   : > { %s14478_s27 = scalar_select %p11096_p3, 1, 0 }
  0x14   : > { %p11102_p7 = por %p120_p4, %p119_p2  ;;  %p7913_p8 = scmp.ge.s32.totalorder %s11002_s22, 1 }
  0x15   : > { %p11107_p9 = por %p126_p6, %p125_p5  ;;  %p133_p10 = scmp.lt.s32.totalorder %s11002_s22, 5 }
  0x16   : > { %s14479_s28 = scalar_select %p11102_p7, 1, 0 }
  0x17   : > { %s14480_s29 = scalar_select %p11107_p9, 1, 0 }
  0x18   : > { %p11112_p11 = pnand %p7913_p8, %p133_p10  ;;  %s11004_s4 = smov [#allocation5]  }
  0x19   : > { %14481 = sst [smem:[#allocation13_spill]] %s14480_s29  ;;  %s145_s5 = sshll.u32 %s11004_s4, 4  ;;  %s146_s5 = int_to_ptr.vmem [resolvable:$true] %s145_s5 }
  0x1a   : > { %s14482_s30 = scalar_select %p11112_p11, 1, 0 }
  0x1b   : > { %p10273_p12 = pneg %p11112_p11  ;;  %s14484_s1 = sld [smem:[#allocation64_spill]] }
  0x1d   : > { %p11120_p13 = pnand %p10273_p12, %p11087_p1 }
  0x1f   : > { %p10820_p2 = pneg %p11120_p13 }
  0x21   : > { %s10818_s9 = scalar_lea.hbm %s14484_s1, 9216 }
  0x22   : > { %p10819_p0 = scmp.ne.s32.totalorder %s14484_s1, %s10818_s9  ;;  %p10825_p6 = scmp.lt.u32.totalorder %s10818_s9, %s14484_s1 }
  0x24   : > { %p10821_p4 = pnand %p10820_p2, %p10819_p0 }
  0x26   : > { %p10822_p5 = pneg %p10821_p4 }
  0x28   : > { %p10827_p8 = pnand %p10825_p6, %p10822_p5 }
  0x2a   : > { %10830 = shalt.err (!%p10827_p8)
}
  0x2b   : > { %s10831_s24 = scalar_lea.vmem %s146_s5, 9216  ;;  %p10839_p7 = scmp.lt.s32.totalorder %s146_s5, %s146_s5 }
  0x2c   : > { %p10832_p10 = scmp.ne.s32.totalorder %s146_s5, %s10831_s24  ;;  %p10840_p1 = scmp.lt.s32.totalorder %s10831_s24, %s10831_s24 }
  0x2e   : > { %p10834_p12 = pnand %p10832_p10, %p10820_p2  ;;  %p10841_p3 = por %p10840_p1, %p10839_p7 }
  0x30   : > { %p10835_p9 = pneg %p10834_p12 }
  0x32   : > { %p10842_p11 = pnand %p10841_p3, %p10835_p9 }
  0x34   : > { %10845 = shalt.err (!%p10842_p11)
}
  0x35   : > { %s14398_s4 = smov 64   ;;  %s14399_s7 = smov 4  }
  0x36   : > { %10276 = dma.hbm_to_vmem [thread:$0]  (!%p11120_p13), %s14484_s1, 9216, %s146_s5, [#allocation6], %s14398_s4, %s14398_s4, %s14399_s7  }
  0x37   : > { %s29_s10 = sadd.s32 1, %s10994_s20  ;;  %s32_s11 = sadd.s32 1, %s10998_s21 }
  0x38   : > { %p30_p1 = scmp.ge.s32.totalorder %s29_s10, 2  ;;  %s39_s15 = sadd.s32 1, %s10982_s17 }
  0x39   : > { %p46_p3 = scmp.ne.s32.totalorder %s10982_s17, %s10978_s16  ;;  %p47_p7 = scmp.eq.s32.totalorder %s11002_s22, 0 }
  0x3a   : > { %s14685_s10 = smov (%p30_p1, %s29_s10), 0  ;;  %s14687_s11 = smov (!%p30_p1, %s32_s11), %s10998_s21 }
  0x3b   : > { %14485 = sst [smem:[#allocation14_spill]] %s14685_s10  ;;  %s105_s6 = ssub.s32 %s10994_s20, %s14685_s10 }
  0x3c   : > { %p34_p9 = scmp.ge.s32.totalorder %s14687_s11, 2  ;;  %p10286_p11 = scmp.lt.s32.totalorder %s11002_s22, 4 }
  0x3d   : > { %p11155_p13 = por %p47_p7, %p46_p3  ;;  %s162_s23 = sand.u32 1, %s10982_s17  }
  0x3e   : > { %s14689_s11 = smov (%p34_p9, %s14687_s11), 0  ;;  %s10262_s24 = smul.u32 416, %s162_s23 }
  0x3f   : > { %14487 = sst [smem:[#allocation15_spill]] %s14689_s11  ;;  %s36_s8 = ssub.s32 %s10998_s21, %s14689_s11 }
  0x40   : > { %s10263_s9 = smul.u32 6656, %s10998_s21  ;;  %p37_p0 = scmp.eq.s32.totalorder %s36_s8, 0 }
  0x41   : > { %s106_s4 = sor.u32 %s105_s6, %s36_s8  ;;  %s166_s12 = scalar_lea.vmem [#allocation2], %s10262_s24 }
  0x42   : > { %p107_p2 = scmp.eq.s32.totalorder %s106_s4, 0  ;;  %s11176_s29 = scalar_lea.hbm %s14389_s0, %s10263_s9 }
  0x43   : > { %s11166_s7 = scalar_select %p37_p0, %s10982_s17, %s39_s15  }
  0x44   : > { %s11171_s1 = scalar_select %p107_p2, %s10970_s14, %s109_s26  }
  0x45   : > { %s173_s11 = sshll.u32 %s166_s12, 4  ;;  %p11184_p4 = pnand %p10286_p11, %p11155_p13  ;;  %s11178_s11 = int_to_ptr.vmem [resolvable:$true] %s173_s11 }
  0x46   : > { %s11188_s26 = scalar_lea.sflag [#allocation3], %s162_s23  ;;  %s10846_s20 = scalar_lea.hbm %s11176_s29, 6656 }
  0x47   : > { %p10847_p5 = scmp.ne.s32.totalorder %s11176_s29, %s10846_s20  ;;  %p10848_p6 = pneg %p11184_p4 }
  0x48   : > { %s10851_s15 = scalar_lea.hbm %s14389_s0, 13312  ;;  %p10852_p12 = scmp.lt.u32.totalorder %s11176_s29, %s14389_s0 }
  0x49   : > { %p10849_p8 = pnand %p10848_p6, %p10847_p5  ;;  %p10853_p1 = scmp.lt.u32.totalorder %s10851_s15, %s10846_s20 }
  0x4a   : > { %p10855_p7 = scmp.lt.u32.totalorder %s10846_s20, %s11176_s29 }
  0x4b   : > { %p10850_p10 = pneg %p10849_p8  ;;  %p10854_p3 = por %p10853_p1, %p10852_p12 }
  0x4d   : > { %p10856_p9 = por %p10855_p7, %p10854_p3 }
  0x4f   : > { %p10857_p11 = pnand %p10856_p9, %p10850_p10 }
  0x51   : > { %10860 = shalt.err (!%p10857_p11)
}
  0x52   : > { %s10861_s23 = scalar_lea.vmem %s11178_s11, 6656  ;;  %s11007_s24 = smov [#allocation2]  }
  0x53   : > { %p10862_p13 = scmp.ne.s32.totalorder %s11178_s11, %s10861_s23  ;;  %s10866_s8 = sshll.u32 %s11007_s24, 4  ;;  %s10867_s8 = int_to_ptr.vmem [resolvable:$false] %s10866_s8 }
  0x54   : > { %s10868_s9 = scalar_lea.vmem %s10867_s8, 13312  ;;  %p10869_p5 = scmp.lt.s32.totalorder %s11178_s11, %s10867_s8 }
  0x55   : > { %p10864_p0 = pnand %p10862_p13, %p10848_p6  ;;  %p10870_p8 = scmp.lt.s32.totalorder %s10868_s9, %s10861_s23 }
  0x57   : > { %p10865_p2 = pneg %p10864_p0  ;;  %p10871_p12 = por %p10870_p8, %p10869_p5 }
  0x59   : > { %p10872_p1 = pnand %p10871_p12, %p10865_p2 }
  0x5b   : > { %10875 = shalt.err (!%p10872_p1)
}
  0x5c   : > { %s14489_s20 = smov 4   ;;  %s14490_s12 = smov 64  }
  0x5d   : > { %10280 = dma.hbm_to_vmem [thread:$0]  (!%p11184_p4), %s11176_s29, 6656, %s11178_s11, %s11188_s26, %s14490_s12, %s14490_s12, %s14489_s20  }
  0x5e   : > { %p14491_p6 = scmp.ne.s32.totalorder %s14482_s30, 0 }
  0x60   : > { %185 = sbr.rel (%p14491_p6) target bundleno = 928 (0x3a0), region = 32 }
  0x67   : > { %s187_s10 = sand.u32 1, %s10978_s16   ;;  %p14492_p10 = scmp.ne.s32.totalorder %s14478_s27, 0 }
  0x68   : > { %s11222_s15 = smul.u32 416, %s187_s10  ;;  %s188_s6 = scalar_lea.sflag [#allocation3], %s187_s10 }
  0x6a   : > { %s191_s5 = scalar_lea.vmem [#allocation2], %s11222_s15 }
  0x6b   : > { %10949 = dma.done.wait (%p14492_p10), %s188_s6, 6656  }
  0x6c   : > { %10951 = vsyncadd (%p14492_p10), %s188_s6, 4294960640  ;;  %p14493_p3 = scmp.ne.s32.totalorder %s14477_s25, 0 }
  0x6e   : > { %10953 = dma.done.wait (%p14493_p3), [#allocation6], 9216  }
  0x6f   : > { %10955 = vsyncadd (%p14493_p3), [#allocation6], 4294958080  ;;  %v10382_v0 = vld [vmem:[#allocation5 + $0x40] sm:$0xff]   ;;  %v10384_v2 = vld [vmem:[#allocation5 + $0x48] sm:$0xff]   ;;  %s8654_s25 = sshll.u32 %s10986_s18, 7  ;;  %vm274_vm2 = vcmask 1041408  }
  0x70   : > { %v10383_v1 = vld [vmem:[#allocation5 + $0xc0] sm:$0xff]   ;;  %9062 = vmatprep.subr.bf16.mxu1 %v10382_v0  ;;  %v10385_v3 = vld [vmem:[#allocation5 + $0xc8] sm:$0xff]   ;;  %v10386_v4 = vld [vmem:[#allocation5 + $0x50] sm:$0xff]   ;;  %vm357_vm0 = vsmask.f32 1280  ;;  %s11236_s27 = scalar_lea.vmem %s191_s5, %s8654_s25 [#allocation2]  ;;  %vm275_vm3 = vcmask 1045508  }
  0x71   : > { %9158 = vmatprep.subr.bf16.mxu0 %v10383_v1  ;;  %9063 = vmatpush3.bf16.msra.mxu1 %v10382_v0  ;;  %v10387_v5 = vld [vmem:[#allocation5 + $0xd0] sm:$0xff]   ;;  %v10388_v6 = vld [vmem:[#allocation5 + $0x58] sm:$0xff]   ;;  %vm358_vm1 = vsmask.f32 5392  ;;  %v10390_v8 = vld [vmem:[#allocation5 + $0x60] sm:$0xff]   ;;  %v14496_v41 = vmov 0 }
  0x72   : > { %9159 = vmatpush3.bf16.msra.mxu0 %v10383_v1  ;;  %9064 = vmatprep.subr.bf16.mxu1 %v10384_v2  ;;  %v10389_v7 = vld [vmem:[#allocation5 + $0xd8] sm:$0xff]   ;;  %v10391_v9 = vld [vmem:[#allocation5 + $0xe0] sm:$0xff]   ;;  %v10392_v10 = vld [vmem:[#allocation5 + $0x68] sm:$0xff]   ;;  %vm978_vm6 = vcmask 1040384   ;;  %vm979_vm7 = vcmask 1044484   ;;  %vm3526_vm9 = vcmask 1042432  }
  0x73   : > { %9160 = vmatprep.subr.bf16.mxu0 %v10385_v3  ;;  %v10393_v11 = vld [vmem:[#allocation5 + $0xe8] sm:$0xff]   ;;  %v11239_v12 = vld [vmem:[%s11236_s27 + $0x40] sm:$0xc]  ;;  %v11242_v13 = vld [vmem:[%s11236_s27 + $0x44] sm:$0xf]  ;;  %vm3527_vm10 = vcmask 1046532  }
  0x74   : > { %v7955_v14 = vld [vmem:[%s11236_s27 + $0x48] sm:$0x7]  ;;  %v361_v15 = vshrl.u32 %v11239_v12, 16  ;;  %v364_v16 = vshll.u32 %v11239_v12, 16  ;;  %v370_v17 = vshrl.u32 %v11242_v13, 16  ;;  %v373_v18 = vshll.u32 %v11242_v13, 16  ;;  %vm11256_vm4 = vmor %vm274_vm2, %vm275_vm3 }
  0x75   : > { %9065 = vmatpush3.bf16.msra.mxu1 %v10384_v2  ;;  %v8029_v19 = vld [vmem:[%s11236_s27 + $0x50] sm:$0xc]  ;;  %v380_v20 = vshrl.u32 %v7955_v14, 16  ;;  %v383_v21 = vshll.u32 %v7955_v14, 16  ;;  %v11251_v22 = vld [vmem:[%s11236_s27 + $0x54] sm:$0xf]  ;;  %vm11269_vm5 = vmor %vm357_vm0, %vm358_vm1 }
  0x76   : > { %9161 = vmatpush3.bf16.msra.mxu0 %v10385_v3  ;;  %9066 = vmatprep.subr.bf16.mxu1 %v10386_v4  ;;  %v8031_v23 = vld [vmem:[%s11236_s27 + $0x58] sm:$0x3]  ;;  %v10394_v24 = vld [vmem:[#allocation5 + $0x70] sm:$0xff]   ;;  %v363_v26 = vrot.slane %v361_v15, 6  ;;  %v366_v27 = vrot.slane %v364_v16, 7  ;;  %v372_v28 = vrot.slane %v370_v17, 6  ;;  %vm11495_vm8 = vmor %vm978_vm6, %vm979_vm7 }
  0x77   : > { %9162 = vmatprep.subr.bf16.mxu0 %v10387_v5  ;;  %v10395_v25 = vld [vmem:[#allocation5 + $0xf0] sm:$0xff]   ;;  %v375_v29 = vrot.slane %v373_v18, 7  ;;  %v382_v31 = vrot.slane %v380_v20, 6  ;;  %v385_v32 = vrot.slane %v383_v21, 7  ;;  %v8053_v33 = vrot.slane %v8029_v19, 10  ;;  %v10396_v52 = vld [vmem:[#allocation5 + $0x78] sm:$0xff]   ;;  %vm12182_vm11 = vmor %vm3526_vm9, %vm3527_vm10 }
  0x78   : > { %v1300_v34 = vrot.slane %v11251_v22, 6  ;;  %v11262_v35 = vld [vmem:[%s11236_s27 + $0x50] sm:$0xc]  ;;  %v367_v36 = vor.u32 %v366_v27, %v363_v26  ;;  %v1303_v38 = vrot.slane %v8031_v23, 6  ;;  %v1572_v39 = vshrl.u32 %v8029_v19, 16  ;;  %v10397_v58 = vld [vmem:[#allocation5 + $0xf8] sm:$0xff]  }
  0x79   : > { %9067 = vmatpush3.bf16.msra.mxu1 %v10386_v4  ;;  %v376_v37 = vor.u32 %v375_v29, %v372_v28  ;;  %v11265_v40 = vld [vmem:[%s11236_s27 + $0x54] sm:$0xf]  ;;  %v14497_v41 = vsel %vm11269_vm5, 4294967295, %v14496_v41  ;;  %v386_v42 = vor.u32 %v385_v32, %v382_v31  ;;  %v1575_v45 = vshll.u32 %v8029_v19, 16  ;;  %v11276_v46 = vld [vmem:[%s11236_s27 + $0x58] sm:$0x7] }
  0x7a   : > { %9163 = vmatpush3.bf16.msra.mxu0 %v10387_v5  ;;  %9068 = vmatprep.subr.bf16.mxu1 %v10388_v6  ;;  %14498 = vst [vmem:[#allocation16_spill] sm:$0xff] %v14497_v41  ;;  %v1301_v43 = vsel %vm11256_vm4, %v8053_v33, %v1300_v34  ;;  %v1302_v44 = vrot.slane %v1300_v34, 4  ;;  %v368_v47 = vrot.slane %v367_v36, 4  ;;  %v11278_v49 = vrot.slane %v1572_v39, 6  ;;  %v8032_v51 = vld [vmem:[%s11236_s27 + $0x60] sm:$0xc] }
  0x7b   : > { %9164 = vmatprep.subr.bf16.mxu0 %v10389_v7  ;;  %v378_v48 = vrot.slane %v376_v37, 4  ;;  %v7948_v50 = vrot.slane %v11262_v35, 10  ;;  %v11284_v54 = vrot.slane %v1575_v45, 7  ;;  %v389_v55 = vshrl.u32 %v11262_v35, 16  ;;  %v11289_v57 = vld [vmem:[%s11236_s27 + $0x64] sm:$0xf] }
  0x7c   : > { %v1304_v53 = vsel %vm11256_vm4, %v1302_v44, %v1303_v38  ;;  %v392_v56 = vshll.u32 %v11262_v35, 16  ;;  %v377_v59 = vsel %vm11269_vm5, %v368_v47, %v376_v37  ;;  %v398_v62 = vshrl.u32 %v11265_v40, 16  ;;  %v8034_v63 = vld [vmem:[%s11236_s27 + $0x68] sm:$0x3]  ;;  %v11298_v4 = vld [vmem:[#allocation5] sm:$0xff]   ;;  %s215_s11 = sand.u32 1, %s10966_s13  }
  0x7d   : > { %9069 = vmatpush3.bf16.msra.mxu1 %v10388_v6  ;;  %v387_v60 = vsel %vm11269_vm5, %v378_v48, %v386_v42  ;;  %v8061_v61 = vcombine.low %v1301_v43, %v1304_v53  ;;  %v391_v1 = vrot.slane %v389_v55, 6  ;;  %v401_v3 = vshll.u32 %v11265_v40, 16  ;;  %v10399_v15 = vld [vmem:[#allocation5 + $0x140] sm:$0xff]   ;;  %v7957_v31 = vld [vmem:[%s11236_s27 + $0x68] sm:$0x7]  ;;  %s7919_s4 = sshll.u32 %s215_s11, 7 }
  0x7e   : > { %9165 = vmatpush3.bf16.msra.mxu0 %v10389_v7  ;;  %9070 = vmatprep.subr.bf16.mxu1 %v10390_v8  ;;  %v7963_v0 = vcombine.low %v377_v59, %v387_v60  ;;  %v394_v2 = vrot.slane %v392_v56, 7  ;;  %v400_v5 = vrot.slane %v398_v62, 6  ;;  %v408_v6 = vshrl.u32 %v11276_v46, 16  ;;  %v11312_v29 = vld [vmem:[%s11236_s27 + $0x64] sm:$0xf]  ;;  %v10401_v42 = vld [vmem:[#allocation5 + $0x148] sm:$0xff]  }
  0x7f   : > { %9166 = vmatprep.subr.bf16.mxu0 %v10391_v9  ;;  %9174 = vmatprep.mubr.bf16.mxu0 %v8061_v61  ;;  %v411_v7 = vshll.u32 %v11276_v46, 16  ;;  %v1307_v14 = vrot.slane %v11289_v57, 6  ;;  %v1310_v18 = vrot.slane %v8034_v63, 6  ;;  %v1600_v19 = vshrl.u32 %v8032_v51, 16  ;;  %v8035_v37 = vld [vmem:[%s11236_s27 + $0x70] sm:$0xc] }
  0x80   : > { %9078 = vmatprep.mubr.bf16.mxu1 %v7963_v0  ;;  %v410_v16 = vrot.slane %v408_v6, 6  ;;  %v1603_v28 = vshll.u32 %v8032_v51, 16  ;;  %v426_v44 = vshrl.u32 %v11312_v29, 16  ;;  %v11327_v45 = vld [vmem:[%s11236_s27 + $0x74] sm:$0xf]  ;;  %v10400_v48 = vld [vmem:[#allocation5 + $0x8] sm:$0xff]  }
  0x81   : > { %9071 = vmatpush3.bf16.msra.mxu1 %v10390_v8  ;;  %v993_v8 = vrot.slane %v11276_v46, 7  ;;  %v413_v17 = vrot.slane %v411_v7, 7  ;;  %v11309_v27 = vrot.slane %v1600_v19, 6  ;;  %v436_v53 = vshrl.u32 %v7957_v31, 16  ;;  %v8037_v55 = vld [vmem:[%s11236_s27 + $0x78] sm:$0x3] }
  0x82   : > { %9167 = vmatpush3.bf16.msra.mxu0 %v10391_v9  ;;  %9072 = vmatprep.subr.bf16.mxu1 %v10392_v10  ;;  %v395_v9 = vor.u32 %v394_v2, %v391_v1  ;;  %v11322_v39 = vrot.slane %v1603_v28, 7  ;;  %v428_v59 = vrot.slane %v426_v44, 6  ;;  %v11334_v60 = vld [vmem:[%s11236_s27 + $0x70] sm:$0xc]  ;;  %v11337_v61 = vld [vmem:[%s11236_s27 + $0x74] sm:$0xf] }
  0x83   : > { %9168 = vmatprep.subr.bf16.mxu0 %v10393_v11  ;;  %v414_v26 = vor.u32 %v413_v17, %v410_v16  ;;  %v10403_v62 = vld [vmem:[#allocation5 + $0x150] sm:$0xff]   ;;  %v438_v0 = vrot.slane %v436_v53, 6  ;;  %v439_v1 = vshll.u32 %v7957_v31, 16  ;;  %v8055_v2 = vrot.slane %v8035_v37, 10  ;;  %v7958_v7 = vld [vmem:[%s11236_s27 + $0x78] sm:$0x7] }
  0x84   : > { %v396_v20 = vrot.slane %v395_v9, 4  ;;  %v1317_v6 = vrot.slane %v8037_v55, 6  ;;  %v454_v19 = vshrl.u32 %v11337_v61, 16  ;;  %v8040_v28 = vld [vmem:[%s11236_s27 + $0x88] sm:$0x3]  ;;  %v10405_v31 = vld [vmem:[#allocation5 + $0x158] sm:$0xff]  }
  0x85   : > { %9073 = vmatpush3.bf16.msra.mxu1 %v10392_v10  ;;  %v403_v10 = vrot.slane %v401_v3, 7  ;;  %v10404_v53 = vld [vmem:[#allocation5 + $0x18] sm:$0xff]   ;;  %v12783_v41 = vld [vmem:[%s11236_s27 + $0xa8] sm:$0x1]  ;;  %s14270_s26 = scalar_lea.vmem [#allocation7], %s7919_s4  ;;  %s8649_s23 = sshll.u32 %s10986_s18, 4 }
  0x86   : > { %9169 = vmatpush3.bf16.msra.mxu0 %v10393_v11  ;;  %9074 = vmatprep.subr.bf16.mxu1 %v10394_v24  ;;  %v8054_v11 = vrot.slane %v8032_v51, 10  ;;  %s8650_s24 = sshll.u32 %s10990_s19, 5  ;;  %s7788_s19 = sshll.u32 %s14270_s26, 4  ;;  %s14321_s19 = int_to_ptr.vmem [resolvable:$true] %s7788_s19 }
  0x87   : > { %9170 = vmatprep.subr.bf16.mxu0 %v10395_v25  ;;  %v404_v21 = vor.u32 %v403_v10, %v400_v5  ;;  %v1314_v5 = vrot.slane %v11327_v45, 6  ;;  %v441_v10 = vrot.slane %v439_v1, 7  ;;  %v11364_v1 = vld [vmem:[%s11236_s27 + $0x84] sm:$0xf]  ;;  %s7785_s8 = sadd.s32 %s8650_s24, %s8649_s23  ;;  %s14328_s10 = scalar_lea.sflag [#allocation4], %s215_s11 }
  0x88   : > { %v1308_v23 = vsel %vm11256_vm4, %v8054_v11, %v1307_v14  ;;  %v445_v11 = vshrl.u32 %v11334_v60, 16  ;;  %s8651_s18 = sshll.u32 %s7785_s8, 7  ;;  %s10876_s15 = scalar_lea.vmem %s14321_s19, 2048 }
  0x89   : > { %9075 = vmatpush3.bf16.msra.mxu1 %v10394_v24  ;;  %v1309_v24 = vrot.slane %v1307_v14, 4  ;;  %v405_v32 = vsel %vm11269_vm5, %v396_v20, %v404_v21  ;;  %v406_v33 = vrot.slane %v404_v21, 4  ;;  %v448_v14 = vshll.u32 %v11334_v60, 16  ;;  %v10402_v20 = vld [vmem:[#allocation5 + $0x10] sm:$0xff]   ;;  %v11349_v21 = vld [vmem:[%s11236_s27 + $0x84] sm:$0xf]  ;;  %s14319_s12 = scalar_lea.hbm %s14392_s3, %s8651_s18  ;;  %p10877_p4 = scmp.ne.s32.totalorder %s14321_s19, %s10876_s15 }
  0x8a   : > { %9171 = vmatpush3.bf16.msra.mxu0 %v10395_v25  ;;  %9076 = vmatprep.subr.bf16.mxu1 %v10396_v52  ;;  %v11307_v25 = vld [vmem:[%s11236_s27 + $0x60] sm:$0xc]  ;;  %v1315_v17 = vsel %vm11256_vm4, %v8055_v2, %v1314_v5  ;;  %p14669_p7 = scmp.ne.s32.totalorder %s14479_s28, 0  ;;  %s11008_s6 = smov [#allocation7]  }
  0x8b   : > { %9172 = vmatprep.subr.bf16.mxu0 %v10397_v58  ;;  %v1311_v34 = vsel %vm11256_vm4, %v1309_v24, %v1310_v18  ;;  %v417_v36 = vshrl.u32 %v11307_v25, 16  ;;  %v420_v43 = vshll.u32 %v11307_v25, 16  ;;  %v415_v47 = vsel %vm11269_vm5, %v406_v33, %v414_v26  ;;  %v10407_v2 = vld [vmem:[#allocation5 + $0x160] sm:$0xff]   ;;  %s10880_s5 = sshll.u32 %s11008_s6, 4  ;;  %s10881_s5 = int_to_ptr.vmem [resolvable:$false] %s10880_s5 }
  0x8c   : > { %v8062_v38 = vcombine.low %v1308_v23, %v1311_v34  ;;  %v7964_v56 = vcombine.low %v405_v32, %v415_v47  ;;  %v1316_v18 = vrot.slane %v1314_v5, 4  ;;  %v442_v23 = vor.u32 %v441_v10, %v438_v0  ;;  %v11361_v0 = vld [vmem:[%s11236_s27 + $0x80] sm:$0xc]  ;;  %p10878_p9 = pnand %p10877_p4, %p14669_p7  ;;  %s10882_s25 = scalar_lea.vmem %s10881_s5, 4096 }
  0x8d   : > { %9077 = vmatpush3.bf16.msra.mxu1 %v10396_v52  ;;  %v419_v51 = vrot.slane %v417_v36, 6  ;;  %v429_v52 = vshll.u32 %v11312_v29, 16  ;;  %v447_v24 = vrot.slane %v445_v11, 6  ;;  %v450_v26 = vrot.slane %v448_v14, 7  ;;  %p10883_p13 = scmp.lt.s32.totalorder %s14321_s19, %s10881_s5  ;;  %p10884_p0 = scmp.lt.s32.totalorder %s10882_s25, %s10876_s15 }
  0x8e   : > { %9173 = vmatpush3.bf16.msra.mxu0 %v10397_v58  ;;  %9094 = vmatprep.subr.bf16.mxu1 %v11298_v4  ;;  %v422_v58 = vrot.slane %v420_v43, 7  ;;  %v1318_v33 = vsel %vm11256_vm4, %v1316_v18, %v1317_v6  ;;  %v456_v34 = vrot.slane %v454_v19, 6  ;;  %v457_v36 = vshll.u32 %v11337_v61, 16  ;;  %v7959_v6 = vld [vmem:[%s11236_s27 + $0x88] sm:$0x7]  ;;  %p10879_p11 = pneg %p10878_p9 }
  0x8f   : > { %9222 = vmatprep.subr.bf16.mxu0 %v10399_v15  ;;  %v431_v63 = vrot.slane %v429_v52, 7  ;;  %v464_v43 = vshrl.u32 %v7958_v7, 16  ;;  %p10885_p2 = por %p10884_p0, %p10883_p13 }
  0x90   : > { %9079 = vmatmul.mubr.bf16.vlgmr.msra.gmra.mrb[0].mxu1 %v7964_v56  ;;  %v423_v3 = vor.u32 %v422_v58, %v419_v51  ;;  %v459_v47 = vrot.slane %v457_v36, 7  ;;  %v467_v51 = vshll.u32 %v7958_v7, 16  ;;  %v1324_v58 = vrot.slane %v8040_v28, 6  ;;  %v10409_v36 = vld [vmem:[#allocation5 + $0x168] sm:$0xff]  }
  0x91   : > { %9175 = vmatmul.mubr.bf16.vlgmr.msra.gmra.mrb[0].mxu0 %v8062_v38  ;;  %9095 = vmatpush3.bf16.msra.mxu1 %v11298_v4  ;;  %v432_v9 = vor.u32 %v431_v63, %v428_v59  ;;  %v8063_v38 = vcombine.low %v1315_v17, %v1318_v33  ;;  %v466_v56 = vrot.slane %v464_v43, 6  ;;  %v476_v7 = vshll.u32 %v11361_v0, 16  ;;  %v11376_v17 = vld [vmem:[%s11236_s27 + $0x94] sm:$0xf]  ;;  %v11385_v33 = vld [vmem:[%s11236_s27 + $0x90] sm:$0xc]  ;;  %p10886_p5 = pnand %p10885_p2, %p10879_p11 }
  0x92   : > { %9223 = vmatpush3.bf16.msra.mxu0 %v10399_v15  ;;  %v8038_v15 = vld [vmem:[%s11236_s27 + $0x80] sm:$0xc]  ;;  %9096 = vmatprep.subr.bf16.mxu1 %v10400_v48  ;;  %v424_v16 = vrot.slane %v423_v3, 4  ;;  %v460_v59 = vor.u32 %v459_v47, %v456_v34  ;;  %v469_v63 = vrot.slane %v467_v51, 7  ;;  %v10408_v34 = vld [vmem:[#allocation5 + $0x28] sm:$0xff]   ;;  %v1328_v51 = vrot.slane %v11376_v17, 6 }
  0x93   : > { %9224 = vmatprep.subr.bf16.mxu0 %v10401_v42  ;;  %v434_v4 = vrot.slane %v432_v9, 4  ;;  %v8056_v52 = vrot.slane %v8038_v15, 10  ;;  %9178 = vmatprep.mubr.bf16.mxu0 %v8063_v38  ;;  %v482_v15 = vshrl.u32 %v11364_v1, 16  ;;  %v11388_v43 = vld [vmem:[%s11236_s27 + $0x94] sm:$0xf] }
  0x94   : > { %v433_v32 = vsel %vm11269_vm5, %v424_v16, %v432_v9  ;;  %v10406_v9 = vld [vmem:[#allocation5 + $0x20] sm:$0xff]   ;;  %v462_v11 = vrot.slane %v460_v59, 4  ;;  %v470_v14 = vor.u32 %v469_v63, %v466_v56  ;;  %v8041_v16 = vld [vmem:[%s11236_s27 + $0x90] sm:$0xc] }
  0x95   : > { %9097 = vmatpush3.bf16.msra.mxu1 %v10400_v48  ;;  %v443_v37 = vsel %vm11269_vm5, %v434_v4, %v442_v23  ;;  %v1321_v48 = vrot.slane %v11349_v21, 6  ;;  %v485_v4 = vshll.u32 %v11364_v1, 16  ;;  %v8043_v23 = vld [vmem:[%s11236_s27 + $0x98] sm:$0x3]  ;;  %v484_v28 = vrot.slane %v482_v15, 6 }
  0x96   : > { %9225 = vmatpush3.bf16.msra.mxu0 %v10401_v42  ;;  %v451_v42 = vor.u32 %v450_v26, %v447_v24  ;;  %v7965_v44 = vcombine.low %v433_v32, %v443_v37  ;;  %9098 = vmatprep.subr.bf16.mxu1 %v10402_v20  ;;  %v471_v24 = vsel %vm11269_vm5, %v462_v11, %v470_v14  ;;  %v492_v32 = vshrl.u32 %v7959_v6, 16 }
  0x97   : > { %9226 = vmatprep.subr.bf16.mxu0 %v10403_v62  ;;  %v1322_v3 = vsel %vm11256_vm4, %v8056_v52, %v1321_v48  ;;  %v1323_v5 = vrot.slane %v1321_v48, 4  ;;  %v487_v38 = vrot.slane %v485_v4, 7  ;;  %v8057_v47 = vrot.slane %v8041_v16, 10 }
  0x98   : > { %v452_v55 = vrot.slane %v451_v42, 4  ;;  %9082 = vmatprep.mubr.bf16.mxu1 %v7965_v44  ;;  %v495_v42 = vshll.u32 %v7959_v6, 16  ;;  %v494_v44 = vrot.slane %v492_v32, 6  ;;  %v1331_v52 = vrot.slane %v8043_v23, 6  ;;  %v10413_v23 = vld [vmem:[#allocation5 + $0x178] sm:$0xff]  }
  0x99   : > { %9099 = vmatpush3.bf16.msra.mxu1 %v10402_v20  ;;  %v1325_v18 = vsel %vm11256_vm4, %v1323_v5, %v1324_v58  ;;  %v478_v20 = vrot.slane %v476_v7, 7  ;;  %v488_v48 = vor.u32 %v487_v38, %v484_v28  ;;  %v1329_v63 = vsel %vm11256_vm4, %v8057_v47, %v1328_v51  ;;  %v10410_v7 = vld [vmem:[#allocation5 + $0x30] sm:$0xff]  }
  0x9a   : > { %9227 = vmatpush3.bf16.msra.mxu0 %v10403_v62  ;;  %v473_v62 = vshrl.u32 %v11361_v0, 16  ;;  %v461_v10 = vsel %vm11269_vm5, %v452_v55, %v460_v59  ;;  %9100 = vmatprep.subr.bf16.mxu1 %v10404_v53  ;;  %v8064_v26 = vcombine.low %v1322_v3, %v1325_v18  ;;  %v7960_v55 = vld [vmem:[%s11236_s27 + $0x98] sm:$0x7]  ;;  %v497_v58 = vrot.slane %v495_v42, 7  ;;  %v8044_v59 = vld [vmem:[%s11236_s27 + $0xa0] sm:$0xc] }
  0x9b   : > { %9228 = vmatprep.subr.bf16.mxu0 %v10405_v31  ;;  %v7966_v37 = vcombine.low %v461_v10, %v471_v24  ;;  %v1330_v3 = vrot.slane %v1328_v51, 4  ;;  %v504_v5 = vshll.u32 %v11385_v33, 16  ;;  %v510_v6 = vshrl.u32 %v11388_v43, 16  ;;  %v10411_v10 = vld [vmem:[#allocation5 + $0x170] sm:$0xff]   ;;  %v11409_v42 = vld [vmem:[#allocation5 + $0x38] sm:$0xff]  }
  0x9c   : > { %v475_v19 = vrot.slane %v473_v62, 6  ;;  %9179 = vmatmul.mubr.bf16.gmra.mrb[4].mxu0 %v8064_v26  ;;  %v11399_v62 = vld [vmem:[%s11236_s27 + $0xa4] sm:$0xf]  ;;  %v490_v14 = vrot.slane %v488_v48, 4  ;;  %v498_v15 = vor.u32 %v497_v58, %v494_v44  ;;  %v513_v4 = vshll.u32 %v11388_v43, 16 }
  0x9d   : > { %9101 = vmatpush3.bf16.msra.mxu1 %v10404_v53  ;;  %v501_v53 = vshrl.u32 %v11385_v33, 16  ;;  %v1332_v18 = vsel %vm11256_vm4, %v1330_v3, %v1331_v52  ;;  %v520_v28 = vshrl.u32 %v7960_v55, 16  ;;  %v523_v32 = vshll.u32 %v7960_v55, 16  ;;  %v11419_v58 = vld [vmem:[%s11236_s27 + $0xa8] sm:$0x7] }
  0x9e   : > { %9229 = vmatpush3.bf16.msra.mxu0 %v10405_v31  ;;  %v479_v31 = vor.u32 %v478_v20, %v475_v19  ;;  %9102 = vmatprep.subr.bf16.mxu1 %v10406_v9  ;;  %v506_v19 = vrot.slane %v504_v5, 7  ;;  %v512_v20 = vrot.slane %v510_v6, 6  ;;  %v499_v24 = vsel %vm11269_vm5, %v490_v14, %v498_v15  ;;  %v8047_v5 = vld [vmem:[%s11236_s27 + $0xb0] sm:$0xc] }
  0x9f   : > { %9230 = vmatprep.subr.bf16.mxu0 %v10407_v2  ;;  %9083 = vmatmul.mubr.bf16.gmra.mrb[4].mxu1 %v7966_v37  ;;  %v503_v16 = vrot.slane %v501_v53, 6  ;;  %v8065_v26 = vcombine.low %v1329_v63, %v1332_v18  ;;  %v8058_v38 = vrot.slane %v8044_v59, 10  ;;  %v522_v44 = vrot.slane %v520_v28, 6 }
  0xa0   : > { %v480_v56 = vrot.slane %v479_v31, 4  ;;  %v515_v31 = vrot.slane %v513_v4, 7  ;;  %v525_v47 = vrot.slane %v523_v32, 7  ;;  %v1335_v51 = vrot.slane %v11399_v62, 6  ;;  %v8049_v4 = vld [vmem:[%s11236_s27 + $0xb8] sm:$0x3] }
  0xa1   : > { %9103 = vmatpush3.bf16.msra.mxu1 %v10406_v9  ;;  %v507_v9 = vor.u32 %v506_v19, %v503_v16  ;;  %9182 = vmatprep.mubr.bf16.mxu0 %v8065_v26  ;;  %v11430_v16 = vld [vmem:[%s11236_s27 + $0xb4] sm:$0xf] }
  0xa2   : > { %9231 = vmatpush3.bf16.msra.mxu0 %v10407_v2  ;;  %v489_v11 = vsel %vm11269_vm5, %v480_v56, %v488_v48  ;;  %v8046_v2 = vld [vmem:[%s11236_s27 + $0xa8] sm:$0x3]  ;;  %9104 = vmatprep.subr.bf16.mxu1 %v10408_v34  ;;  %v11413_v56 = vld [vmem:[%s11236_s27 + $0xa0] sm:$0xc]  ;;  %v516_v55 = vor.u32 %v515_v31, %v512_v20  ;;  %v11416_v48 = vld [vmem:[%s11236_s27 + $0xa4] sm:$0xf]  ;;  %v526_v59 = vor.u32 %v525_v47, %v522_v44 }
  0xa3   : > { %9232 = vmatprep.subr.bf16.mxu0 %v10409_v36  ;;  %v7967_v37 = vcombine.low %v489_v11, %v499_v24  ;;  %v1338_v52 = vrot.slane %v8046_v2, 6  ;;  %v529_v53 = vshrl.u32 %v11413_v56, 16  ;;  %v1336_v63 = vsel %vm11256_vm4, %v8058_v38, %v1335_v51  ;;  %v11432_v2 = vld [vmem:[#allocation5 + $0x180] sm:$0xff]   ;;  %v11448_v31 = vld [vmem:[%s11236_s27 + $0xb4] sm:$0xf] }
  0xa4   : > { %v1337_v3 = vrot.slane %v1335_v51, 4  ;;  %v518_v11 = vrot.slane %v516_v55, 4  ;;  %v538_v15 = vshrl.u32 %v11416_v48, 16  ;;  %v548_v20 = vshrl.u32 %v11419_v58, 16  ;;  %v11439_v24 = vld [vmem:[#allocation5 + $0x80] sm:$0xff]  }
  0xa5   : > { %9105 = vmatpush3.bf16.msra.mxu1 %v10408_v34  ;;  %9086 = vmatprep.mubr.bf16.mxu1 %v7967_v37  ;;  %v532_v34 = vshll.u32 %v11413_v56, 16  ;;  %v531_v14 = vrot.slane %v529_v53, 6  ;;  %v551_v37 = vshll.u32 %v11419_v58, 16  ;;  %v11453_v53 = vld [vmem:[%s11236_s27 + $0xb8] sm:$0x7] }
  0xa6   : > { %9233 = vmatpush3.bf16.msra.mxu0 %v10409_v36  ;;  %v508_v36 = vrot.slane %v507_v9, 4  ;;  %9106 = vmatprep.subr.bf16.mxu1 %v10410_v7  ;;  %v1339_v18 = vsel %vm11256_vm4, %v1337_v3, %v1338_v52  ;;  %v527_v26 = vsel %vm11269_vm5, %v518_v11, %v526_v59  ;;  %v540_v32 = vrot.slane %v538_v15, 6  ;;  %v11445_v9 = vld [vmem:[%s11236_s27 + $0xb0] sm:$0xc]  ;;  %v11463_v15 = vld [vmem:[%s11236_s27 + $0xc4] sm:$0xf] }
  0xa7   : > { %9234 = vmatprep.subr.bf16.mxu0 %v10411_v10  ;;  %v534_v19 = vrot.slane %v532_v34, 7  ;;  %v8066_v28 = vcombine.low %v1336_v63, %v1339_v18  ;;  %v553_v51 = vrot.slane %v551_v37, 7  ;;  %v8059_v52 = vrot.slane %v8047_v5, 10  ;;  %v8050_v34 = vld [vmem:[%s11236_s27 + $0xc0] sm:$0xc] }
  0xa8   : > { %v517_v6 = vsel %vm11269_vm5, %v508_v36, %v516_v55  ;;  %v1342_v36 = vrot.slane %v11430_v16, 6  ;;  %v1345_v55 = vrot.slane %v8049_v4, 6  ;;  %v557_v3 = vshrl.u32 %v11445_v9, 16  ;;  %v8052_v18 = vld [vmem:[%s11236_s27 + $0xc8] sm:$0x3] }
  0xa9   : > { %9107 = vmatpush3.bf16.msra.mxu1 %v10410_v7  ;;  %v7968_v38 = vcombine.low %v517_v6, %v527_v26  ;;  %v535_v44 = vor.u32 %v534_v19, %v531_v14  ;;  %v550_v7 = vrot.slane %v548_v20, 6  ;;  %9183 = vmatmul.mubr.bf16.gmra.mrb[8].mxu0 %v8066_v28  ;;  %v566_v14 = vshrl.u32 %v11448_v31, 16 }
  0xaa   : > { %9235 = vmatpush3.bf16.msra.mxu0 %v10411_v10  ;;  %v541_v10 = vshll.u32 %v11416_v48, 16  ;;  %9108 = vmatprep.subr.bf16.mxu1 %v11409_v42  ;;  %v1343_v5 = vsel %vm11256_vm4, %v8059_v52, %v1342_v36  ;;  %v1344_v11 = vrot.slane %v1342_v36, 4  ;;  %v559_v20 = vrot.slane %v557_v3, 6 }
  0xab   : > { %9236 = vmatprep.subr.bf16.mxu0 %v10413_v23  ;;  %9087 = vmatmul.mubr.bf16.gmra.mrb[8].mxu1 %v7968_v38  ;;  %v536_v59 = vrot.slane %v535_v44, 4  ;;  %v554_v6 = vor.u32 %v553_v51, %v550_v7  ;;  %v568_v28 = vrot.slane %v566_v14, 6  ;;  %v576_v37 = vshrl.u32 %v11453_v53, 16 }
  0xac   : > { %v543_v47 = vrot.slane %v541_v10, 7  ;;  %v1346_v26 = vsel %vm11256_vm4, %v1344_v11, %v1345_v55  ;;  %v8060_v36 = vrot.slane %v8050_v34, 10  ;;  %v1352_v3 = vrot.slane %v8052_v18, 6  ;;  %v7928_v18 = vld [vmem:[%s11236_s27 + $0x58] sm:$0x3] }
  0xad   : > { %9109 = vmatpush3.bf16.msra.mxu1 %v11409_v42  ;;  %v8067_v38 = vcombine.low %v1343_v5, %v1346_v26  ;;  %v578_v52 = vrot.slane %v576_v37, 6  ;;  %v7947_v5 = vrot.slane %v11239_v12, 10  ;;  %v279_v11 = vrot.slane %v11242_v13, 6 }
  0xae   : > { %9237 = vmatpush3.bf16.msra.mxu0 %v10413_v23  ;;  %v544_v63 = vor.u32 %v543_v47, %v540_v32  ;;  %v560_v23 = vshll.u32 %v11445_v9, 16  ;;  %9126 = vmatprep.subr.bf16.mxu1 %v11439_v24  ;;  %v569_v32 = vshll.u32 %v11448_v31, 16  ;;  %v579_v47 = vshll.u32 %v11453_v53, 16 }
  0xaf   : > { %9254 = vmatprep.subr.bf16.mxu0 %v11432_v2  ;;  %9186 = vmatprep.mubr.bf16.mxu0 %v8067_v38  ;;  %v2030_v26 = vrot.slane %v11251_v22, 7  ;;  %v280_v13 = vsel %vm11256_vm4, %v7947_v5, %v279_v11 }
  0xb0   : > { %v545_v19 = vsel %vm11269_vm5, %v536_v59, %v544_v63  ;;  %v546_v10 = vrot.slane %v544_v63, 4  ;;  %v562_v4 = vrot.slane %v560_v23, 7  ;;  %v571_v51 = vrot.slane %v569_v32, 7  ;;  %v7925_v23 = vld [vmem:[%s11236_s27 + $0x48] sm:$0x3] }
  0xb1   : > { %v581_v59 = vrot.slane %v579_v47, 7  ;;  %v1349_v63 = vrot.slane %v11463_v15, 6  ;;  %v282_v14 = vrot.slane %v7925_v23, 6  ;;  %v281_v32 = vrot.slane %v279_v11, 4  ;;  %v11503_v47 = vld [vmem:[%s11236_s27 + $0x68] sm:$0x7] }
  0xb2   : > { %v555_v42 = vsel %vm11269_vm5, %v546_v10, %v554_v6  ;;  %v563_v44 = vor.u32 %v562_v4, %v559_v20  ;;  %v572_v6 = vor.u32 %v571_v51, %v568_v28  ;;  %v8101_v4 = vld [vmem:[%s11236_s27 + $0x50] sm:$0x8]  ;;  %v2032_v38 = vrot.slane %v2030_v26, 4 }
  0xb3   : > { %v7969_v7 = vcombine.low %v545_v19, %v555_v42  ;;  %v11482_v19 = vld [vmem:[%s11236_s27 + $0x58] sm:$0x7]  ;;  %v582_v34 = vor.u32 %v581_v59, %v578_v52  ;;  %v1350_v10 = vsel %vm11256_vm4, %v8060_v36, %v1349_v63  ;;  %v1351_v20 = vrot.slane %v1349_v63, 4 }
  0xb4   : > { %v564_v55 = vrot.slane %v563_v44, 4  ;;  %v574_v12 = vrot.slane %v572_v6, 4  ;;  %v8109_v22 = vrot.slane %v8101_v4, 11  ;;  %v2033_v44 = vrot.slane %v11482_v19, 7 }
  0xb5   : > { %9090 = vmatprep.mubr.bf16.mxu1 %v7969_v7  ;;  %v1353_v42 = vsel %vm11256_vm4, %v1351_v20, %v1352_v3  ;;  %v283_v52 = vsel %vm11256_vm4, %v281_v32, %v282_v14  ;;  %v286_v36 = vrot.slane %v11265_v40, 6  ;;  %v289_v40 = vrot.slane %v7928_v18, 6  ;;  %v7931_v20 = vld [vmem:[%s11236_s27 + $0x68] sm:$0x3]  ;;  %v8103_v18 = vld [vmem:[%s11236_s27 + $0x70] sm:$0x8] }
  0xb6   : > { %v573_v28 = vsel %vm11269_vm5, %v564_v55, %v572_v6  ;;  %v583_v7 = vsel %vm11269_vm5, %v574_v12, %v582_v34  ;;  %v8068_v51 = vcombine.low %v1350_v10, %v1353_v42  ;;  %v8102_v55 = vld [vmem:[%s11236_s27 + $0x60] sm:$0x8]  ;;  %v7979_v63 = vcombine.low %v280_v13, %v283_v52  ;;  %v7934_v42 = vld [vmem:[%s11236_s27 + $0x78] sm:$0x3] }
  0xb7   : > { %v7970_v59 = vcombine.low %v573_v28, %v583_v7  ;;  %v2031_v3 = vsel %vm11495_vm8, %v8109_v22, %v2030_v26  ;;  %v2034_v23 = vsel %vm11495_vm8, %v2032_v38, %v2033_v44  ;;  %v287_v5 = vsel %vm11256_vm4, %v7948_v50, %v286_v36  ;;  %v8079_v28 = vld [vmem:[%s11236_s27 + $0x78] sm:$0x7]  ;;  %v10416_v7 = vld [vmem:[#allocation5 + $0x88] sm:$0xff]  }
  0xb8   : > { %9187 = vmatmul.mubr.bf16.gmra.mrb[12].mxu0 %v8068_v51  ;;  %v8117_v6 = vcombine.low %v2031_v3, %v2034_v23  ;;  %v288_v11 = vrot.slane %v286_v36, 4  ;;  %v8110_v14 = vrot.slane %v8102_v55, 11  ;;  %v2037_v34 = vrot.slane %v11289_v57, 7  ;;  %v8080_v55 = vld [vmem:[%s11236_s27 + $0x88] sm:$0x7] }
  0xb9   : > { %9091 = vmatmul.mubr.bf16.gmra.mrb[12].mxu1 %v7970_v59  ;;  %v2040_v10 = vrot.slane %v11503_v47, 7  ;;  %v7949_v4 = vrot.slane %v11307_v25, 10  ;;  %v293_v26 = vrot.slane %v11312_v29, 6  ;;  %v296_v50 = vrot.slane %v7931_v20, 6 }
  0xba   : > { %9110 = vmatprep.mubr.bf16.mxu1 %v7979_v63  ;;  %9238 = vmatprep.mubr.bf16.mxu0 %v8117_v6  ;;  %v290_v35 = vsel %vm11256_vm4, %v288_v11, %v289_v40  ;;  %v2038_v57 = vsel %vm11495_vm8, %v8110_v14, %v2037_v34  ;;  %v2039_v13 = vrot.slane %v2037_v34, 4  ;;  %v8111_v32 = vrot.slane %v8103_v18, 11  ;;  %v10417_v63 = vld [vmem:[#allocation5 + $0x188] sm:$0xff]   ;;  %v8104_v6 = vld [vmem:[%s11236_s27 + $0x80] sm:$0x8] }
  0xbb   : > { %v7980_v12 = vcombine.low %v287_v5, %v290_v35  ;;  %v294_v25 = vsel %vm11256_vm4, %v7949_v4, %v293_v26  ;;  %v295_v22 = vrot.slane %v293_v26, 4  ;;  %v2044_v38 = vrot.slane %v11327_v45, 7  ;;  %v7937_v35 = vld [vmem:[%s11236_s27 + $0x88] sm:$0x3] }
  0xbc   : > { %v2047_v44 = vrot.slane %v8079_v28, 7  ;;  %v2041_v29 = vsel %vm11495_vm8, %v2039_v13, %v2040_v10  ;;  %v7950_v51 = vrot.slane %v11334_v60, 10  ;;  %v300_v52 = vrot.slane %v11337_v61, 6  ;;  %v10419_v10 = vld [vmem:[#allocation5 + $0x190] sm:$0xff]  }
  0xbd   : > { %v303_v36 = vrot.slane %v7934_v42, 6  ;;  %v8118_v59 = vcombine.low %v2038_v57, %v2041_v29  ;;  %v297_v3 = vsel %vm11256_vm4, %v295_v22, %v296_v50  ;;  %v2045_v23 = vsel %vm11495_vm8, %v8111_v32, %v2044_v38  ;;  %v8105_v57 = vld [vmem:[%s11236_s27 + $0x90] sm:$0x8]  ;;  %v7940_v42 = vld [vmem:[%s11236_s27 + $0x98] sm:$0x3] }
  0xbe   : > { %v2046_v45 = vrot.slane %v2044_v38, 4  ;;  %v7981_v5 = vcombine.low %v294_v25, %v297_v3  ;;  %v301_v11 = vsel %vm11256_vm4, %v7950_v51, %v300_v52  ;;  %v302_v60 = vrot.slane %v300_v52, 4  ;;  %v10418_v13 = vld [vmem:[#allocation5 + $0x90] sm:$0xff]   ;;  %v10421_v51 = vld [vmem:[#allocation5 + $0x198] sm:$0xff]  }
  0xbf   : > { %v8112_v40 = vrot.slane %v8104_v6, 11  ;;  %v2051_v14 = vrot.slane %v11349_v21, 7  ;;  %v2054_v34 = vrot.slane %v8080_v55, 7  ;;  %v7951_v26 = vrot.slane %v11361_v0, 10  ;;  %v8082_v55 = vld [vmem:[%s11236_s27 + $0xa8] sm:$0x7] }
  0xc0   : > { %9239 = vmatmul.mubr.bf16.vlgmr.msra.gmra.mrb[0].mxu0 %v8118_v59  ;;  %v2048_v61 = vsel %vm11495_vm8, %v2046_v45, %v2047_v44  ;;  %v304_v4 = vsel %vm11256_vm4, %v302_v60, %v303_v36  ;;  %v307_v50 = vrot.slane %v11364_v1, 6  ;;  %v8113_v32 = vrot.slane %v8105_v57, 11  ;;  %v10420_v45 = vld [vmem:[#allocation5 + $0x98] sm:$0xff]  }
  0xc1   : > { %9111 = vmatmul.mubr.bf16.vlgmr.msra.gmra.mrb[0].mxu1 %v7980_v12  ;;  %9255 = vmatpush3.bf16.msra.mxu0 %v11432_v2  ;;  %v8119_v20 = vcombine.low %v2045_v23, %v2048_v61  ;;  %v7982_v21 = vcombine.low %v301_v11, %v304_v4  ;;  %v2052_v28 = vsel %vm11495_vm8, %v8112_v40, %v2051_v14  ;;  %v2053_v18 = vrot.slane %v2051_v14, 4  ;;  %v8081_v2 = vld [vmem:[%s11236_s27 + $0x98] sm:$0x7]  ;;  %v10423_v61 = vld [vmem:[#allocation5 + $0x1a0] sm:$0xff]  }
  0xc2   : > { %9127 = vmatpush3.bf16.msra.mxu1 %v11439_v24  ;;  %9256 = vmatprep.subr.bf16.mxu0 %v10417_v63  ;;  %v310_v12 = vrot.slane %v7937_v35, 6  ;;  %v308_v0 = vsel %vm11256_vm4, %v7951_v26, %v307_v50  ;;  %v309_v1 = vrot.slane %v307_v50, 4  ;;  %v2058_v24 = vrot.slane %v11376_v17, 7  ;;  %v8083_v50 = vld [vmem:[%s11236_s27 + $0xb8] sm:$0x7] }
  0xc3   : > { %9128 = vmatprep.subr.bf16.mxu1 %v10416_v7  ;;  %9114 = vmatprep.mubr.bf16.mxu1 %v7981_v5  ;;  %v2055_v25 = vsel %vm11495_vm8, %v2053_v18, %v2054_v34  ;;  %v2061_v22 = vrot.slane %v8081_v2, 7  ;;  %v7952_v38 = vrot.slane %v11385_v33, 10  ;;  %v314_v44 = vrot.slane %v11388_v43, 6  ;;  %v7946_v2 = vld [vmem:[%s11236_s27 + $0xb8] sm:$0x3] }
  0xc4   : > { %9242 = vmatprep.mubr.bf16.mxu0 %v8119_v20  ;;  %v8120_v29 = vcombine.low %v2052_v28, %v2055_v25  ;;  %v311_v52 = vsel %vm11256_vm4, %v309_v1, %v310_v12  ;;  %v2059_v17 = vsel %vm11495_vm8, %v8113_v32, %v2058_v24  ;;  %v2060_v36 = vrot.slane %v2058_v24, 4  ;;  %v7943_v20 = vld [vmem:[%s11236_s27 + $0xa8] sm:$0x3]  ;;  %v8107_v28 = vld [vmem:[%s11236_s27 + $0xb0] sm:$0x8] }
  0xc5   : > { %9257 = vmatpush3.bf16.msra.mxu0 %v10417_v63  ;;  %v7983_v59 = vcombine.low %v308_v0, %v311_v52  ;;  %v11575_v3 = vsel %vm11256_vm4, %v7952_v38, %v314_v44  ;;  %v316_v33 = vrot.slane %v314_v44, 4  ;;  %v317_v23 = vrot.slane %v7940_v42, 6  ;;  %v8106_v63 = vld [vmem:[%s11236_s27 + $0xa0] sm:$0x8]  ;;  %v10425_v32 = vld [vmem:[#allocation5 + $0x1a8] sm:$0xff]  }
  0xc6   : > { %9129 = vmatpush3.bf16.msra.mxu1 %v10416_v7  ;;  %9258 = vmatprep.subr.bf16.mxu0 %v10419_v10  ;;  %v2062_v6 = vsel %vm11495_vm8, %v2060_v36, %v2061_v22  ;;  %v8114_v5 = vrot.slane %v8106_v63, 11  ;;  %v2065_v11 = vrot.slane %v11399_v62, 7  ;;  %v2068_v60 = vrot.slane %v8082_v55, 7  ;;  %v8084_v22 = vld [vmem:[%s11236_s27 + $0xc8] sm:$0x7] }
  0xc7   : > { %9130 = vmatprep.subr.bf16.mxu1 %v10418_v13  ;;  %v8121_v7 = vcombine.low %v2059_v17, %v2062_v6  ;;  %v318_v40 = vsel %vm11256_vm4, %v316_v33, %v317_v23  ;;  %v7953_v4 = vrot.slane %v11413_v56, 10  ;;  %v321_v35 = vrot.slane %v11416_v48, 6  ;;  %v8108_v44 = vld [vmem:[%s11236_s27 + $0xc0] sm:$0x8]  ;;  %v10694_v63 = vld [vmem:[%s11236_s27 + $0x44] sm:$0xf] }
  0xc8   : > { %9243 = vmatmul.mubr.bf16.gmra.mrb[4].mxu0 %v8120_v29  ;;  %v2066_v14 = vsel %vm11495_vm8, %v8114_v5, %v2065_v11  ;;  %v2067_v34 = vrot.slane %v2065_v11, 4  ;;  %v7984_v62 = vcombine.low %v11575_v3, %v318_v40  ;;  %v324_v26 = vrot.slane %v7943_v20, 6  ;;  %v7995_v23 = vld [vmem:[%s11236_s27 + $0x40] sm:$0x8]  ;;  %v10695_v6 = vld [vmem:[%s11236_s27 + $0x48] sm:$0x7] }
  0xc9   : > { %9115 = vmatmul.mubr.bf16.gmra.mrb[4].mxu1 %v7982_v21  ;;  %9259 = vmatpush3.bf16.msra.mxu0 %v10419_v10  ;;  %v10422_v10 = vld [vmem:[#allocation5 + $0xa0] sm:$0xff]   ;;  %v8115_v18 = vrot.slane %v8107_v28, 11  ;;  %v2072_v12 = vrot.slane %v11430_v16, 7  ;;  %v2075_v56 = vrot.slane %v8083_v50, 7  ;;  %v323_v0 = vrot.slane %v321_v35, 4  ;;  %v10426_v20 = vld [vmem:[#allocation5 + $0xb0] sm:$0xff]  }
  0xca   : > { %9131 = vmatpush3.bf16.msra.mxu1 %v10418_v13  ;;  %9260 = vmatprep.subr.bf16.mxu0 %v10421_v51  ;;  %v2069_v21 = vsel %vm11495_vm8, %v2067_v34, %v2068_v60  ;;  %v322_v13 = vsel %vm11256_vm4, %v7953_v4, %v321_v35  ;;  %v7954_v1 = vrot.slane %v11445_v9, 10  ;;  %v328_v25 = vrot.slane %v11448_v31, 6  ;;  %v10429_v28 = vld [vmem:[#allocation5 + $0x1b8] sm:$0xff]  }
  0xcb   : > { %9132 = vmatprep.subr.bf16.mxu1 %v10420_v45  ;;  %9118 = vmatprep.mubr.bf16.mxu1 %v7983_v59  ;;  %v8122_v57 = vcombine.low %v2066_v14, %v2069_v21  ;;  %v2073_v24 = vsel %vm11495_vm8, %v8115_v18, %v2072_v12  ;;  %v2074_v42 = vrot.slane %v2072_v12, 4  ;;  %v331_v16 = vrot.slane %v7946_v2, 6  ;;  %v11623_v14 = vld [vmem:[%s11236_s27 + $0x64] sm:$0xf]  ;;  %v7996_v18 = vld [vmem:[%s11236_s27 + $0x50] sm:$0x8] }
  0xcc   : > { %9246 = vmatprep.mubr.bf16.mxu0 %v8121_v7  ;;  %v325_v38 = vsel %vm11256_vm4, %v323_v0, %v324_v26  ;;  %v2079_v29 = vrot.slane %v11463_v15, 7  ;;  %v2082_v9 = vrot.slane %v8084_v22, 7  ;;  %v330_v36 = vrot.slane %v328_v25, 4  ;;  %v10427_v7 = vld [vmem:[#allocation5 + $0x1b0] sm:$0xff]   ;;  %v10428_v2 = vld [vmem:[#allocation5 + $0xb8] sm:$0xff]  }
  0xcd   : > { %9261 = vmatpush3.bf16.msra.mxu0 %v10421_v51  ;;  %v10424_v51 = vld [vmem:[#allocation5 + $0xa8] sm:$0xff]   ;;  %v7985_v52 = vcombine.low %v322_v13, %v325_v38  ;;  %v2076_v17 = vsel %vm11495_vm8, %v2074_v42, %v2075_v56  ;;  %v329_v59 = vsel %vm11256_vm4, %v7954_v1, %v328_v25  ;;  %v8116_v3 = vrot.slane %v8108_v44, 11  ;;  %v10696_v12 = vld [vmem:[%s11236_s27 + $0x54] sm:$0xf]  ;;  %v8140_v22 = vld [vmem:[%s11236_s27 + $0x78] sm:$0x3] }
  0xce   : > { %9133 = vmatpush3.bf16.msra.mxu1 %v10420_v45  ;;  %9262 = vmatprep.subr.bf16.mxu0 %v10423_v61  ;;  %v8123_v55 = vcombine.low %v2073_v24, %v2076_v17  ;;  %v2081_v33 = vrot.slane %v2079_v29, 4  ;;  %v332_v15 = vsel %vm11256_vm4, %v330_v36, %v331_v16  ;;  %v983_v45 = vrot.slane %v10694_v63, 7  ;;  %v11637_v24 = vld [vmem:[%s11236_s27 + $0x70] sm:$0xc]  ;;  %v11640_v16 = vld [vmem:[%s11236_s27 + $0x74] sm:$0xf] }
  0xcf   : > { %9134 = vmatprep.subr.bf16.mxu1 %v10422_v10  ;;  %v986_v5 = vrot.slane %v10695_v6, 7  ;;  %v2080_v11 = vsel %vm11495_vm8, %v8116_v3, %v2079_v29  ;;  %v8003_v40 = vrot.slane %v7995_v23, 11  ;;  %v7986_v34 = vcombine.low %v329_v59, %v332_v15  ;;  %v10431_v17 = vld [vmem:[#allocation5 + $0x1c0] sm:$0xff]   ;;  %v10698_v23 = vld [vmem:[%s11236_s27 + $0x68] sm:$0x7] }
  0xd0   : > { %9247 = vmatmul.mubr.bf16.gmra.mrb[8].mxu0 %v8122_v57  ;;  %v2083_v60 = vsel %vm11495_vm8, %v2081_v33, %v2082_v9  ;;  %v985_v4 = vrot.slane %v983_v45, 4  ;;  %v2347_v26 = vrot.slane %v11623_v14, 6  ;;  %v990_v56 = vrot.slane %v10696_v12, 7  ;;  %v7997_v59 = vld [vmem:[%s11236_s27 + $0x60] sm:$0x8] }
  0xd1   : > { %9119 = vmatmul.mubr.bf16.gmra.mrb[8].mxu1 %v7984_v62  ;;  %9263 = vmatpush3.bf16.msra.mxu0 %v10423_v61  ;;  %v11620_v61 = vld [vmem:[%s11236_s27 + $0x60] sm:$0xc]  ;;  %v8137_v62 = vld [vmem:[%s11236_s27 + $0x68] sm:$0x3]  ;;  %v8124_v50 = vcombine.low %v2080_v11, %v2083_v60  ;;  %v8004_v1 = vrot.slane %v7996_v18, 11  ;;  %v2354_v29 = vrot.slane %v11640_v16, 6 }
  0xd2   : > { %9135 = vmatpush3.bf16.msra.mxu1 %v10422_v10  ;;  %9264 = vmatprep.subr.bf16.mxu0 %v10425_v32  ;;  %v8159_v35 = vrot.slane %v11620_v61, 10  ;;  %v984_v10 = vsel %vm11495_vm8, %v8003_v40, %v983_v45  ;;  %v2350_v21 = vrot.slane %v8137_v62, 6  ;;  %v987_v57 = vsel %vm11495_vm8, %v985_v4, %v986_v5  ;;  %v10697_v3 = vld [vmem:[%s11236_s27 + $0x64] sm:$0xf]  ;;  %v8143_v60 = vld [vmem:[%s11236_s27 + $0x88] sm:$0x3] }
  0xd3   : > { %9136 = vmatprep.subr.bf16.mxu1 %v10424_v51  ;;  %9122 = vmatprep.mubr.bf16.mxu1 %v7985_v52  ;;  %v2349_v0 = vrot.slane %v2347_v26, 4  ;;  %v8011_v42 = vcombine.low %v984_v10, %v987_v57  ;;  %v992_v25 = vrot.slane %v990_v56, 4  ;;  %v11648_v44 = vsel %vm11495_vm8, %v8004_v1, %v990_v56  ;;  %v11665_v45 = vld [vmem:[%s11236_s27 + $0x84] sm:$0xf]  ;;  %v10432_v10 = vld [vmem:[#allocation5 + $0x108] sm:$0xff]  }
  0xd4   : > { %9250 = vmatprep.mubr.bf16.mxu0 %v8123_v55  ;;  %v2348_v13 = vsel %vm11256_vm4, %v8159_v35, %v2347_v26  ;;  %v2357_v9 = vrot.slane %v8140_v22, 6  ;;  %v2356_v55 = vrot.slane %v2354_v29, 4  ;;  %v997_v33 = vrot.slane %v10697_v3, 7  ;;  %v10430_v6 = vld [vmem:[#allocation5 + $0x100] sm:$0xff]   ;;  %v7998_v35 = vld [vmem:[%s11236_s27 + $0x70] sm:$0x8] }
  0xd5   : > { %9265 = vmatpush3.bf16.msra.mxu0 %v10425_v32  ;;  %v8160_v32 = vrot.slane %v11637_v24, 10  ;;  %v2351_v38 = vsel %vm11256_vm4, %v2349_v0, %v2350_v21  ;;  %v994_v52 = vsel %vm11495_vm8, %v992_v25, %v993_v8  ;;  %v8005_v15 = vrot.slane %v7997_v59, 11  ;;  %v11662_v8 = vld [vmem:[%s11236_s27 + $0x80] sm:$0xc]  ;;  %v10699_v26 = vld [vmem:[%s11236_s27 + $0x74] sm:$0xf] }
  0xd6   : > { %9137 = vmatpush3.bf16.msra.mxu1 %v10424_v51  ;;  %9266 = vmatprep.subr.bf16.mxu0 %v10427_v7  ;;  %v8167_v51 = vcombine.low %v2348_v13, %v2351_v38  ;;  %v8012_v46 = vcombine.low %v11648_v44, %v994_v52  ;;  %v1000_v63 = vrot.slane %v10698_v23, 7  ;;  %v2358_v5 = vsel %vm11256_vm4, %v2356_v55, %v2357_v9  ;;  %v11681_v57 = vld [vmem:[%s11236_s27 + $0x90] sm:$0xc]  ;;  %v10700_v1 = vld [vmem:[%s11236_s27 + $0x78] sm:$0x7] }
  0xd7   : > { %9138 = vmatprep.subr.bf16.mxu1 %v10426_v20  ;;  %v2355_v36 = vsel %vm11256_vm4, %v8160_v32, %v2354_v29  ;;  %v999_v11 = vrot.slane %v997_v33, 4  ;;  %v2361_v40 = vrot.slane %v11665_v45, 6  ;;  %v998_v4 = vsel %vm11495_vm8, %v8005_v15, %v997_v33  ;;  %v11685_v25 = vld [vmem:[%s11236_s27 + $0x94] sm:$0xf]  ;;  %v10701_v52 = vld [vmem:[%s11236_s27 + $0x84] sm:$0xf] }
  0xd8   : > { %9251 = vmatmul.mubr.bf16.gmra.mrb[12].mxu0 %v8124_v50  ;;  %v2364_v62 = vrot.slane %v8143_v60, 6  ;;  %v1004_v50 = vrot.slane %v10699_v26, 7  ;;  %v8006_v56 = vrot.slane %v7998_v35, 11  ;;  %v8162_v38 = vrot.slane %v11681_v57, 10  ;;  %v10434_v55 = vld [vmem:[#allocation5 + $0x110] sm:$0xff]   ;;  %v10436_v26 = vld [vmem:[#allocation5 + $0x118] sm:$0xff]  }
  0xd9   : > { %9123 = vmatmul.mubr.bf16.gmra.mrb[12].mxu1 %v7986_v34  ;;  %9267 = vmatpush3.bf16.msra.mxu0 %v10427_v7  ;;  %v8161_v7 = vrot.slane %v11662_v8, 10  ;;  %v8168_v34 = vcombine.low %v2355_v36, %v2358_v5  ;;  %v1001_v21 = vsel %vm11495_vm8, %v999_v11, %v1000_v63  ;;  %v2363_v12 = vrot.slane %v2361_v40, 4  ;;  %v10702_v33 = vld [vmem:[%s11236_s27 + $0x88] sm:$0x7]  ;;  %v7999_v23 = vld [vmem:[%s11236_s27 + $0x80] sm:$0x8] }
  0xda   : > { %9139 = vmatpush3.bf16.msra.mxu1 %v10426_v20  ;;  %9268 = vmatprep.subr.bf16.mxu0 %v10429_v28  ;;  %v10433_v20 = vld [vmem:[#allocation5 + $0x1c8] sm:$0xff]   ;;  %v8013_v13 = vcombine.low %v998_v4, %v1001_v21  ;;  %v1006_v0 = vrot.slane %v1004_v50, 4  ;;  %v1005_v32 = vsel %vm11495_vm8, %v8006_v56, %v1004_v50  ;;  %v1011_v36 = vrot.slane %v10701_v52, 7  ;;  %v11702_v5 = vld [vmem:[%s11236_s27 + $0xa0] sm:$0xc]  ;;  %v10437_v50 = vld [vmem:[#allocation5 + $0x1d8] sm:$0xff]  }
  0xdb   : > { %9140 = vmatprep.subr.bf16.mxu1 %v10428_v2  ;;  %9142 = vmatprep.mubr.bf16.mxu1 %v8011_v42  ;;  %v2362_v18 = vsel %vm11256_vm4, %v8161_v7, %v2361_v40  ;;  %v1007_v42 = vrot.slane %v10700_v1, 7  ;;  %v2365_v22 = vsel %vm11256_vm4, %v2363_v12, %v2364_v62  ;;  %v1014_v15 = vrot.slane %v10702_v33, 7  ;;  %v11708_v7 = vld [vmem:[%s11236_s27 + $0xa4] sm:$0xf]  ;;  %v8149_v40 = vld [vmem:[%s11236_s27 + $0xa8] sm:$0x3] }
  0xdc   : > { %9270 = vmatprep.mubr.bf16.mxu0 %v8167_v51  ;;  %v8169_v44 = vcombine.low %v2362_v18, %v2365_v22  ;;  %v10435_v51 = vld [vmem:[#allocation5 + $0x1d0] sm:$0xff]   ;;  %v1013_v63 = vrot.slane %v1011_v36, 4  ;;  %v1018_v11 = vrot.slane %v11388_v43, 7  ;;  %v8007_v60 = vrot.slane %v7999_v23, 11  ;;  %v10703_v56 = vld [vmem:[%s11236_s27 + $0x98] sm:$0x7] }
  0xdd   : > { %9269 = vmatpush3.bf16.msra.mxu0 %v10429_v28  ;;  %v8146_v28 = vld [vmem:[%s11236_s27 + $0x98] sm:$0x3]  ;;  %v1008_v29 = vsel %vm11495_vm8, %v1006_v0, %v1007_v42  ;;  %v2375_v43 = vrot.slane %v11708_v7, 6  ;;  %v2378_v62 = vrot.slane %v8149_v40, 6  ;;  %v8000_v35 = vld [vmem:[%s11236_s27 + $0x90] sm:$0x8]  ;;  %v1606_v33 = vor.u32 %v11322_v39, %v11309_v27 }
  0xde   : > { %9141 = vmatpush3.bf16.msra.mxu1 %v10428_v2  ;;  %9286 = vmatprep.subr.bf16.mxu0 %v10431_v17  ;;  %v2368_v2 = vrot.slane %v11685_v25, 6  ;;  %v2371_v9 = vrot.slane %v8146_v28, 6  ;;  %v1015_v4 = vsel %vm11495_vm8, %v1013_v63, %v1014_v15  ;;  %v1012_v21 = vsel %vm11495_vm8, %v8007_v60, %v1011_v36  ;;  %v11722_v42 = vld [vmem:[%s11236_s27 + $0xb0] sm:$0xc]  ;;  %v11725_v28 = vld [vmem:[%s11236_s27 + $0xb4] sm:$0xf] }
  0xdf   : > { %9190 = vmatprep.subr.bf16.mxu1 %v10430_v6  ;;  %v8008_v18 = vrot.slane %v8000_v35, 11  ;;  %v1020_v12 = vrot.slane %v1018_v11, 4  ;;  %v2377_v1 = vrot.slane %v2375_v43, 4  ;;  %v8015_v22 = vcombine.low %v1012_v21, %v1015_v4  ;;  %v8001_v23 = vld [vmem:[%s11236_s27 + $0xa0] sm:$0x8]  ;;  %v10441_v60 = vld [vmem:[#allocation5 + $0x1e8] sm:$0xff]  }
  0xe0   : > { %9271 = vmatmul.mubr.bf16.vlgmr.msra.gmra.mrb[0].mxu0 %v8168_v34  ;;  %v2369_v59 = vsel %vm11256_vm4, %v8162_v38, %v2368_v2  ;;  %v2370_v3 = vrot.slane %v2368_v2, 4  ;;  %v8164_v38 = vrot.slane %v11722_v42, 10  ;;  %v2382_v2 = vrot.slane %v11725_v28, 6  ;;  %v11744_v63 = vld [vmem:[%s11236_s27 + $0xc0] sm:$0xc] }
  0xe1   : > { %9143 = vmatmul.mubr.bf16.vlgmr.msra.gmra.mrb[0].mxu1 %v8012_v46  ;;  %9287 = vmatpush3.bf16.msra.mxu0 %v10431_v17  ;;  %v8014_v17 = vcombine.low %v1005_v32, %v1008_v29  ;;  %v8152_v32 = vld [vmem:[%s11236_s27 + $0xb8] sm:$0x3]  ;;  %v10439_v29 = vld [vmem:[#allocation5 + $0x1e0] sm:$0xff]   ;;  %v1019_v15 = vsel %vm11495_vm8, %v8008_v18, %v1018_v11  ;;  %v8165_v11 = vrot.slane %v11744_v63, 10  ;;  %v1032_v4 = vrot.slane %v11448_v31, 7 }
  0xe2   : > { %9191 = vmatpush3.bf16.msra.mxu1 %v10430_v6  ;;  %9288 = vmatprep.subr.bf16.mxu0 %v10433_v20  ;;  %v2372_v46 = vsel %vm11256_vm4, %v2370_v3, %v2371_v9  ;;  %v8163_v6 = vrot.slane %v11702_v5, 10  ;;  %v2383_v36 = vsel %vm11256_vm4, %v8164_v38, %v2382_v2  ;;  %v1028_v3 = vrot.slane %v11419_v58, 7  ;;  %v11751_v39 = vld [vmem:[%s11236_s27 + $0xc4] sm:$0xf]  ;;  %v11767_v31 = vld [vmem:[%s11236_s27 + $0xd4] sm:$0xf] }
  0xe3   : > { %9192 = vmatprep.subr.bf16.mxu1 %v10432_v10  ;;  %9146 = vmatprep.mubr.bf16.mxu1 %v8013_v13  ;;  %v8170_v34 = vcombine.low %v2369_v59, %v2372_v46  ;;  %v1021_v13 = vrot.slane %v10703_v56, 7  ;;  %v2384_v59 = vrot.slane %v2382_v2, 4  ;;  %v2389_v40 = vrot.slane %v11751_v39, 6 }
  0xe4   : > { %9274 = vmatprep.mubr.bf16.mxu0 %v8169_v44  ;;  %v2376_v0 = vsel %vm11256_vm4, %v8163_v6, %v2375_v43  ;;  %v2385_v44 = vrot.slane %v8152_v32, 6  ;;  %v1035_v18 = vrot.slane %v11453_v53, 7  ;;  %v8158_v53 = vld [vmem:[%s11236_s27 + $0xd8] sm:$0x3]  ;;  %v11776_v32 = vrot.slane %v1606_v33, 4 }
  0xe5   : > { %9289 = vmatpush3.bf16.msra.mxu0 %v10433_v20  ;;  %v1025_v20 = vrot.slane %v11416_v48, 7  ;;  %v10438_v48 = vld [vmem:[#allocation5 + $0x120] sm:$0xff]   ;;  %v2391_v56 = vrot.slane %v2389_v40, 4 }
  0xe6   : > { %9193 = vmatpush3.bf16.msra.mxu1 %v10432_v10  ;;  %9290 = vmatprep.subr.bf16.mxu0 %v10435_v51  ;;  %v2379_v10 = vsel %vm11256_vm4, %v2377_v1, %v2378_v62  ;;  %v2386_v58 = vsel %vm11256_vm4, %v2384_v59, %v2385_v44  ;;  %v10440_v62 = vld [vmem:[#allocation5 + $0x128] sm:$0xff]   ;;  %v10704_v59 = vld [vmem:[%s11236_s27 + $0x54] sm:$0xf] }
  0xe7   : > { %9194 = vmatprep.subr.bf16.mxu1 %v10434_v55  ;;  %v1027_v9 = vrot.slane %v1025_v20, 4  ;;  %v8171_v52 = vcombine.low %v2376_v0, %v2379_v10  ;;  %v8172_v46 = vcombine.low %v2383_v36, %v2386_v58  ;;  %v11764_v0 = vld [vmem:[%s11236_s27 + $0xd0] sm:$0xc]  ;;  %v1584_v33 = vshll.u32 %v10704_v59, 16  ;;  %v11790_v58 = vld [vmem:[%s11236_s27 + $0x68] sm:$0x7] }
  0xe8   : > { %9275 = vmatmul.mubr.bf16.gmra.mrb[4].mxu0 %v8170_v34  ;;  %v8002_v34 = vld [vmem:[%s11236_s27 + $0xb0] sm:$0x8] }
  0xe9   : > { %9147 = vmatmul.mubr.bf16.gmra.mrb[4].mxu1 %v8014_v17  ;;  %9291 = vmatpush3.bf16.msra.mxu0 %v10435_v51  ;;  %v1022_v51 = vsel %vm11495_vm8, %v1020_v12, %v1021_v13  ;;  %v8009_v17 = vrot.slane %v8001_v23, 11  ;;  %v1029_v27 = vsel %vm11495_vm8, %v1027_v9, %v1028_v3  ;;  %v8010_v21 = vrot.slane %v8002_v34, 11 }
  0xea   : > { %9195 = vmatpush3.bf16.msra.mxu1 %v10434_v55  ;;  %9292 = vmatprep.subr.bf16.mxu0 %v10437_v50  ;;  %v8155_v55 = vld [vmem:[%s11236_s27 + $0xc8] sm:$0x3]  ;;  %v8016_v43 = vcombine.low %v1019_v15, %v1022_v51  ;;  %v2390_v12 = vsel %vm11256_vm4, %v8165_v11, %v2389_v40  ;;  %v1034_v13 = vrot.slane %v1032_v4, 4  ;;  %v1581_v3 = vshrl.u32 %v10704_v59, 16  ;;  %v10442_v15 = vld [vmem:[#allocation5 + $0x130] sm:$0xff]  }
  0xeb   : > { %9196 = vmatprep.subr.bf16.mxu1 %v10436_v26  ;;  %9150 = vmatprep.mubr.bf16.mxu1 %v8015_v22  ;;  %v2392_v6 = vrot.slane %v8155_v55, 6  ;;  %v1026_v35 = vsel %vm11495_vm8, %v8009_v17, %v1025_v20  ;;  %v1033_v20 = vsel %vm11495_vm8, %v8010_v21, %v1032_v4  ;;  %v2396_v22 = vrot.slane %v11767_v31, 6  ;;  %v10444_v21 = vld [vmem:[#allocation5 + $0x138] sm:$0xff]  }
  0xec   : > { %9278 = vmatprep.mubr.bf16.mxu0 %v8171_v52  ;;  %v8017_v1 = vcombine.low %v1026_v35, %v1029_v27  ;;  %v10443_v52 = vld [vmem:[#allocation5 + $0x1f0] sm:$0xff]   ;;  %v1591_v51 = vshrl.u32 %v11482_v19, 16  ;;  %v1594_v23 = vshll.u32 %v11482_v19, 16  ;;  %v1583_v27 = vrot.slane %v1581_v3, 6  ;;  %v10445_v19 = vld [vmem:[#allocation5 + $0x1f8] sm:$0xff]  }
  0xed   : > { %9293 = vmatpush3.bf16.msra.mxu0 %v10437_v50  ;;  %v1578_v50 = vor.u32 %v11284_v54, %v11278_v49  ;;  %v2393_v38 = vsel %vm11256_vm4, %v2391_v56, %v2392_v6  ;;  %v1036_v49 = vsel %vm11495_vm8, %v1034_v13, %v1035_v18  ;;  %v2399_v54 = vrot.slane %v8158_v53, 6 }
  0xee   : > { %9197 = vmatpush3.bf16.msra.mxu1 %v10436_v26  ;;  %9294 = vmatprep.subr.bf16.mxu0 %v10439_v29  ;;  %v8166_v26 = vrot.slane %v11764_v0, 10  ;;  %v8173_v2 = vcombine.low %v2390_v12, %v2393_v38  ;;  %v8018_v10 = vcombine.low %v1033_v20, %v1036_v49  ;;  %v2398_v9 = vrot.slane %v2396_v22, 4  ;;  %v10705_v12 = vld [vmem:[%s11236_s27 + $0x64] sm:$0xf]  ;;  %v11804_v38 = vld [vmem:[%s11236_s27 + $0x78] sm:$0x7] }
  0xef   : > { %9198 = vmatprep.subr.bf16.mxu1 %v10438_v48  ;;  %v1579_v36 = vrot.slane %v1578_v50, 4  ;;  %v1586_v55 = vrot.slane %v1584_v33, 7  ;;  %v2622_v11 = vshll.u32 %v11620_v61, 16  ;;  %v1596_v40 = vrot.slane %v1594_v23, 7  ;;  %v11801_v20 = vld [vmem:[#allocation5 + $0x200] sm:$0xff]  }
  0xf0   : > { %9279 = vmatmul.mubr.bf16.gmra.mrb[8].mxu0 %v8172_v46  ;;  %v2397_v44 = vsel %vm11256_vm4, %v8166_v26, %v2396_v22  ;;  %v1593_v46 = vrot.slane %v1591_v51, 6  ;;  %v2628_v6 = vshrl.u32 %v11623_v14, 16  ;;  %v2638_v35 = vshrl.u32 %v11790_v58, 16 }
  0xf1   : > { %9151 = vmatmul.mubr.bf16.gmra.mrb[8].mxu1 %v8016_v43  ;;  %9295 = vmatpush3.bf16.msra.mxu0 %v10439_v29  ;;  %v2400_v29 = vsel %vm11256_vm4, %v2398_v9, %v2399_v54  ;;  %v1587_v34 = vor.u32 %v1586_v55, %v1583_v27  ;;  %v2624_v4 = vrot.slane %v2622_v11, 7  ;;  %v2631_v43 = vshll.u32 %v11623_v14, 16 }
  0xf2   : > { %9199 = vmatpush3.bf16.msra.mxu1 %v10438_v48  ;;  %9296 = vmatprep.subr.bf16.mxu0 %v10441_v60  ;;  %v2619_v48 = vshrl.u32 %v11620_v61, 16  ;;  %v8174_v17 = vcombine.low %v2397_v44, %v2400_v29  ;;  %v1597_v18 = vor.u32 %v1596_v40, %v1593_v46  ;;  %v2630_v61 = vrot.slane %v2628_v6, 6 }
  0xf3   : > { %9200 = vmatprep.subr.bf16.mxu1 %v10440_v62  ;;  %9154 = vmatprep.mubr.bf16.mxu1 %v8017_v1  ;;  %v1609_v56 = vshrl.u32 %v10705_v12, 16  ;;  %v1589_v13 = vrot.slane %v1587_v34, 4  ;;  %v2633_v1 = vrot.slane %v2631_v43, 7  ;;  %v2640_v14 = vrot.slane %v2638_v35, 6  ;;  %v10707_v35 = vld [vmem:[%s11236_s27 + $0x70] sm:$0xc] }
  0xf4   : > { %9282 = vmatprep.mubr.bf16.mxu0 %v8173_v2  ;;  %v2621_v30 = vrot.slane %v2619_v48, 6  ;;  %v1612_v22 = vshll.u32 %v10705_v12, 16  ;;  %v1619_v44 = vshrl.u32 %v11503_v47, 16  ;;  %v2650_v23 = vshll.u32 %v11637_v24, 16  ;;  %v10708_v12 = vld [vmem:[%s11236_s27 + $0x74] sm:$0xf] }
  0xf5   : > { %9297 = vmatpush3.bf16.msra.mxu0 %v10441_v60  ;;  %v2641_v60 = vshll.u32 %v11790_v58, 16  ;;  %v1611_v26 = vrot.slane %v1609_v56, 6  ;;  %v1598_v49 = vsel %vm11269_vm5, %v1589_v13, %v1597_v18  ;;  %v2634_v2 = vor.u32 %v2633_v1, %v2630_v61 }
  0xf6   : > { %9201 = vmatpush3.bf16.msra.mxu1 %v10440_v62  ;;  %9298 = vmatprep.subr.bf16.mxu0 %v10443_v52  ;;  %v1588_v62 = vsel %vm11269_vm5, %v1579_v36, %v1587_v34  ;;  %v2625_v50 = vor.u32 %v2624_v4, %v2621_v30  ;;  %v1621_v33 = vrot.slane %v1619_v44, 6  ;;  %v2656_v48 = vshrl.u32 %v11640_v16, 16  ;;  %v11823_v30 = vld [vmem:[#allocation5 + $0x40] sm:$0xff]  }
  0xf7   : > { %9202 = vmatprep.subr.bf16.mxu1 %v10442_v15  ;;  %v2643_v53 = vrot.slane %v2641_v60, 7  ;;  %v8085_v9 = vcombine.low %v1588_v62, %v1598_v49  ;;  %v2636_v3 = vrot.slane %v2634_v2, 4  ;;  %v2659_v27 = vshll.u32 %v11640_v16, 16 }
  0xf8   : > { %9283 = vmatmul.mubr.bf16.gmra.mrb[12].mxu0 %v8174_v17  ;;  %v2626_v54 = vrot.slane %v2625_v50, 4  ;;  %v2666_v55 = vshrl.u32 %v11804_v38, 16  ;;  %v2652_v6 = vrot.slane %v2650_v23, 7  ;;  %v2669_v43 = vshll.u32 %v11804_v38, 16  ;;  %v11843_v23 = vld [vmem:[%s11236_s27 + $0x88] sm:$0x7] }
  0xf9   : > { %9155 = vmatmul.mubr.bf16.gmra.mrb[12].mxu1 %v8018_v10  ;;  %9299 = vmatpush3.bf16.msra.mxu0 %v10443_v52  ;;  %v2644_v36 = vor.u32 %v2643_v53, %v2640_v14  ;;  %v1614_v10 = vrot.slane %v1612_v22, 7  ;;  %v1622_v52 = vshll.u32 %v11503_v47, 16  ;;  %v2661_v16 = vrot.slane %v2659_v27, 7  ;;  %v10709_v22 = vld [vmem:[%s11236_s27 + $0x78] sm:$0x7] }
  0xfa   : > { %9203 = vmatpush3.bf16.msra.mxu1 %v10442_v15  ;;  %9300 = vmatprep.subr.bf16.mxu0 %v10445_v19  ;;  %v2635_v59 = vsel %vm11269_vm5, %v2626_v54, %v2634_v2  ;;  %v2647_v15 = vshrl.u32 %v11637_v24, 16  ;;  %v2668_v34 = vrot.slane %v2666_v55, 6  ;;  %v1637_v56 = vshrl.u32 %v10708_v12, 16 }
  0xfb   : > { %9204 = vmatprep.subr.bf16.mxu1 %v10444_v21  ;;  %9206 = vmatprep.mubr.bf16.mxu1 %v8085_v9  ;;  %v1615_v29 = vor.u32 %v1614_v10, %v1611_v26  ;;  %v1624_v51 = vrot.slane %v1622_v52, 7  ;;  %v2645_v17 = vsel %vm11269_vm5, %v2636_v3, %v2644_v36  ;;  %v2671_v62 = vrot.slane %v2669_v43, 7  ;;  %v11835_v10 = vld [vmem:[#allocation5 + $0x48] sm:$0xff]  }
  0xfc   : > { %v2649_v47 = vrot.slane %v2647_v15, 6  ;;  %v8191_v11 = vcombine.low %v2635_v59, %v2645_v17  ;;  %v1640_v1 = vshll.u32 %v10708_v12, 16  ;;  %v1639_v26 = vrot.slane %v1637_v56, 6  ;;  %v10447_v17 = vld [vmem:[#allocation5 + $0x208] sm:$0xff]   ;;  %v10448_v12 = vld [vmem:[#allocation5 + $0x210] sm:$0xff]  }
  0xfd   : > { %9301 = vmatpush3.bf16.msra.mxu0 %v10445_v19  ;;  %v1616_v46 = vsel %vm11269_vm5, %v11776_v32, %v1615_v29  ;;  %v1617_v24 = vrot.slane %v1615_v29, 4  ;;  %v1625_v40 = vor.u32 %v1624_v51, %v1621_v33  ;;  %v2658_v19 = vrot.slane %v2656_v48, 6 }
  0xfe   : > { %9205 = vmatpush3.bf16.msra.mxu1 %v10444_v21  ;;  %9318 = vmatprep.subr.bf16.mxu0 %v11801_v20  ;;  %v1628_v32 = vshrl.u32 %v10707_v35, 16  ;;  %v1631_v21 = vshll.u32 %v10707_v35, 16  ;;  %v2653_v61 = vor.u32 %v2652_v6, %v2649_v47  ;;  %v1647_v49 = vshrl.u32 %v10709_v22, 16  ;;  %v10712_v35 = vld [vmem:[%s11236_s27 + $0x80] sm:$0xc] }
  0xff   : > { %9350 = vmatprep.subr.bf16.mxu1 %v11823_v30  ;;  %9302 = vmatprep.mubr.bf16.mxu0 %v8191_v11  ;;  %v1626_v4 = vsel %vm11269_vm5, %v1617_v24, %v1625_v40  ;;  %v2662_v60 = vor.u32 %v2661_v16, %v2658_v19  ;;  %v2672_v54 = vor.u32 %v2671_v62, %v2668_v34  ;;  %v1642_v44 = vrot.slane %v1640_v1, 7  ;;  %v11852_v34 = vld [vmem:[#allocation5 + $0x50] sm:$0xff]  }
 0x100   : > { %v8086_v18 = vcombine.low %v1616_v46, %v1626_v4  ;;  %v1630_v13 = vrot.slane %v1628_v32, 6  ;;  %v1633_v50 = vrot.slane %v1631_v21, 7  ;;  %v2654_v14 = vrot.slane %v2653_v61, 4 }
 0x101   : > { %v2664_v53 = vrot.slane %v2662_v60, 4  ;;  %v1650_v9 = vshll.u32 %v10709_v22, 16  ;;  %v1649_v52 = vrot.slane %v1647_v49, 6  ;;  %v2675_v59 = vshrl.u32 %v11662_v8, 16  ;;  %v11862_v49 = vld [vmem:[#allocation5 + $0x58] sm:$0xff]  }
 0x102   : > { %9207 = vmatmul.mubr.bf16.vlgmr.msra.gmra.mrb[16].mxu1 %v8086_v18  ;;  %v1634_v2 = vor.u32 %v1633_v50, %v1630_v13  ;;  %v2663_v36 = vsel %vm11269_vm5, %v2654_v14, %v2662_v60  ;;  %v2678_v3 = vshll.u32 %v11662_v8, 16  ;;  %v1643_v29 = vor.u32 %v1642_v44, %v1639_v26  ;;  %v10713_v50 = vld [vmem:[%s11236_s27 + $0x84] sm:$0xf] }
 0x103   : > { %9351 = vmatpush3.bf16.msra.mxu1 %v11823_v30  ;;  %v2673_v33 = vsel %vm11269_vm5, %v2664_v53, %v2672_v54  ;;  %v1652_v51 = vrot.slane %v1650_v9, 7  ;;  %v2677_v47 = vrot.slane %v2675_v59, 6  ;;  %v2684_v55 = vshrl.u32 %v11665_v45, 16  ;;  %v10714_v53 = vld [vmem:[%s11236_s27 + $0x88] sm:$0x7] }
 0x104   : > { %9352 = vmatprep.subr.bf16.mxu1 %v11835_v10  ;;  %v1635_v15 = vrot.slane %v1634_v2, 4  ;;  %v8192_v48 = vcombine.low %v2663_v36, %v2673_v33  ;;  %v2680_v27 = vrot.slane %v2678_v3, 7  ;;  %v1645_v11 = vrot.slane %v1643_v29, 4  ;;  %v10449_v36 = vld [vmem:[#allocation5 + $0x218] sm:$0xff]  }
 0x105   : > { %v1653_v46 = vor.u32 %v1652_v51, %v1649_v52  ;;  %v2687_v24 = vshll.u32 %v11665_v45, 16  ;;  %v2686_v6 = vrot.slane %v2684_v55, 6  ;;  %v2694_v19 = vshrl.u32 %v11843_v23, 16  ;;  %v11868_v33 = vld [vmem:[%s11236_s27 + $0x98] sm:$0x7] }
 0x106   : > { %v1644_v8 = vsel %vm11269_vm5, %v1635_v15, %v1643_v29  ;;  %9303 = vmatmul.mubr.bf16.vlgmr.msra.gmra.mrb[0].mxu0 %v8192_v48  ;;  %v2681_v40 = vor.u32 %v2680_v27, %v2677_v47  ;;  %v2697_v16 = vshll.u32 %v11843_v23, 16  ;;  %v1656_v45 = vshrl.u32 %v10712_v35, 16 }
 0x107   : > { %9353 = vmatpush3.bf16.msra.mxu1 %v11835_v10  ;;  %9319 = vmatpush3.bf16.msra.mxu0 %v11801_v20  ;;  %v1654_v4 = vsel %vm11269_vm5, %v1645_v11, %v1653_v46  ;;  %v2689_v43 = vrot.slane %v2687_v24, 7  ;;  %v1659_v32 = vshll.u32 %v10712_v35, 16  ;;  %v2696_v61 = vrot.slane %v2694_v19, 6  ;;  %v11876_v11 = vld [vmem:[#allocation5 + $0x60] sm:$0xff]  }
 0x108   : > { %9354 = vmatprep.subr.bf16.mxu1 %v11852_v34  ;;  %9320 = vmatprep.subr.bf16.mxu0 %v10447_v17  ;;  %v8087_v21 = vcombine.low %v1644_v8, %v1654_v4  ;;  %v2682_v18 = vrot.slane %v2681_v40, 4  ;;  %v2699_v60 = vrot.slane %v2697_v16, 7  ;;  %v1658_v62 = vrot.slane %v1656_v45, 6  ;;  %v10717_v4 = vld [vmem:[%s11236_s27 + $0x90] sm:$0xc]  ;;  %v10450_v35 = vld [vmem:[#allocation5 + $0x220] sm:$0xff]  }
 0x109   : > { %v2690_v56 = vor.u32 %v2689_v43, %v2686_v6  ;;  %v1661_v13 = vrot.slane %v1659_v32, 7  ;;  %v1665_v1 = vshrl.u32 %v10713_v50, 16  ;;  %v1668_v14 = vshll.u32 %v10713_v50, 16 }
 0x10a   : > { %9210 = vmatprep.mubr.bf16.mxu1 %v8087_v21  ;;  %v2700_v20 = vor.u32 %v2699_v60, %v2696_v61  ;;  %v1675_v26 = vshrl.u32 %v10714_v53, 16  ;;  %v1678_v22 = vshll.u32 %v10714_v53, 16  ;;  %v2703_v15 = vshrl.u32 %v11681_v57, 16 }
 0x10b   : > { %9355 = vmatpush3.bf16.msra.mxu1 %v11852_v34  ;;  %9321 = vmatpush3.bf16.msra.mxu0 %v10447_v17  ;;  %v2691_v54 = vsel %vm11269_vm5, %v2682_v18, %v2690_v56  ;;  %v2692_v2 = vrot.slane %v2690_v56, 4  ;;  %v1662_v44 = vor.u32 %v1661_v13, %v1658_v62  ;;  %v1667_v9 = vrot.slane %v1665_v1, 6  ;;  %v11889_v62 = vld [vmem:[#allocation5 + $0x68] sm:$0xff]  }
 0x10c   : > { %9356 = vmatprep.subr.bf16.mxu1 %v11862_v49  ;;  %v1670_v52 = vrot.slane %v1668_v14, 7  ;;  %v1677_v59 = vrot.slane %v1675_v26, 6  ;;  %v1680_v3 = vrot.slane %v1678_v22, 7  ;;  %9322 = vmatprep.subr.bf16.mxu0 %v10448_v12  ;;  %v2706_v48 = vshll.u32 %v11681_v57, 16  ;;  %v10720_v22 = vld [vmem:[%s11236_s27 + $0x98] sm:$0x7] }
 0x10d   : > { %v2701_v29 = vsel %vm11269_vm5, %v2692_v2, %v2700_v20  ;;  %v1663_v51 = vrot.slane %v1662_v44, 4  ;;  %v2712_v17 = vshrl.u32 %v11685_v25, 16  ;;  %v2705_v8 = vrot.slane %v2703_v15, 6  ;;  %v10451_v2 = vld [vmem:[#allocation5 + $0x228] sm:$0xff]  }
 0x10e   : > { %v8193_v47 = vcombine.low %v2691_v54, %v2701_v29  ;;  %v1671_v27 = vor.u32 %v1670_v52, %v1667_v9  ;;  %v1681_v55 = vor.u32 %v1680_v3, %v1677_v59  ;;  %v2708_v46 = vrot.slane %v2706_v48, 7  ;;  %v11896_v29 = vld [vmem:[%s11236_s27 + $0xa8] sm:$0x7] }
 0x10f   : > { %9357 = vmatpush3.bf16.msra.mxu1 %v11862_v49  ;;  %v2714_v24 = vrot.slane %v2712_v17, 6  ;;  %v2715_v40 = vshll.u32 %v11685_v25, 16  ;;  %v2722_v6 = vshrl.u32 %v11868_v33, 16  ;;  %9323 = vmatpush3.bf16.msra.mxu0 %v10448_v12  ;;  %v2725_v16 = vshll.u32 %v11868_v33, 16  ;;  %v10718_v12 = vld [vmem:[%s11236_s27 + $0x94] sm:$0xf] }
 0x110   : > { %9358 = vmatprep.subr.bf16.mxu1 %v11876_v11  ;;  %9306 = vmatprep.mubr.bf16.mxu0 %v8193_v47  ;;  %v1672_v57 = vsel %vm11269_vm5, %v1663_v51, %v1671_v27  ;;  %v1673_v19 = vrot.slane %v1671_v27, 4  ;;  %v1684_v43 = vshrl.u32 %v10717_v4, 16  ;;  %v2709_v45 = vor.u32 %v2708_v46, %v2705_v8 }
 0x111   : > { %9324 = vmatprep.subr.bf16.mxu0 %v10449_v36  ;;  %v2717_v32 = vrot.slane %v2715_v40, 7  ;;  %v2724_v21 = vrot.slane %v2722_v6, 6  ;;  %v1687_v18 = vshll.u32 %v10717_v4, 16  ;;  %v2727_v61 = vrot.slane %v2725_v16, 7 }
 0x112   : > { %v1682_v25 = vsel %vm11269_vm5, %v1673_v19, %v1681_v55  ;;  %v1686_v60 = vrot.slane %v1684_v43, 6  ;;  %v1693_v56 = vshrl.u32 %v10718_v12, 16  ;;  %v2710_v50 = vrot.slane %v2709_v45, 4  ;;  %v11904_v55 = vld [vmem:[#allocation5 + $0x70] sm:$0xff]  }
 0x113   : > { %9359 = vmatpush3.bf16.msra.mxu1 %v11876_v11  ;;  %v8088_v13 = vcombine.low %v1672_v57, %v1682_v25  ;;  %v2718_v1 = vor.u32 %v2717_v32, %v2714_v24  ;;  %9325 = vmatpush3.bf16.msra.mxu0 %v10449_v36  ;;  %v1689_v20 = vrot.slane %v1687_v18, 7  ;;  %v2728_v14 = vor.u32 %v2727_v61, %v2724_v21  ;;  %v10722_v18 = vld [vmem:[%s11236_s27 + $0xa0] sm:$0xc] }
 0x114   : > { %9360 = vmatprep.subr.bf16.mxu1 %v11889_v62  ;;  %v1695_v53 = vrot.slane %v1693_v56, 6  ;;  %v1696_v26 = vshll.u32 %v10718_v12, 16  ;;  %v1703_v54 = vshrl.u32 %v10720_v22, 16  ;;  %9326 = vmatprep.subr.bf16.mxu0 %v10450_v35  ;;  %v1706_v59 = vshll.u32 %v10720_v22, 16 }
 0x115   : > { %9211 = vmatmul.mubr.bf16.gmra.mrb[20].mxu1 %v8088_v13  ;;  %v2719_v44 = vsel %vm11269_vm5, %v2710_v50, %v2718_v1  ;;  %v2720_v9 = vrot.slane %v2718_v1, 4  ;;  %v1690_v52 = vor.u32 %v1689_v20, %v1686_v60  ;;  %v2731_v36 = vshrl.u32 %v11702_v5, 16  ;;  %v10724_v13 = vld [vmem:[%s11236_s27 + $0xa4] sm:$0xf]  ;;  %v10453_v1 = vld [vmem:[#allocation5 + $0x238] sm:$0xff]  }
 0x116   : > { %v1698_v3 = vrot.slane %v1696_v26, 7  ;;  %v1705_v15 = vrot.slane %v1703_v54, 6  ;;  %v2734_v51 = vshll.u32 %v11702_v5, 16  ;;  %v1708_v47 = vrot.slane %v1706_v59, 7  ;;  %v10452_v5 = vld [vmem:[#allocation5 + $0x230] sm:$0xff]  }
 0x117   : > { %9361 = vmatpush3.bf16.msra.mxu1 %v11889_v62  ;;  %v2729_v48 = vsel %vm11269_vm5, %v2720_v9, %v2728_v14  ;;  %v1691_v17 = vrot.slane %v1690_v52, 4  ;;  %v2740_v27 = vshrl.u32 %v11708_v7, 16  ;;  %9327 = vmatpush3.bf16.msra.mxu0 %v10450_v35  ;;  %v2733_v24 = vrot.slane %v2731_v36, 6 }
 0x118   : > { %9362 = vmatprep.subr.bf16.mxu1 %v11904_v55  ;;  %v8194_v8 = vcombine.low %v2719_v44, %v2729_v48  ;;  %v1699_v46 = vor.u32 %v1698_v3, %v1695_v53  ;;  %v2736_v40 = vrot.slane %v2734_v51, 7  ;;  %9328 = vmatprep.subr.bf16.mxu0 %v10451_v2  ;;  %v1709_v6 = vor.u32 %v1708_v47, %v1705_v15  ;;  %v10725_v44 = vld [vmem:[%s11236_s27 + $0xa8] sm:$0x7]  ;;  %v11925_v48 = vld [vmem:[%s11236_s27 + $0xb8] sm:$0x7] }
 0x119   : > { %v2742_v57 = vrot.slane %v2740_v27, 6  ;;  %v2743_v19 = vshll.u32 %v11708_v7, 16  ;;  %v2750_v16 = vshrl.u32 %v11896_v29, 16  ;;  %v2753_v45 = vshll.u32 %v11896_v29, 16  ;;  %v11914_v7 = vld [vmem:[#allocation5 + $0x78] sm:$0xff]   ;;  %v11929_v27 = vld [vmem:[#allocation5] sm:$0xff]  }
 0x11a   : > { %9307 = vmatmul.mubr.bf16.gmra.mrb[4].mxu0 %v8194_v8  ;;  %v1700_v4 = vsel %vm11269_vm5, %v1691_v17, %v1699_v46  ;;  %v1701_v43 = vrot.slane %v1699_v46, 4  ;;  %v2737_v35 = vor.u32 %v2736_v40, %v2733_v24  ;;  %v1712_v25 = vshrl.u32 %v10722_v18, 16 }
 0x11b   : > { %9363 = vmatpush3.bf16.msra.mxu1 %v11904_v55  ;;  %v2745_v32 = vrot.slane %v2743_v19, 7  ;;  %v2752_v21 = vrot.slane %v2750_v16, 6  ;;  %v1715_v61 = vshll.u32 %v10722_v18, 16  ;;  %9329 = vmatpush3.bf16.msra.mxu0 %v10451_v2  ;;  %v2755_v56 = vrot.slane %v2753_v45, 7 }
 0x11c   : > { %9364 = vmatprep.subr.bf16.mxu1 %v11914_v7  ;;  %v1710_v60 = vsel %vm11269_vm5, %v1701_v43, %v1709_v6  ;;  %v2738_v12 = vrot.slane %v2737_v35, 4  ;;  %v1721_v50 = vshrl.u32 %v10724_v13, 16  ;;  %9330 = vmatprep.subr.bf16.mxu0 %v10452_v5  ;;  %v1714_v53 = vrot.slane %v1712_v25, 6 }
 0x11d   : > { %v8089_v20 = vcombine.low %v1700_v4, %v1710_v60  ;;  %v2746_v14 = vor.u32 %v2745_v32, %v2742_v57  ;;  %v1717_v26 = vrot.slane %v1715_v61, 7  ;;  %v2756_v22 = vor.u32 %v2755_v56, %v2752_v21  ;;  %v10727_v61 = vld [vmem:[%s11236_s27 + $0xb0] sm:$0xc] }
 0x11e   : > { %v1723_v54 = vrot.slane %v1721_v50, 6  ;;  %v1724_v2 = vshll.u32 %v10724_v13, 16  ;;  %v1731_v9 = vshrl.u32 %v10725_v44, 16  ;;  %v1734_v15 = vshll.u32 %v10725_v44, 16  ;;  %v10728_v50 = vld [vmem:[%s11236_s27 + $0xb4] sm:$0xf] }
 0x11f   : > { %9365 = vmatpush3.bf16.msra.mxu1 %v11914_v7  ;;  %9214 = vmatprep.mubr.bf16.mxu1 %v8089_v20  ;;  %v2747_v52 = vsel %vm11269_vm5, %v2738_v12, %v2746_v14  ;;  %v2748_v59 = vrot.slane %v2746_v14, 4  ;;  %v1718_v3 = vor.u32 %v1717_v26, %v1714_v53  ;;  %v2759_v17 = vshrl.u32 %v11722_v42, 16  ;;  %v10729_v44 = vld [vmem:[%s11236_s27 + $0xb8] sm:$0x7] }
 0x120   : > { %9331 = vmatpush3.bf16.msra.mxu0 %v10452_v5  ;;  %v1726_v36 = vrot.slane %v1724_v2, 7  ;;  %v1733_v51 = vrot.slane %v1731_v9, 6  ;;  %v2762_v47 = vshll.u32 %v11722_v42, 16  ;;  %9382 = vmatprep.subr.bf16.mxu1 %v11929_v27  ;;  %v1736_v24 = vrot.slane %v1734_v15, 7 }
 0x121   : > { %9332 = vmatprep.subr.bf16.mxu0 %v10453_v1  ;;  %v2757_v8 = vsel %vm11269_vm5, %v2748_v59, %v2756_v22  ;;  %v1719_v46 = vrot.slane %v1718_v3, 4  ;;  %v2768_v40 = vshrl.u32 %v11725_v28, 16  ;;  %v2761_v57 = vrot.slane %v2759_v17, 6  ;;  %v11949_v17 = vld [vmem:[%s11236_s27 + $0xc8] sm:$0x7] }
 0x122   : > { %v8195_v5 = vcombine.low %v2747_v52, %v2757_v8  ;;  %v1727_v6 = vor.u32 %v1726_v36, %v1723_v54  ;;  %v2764_v19 = vrot.slane %v2762_v47, 7  ;;  %v1737_v16 = vor.u32 %v1736_v24, %v1733_v51 }
 0x123   : > { %v2770_v4 = vrot.slane %v2768_v40, 6  ;;  %v2771_v42 = vshll.u32 %v11725_v28, 16  ;;  %v2778_v43 = vshrl.u32 %v11925_v48, 16  ;;  %v2781_v21 = vshll.u32 %v11925_v48, 16 }
 0x124   : > { %9333 = vmatpush3.bf16.msra.mxu0 %v10453_v1  ;;  %9310 = vmatprep.mubr.bf16.mxu0 %v8195_v5  ;;  %v1728_v35 = vsel %vm11269_vm5, %v1719_v46, %v1727_v6  ;;  %v1729_v45 = vrot.slane %v1727_v6, 4  ;;  %v2765_v32 = vor.u32 %v2764_v19, %v2761_v57  ;;  %v1740_v60 = vshrl.u32 %v10727_v61, 16 }
 0x125   : > { %9606 = vmatprep.subr.bf16.mxu0 %v11823_v30  ;;  %v2773_v18 = vrot.slane %v2771_v42, 7  ;;  %v2780_v25 = vrot.slane %v2778_v43, 6  ;;  %v1743_v28 = vshll.u32 %v10727_v61, 16  ;;  %v2783_v13 = vrot.slane %v2781_v21, 7  ;;  %v10730_v61 = vld [vmem:[%s11236_s27 + $0xc0] sm:$0xc] }
 0x126   : > { %v1738_v12 = vsel %vm11269_vm5, %v1729_v45, %v1737_v16  ;;  %v2766_v56 = vrot.slane %v2765_v32, 4  ;;  %v1749_v1 = vshrl.u32 %v10728_v50, 16  ;;  %v1742_v53 = vrot.slane %v1740_v60, 6 }
 0x127   : > { %v8090_v20 = vcombine.low %v1728_v35, %v1738_v12  ;;  %v2774_v14 = vor.u32 %v2773_v18, %v2770_v4  ;;  %v1745_v26 = vrot.slane %v1743_v28, 7  ;;  %v2784_v22 = vor.u32 %v2783_v13, %v2780_v25  ;;  %v10731_v13 = vld [vmem:[%s11236_s27 + $0xc4] sm:$0xf] }
 0x128   : > { %v1751_v54 = vrot.slane %v1749_v1, 6  ;;  %v1752_v2 = vshll.u32 %v10728_v50, 16  ;;  %v1759_v9 = vshrl.u32 %v10729_v44, 16  ;;  %v1762_v15 = vshll.u32 %v10729_v44, 16 }
 0x129   : > { %9215 = vmatmul.mubr.bf16.gmra.mrb[24].mxu1 %v8090_v20  ;;  %v2775_v52 = vsel %vm11269_vm5, %v2766_v56, %v2774_v14  ;;  %v2776_v59 = vrot.slane %v2774_v14, 4  ;;  %v1746_v3 = vor.u32 %v1745_v26, %v1742_v53  ;;  %v2787_v47 = vshrl.u32 %v11744_v63, 16 }
 0x12a   : > { %v1754_v36 = vrot.slane %v1752_v2, 7  ;;  %v1761_v51 = vrot.slane %v1759_v9, 6  ;;  %v2790_v8 = vshll.u32 %v11744_v63, 16  ;;  %v1764_v40 = vrot.slane %v1762_v15, 7  ;;  %v10732_v2 = vld [vmem:[%s11236_s27 + $0xc8] sm:$0x7] }
 0x12b   : > { %v2785_v46 = vsel %vm11269_vm5, %v2776_v59, %v2784_v22  ;;  %v1747_v24 = vrot.slane %v1746_v3, 4  ;;  %v2796_v5 = vshrl.u32 %v11751_v39, 16  ;;  %v2789_v19 = vrot.slane %v2787_v47, 6 }
 0x12c   : > { %v8196_v6 = vcombine.low %v2775_v52, %v2785_v46  ;;  %v1755_v57 = vor.u32 %v1754_v36, %v1751_v54  ;;  %v2792_v16 = vrot.slane %v2790_v8, 7  ;;  %v1765_v4 = vor.u32 %v1764_v40, %v1761_v51  ;;  %v11969_v51 = vld [vmem:[%s11236_s27 + $0xd8] sm:$0x7] }
 0x12d   : > { %v2798_v42 = vrot.slane %v2796_v5, 6  ;;  %v2799_v43 = vshll.u32 %v11751_v39, 16  ;;  %v2806_v35 = vshrl.u32 %v11949_v17, 16  ;;  %v2809_v21 = vshll.u32 %v11949_v17, 16 }
 0x12e   : > { %9311 = vmatmul.mubr.bf16.gmra.mrb[8].mxu0 %v8196_v6  ;;  %v1756_v63 = vsel %vm11269_vm5, %v1747_v24, %v1755_v57  ;;  %v1757_v45 = vrot.slane %v1755_v57, 4  ;;  %v2793_v32 = vor.u32 %v2792_v16, %v2789_v19  ;;  %v1768_v60 = vshrl.u32 %v10730_v61, 16 }
 0x12f   : > { %v2801_v18 = vrot.slane %v2799_v43, 7  ;;  %v2808_v25 = vrot.slane %v2806_v35, 6  ;;  %v1771_v28 = vshll.u32 %v10730_v61, 16  ;;  %v2811_v56 = vrot.slane %v2809_v21, 7 }
 0x130   : > { %v1766_v12 = vsel %vm11269_vm5, %v1757_v45, %v1765_v4  ;;  %v2794_v39 = vrot.slane %v2793_v32, 4  ;;  %v1777_v50 = vshrl.u32 %v10731_v13, 16  ;;  %v1770_v14 = vrot.slane %v1768_v60, 6  ;;  %v8207_v4 = vld [vmem:[%s11236_s27 + $0x60] sm:$0x8] }
 0x131   : > { %v8091_v1 = vcombine.low %v1756_v63, %v1766_v12  ;;  %v2802_v20 = vor.u32 %v2801_v18, %v2798_v42  ;;  %v1773_v53 = vrot.slane %v1771_v28, 7  ;;  %v2812_v26 = vor.u32 %v2811_v56, %v2808_v25  ;;  %v11983_v18 = vld [vmem:[%s11236_s27 + $0x24] sm:$0xf]  ;;  %v8274_v25 = vld [vmem:[%s11236_s27 + $0x20] sm:$0xc] }
 0x132   : > { %v1779_v22 = vrot.slane %v1777_v50, 6  ;;  %v1780_v54 = vshll.u32 %v10731_v13, 16  ;;  %v1787_v44 = vshrl.u32 %v10732_v2, 16  ;;  %v1790_v3 = vshll.u32 %v10732_v2, 16  ;;  %v10733_v12 = vld [vmem:[%s11236_s27 + $0x64] sm:$0xf] }
 0x133   : > { %9218 = vmatprep.mubr.bf16.mxu1 %v8091_v1  ;;  %v2803_v9 = vsel %vm11269_vm5, %v2794_v39, %v2802_v20  ;;  %v2804_v52 = vrot.slane %v2802_v20, 4  ;;  %v1774_v59 = vor.u32 %v1773_v53, %v1770_v14  ;;  %v2815_v47 = vshrl.u32 %v11764_v0, 16 }
 0x134   : > { %v1782_v15 = vrot.slane %v1780_v54, 7  ;;  %v1789_v36 = vrot.slane %v1787_v44, 6  ;;  %v2818_v8 = vshll.u32 %v11764_v0, 16  ;;  %v1792_v40 = vrot.slane %v1790_v3, 7 }
 0x135   : > { %v2813_v46 = vsel %vm11269_vm5, %v2804_v52, %v2812_v26  ;;  %v1775_v24 = vrot.slane %v1774_v59, 4  ;;  %v2824_v5 = vshrl.u32 %v11767_v31, 16  ;;  %v2817_v19 = vrot.slane %v2815_v47, 6  ;;  %v8275_v26 = vld [vmem:[%s11236_s27 + $0x28] sm:$0x7] }
 0x136   : > { %v8197_v6 = vcombine.low %v2803_v9, %v2813_v46  ;;  %v1783_v57 = vor.u32 %v1782_v15, %v1779_v22  ;;  %v2820_v16 = vrot.slane %v2818_v8, 7  ;;  %v1793_v42 = vor.u32 %v1792_v40, %v1789_v36  ;;  %v8208_v9 = vld [vmem:[%s11236_s27 + $0x70] sm:$0x8] }
 0x137   : > { %v2826_v43 = vrot.slane %v2824_v5, 6  ;;  %v2827_v35 = vshll.u32 %v11767_v31, 16  ;;  %v2834_v0 = vshrl.u32 %v11969_v51, 16  ;;  %v2837_v21 = vshll.u32 %v11969_v51, 16  ;;  %v8276_v15 = vld [vmem:[%s11236_s27 + $0x30] sm:$0xc] }
 0x138   : > { %9314 = vmatprep.mubr.bf16.mxu0 %v8197_v6  ;;  %v1784_v63 = vsel %vm11269_vm5, %v1775_v24, %v1783_v57  ;;  %v1785_v45 = vrot.slane %v1783_v57, 4  ;;  %v2821_v32 = vor.u32 %v2820_v16, %v2817_v19  ;;  %v8215_v28 = vrot.slane %v8207_v4, 11  ;;  %v12002_v24 = vld [vmem:[%s11236_s27 + $0x34] sm:$0xf] }
 0x139   : > { %v2829_v61 = vrot.slane %v2827_v35, 7  ;;  %v2836_v60 = vrot.slane %v2834_v0, 6  ;;  %v3077_v31 = vrot.slane %v10733_v12, 7  ;;  %v2839_v13 = vrot.slane %v2837_v21, 7  ;;  %v8277_v12 = vld [vmem:[%s11236_s27 + $0x38] sm:$0x7] }
 0x13a   : > { %v1794_v39 = vsel %vm11269_vm5, %v1785_v45, %v1793_v42  ;;  %v2822_v56 = vrot.slane %v2821_v32, 4  ;;  %v3080_v50 = vrot.slane %v11790_v58, 7  ;;  %v3602_v54 = vshrl.u32 %v8274_v25, 16  ;;  %v10734_v42 = vld [vmem:[%s11236_s27 + $0x74] sm:$0xf] }
 0x13b   : > { %v8092_v1 = vcombine.low %v1784_v63, %v1794_v39  ;;  %v2830_v20 = vor.u32 %v2829_v61, %v2826_v43  ;;  %v3078_v14 = vsel %vm11495_vm8, %v8215_v28, %v3077_v31  ;;  %v3079_v53 = vrot.slane %v3077_v31, 4 }
 0x13c   : > { %v2840_v22 = vor.u32 %v2839_v13, %v2836_v60  ;;  %v3605_v2 = vshll.u32 %v8274_v25, 16  ;;  %v3611_v44 = vshrl.u32 %v11983_v18, 16  ;;  %v3614_v3 = vshll.u32 %v11983_v18, 16 }
 0x13d   : > { %9219 = vmatmul.mubr.bf16.gmra.mrb[28].mxu1 %v8092_v1  ;;  %v2831_v52 = vsel %vm11269_vm5, %v2822_v56, %v2830_v20  ;;  %v2832_v58 = vrot.slane %v2830_v20, 4  ;;  %v3081_v59 = vsel %vm11495_vm8, %v3079_v53, %v3080_v50  ;;  %v3604_v47 = vrot.slane %v3602_v54, 6  ;;  %v8209_v1 = vld [vmem:[%s11236_s27 + $0x80] sm:$0x8]  ;;  %v12022_v54 = vld [vmem:[%s11236_s27 + $0x44] sm:$0xf] }
 0x13e   : > { %v8223_v36 = vcombine.low %v3078_v14, %v3081_v59  ;;  %v3607_v8 = vrot.slane %v3605_v2, 7  ;;  %v3613_v46 = vrot.slane %v3611_v44, 6  ;;  %v3616_v5 = vrot.slane %v3614_v3, 7  ;;  %v8278_v20 = vld [vmem:[%s11236_s27 + $0x40] sm:$0xc] }
 0x13f   : > { %v2841_v40 = vsel %vm11269_vm5, %v2832_v58, %v2840_v22  ;;  %v3621_v6 = vshrl.u32 %v8275_v26, 16  ;;  %v3624_v57 = vshll.u32 %v8275_v26, 16  ;;  %v8216_v4 = vrot.slane %v8208_v9, 11  ;;  %v10735_v3 = vld [vmem:[%s11236_s27 + $0x84] sm:$0xf] }
 0x140   : > { %v8198_v19 = vcombine.low %v2831_v52, %v2841_v40  ;;  %v3608_v16 = vor.u32 %v3607_v8, %v3604_v47  ;;  %v3084_v43 = vrot.slane %v10734_v42, 7  ;;  %v3617_v35 = vor.u32 %v3616_v5, %v3613_v46  ;;  %v8279_v47 = vld [vmem:[%s11236_s27 + $0x48] sm:$0x7] }
 0x141   : > { %v3623_v0 = vrot.slane %v3621_v6, 6  ;;  %v3626_v63 = vrot.slane %v3624_v57, 7  ;;  %v3087_v45 = vrot.slane %v11804_v38, 7  ;;  %v3630_v61 = vshrl.u32 %v8276_v15, 16 }
 0x142   : > { %9315 = vmatmul.mubr.bf16.gmra.mrb[12].mxu0 %v8198_v19  ;;  %v3609_v32 = vrot.slane %v3608_v16, 4  ;;  %v3085_v21 = vsel %vm11495_vm8, %v8216_v4, %v3084_v43  ;;  %v3086_v25 = vrot.slane %v3084_v43, 4  ;;  %v3619_v60 = vrot.slane %v3617_v35, 4 }
 0x143   : > { %9334 = vmatprep.mubr.bf16.mxu0 %v8223_v36  ;;  %v3627_v28 = vor.u32 %v3626_v63, %v3623_v0  ;;  %v3633_v31 = vshll.u32 %v8276_v15, 16  ;;  %v3639_v39 = vshrl.u32 %v12002_v24, 16  ;;  %v3632_v13 = vrot.slane %v3630_v61, 6 }
 0x144   : > { %v3618_v38 = vsel %vm11269_vm5, %v3609_v32, %v3617_v35  ;;  %v3088_v56 = vsel %vm11495_vm8, %v3086_v25, %v3087_v45  ;;  %v3642_v50 = vshll.u32 %v12002_v24, 16  ;;  %v3649_v9 = vshrl.u32 %v8277_v12, 16  ;;  %v8210_v32 = vld [vmem:[%s11236_s27 + $0x90] sm:$0x8] }
 0x145   : > { %v3628_v14 = vsel %vm11269_vm5, %v3619_v60, %v3627_v28  ;;  %v8224_v53 = vcombine.low %v3085_v21, %v3088_v56  ;;  %v3635_v26 = vrot.slane %v3633_v31, 7  ;;  %v3641_v22 = vrot.slane %v3639_v39, 6  ;;  %v8280_v28 = vld [vmem:[%s11236_s27 + $0x50] sm:$0xc] }
 0x146   : > { %v8290_v2 = vcombine.low %v3618_v38, %v3628_v14  ;;  %v3644_v44 = vrot.slane %v3642_v50, 7  ;;  %v3652_v52 = vshll.u32 %v8277_v12, 16  ;;  %v8217_v59 = vrot.slane %v8209_v1, 11  ;;  %v12042_v38 = vld [vmem:[%s11236_s27 + $0x54] sm:$0xf] }
 0x147   : > { %v3636_v58 = vor.u32 %v3635_v26, %v3632_v13  ;;  %v3091_v15 = vrot.slane %v10735_v3, 7  ;;  %v3094_v36 = vrot.slane %v11843_v23, 7  ;;  %v3651_v46 = vrot.slane %v3649_v9, 6  ;;  %v10736_v50 = vld [vmem:[%s11236_s27 + $0x94] sm:$0xf] }
 0x148   : > { %9366 = vmatprep.mubr.bf16.mxu1 %v8290_v2  ;;  %v3645_v8 = vor.u32 %v3644_v44, %v3641_v22  ;;  %v3654_v40 = vrot.slane %v3652_v52, 7  ;;  %v3658_v5 = vshrl.u32 %v8278_v20, 16  ;;  %v3661_v16 = vshll.u32 %v8278_v20, 16  ;;  %v8281_v9 = vld [vmem:[%s11236_s27 + $0x58] sm:$0x7] }
 0x149   : > { %v3637_v6 = vrot.slane %v3636_v58, 4  ;;  %v3092_v57 = vsel %vm11495_vm8, %v8217_v59, %v3091_v15  ;;  %v3093_v19 = vrot.slane %v3091_v15, 4  ;;  %v3667_v23 = vshrl.u32 %v12022_v54, 16 }
 0x14a   : > { %9335 = vmatmul.mubr.bf16.vlgmr.msra.gmra.mrb[0].mxu0 %v8224_v53  ;;  %v3647_v4 = vrot.slane %v3645_v8, 4  ;;  %v3655_v42 = vor.u32 %v3654_v40, %v3651_v46  ;;  %v3660_v43 = vrot.slane %v3658_v5, 6  ;;  %v3663_v63 = vrot.slane %v3661_v16, 7  ;;  %v8282_v16 = vld [vmem:[%s11236_s27 + $0x60] sm:$0xc] }
 0x14b   : > { %v3646_v35 = vsel %vm11269_vm5, %v3637_v6, %v3645_v8  ;;  %9607 = vmatpush3.bf16.msra.mxu0 %v11823_v30  ;;  %v3095_v0 = vsel %vm11495_vm8, %v3093_v19, %v3094_v36  ;;  %v3670_v45 = vshll.u32 %v12022_v54, 16  ;;  %v3669_v61 = vrot.slane %v3667_v23, 6  ;;  %v8211_v36 = vld [vmem:[%s11236_s27 + $0xa0] sm:$0x8] }
 0x14c   : > { %v3656_v21 = vsel %vm11269_vm5, %v3647_v4, %v3655_v42  ;;  %9608 = vmatprep.subr.bf16.mxu0 %v11835_v10  ;;  %v8225_v25 = vcombine.low %v3092_v57, %v3095_v0  ;;  %v3677_v60 = vshrl.u32 %v8279_v47, 16  ;;  %v3664_v31 = vor.u32 %v3663_v63, %v3660_v43 }
 0x14d   : > { %v8291_v12 = vcombine.low %v3646_v35, %v3656_v21  ;;  %v3672_v30 = vrot.slane %v3670_v45, 7  ;;  %v3680_v39 = vshll.u32 %v8279_v47, 16  ;;  %v8218_v13 = vrot.slane %v8210_v32, 11  ;;  %v12069_v35 = vld [vmem:[%s11236_s27 + $0x64] sm:$0xf]  ;;  %v12071_v45 = vld [vmem:[#allocation5 + $0x10] sm:$0xff]  }
 0x14e   : > { %9338 = vmatprep.mubr.bf16.mxu0 %v8225_v25  ;;  %v3679_v56 = vrot.slane %v3677_v60, 6  ;;  %v3098_v1 = vrot.slane %v10736_v50, 7  ;;  %v3101_v20 = vrot.slane %v11868_v33, 7  ;;  %v3665_v14 = vrot.slane %v3664_v31, 4  ;;  %v12053_v33 = vld [vmem:[#allocation5 + $0x8] sm:$0xff]  }
 0x14f   : > { %9367 = vmatmul.mubr.bf16.vlgmr.msra.gmra.mrb[32].mxu1 %v8291_v12  ;;  %9609 = vmatpush3.bf16.msra.mxu0 %v11835_v10  ;;  %v3673_v53 = vor.u32 %v3672_v30, %v3669_v61  ;;  %v3682_v26 = vrot.slane %v3680_v39, 7  ;;  %v3686_v22 = vshrl.u32 %v8280_v28, 16  ;;  %v3689_v52 = vshll.u32 %v8280_v28, 16  ;;  %v8283_v60 = vld [vmem:[%s11236_s27 + $0x68] sm:$0x7] }
 0x150   : > { %9383 = vmatpush3.bf16.msra.mxu1 %v11929_v27  ;;  %v3099_v2 = vsel %vm11495_vm8, %v8218_v13, %v3098_v1  ;;  %v3100_v44 = vrot.slane %v3098_v1, 4  ;;  %v3695_v58 = vshrl.u32 %v12042_v38, 16  ;;  %9610 = vmatprep.subr.bf16.mxu0 %v11852_v34  ;;  %v3698_v40 = vshll.u32 %v12042_v38, 16 }
 0x151   : > { %9384 = vmatprep.subr.bf16.mxu1 %v12053_v33  ;;  %v3674_v10 = vsel %vm11269_vm5, %v3665_v14, %v3673_v53  ;;  %v3675_v59 = vrot.slane %v3673_v53, 4  ;;  %v3683_v3 = vor.u32 %v3682_v26, %v3679_v56  ;;  %v3688_v15 = vrot.slane %v3686_v22, 6 }
 0x152   : > { %v3102_v47 = vsel %vm11495_vm8, %v3100_v44, %v3101_v20  ;;  %v3691_v8 = vrot.slane %v3689_v52, 7  ;;  %v3697_v46 = vrot.slane %v3695_v58, 6  ;;  %v3705_v57 = vshrl.u32 %v8281_v9, 16  ;;  %v8212_v20 = vld [vmem:[%s11236_s27 + $0xb0] sm:$0x8] }
 0x153   : > { %v3684_v5 = vsel %vm11269_vm5, %v3675_v59, %v3683_v3  ;;  %v8226_v6 = vcombine.low %v3099_v2, %v3102_v47  ;;  %v3708_v19 = vshll.u32 %v8281_v9, 16  ;;  %9611 = vmatpush3.bf16.msra.mxu0 %v11852_v34  ;;  %v3700_v43 = vrot.slane %v3698_v40, 7  ;;  %v10739_v34 = vld [vmem:[%s11236_s27 + $0xa4] sm:$0xf]  ;;  %v12095_v58 = vld [vmem:[%s11236_s27 + $0x74] sm:$0xf] }
 0x154   : > { %9385 = vmatpush3.bf16.msra.mxu1 %v12053_v33  ;;  %v8292_v4 = vcombine.low %v3674_v10, %v3684_v5  ;;  %v3692_v42 = vor.u32 %v3691_v8, %v3688_v15  ;;  %9612 = vmatprep.subr.bf16.mxu0 %v11862_v49  ;;  %v8219_v23 = vrot.slane %v8211_v36, 11  ;;  %v3707_v0 = vrot.slane %v3705_v57, 6  ;;  %v8284_v10 = vld [vmem:[%s11236_s27 + $0x70] sm:$0xc]  ;;  %v8285_v57 = vld [vmem:[%s11236_s27 + $0x78] sm:$0x7] }
 0x155   : > { %9339 = vmatmul.mubr.bf16.gmra.mrb[4].mxu0 %v8226_v6  ;;  %v3710_v63 = vrot.slane %v3708_v19, 7  ;;  %9386 = vmatprep.subr.bf16.mxu1 %v12071_v45  ;;  %v3105_v32 = vrot.slane %v10739_v34, 7  ;;  %v3108_v21 = vrot.slane %v11896_v29, 7  ;;  %v3701_v61 = vor.u32 %v3700_v43, %v3697_v46  ;;  %v10741_v46 = vld [vmem:[%s11236_s27 + $0xb4] sm:$0xf] }
 0x156   : > { %9370 = vmatprep.mubr.bf16.mxu1 %v8292_v4  ;;  %v3693_v25 = vrot.slane %v3692_v42, 4  ;;  %v3714_v28 = vshrl.u32 %v8282_v16, 16  ;;  %v3717_v12 = vshll.u32 %v8282_v16, 16  ;;  %v3723_v56 = vshrl.u32 %v12069_v35, 16  ;;  %v12104_v42 = vld [vmem:[#allocation5 + $0x20] sm:$0xff]  }
 0x157   : > { %v3711_v31 = vor.u32 %v3710_v63, %v3707_v0  ;;  %9613 = vmatpush3.bf16.msra.mxu0 %v11862_v49  ;;  %v3106_v30 = vsel %vm11495_vm8, %v8219_v23, %v3105_v32  ;;  %v3107_v39 = vrot.slane %v3105_v32, 4  ;;  %v3703_v29 = vrot.slane %v3701_v61, 4  ;;  %v12086_v49 = vld [vmem:[#allocation5 + $0x18] sm:$0xff]  }
 0x158   : > { %v3702_v13 = vsel %vm11269_vm5, %v3693_v25, %v3701_v61  ;;  %9387 = vmatpush3.bf16.msra.mxu1 %v12071_v45  ;;  %v3716_v50 = vrot.slane %v3714_v28, 6  ;;  %v3719_v1 = vrot.slane %v3717_v12, 7  ;;  %9614 = vmatprep.subr.bf16.mxu0 %v11876_v11  ;;  %v3725_v53 = vrot.slane %v3723_v56, 6  ;;  %v12121_v56 = vld [vmem:[#allocation5 + $0x28] sm:$0xff]  }
 0x159   : > { %9388 = vmatprep.subr.bf16.mxu1 %v12086_v49  ;;  %v3109_v14 = vsel %vm11495_vm8, %v3107_v39, %v3108_v21  ;;  %v3726_v26 = vshll.u32 %v12069_v35, 16  ;;  %v3733_v22 = vshrl.u32 %v8283_v60, 16  ;;  %v3712_v2 = vsel %vm11269_vm5, %v3703_v29, %v3711_v31  ;;  %v8213_v21 = vld [vmem:[%s11236_s27 + $0xc0] sm:$0x8] }
 0x15a   : > { %v8227_v44 = vcombine.low %v3106_v30, %v3109_v14  ;;  %v3720_v9 = vor.u32 %v3719_v1, %v3716_v50  ;;  %v3736_v52 = vshll.u32 %v8283_v60, 16  ;;  %v8293_v59 = vcombine.low %v3702_v13, %v3712_v2  ;;  %v8286_v13 = vld [vmem:[%s11236_s27 + $0x80] sm:$0xc] }
 0x15b   : > { %v3728_v3 = vrot.slane %v3726_v26, 7  ;;  %v3735_v15 = vrot.slane %v3733_v22, 6  ;;  %v8220_v36 = vrot.slane %v8212_v20, 11  ;;  %9615 = vmatpush3.bf16.msra.mxu0 %v11876_v11  ;;  %v3112_v40 = vrot.slane %v10741_v46, 7  ;;  %v10744_v26 = vld [vmem:[%s11236_s27 + $0xc4] sm:$0xf] }
 0x15c   : > { %9389 = vmatpush3.bf16.msra.mxu1 %v12086_v49  ;;  %9342 = vmatprep.mubr.bf16.mxu0 %v8227_v44  ;;  %v3721_v47 = vrot.slane %v3720_v9, 4  ;;  %v3738_v8 = vrot.slane %v3736_v52, 7  ;;  %v3115_v5 = vrot.slane %v11925_v48, 7  ;;  %v3742_v19 = vshrl.u32 %v8284_v10, 16  ;;  %v8287_v9 = vld [vmem:[%s11236_s27 + $0x88] sm:$0x7] }
 0x15d   : > { %9371 = vmatmul.mubr.bf16.gmra.mrb[36].mxu1 %v8293_v59  ;;  %v3729_v6 = vor.u32 %v3728_v3, %v3725_v53  ;;  %v3745_v16 = vshll.u32 %v8284_v10, 16  ;;  %v3751_v4 = vshrl.u32 %v12095_v58, 16  ;;  %9390 = vmatprep.subr.bf16.mxu1 %v12104_v42  ;;  %v3113_v43 = vsel %vm11495_vm8, %v8220_v36, %v3112_v40 }
 0x15e   : > { %v3739_v11 = vor.u32 %v3738_v8, %v3735_v15  ;;  %v3114_v23 = vrot.slane %v3112_v40, 4  ;;  %v3754_v0 = vshll.u32 %v12095_v58, 16  ;;  %9616 = vmatprep.subr.bf16.mxu0 %v11889_v62  ;;  %v3744_v34 = vrot.slane %v3742_v19, 6 }
 0x15f   : > { %v3730_v48 = vsel %vm11269_vm5, %v3721_v47, %v3729_v6  ;;  %v3731_v63 = vrot.slane %v3729_v6, 4  ;;  %v3747_v32 = vrot.slane %v3745_v16, 7  ;;  %9617 = vmatpush3.bf16.msra.mxu0 %v11889_v62  ;;  %v3753_v61 = vrot.slane %v3751_v4, 6  ;;  %v12125_v62 = vld [vmem:[%s11236_s27 + $0x84] sm:$0xf] }
 0x160   : > { %v3116_v25 = vsel %vm11495_vm8, %v3114_v23, %v3115_v5  ;;  %v3756_v60 = vrot.slane %v3754_v0, 7  ;;  %v3761_v28 = vshrl.u32 %v8285_v57, 16  ;;  %9391 = vmatpush3.bf16.msra.mxu1 %v12104_v42  ;;  %9618 = vmatprep.subr.bf16.mxu0 %v11904_v55  ;;  %v3764_v39 = vshll.u32 %v8285_v57, 16  ;;  %v8214_v6 = vld [vmem:[%s11236_s27 + $0xd0] sm:$0x8] }
 0x161   : > { %v3740_v12 = vsel %vm11269_vm5, %v3731_v63, %v3739_v11  ;;  %v8228_v31 = vcombine.low %v3113_v43, %v3116_v25  ;;  %v3748_v30 = vor.u32 %v3747_v32, %v3744_v34  ;;  %9392 = vmatprep.subr.bf16.mxu1 %v12121_v56  ;;  %v8221_v20 = vrot.slane %v8213_v21, 11  ;;  %v8288_v11 = vld [vmem:[%s11236_s27 + $0x90] sm:$0xc]  ;;  %v10746_v32 = vld [vmem:[%s11236_s27 + $0xd4] sm:$0xf] }
 0x162   : > { %v8294_v29 = vcombine.low %v3730_v48, %v3740_v12  ;;  %v3757_v50 = vor.u32 %v3756_v60, %v3753_v61  ;;  %v3763_v1 = vrot.slane %v3761_v28, 6  ;;  %v3766_v53 = vrot.slane %v3764_v39, 7  ;;  %v12152_v25 = vld [vmem:[%s11236_s27 + $0x94] sm:$0xf]  ;;  %v12154_v61 = vld [vmem:[#allocation5 + $0x38] sm:$0xff]  }
 0x163   : > { %9343 = vmatmul.mubr.bf16.gmra.mrb[8].mxu0 %v8228_v31  ;;  %v3749_v14 = vrot.slane %v3748_v30, 4  ;;  %v3119_v22 = vrot.slane %v10744_v26, 7  ;;  %v3122_v2 = vrot.slane %v11949_v17, 7  ;;  %v3770_v52 = vshrl.u32 %v8286_v13, 16  ;;  %v12137_v17 = vld [vmem:[#allocation5 + $0x30] sm:$0xff]  }
 0x164   : > { %9374 = vmatprep.mubr.bf16.mxu1 %v8294_v29  ;;  %v3759_v44 = vrot.slane %v3757_v50, 4  ;;  %9393 = vmatpush3.bf16.msra.mxu1 %v12121_v56  ;;  %v3773_v10 = vshll.u32 %v8286_v13, 16  ;;  %v3779_v59 = vshrl.u32 %v12125_v62, 16  ;;  %v3767_v15 = vor.u32 %v3766_v53, %v3763_v1  ;;  %v8289_v31 = vld [vmem:[%s11236_s27 + $0x98] sm:$0x7] }
 0x165   : > { %v3758_v3 = vsel %vm11269_vm5, %v3749_v14, %v3757_v50  ;;  %v3120_v36 = vsel %vm11495_vm8, %v8221_v20, %v3119_v22  ;;  %v3121_v47 = vrot.slane %v3119_v22, 4  ;;  %9394 = vmatprep.subr.bf16.mxu1 %v12137_v17  ;;  %9619 = vmatpush3.bf16.msra.mxu0 %v11904_v55  ;;  %v3772_v8 = vrot.slane %v3770_v52, 6  ;;  %v8242_v1 = vld [vmem:[%s11236_s27 + $0x20] sm:$0xe]  ;;  %v8244_v53 = vld [vmem:[%s11236_s27 + $0x28] sm:$0x1] }
 0x166   : > { %v3775_v46 = vrot.slane %v3773_v10, 7  ;;  %v3781_v40 = vrot.slane %v3779_v59, 6  ;;  %v3782_v5 = vshll.u32 %v12125_v62, 16  ;;  %9620 = vmatprep.subr.bf16.mxu0 %v11914_v7  ;;  %v3768_v57 = vsel %vm11269_vm5, %v3759_v44, %v3767_v15  ;;  %v12176_v52 = vld [vmem:[#allocation5 + $0x80] sm:$0xff]  }
 0x167   : > { %v3123_v19 = vsel %vm11495_vm8, %v3121_v47, %v3122_v2  ;;  %v3789_v16 = vshrl.u32 %v8287_v9, 16  ;;  %v3792_v4 = vshll.u32 %v8287_v9, 16  ;;  %v8295_v55 = vcombine.low %v3758_v3, %v3768_v57  ;;  %v12173_v9 = vld [vmem:[%s11236_s27 + $0x4] sm:$0xf] }
 0x168   : > { %v8229_v43 = vcombine.low %v3120_v36, %v3123_v19  ;;  %v3776_v23 = vor.u32 %v3775_v46, %v3772_v8  ;;  %v3784_v0 = vrot.slane %v3782_v5, 7  ;;  %9395 = vmatpush3.bf16.msra.mxu1 %v12137_v17  ;;  %v8222_v34 = vrot.slane %v8214_v6, 11  ;;  %v5601_v5 = vld [vmem:[%s11236_s27 + $0x8] sm:$0x7] }
 0x169   : > { %v3791_v48 = vrot.slane %v3789_v16, 6  ;;  %v3794_v63 = vrot.slane %v3792_v4, 7  ;;  %v3126_v21 = vrot.slane %v10746_v32, 7  ;;  %9396 = vmatprep.subr.bf16.mxu1 %v12154_v61  ;;  %9621 = vmatpush3.bf16.msra.mxu0 %v11914_v7  ;;  %v3129_v12 = vrot.slane %v11969_v51, 7 }
 0x16a   : > { %9375 = vmatmul.mubr.bf16.gmra.mrb[40].mxu1 %v8295_v55  ;;  %9346 = vmatprep.mubr.bf16.mxu0 %v8229_v43  ;;  %v3777_v60 = vrot.slane %v3776_v23, 4  ;;  %v3785_v28 = vor.u32 %v3784_v0, %v3781_v40  ;;  %v3798_v30 = vshrl.u32 %v8288_v11, 16  ;;  %v3801_v50 = vshll.u32 %v8288_v11, 16  ;;  %v8245_v0 = vld [vmem:[%s11236_s27 + $0x30] sm:$0xe] }
 0x16b   : > { %v3795_v39 = vor.u32 %v3794_v63, %v3791_v48  ;;  %v3127_v13 = vsel %vm11495_vm8, %v8222_v34, %v3126_v21  ;;  %v3128_v29 = vrot.slane %v3126_v21, 4  ;;  %9638 = vmatprep.subr.bf16.mxu0 %v11929_v27  ;;  %v3807_v51 = vshrl.u32 %v12152_v25, 16  ;;  %v5600_v27 = vld [vmem:[%s11236_s27] sm:$0xc]  ;;  %v8247_v21 = vld [vmem:[%s11236_s27 + $0x38] sm:$0x1] }
 0x16c   : > { %v3786_v7 = vsel %vm11269_vm5, %v3777_v60, %v3785_v28  ;;  %v3787_v20 = vrot.slane %v3785_v28, 4  ;;  %v3800_v14 = vrot.slane %v3798_v30, 6  ;;  %9397 = vmatpush3.bf16.msra.mxu1 %v12154_v61  ;;  %v3803_v22 = vrot.slane %v3801_v50, 7  ;;  %v5602_v60 = vld [vmem:[%s11236_s27 + $0x10] sm:$0xc] }
 0x16d   : > { %v3130_v26 = vsel %vm11495_vm8, %v3128_v29, %v3129_v12  ;;  %v3810_v2 = vshll.u32 %v12152_v25, 16  ;;  %v3817_v44 = vshrl.u32 %v8289_v31, 16  ;;  %9414 = vmatprep.subr.bf16.mxu1 %v12176_v52  ;;  %v3809_v3 = vrot.slane %v3807_v51, 6 }
 0x16e   : > { %v3796_v10 = vsel %vm11269_vm5, %v3787_v20, %v3795_v39  ;;  %v8230_v59 = vcombine.low %v3127_v13, %v3130_v26  ;;  %v3820_v15 = vshll.u32 %v8289_v31, 16  ;;  %v3804_v36 = vor.u32 %v3803_v22, %v3800_v14  ;;  %v12202_v22 = vld [vmem:[%s11236_s27 + $0x14] sm:$0xf] }
 0x16f   : > { %v8296_v37 = vcombine.low %v3786_v7, %v3796_v10  ;;  %v3812_v47 = vrot.slane %v3810_v2, 7  ;;  %v3819_v8 = vrot.slane %v3817_v44, 6  ;;  %v8266_v40 = vrot.slane %v8242_v1, 9  ;;  %v5603_v10 = vld [vmem:[%s11236_s27 + $0x18] sm:$0x7] }
 0x170   : > { %9347 = vmatmul.mubr.bf16.gmra.mrb[12].mxu0 %v8230_v59  ;;  %v3822_v46 = vrot.slane %v3820_v15, 7  ;;  %v3805_v6 = vrot.slane %v3804_v36, 4  ;;  %v14501_v19 = vmov 0  ;;  %v3531_v16 = vrot.slane %v11983_v18, 5 }
 0x171   : > { %9378 = vmatprep.mubr.bf16.mxu1 %v8296_v37  ;;  %v3813_v57 = vor.u32 %v3812_v47, %v3809_v3  ;;  %v14502_v19 = vsel %vm12182_vm11, 4294967295, %v14501_v19  ;;  %v3534_v4 = vrot.slane %v8244_v53, 5  ;;  %v5617_v55 = vshrl.u32 %v5600_v27, 16 }
 0x172   : > { %14503 = vst [vmem:[#allocation17_spill] sm:$0xff] %v14502_v19  ;;  %v3823_v11 = vor.u32 %v3822_v46, %v3819_v8  ;;  %v5620_v43 = vshll.u32 %v5600_v27, 16  ;;  %v5626_v23 = vshrl.u32 %v12173_v9, 16  ;;  %v3532_v34 = vsel %vm12182_vm11, %v8266_v40, %v3531_v16  ;;  %v8248_v40 = vld [vmem:[%s11236_s27 + $0x40] sm:$0xe] }
 0x173   : > { %v3814_v48 = vsel %vm11269_vm5, %v3805_v6, %v3813_v57  ;;  %v3815_v63 = vrot.slane %v3813_v57, 4  ;;  %v3533_v32 = vrot.slane %v3531_v16, 4  ;;  %v5619_v28 = vrot.slane %v5617_v55, 6 }
 0x174   : > { %v5622_v18 = vrot.slane %v5620_v43, 7  ;;  %v5628_v12 = vrot.slane %v5626_v23, 6  ;;  %v5629_v31 = vshll.u32 %v12173_v9, 16  ;;  %v5636_v13 = vshrl.u32 %v5601_v5, 16 }
 0x175   : > { %v3824_v30 = vsel %vm11269_vm5, %v3815_v63, %v3823_v11  ;;  %v3535_v39 = vsel %vm12182_vm11, %v3533_v32, %v3534_v4  ;;  %v5639_v29 = vshll.u32 %v5601_v5, 16  ;;  %v8267_v53 = vrot.slane %v8245_v0, 9  ;;  %v8250_v4 = vld [vmem:[%s11236_s27 + $0x48] sm:$0x1]  ;;  %v5604_v0 = vld [vmem:[%s11236_s27 + $0x20] sm:$0xc] }
 0x176   : > { %v8297_v50 = vcombine.low %v3814_v48, %v3824_v30  ;;  %v8298_v1 = vcombine.low %v3532_v34, %v3535_v39  ;;  %v5623_v7 = vor.u32 %v5622_v18, %v5619_v28  ;;  %v5631_v20 = vrot.slane %v5629_v31, 7  ;;  %v5605_v39 = vld [vmem:[%s11236_s27 + $0x28] sm:$0x7] }
 0x177   : > { %v5638_v14 = vrot.slane %v5636_v13, 6  ;;  %v5641_v51 = vrot.slane %v5639_v29, 7  ;;  %v3538_v26 = vrot.slane %v12002_v24, 5  ;;  %v3541_v27 = vrot.slane %v8247_v21, 5  ;;  %v12219_v21 = vld [vmem:[%s11236_s27 + $0x24] sm:$0xf] }
 0x178   : > { %9379 = vmatmul.mubr.bf16.gmra.mrb[44].mxu1 %v8297_v50  ;;  %v5624_v2 = vrot.slane %v5623_v7, 4  ;;  %v5632_v44 = vor.u32 %v5631_v20, %v5628_v12  ;;  %v5645_v59 = vshrl.u32 %v5602_v60, 16  ;;  %v5648_v36 = vshll.u32 %v5602_v60, 16 }
 0x179   : > { %9398 = vmatprep.mubr.bf16.mxu1 %v8298_v1  ;;  %v5642_v3 = vor.u32 %v5641_v51, %v5638_v14  ;;  %v3539_v15 = vsel %vm12182_vm11, %v8267_v53, %v3538_v26  ;;  %v3540_v37 = vrot.slane %v3538_v26, 4  ;;  %v5654_v46 = vshrl.u32 %v12202_v22, 16  ;;  %v8251_v26 = vld [vmem:[%s11236_s27 + $0x50] sm:$0xe] }
 0x17a   : > { %v5633_v24 = vsel %vm11269_vm5, %v5624_v2, %v5632_v44  ;;  %v5634_v47 = vrot.slane %v5632_v44, 4  ;;  %v5647_v8 = vrot.slane %v5645_v59, 6  ;;  %v5650_v6 = vrot.slane %v5648_v36, 7  ;;  %v12230_v2 = vld [vmem:[#allocation5 + $0x88] sm:$0xff]  }
 0x17b   : > { %v3542_v5 = vsel %vm12182_vm11, %v3540_v37, %v3541_v27  ;;  %v5657_v57 = vshll.u32 %v12202_v22, 16  ;;  %v5664_v16 = vshrl.u32 %v5603_v10, 16  ;;  %v5656_v43 = vrot.slane %v5654_v46, 6 }
 0x17c   : > { %v5643_v11 = vsel %vm11269_vm5, %v5634_v47, %v5642_v3  ;;  %v8299_v55 = vcombine.low %v3539_v15, %v3542_v5  ;;  %v5667_v23 = vshll.u32 %v5603_v10, 16  ;;  %v5651_v63 = vor.u32 %v5650_v6, %v5647_v8  ;;  %v8253_v3 = vld [vmem:[%s11236_s27 + $0x58] sm:$0x1]  ;;  %v12240_v47 = vld [vmem:[%s11236_s27 + $0x34] sm:$0xf] }
 0x17d   : > { %v8454_v48 = vcombine.low %v5633_v24, %v5643_v11  ;;  %v5659_v34 = vrot.slane %v5657_v57, 7  ;;  %v5666_v32 = vrot.slane %v5664_v16, 6  ;;  %v8268_v28 = vrot.slane %v8248_v40, 9  ;;  %v5606_v8 = vld [vmem:[%s11236_s27 + $0x30] sm:$0xc] }
 0x17e   : > { %v5669_v60 = vrot.slane %v5667_v23, 7  ;;  %v3545_v18 = vrot.slane %v12022_v54, 5  ;;  %v3548_v12 = vrot.slane %v8250_v4, 5  ;;  %v5652_v31 = vrot.slane %v5651_v63, 4  ;;  %v5607_v23 = vld [vmem:[%s11236_s27 + $0x38] sm:$0x7] }
 0x17f   : > { %9622 = vmatprep.mubr.bf16.mxu0 %v8454_v48  ;;  %v5660_v30 = vor.u32 %v5659_v34, %v5656_v43  ;;  %v5673_v13 = vshrl.u32 %v5604_v0, 16  ;;  %v5676_v29 = vshll.u32 %v5604_v0, 16  ;;  %v5682_v20 = vshrl.u32 %v12219_v21, 16  ;;  %v12245_v43 = vld [vmem:[#allocation5 + $0x90] sm:$0xff]   ;;  %v10751_v34 = vld [vmem:[#allocation5] sm:$0xff]  }
 0x180   : > { %9399 = vmatmul.mubr.bf16.vlgmr.msra.gmra.mrb[32].mxu1 %v8299_v55  ;;  %v5670_v50 = vor.u32 %v5669_v60, %v5666_v32  ;;  %v3546_v1 = vsel %vm12182_vm11, %v8268_v28, %v3545_v18  ;;  %v3547_v7 = vrot.slane %v3545_v18, 4  ;;  %v5685_v10 = vshll.u32 %v12219_v21, 16 }
 0x181   : > { %v5661_v54 = vsel %vm11269_vm5, %v5652_v31, %v5660_v30  ;;  %v5662_v14 = vrot.slane %v5660_v30, 4  ;;  %9415 = vmatpush3.bf16.msra.mxu1 %v12176_v52  ;;  %v5675_v51 = vrot.slane %v5673_v13, 6  ;;  %v5678_v53 = vrot.slane %v5676_v29, 7 }
 0x182   : > { %9416 = vmatprep.subr.bf16.mxu1 %v12230_v2  ;;  %v3549_v44 = vsel %vm12182_vm11, %v3547_v7, %v3548_v12  ;;  %v5684_v27 = vrot.slane %v5682_v20, 6  ;;  %v5692_v59 = vshrl.u32 %v5605_v39, 16  ;;  %v5695_v24 = vshll.u32 %v5605_v39, 16  ;;  %v8254_v39 = vld [vmem:[%s11236_s27 + $0x60] sm:$0xe] }
 0x183   : > { %v5671_v15 = vsel %vm11269_vm5, %v5662_v14, %v5670_v50  ;;  %v8300_v37 = vcombine.low %v3546_v1, %v3549_v44  ;;  %v5679_v36 = vor.u32 %v5678_v53, %v5675_v51  ;;  %v5687_v40 = vrot.slane %v5685_v10, 7  ;;  %v8256_v7 = vld [vmem:[%s11236_s27 + $0x68] sm:$0x1]  ;;  %v12263_v53 = vld [vmem:[#allocation5 + $0x98] sm:$0xff]   ;;  %v5608_v44 = vld [vmem:[%s11236_s27 + $0x40] sm:$0xc] }
 0x184   : > { %v8455_v46 = vcombine.low %v5661_v54, %v5671_v15  ;;  %v5694_v5 = vrot.slane %v5692_v59, 6  ;;  %v8269_v6 = vrot.slane %v8251_v26, 9  ;;  %v5697_v16 = vrot.slane %v5695_v24, 7  ;;  %v12267_v26 = vld [vmem:[%s11236_s27 + $0x44] sm:$0xf] }
 0x185   : > { %9417 = vmatpush3.bf16.msra.mxu1 %v12230_v2  ;;  %9402 = vmatprep.mubr.bf16.mxu1 %v8300_v37  ;;  %v5680_v57 = vrot.slane %v5679_v36, 4  ;;  %v3552_v4 = vrot.slane %v12042_v38, 5  ;;  %v3555_v11 = vrot.slane %v8253_v3, 5  ;;  %v5688_v55 = vor.u32 %v5687_v40, %v5684_v27 }
 0x186   : > { %9623 = vmatmul.mubr.bf16.vlgmr.msra.gmra.mrb[16].mxu0 %v8455_v46  ;;  %9418 = vmatprep.subr.bf16.mxu1 %v12245_v43  ;;  %v5701_v0 = vshrl.u32 %v5606_v8, 16  ;;  %v5704_v48 = vshll.u32 %v5606_v8, 16  ;;  %v5710_v63 = vshrl.u32 %v12240_v47, 16  ;;  %v5698_v32 = vor.u32 %v5697_v16, %v5694_v5  ;;  %v5609_v46 = vld [vmem:[%s11236_s27 + $0x48] sm:$0x7] }
 0x187   : > { %9639 = vmatpush3.bf16.msra.mxu0 %v10751_v34  ;;  %v3553_v38 = vsel %vm12182_vm11, %v8269_v6, %v3552_v4  ;;  %v3554_v60 = vrot.slane %v3552_v4, 4  ;;  %v5713_v28 = vshll.u32 %v12240_v47, 16  ;;  %v5689_v18 = vsel %vm11269_vm5, %v5680_v57, %v5688_v55  ;;  %v12280_v4 = vld [vmem:[#allocation5 + $0xa0] sm:$0xff]  }
 0x188   : > { %9640 = vmatprep.subr.bf16.mxu0 %v12053_v33  ;;  %v5690_v12 = vrot.slane %v5688_v55, 4  ;;  %v5703_v31 = vrot.slane %v5701_v0, 6  ;;  %v5706_v30 = vrot.slane %v5704_v48, 7  ;;  %v5712_v29 = vrot.slane %v5710_v63, 6  ;;  %v8257_v48 = vld [vmem:[%s11236_s27 + $0x70] sm:$0xe] }
 0x189   : > { %v3556_v13 = vsel %vm12182_vm11, %v3554_v60, %v3555_v11  ;;  %v5715_v50 = vrot.slane %v5713_v28, 7  ;;  %v5720_v1 = vshrl.u32 %v5607_v23, 16  ;;  %9419 = vmatpush3.bf16.msra.mxu1 %v12245_v43  ;;  %v5723_v51 = vshll.u32 %v5607_v23, 16  ;;  %v8259_v60 = vld [vmem:[%s11236_s27 + $0x78] sm:$0x1] }
 0x18a   : > { %v5699_v20 = vsel %vm11269_vm5, %v5690_v12, %v5698_v32  ;;  %v8301_v54 = vcombine.low %v3553_v38, %v3556_v13  ;;  %v5707_v14 = vor.u32 %v5706_v30, %v5703_v31  ;;  %9420 = vmatprep.subr.bf16.mxu1 %v12263_v53  ;;  %v8270_v3 = vrot.slane %v8254_v39, 9  ;;  %v5610_v28 = vld [vmem:[%s11236_s27 + $0x50] sm:$0xc] }
 0x18b   : > { %9641 = vmatpush3.bf16.msra.mxu0 %v12053_v33  ;;  %v8456_v27 = vcombine.low %v5689_v18, %v5699_v20  ;;  %v5716_v10 = vor.u32 %v5715_v50, %v5712_v29  ;;  %v5722_v59 = vrot.slane %v5720_v1, 6  ;;  %v5725_v37 = vrot.slane %v5723_v51, 7  ;;  %v12296_v50 = vld [vmem:[%s11236_s27 + $0x54] sm:$0xf]  ;;  %v12298_v1 = vld [vmem:[#allocation5 + $0xa8] sm:$0xff]  }
 0x18c   : > { %9403 = vmatmul.mubr.bf16.gmra.mrb[36].mxu1 %v8301_v54  ;;  %v5708_v15 = vrot.slane %v5707_v14, 4  ;;  %9642 = vmatprep.subr.bf16.mxu0 %v12071_v45  ;;  %v3559_v36 = vrot.slane %v12069_v35, 5  ;;  %v3562_v24 = vrot.slane %v8256_v7, 5  ;;  %v5729_v40 = vshrl.u32 %v5608_v44, 16  ;;  %v5611_v14 = vld [vmem:[%s11236_s27 + $0x58] sm:$0x7] }
 0x18d   : > { %9626 = vmatprep.mubr.bf16.mxu0 %v8456_v27  ;;  %v5718_v8 = vrot.slane %v5716_v10, 4  ;;  %9421 = vmatpush3.bf16.msra.mxu1 %v12263_v53  ;;  %v5732_v33 = vshll.u32 %v5608_v44, 16  ;;  %v5738_v5 = vshrl.u32 %v12267_v26, 16  ;;  %v5726_v57 = vor.u32 %v5725_v37, %v5722_v59 }
 0x18e   : > { %v5717_v6 = vsel %vm11269_vm5, %v5708_v15, %v5716_v10  ;;  %v3560_v16 = vsel %vm12182_vm11, %v8270_v3, %v3559_v36  ;;  %v3561_v35 = vrot.slane %v3559_v36, 4  ;;  %9422 = vmatprep.subr.bf16.mxu1 %v12280_v4  ;;  %v5731_v11 = vrot.slane %v5729_v40, 6 }
 0x18f   : > { %9643 = vmatpush3.bf16.msra.mxu0 %v12071_v45  ;;  %v5734_v55 = vrot.slane %v5732_v33, 7  ;;  %v5740_v23 = vrot.slane %v5738_v5, 6  ;;  %v5741_v0 = vshll.u32 %v12267_v26, 16  ;;  %v5727_v63 = vsel %vm11269_vm5, %v5718_v8, %v5726_v57  ;;  %v8262_v33 = vld [vmem:[%s11236_s27 + $0x88] sm:$0x1]  ;;  %v12315_v5 = vld [vmem:[#allocation5 + $0xb0] sm:$0xff]  }
 0x190   : > { %9644 = vmatprep.subr.bf16.mxu0 %v12086_v49  ;;  %v3563_v34 = vsel %vm12182_vm11, %v3561_v35, %v3562_v24  ;;  %v5748_v32 = vshrl.u32 %v5609_v46, 16  ;;  %v5751_v38 = vshll.u32 %v5609_v46, 16  ;;  %v8457_v45 = vcombine.low %v5717_v6, %v5727_v63  ;;  %v12323_v63 = vld [vmem:[%s11236_s27 + $0x64] sm:$0xf] }
 0x191   : > { %v8302_v18 = vcombine.low %v3560_v16, %v3563_v34  ;;  %v5735_v12 = vor.u32 %v5734_v55, %v5731_v11  ;;  %v5743_v31 = vrot.slane %v5741_v0, 7  ;;  %9423 = vmatpush3.bf16.msra.mxu1 %v12280_v4  ;;  %v8271_v13 = vrot.slane %v8257_v48, 9  ;;  %v5612_v11 = vld [vmem:[%s11236_s27 + $0x60] sm:$0xc] }
 0x192   : > { %v5750_v30 = vrot.slane %v5748_v32, 6  ;;  %v5753_v39 = vrot.slane %v5751_v38, 7  ;;  %v3566_v29 = vrot.slane %v12095_v58, 5  ;;  %9424 = vmatprep.subr.bf16.mxu1 %v12298_v1  ;;  %9627 = vmatmul.mubr.bf16.gmra.mrb[20].mxu0 %v8457_v45  ;;  %v3569_v54 = vrot.slane %v8259_v60, 5 }
 0x193   : > { %9406 = vmatprep.mubr.bf16.mxu1 %v8302_v18  ;;  %v5736_v7 = vrot.slane %v5735_v12, 4  ;;  %v5744_v20 = vor.u32 %v5743_v31, %v5740_v23  ;;  %v5757_v51 = vshrl.u32 %v5610_v28, 16  ;;  %9645 = vmatpush3.bf16.msra.mxu0 %v12086_v49  ;;  %v5760_v59 = vshll.u32 %v5610_v28, 16  ;;  %v8260_v49 = vld [vmem:[%s11236_s27 + $0x80] sm:$0xe] }
 0x194   : > { %v5754_v44 = vor.u32 %v5753_v39, %v5750_v30  ;;  %v3567_v27 = vsel %vm12182_vm11, %v8271_v13, %v3566_v29  ;;  %v3568_v10 = vrot.slane %v3566_v29, 4  ;;  %v5766_v36 = vshrl.u32 %v12296_v50, 16  ;;  %9646 = vmatprep.subr.bf16.mxu0 %v12104_v42  ;;  %v5613_v18 = vld [vmem:[%s11236_s27 + $0x68] sm:$0x7]  ;;  %v12332_v29 = vld [vmem:[#allocation5 + $0xb8] sm:$0xff]  }
 0x195   : > { %v5745_v3 = vsel %vm11269_vm5, %v5736_v7, %v5744_v20  ;;  %v5746_v15 = vrot.slane %v5744_v20, 4  ;;  %v5759_v37 = vrot.slane %v5757_v51, 6  ;;  %9425 = vmatpush3.bf16.msra.mxu1 %v12298_v1  ;;  %v5762_v8 = vrot.slane %v5760_v59, 7  ;;  %v8263_v51 = vld [vmem:[%s11236_s27 + $0x90] sm:$0xe] }
 0x196   : > { %v3570_v24 = vsel %vm12182_vm11, %v3568_v10, %v3569_v54  ;;  %v5769_v46 = vshll.u32 %v12296_v50, 16  ;;  %v5776_v40 = vshrl.u32 %v5611_v14, 16  ;;  %9426 = vmatprep.subr.bf16.mxu1 %v12315_v5  ;;  %v5768_v16 = vrot.slane %v5766_v36, 6 }
 0x197   : > { %v5755_v6 = vsel %vm11269_vm5, %v5746_v15, %v5754_v44  ;;  %v8303_v57 = vcombine.low %v3567_v27, %v3570_v24  ;;  %v5779_v35 = vshll.u32 %v5611_v14, 16  ;;  %v5763_v23 = vor.u32 %v5762_v8, %v5759_v37  ;;  %9647 = vmatpush3.bf16.msra.mxu0 %v12104_v42  ;;  %v5614_v24 = vld [vmem:[%s11236_s27 + $0x70] sm:$0xc] }
 0x198   : > { %v8458_v55 = vcombine.low %v5745_v3, %v5755_v6  ;;  %v5771_v0 = vrot.slane %v5769_v46, 7  ;;  %v5778_v48 = vrot.slane %v5776_v40, 6  ;;  %9648 = vmatprep.subr.bf16.mxu0 %v12121_v56  ;;  %v8272_v32 = vrot.slane %v8260_v49, 9  ;;  %v8265_v3 = vld [vmem:[%s11236_s27 + $0x98] sm:$0x1]  ;;  %v12351_v6 = vld [vmem:[#allocation5 + $0xc0] sm:$0xff]  }
 0x199   : > { %9407 = vmatmul.mubr.bf16.gmra.mrb[40].mxu1 %v8303_v57  ;;  %v5781_v34 = vrot.slane %v5779_v35, 7  ;;  %v3573_v38 = vrot.slane %v12125_v62, 5  ;;  %v3576_v60 = vrot.slane %v8262_v33, 5  ;;  %v5764_v28 = vrot.slane %v5763_v23, 4  ;;  %v5615_v23 = vld [vmem:[%s11236_s27 + $0x78] sm:$0x7] }
 0x19a   : > { %9630 = vmatprep.mubr.bf16.mxu0 %v8458_v55  ;;  %v5772_v45 = vor.u32 %v5771_v0, %v5768_v16  ;;  %v5785_v12 = vshrl.u32 %v5612_v11, 16  ;;  %v5788_v31 = vshll.u32 %v5612_v11, 16  ;;  %9427 = vmatpush3.bf16.msra.mxu1 %v12315_v5  ;;  %v5794_v13 = vshrl.u32 %v12323_v63, 16 }
 0x19b   : > { %v5782_v42 = vor.u32 %v5781_v34, %v5778_v48  ;;  %v3574_v30 = vsel %vm12182_vm11, %v8272_v32, %v3573_v38  ;;  %v3575_v39 = vrot.slane %v3573_v38, 4  ;;  %9428 = vmatprep.subr.bf16.mxu1 %v12332_v29  ;;  %9649 = vmatpush3.bf16.msra.mxu0 %v12121_v56  ;;  %v5797_v10 = vshll.u32 %v12323_v63, 16  ;;  %v12347_v56 = vld [vmem:[%s11236_s27 + $0x74] sm:$0xf] }
 0x19c   : > { %v5773_v7 = vsel %vm11269_vm5, %v5764_v28, %v5772_v45  ;;  %v5774_v20 = vrot.slane %v5772_v45, 4  ;;  %v5787_v54 = vrot.slane %v5785_v12, 6  ;;  %v5790_v14 = vrot.slane %v5788_v31, 7  ;;  %9650 = vmatprep.subr.bf16.mxu0 %v12137_v17  ;;  %v8306_v31 = vld [vmem:[%s11236_s27 + $0x28] sm:$0xf] }
 0x19d   : > { %v3577_v44 = vsel %vm12182_vm11, %v3575_v39, %v3576_v60  ;;  %v5796_v27 = vrot.slane %v5794_v13, 6  ;;  %v5804_v59 = vshrl.u32 %v5613_v18, 16  ;;  %v5807_v49 = vshll.u32 %v5613_v18, 16 }
 0x19e   : > { %v5783_v15 = vsel %vm11269_vm5, %v5774_v20, %v5782_v42  ;;  %v8304_v37 = vcombine.low %v3574_v30, %v3577_v44  ;;  %v5791_v36 = vor.u32 %v5790_v14, %v5787_v54  ;;  %9429 = vmatpush3.bf16.msra.mxu1 %v12332_v29  ;;  %v5799_v46 = vrot.slane %v5797_v10, 7  ;;  %v10758_v10 = vld [vmem:[%s11236_s27 + $0x24] sm:$0xf] }
 0x19f   : > { %v8459_v8 = vcombine.low %v5773_v7, %v5783_v15  ;;  %v5806_v40 = vrot.slane %v5804_v59, 6  ;;  %v8273_v33 = vrot.slane %v8263_v51, 9  ;;  %9446 = vmatprep.subr.bf16.mxu1 %v12351_v6  ;;  %v5809_v16 = vrot.slane %v5807_v49, 7  ;;  %9651 = vmatpush3.bf16.msra.mxu0 %v12137_v17 }
 0x1a0   : > { %9410 = vmatprep.mubr.bf16.mxu1 %v8304_v37  ;;  %v5792_v57 = vrot.slane %v5791_v36, 4  ;;  %v3580_v35 = vrot.slane %v12152_v25, 5  ;;  %v3583_v11 = vrot.slane %v8265_v3, 5  ;;  %v5800_v55 = vor.u32 %v5799_v46, %v5796_v27  ;;  %9652 = vmatprep.subr.bf16.mxu0 %v12154_v61  ;;  %v5584_v37 = vld [vmem:[%s11236_s27] sm:$0xf] }
 0x1a1   : > { %9631 = vmatmul.mubr.bf16.gmra.mrb[24].mxu0 %v8459_v8  ;;  %v5813_v0 = vshrl.u32 %v5614_v24, 16  ;;  %v5816_v48 = vshll.u32 %v5614_v24, 16  ;;  %v5822_v34 = vshrl.u32 %v12347_v56, 16  ;;  %v5810_v32 = vor.u32 %v5809_v16, %v5806_v40  ;;  %v8307_v36 = vld [vmem:[%s11236_s27 + $0x38] sm:$0xf] }
 0x1a2   : > { %v3581_v38 = vsel %vm12182_vm11, %v8273_v33, %v3580_v35  ;;  %v3582_v60 = vrot.slane %v3580_v35, 4  ;;  %v5825_v28 = vshll.u32 %v12347_v56, 16  ;;  %v5801_v17 = vsel %vm11269_vm5, %v5792_v57, %v5800_v55  ;;  %v8308_v8 = vld [vmem:[%s11236_s27 + $0x48] sm:$0xf]  ;;  %v10759_v33 = vld [vmem:[%s11236_s27 + $0x34] sm:$0xf] }
 0x1a3   : > { %v5802_v45 = vrot.slane %v5800_v55, 4  ;;  %v5815_v18 = vrot.slane %v5813_v0, 6  ;;  %v5818_v12 = vrot.slane %v5816_v48, 7  ;;  %v5824_v30 = vrot.slane %v5822_v34, 6  ;;  %9653 = vmatpush3.bf16.msra.mxu0 %v12154_v61  ;;  %v10760_v35 = vld [vmem:[%s11236_s27 + $0x44] sm:$0xf] }
 0x1a4   : > { %v3584_v42 = vsel %vm12182_vm11, %v3582_v60, %v3583_v11  ;;  %v5827_v39 = vrot.slane %v5825_v28, 7  ;;  %v5832_v13 = vshrl.u32 %v5615_v23, 16  ;;  %v5835_v14 = vshll.u32 %v5615_v23, 16  ;;  %9670 = vmatprep.subr.bf16.mxu0 %v12176_v52  ;;  %v5586_v55 = vld [vmem:[%s11236_s27 + $0x10] sm:$0xf] }
 0x1a5   : > { %v5811_v7 = vsel %vm11269_vm5, %v5802_v45, %v5810_v32  ;;  %v8305_v20 = vcombine.low %v3581_v38, %v3584_v42  ;;  %v5819_v54 = vor.u32 %v5818_v12, %v5815_v18  ;;  %v8314_v59 = vcombine.low %v10758_v10, %v8306_v31  ;;  %v5588_v23 = vld [vmem:[%s11236_s27 + $0x20] sm:$0xf]  ;;  %v8309_v48 = vld [vmem:[%s11236_s27 + $0x58] sm:$0xf]  ;;  %v8310_v38 = vld [vmem:[%s11236_s27 + $0x68] sm:$0xf] }
 0x1a6   : > { %v8460_v51 = vcombine.low %v5801_v17, %v5811_v7  ;;  %v5828_v44 = vor.u32 %v5827_v39, %v5824_v30  ;;  %v5834_v27 = vrot.slane %v5832_v13, 6  ;;  %v5837_v3 = vrot.slane %v5835_v14, 7  ;;  %v10762_v45 = vld [vmem:[%s11236_s27 + $0x54] sm:$0xf]  ;;  %v10764_v31 = vld [vmem:[%s11236_s27 + $0x64] sm:$0xf] }
 0x1a7   : > { %9411 = vmatmul.mubr.bf16.gmra.mrb[44].mxu1 %v8305_v20  ;;  %v5820_v61 = vrot.slane %v5819_v54, 4  ;;  %v8462_v40 = vcombine.low %v5584_v37, %v12173_v9  ;;  %v8315_v57 = vcombine.low %v10759_v33, %v8307_v36  ;;  %v8316_v11 = vcombine.low %v10760_v35, %v8308_v8  ;;  %v12387_v9 = vld [vmem:[#allocation5 + $0xc8] sm:$0xff]   ;;  %v12402_v12 = vld [vmem:[#allocation5 + $0xd0] sm:$0xff]   ;;  %v8311_v39 = vld [vmem:[%s11236_s27 + $0x78] sm:$0xf] }
 0x1a8   : > { %9634 = vmatprep.mubr.bf16.mxu0 %v8460_v51  ;;  %v5830_v15 = vrot.slane %v5828_v44, 4  ;;  %9430 = vmatprep.mubr.bf16.mxu1 %v8314_v59  ;;  %v5838_v24 = vor.u32 %v5837_v3, %v5834_v27  ;;  %v8463_v32 = vcombine.low %v5586_v55, %v12202_v22  ;;  %v8464_v28 = vcombine.low %v5588_v23, %v12219_v21  ;;  %v5590_v22 = vld [vmem:[%s11236_s27 + $0x30] sm:$0xf]  ;;  %v5592_v21 = vld [vmem:[%s11236_s27 + $0x40] sm:$0xf] }
 0x1a9   : > { %v5829_v49 = vsel %vm11269_vm5, %v5820_v61, %v5828_v44  ;;  %v8317_v18 = vcombine.low %v10762_v45, %v8309_v48  ;;  %v8318_v42 = vcombine.low %v10764_v31, %v8310_v38  ;;  %v8465_v7 = vcombine.low %v5590_v22, %v12240_v47  ;;  %v8312_v20 = vld [vmem:[%s11236_s27 + $0x88] sm:$0xf]  ;;  %v12422_v54 = vld [vmem:[%s11236_s27 + $0x54] sm:$0xf]  ;;  %v8322_v27 = vld [vmem:[%s11236_s27 + $0x50] sm:$0xe] }
 0x1aa   : > { %v5839_v46 = vsel %vm11269_vm5, %v5830_v15, %v5838_v24  ;;  %v4278_v14 = vrot.slane %v12422_v54, 5  ;;  %v8466_v44 = vcombine.low %v5592_v21, %v12267_v26  ;;  %v8323_v10 = vld [vmem:[%s11236_s27 + $0x58] sm:$0x1]  ;;  %v8319_v59 = vcombine.low %v12095_v58, %v8311_v39  ;;  %v12438_v3 = vld [vmem:[%s11236_s27 + $0x8] sm:$0xf] }
 0x1ab   : > { %v8461_v16 = vcombine.low %v5829_v49, %v5839_v46  ;;  %v8320_v61 = vcombine.low %v12125_v62, %v8312_v20  ;;  %v8338_v26 = vrot.slane %v8322_v27, 9  ;;  %v4281_v37 = vrot.slane %v8323_v10, 5  ;;  %v5594_v58 = vld [vmem:[%s11236_s27 + $0x50] sm:$0xf]  ;;  %v5596_v62 = vld [vmem:[%s11236_s27 + $0x60] sm:$0xf] }
 0x1ac   : > { %v4280_v15 = vrot.slane %v4278_v14, 4  ;;  %v8313_v36 = vld [vmem:[%s11236_s27 + $0x98] sm:$0xf]  ;;  %v6164_v49 = vrot.slane %v12438_v3, 5  ;;  %v6114_v8 = vld [vmem:[%s11236_s27 + $0x4] sm:$0xe] }
 0x1ad   : > { %9635 = vmatmul.mubr.bf16.gmra.mrb[28].mxu0 %v8461_v16  ;;  %v6116_v46 = vld [vmem:[%s11236_s27 + $0xc] sm:$0x1]  ;;  %v4279_v35 = vsel %vm12182_vm11, %v8338_v26, %v4278_v14  ;;  %v8324_v55 = vld [vmem:[%s11236_s27 + $0x60] sm:$0xe]  ;;  %v8325_v23 = vld [vmem:[%s11236_s27 + $0x68] sm:$0x1]  ;;  %v8321_v31 = vcombine.low %v12152_v25, %v8313_v36 }
 0x1ae   : > { %9654 = vmatprep.mubr.bf16.mxu0 %v8462_v40  ;;  %v12461_v16 = vld [vmem:[#allocation5 + $0xe8] sm:$0xff]   ;;  %v12471_v48 = vld [vmem:[%s11236_s27 + $0x74] sm:$0xf]  ;;  %v8327_v45 = vld [vmem:[%s11236_s27 + $0x78] sm:$0x1]  ;;  %v6166_v22 = vrot.slane %v6164_v49, 4 }
 0x1af   : > { %9431 = vmatmul.mubr.bf16.vlgmr.msra.gmra.mrb[32].mxu1 %v8315_v57  ;;  %v8467_v57 = vcombine.low %v5594_v58, %v12296_v50  ;;  %v8468_v50 = vcombine.low %v5596_v62, %v12323_v63  ;;  %v6167_v21 = vrot.slane %v6116_v46, 5  ;;  %v12485_v39 = vld [vmem:[%s11236_s27 + $0x18] sm:$0xf]  ;;  %v4288_v20 = vrot.slane %v8325_v23, 5  ;;  %v12489_v14 = vld [vmem:[%s11236_s27 + $0x28] sm:$0xf] }
 0x1b0   : > { %9447 = vmatpush3.bf16.msra.mxu1 %v12351_v6  ;;  %9434 = vmatprep.mubr.bf16.mxu1 %v8316_v11  ;;  %v4282_v11 = vsel %vm12182_vm11, %v4280_v15, %v4281_v37  ;;  %v4295_v10 = vrot.slane %v8327_v45, 5  ;;  %v6171_v3 = vrot.slane %v12485_v39, 5  ;;  %v6119_v37 = vld [vmem:[%s11236_s27 + $0x1c] sm:$0x1]  ;;  %v6120_v58 = vld [vmem:[%s11236_s27 + $0x24] sm:$0xe] }
 0x1b1   : > { %9448 = vmatprep.subr.bf16.mxu1 %v12387_v9  ;;  %v6168_v15 = vsel %vm12182_vm11, %v6166_v22, %v6167_v21  ;;  %v8328_v46 = vld [vmem:[%s11236_s27 + $0x80] sm:$0xe]  ;;  %v12522_v23 = vld [vmem:[#allocation5 + $0xf8] sm:$0xff]   ;;  %v8330_v45 = vld [vmem:[%s11236_s27 + $0x90] sm:$0xe] }
 0x1b2   : > { %v6173_v39 = vrot.slane %v6171_v3, 4 }
 0x1b4   : > { %v12385_v0 = vpop.f32.mrb[0].mxu1  ;;  %9449 = vmatpush3.bf16.msra.mxu1 %v12387_v9 }
 0x1b5   : > { %v12391_v34 = vpop.f32.mrb[1].mxu1  ;;  %9450 = vmatprep.subr.bf16.mxu1 %v12402_v12  ;;  %9655 = vmatmul.mubr.bf16.vlgmr.msra.gmra.mrb[16].mxu0 %v8463_v32  ;;  %v4292_v32 = vrot.slane %v12471_v48, 5 }
 0x1b6   : > { %v12395_v60 = vpop.f32.mrb[2].mxu1  ;;  %9671 = vmatpush3.bf16.msra.mxu0 %v12176_v52  ;;  %9658 = vmatprep.mubr.bf16.mxu0 %v8464_v28  ;;  %v12417_v52 = vld [vmem:[#allocation5 + $0xd8] sm:$0xff]   ;;  %v8326_v28 = vld [vmem:[%s11236_s27 + $0x70] sm:$0xe] }
 0x1b7   : > { %v12398_v17 = vpop.f32.mrb[3].mxu1  ;;  %9672 = vmatprep.subr.bf16.mxu0 %v12230_v2  ;;  %9435 = vmatmul.mubr.bf16.gmra.mrb[36].mxu1 %v8317_v18  ;;  %v8340_v25 = vrot.slane %v8326_v28, 9  ;;  %v4294_v27 = vrot.slane %v4292_v32, 4  ;;  %v8329_v28 = vld [vmem:[%s11236_s27 + $0x88] sm:$0x1] }
 0x1b8   : > { %9451 = vmatpush3.bf16.msra.mxu1 %v12402_v12  ;;  %9438 = vmatprep.mubr.bf16.mxu1 %v8318_v42  ;;  %v8470_v42 = vrot.slane %v6114_v8, 9  ;;  %v6122_v8 = vld [vmem:[%s11236_s27 + $0x2c] sm:$0x1] }
 0x1b9   : > { %9452 = vmatprep.subr.bf16.mxu1 %v12417_v52 }
 0x1ba   : > { %9673 = vmatpush3.bf16.msra.mxu0 %v12230_v2  ;;  %v12440_v2 = vld [vmem:[#allocation5 + $0xe0] sm:$0xff]   ;;  %v6165_v26 = vsel %vm12182_vm11, %v8470_v42, %v6164_v49 }
 0x1bb   : > { %9674 = vmatprep.subr.bf16.mxu0 %v12245_v43 }
 0x1bc   : > { %v12410_v30 = vpop.f32.mrb[4].mxu1  ;;  %9453 = vmatpush3.bf16.msra.mxu1 %v12417_v52 }
 0x1bd   : > { %14504 = vst [vmem:[#allocation18_spill] sm:$0xff] %v12410_v30  ;;  %v12414_v13 = vpop.f32.mrb[5].mxu1  ;;  %9659 = vmatmul.mubr.bf16.gmra.mrb[20].mxu0 %v8465_v7  ;;  %9454 = vmatprep.subr.bf16.mxu1 %v12440_v2  ;;  %v8339_v7 = vrot.slane %v8324_v55, 9  ;;  %v8522_v30 = vld [vmem:[%s11236_s27 + $0x94] sm:$0xe] }
 0x1be   : > { %14505 = vst [vmem:[#allocation19_spill] sm:$0xff] %v12414_v13  ;;  %v12425_v51 = vpop.f32.mrb[6].mxu1  ;;  %9675 = vmatpush3.bf16.msra.mxu0 %v12245_v43  ;;  %9662 = vmatprep.mubr.bf16.mxu0 %v8466_v44  ;;  %v12455_v43 = vld [vmem:[%s11236_s27 + $0x64] sm:$0xf]  ;;  %v12491_v44 = vld [vmem:[#allocation5 + $0xf0] sm:$0xff]  }
 0x1bf   : > { %14506 = vst [vmem:[#allocation20_spill] sm:$0xff] %v12425_v51  ;;  %v12431_v47 = vpop.f32.mrb[7].mxu1  ;;  %9676 = vmatprep.subr.bf16.mxu0 %v12263_v53  ;;  %9439 = vmatmul.mubr.bf16.gmra.mrb[40].mxu1 %v8319_v59  ;;  %v4285_v40 = vrot.slane %v12455_v43, 5  ;;  %v5598_v59 = vld [vmem:[%s11236_s27 + $0x70] sm:$0xf] }
 0x1c0   : > { %14507 = vst [vmem:[#allocation21_spill] sm:$0xff] %v12431_v47  ;;  %9455 = vmatpush3.bf16.msra.mxu1 %v12440_v2  ;;  %9442 = vmatprep.mubr.bf16.mxu1 %v8320_v61  ;;  %v6117_v61 = vld [vmem:[%s11236_s27 + $0x14] sm:$0xe]  ;;  %v8469_v55 = vcombine.low %v5598_v59, %v12347_v56  ;;  %v8478_v56 = vcombine.low %v6165_v26, %v6168_v15  ;;  %v12547_v26 = vld [vmem:[%s11236_s27 + $0x48] sm:$0xf]  ;;  %v12549_v15 = vld [vmem:[#allocation5 + $0x140] sm:$0xff]  }
 0x1c1   : > { %9456 = vmatprep.subr.bf16.mxu1 %v12461_v16  ;;  %v4287_v63 = vrot.slane %v4285_v40, 4  ;;  %v4286_v36 = vsel %vm12182_vm11, %v8339_v7, %v4285_v40  ;;  %v4293_v40 = vsel %vm12182_vm11, %v8340_v25, %v4292_v32  ;;  %v8471_v21 = vrot.slane %v6117_v61, 9  ;;  %v8331_v32 = vld [vmem:[%s11236_s27 + $0x98] sm:$0x1]  ;;  %v8519_v13 = vld [vmem:[%s11236_s27 + $0x84] sm:$0xe] }
 0x1c2   : > { %9677 = vmatpush3.bf16.msra.mxu0 %v12263_v53  ;;  %v8346_v53 = vcombine.low %v4279_v35, %v4282_v11  ;;  %v6181_v25 = vrot.slane %v6122_v8, 5  ;;  %v4302_v61 = vrot.slane %v8329_v28, 5  ;;  %v6192_v28 = vrot.slane %v12547_v26, 5 }
 0x1c3   : > { %9678 = vmatprep.subr.bf16.mxu0 %v12280_v4  ;;  %v4289_v49 = vsel %vm12182_vm11, %v4287_v63, %v4288_v20  ;;  %v8472_v20 = vrot.slane %v6120_v58, 9 }
 0x1c4   : > { %v12449_v24 = vpop.f32.mrb[8].mxu1  ;;  %9457 = vmatpush3.bf16.msra.mxu1 %v12461_v16  ;;  %v8347_v63 = vcombine.low %v4286_v36, %v4289_v49  ;;  %v4309_v36 = vrot.slane %v8331_v32, 5  ;;  %v6172_v49 = vsel %vm12182_vm11, %v8471_v21, %v6171_v3  ;;  %v6126_v3 = vld [vmem:[%s11236_s27 + $0x44] sm:$0xe]  ;;  %v8332_v21 = vld [vmem:[%s11236_s27 + $0xa0] sm:$0xe] }
 0x1c5   : > { %14508 = vst [vmem:[#allocation22_spill] sm:$0xff] %v12449_v24  ;;  %v12458_v33 = vpop.f32.mrb[9].mxu1  ;;  %9663 = vmatmul.mubr.bf16.gmra.mrb[24].mxu0 %v8467_v57  ;;  %9458 = vmatprep.subr.bf16.mxu1 %v12491_v44  ;;  %v12516_v57 = vld [vmem:[%s11236_s27 + $0x84] sm:$0xf]  ;;  %v12757_v24 = vld [vmem:[#allocation5 + $0x178] sm:$0xff]  }
 0x1c6   : > { %14509 = vst [vmem:[#allocation23_spill] sm:$0xff] %v12458_v33  ;;  %v12474_v38 = vpop.f32.mrb[10].mxu1  ;;  %9679 = vmatpush3.bf16.msra.mxu0 %v12280_v4  ;;  %9666 = vmatprep.mubr.bf16.mxu0 %v8468_v50  ;;  %v6178_v4 = vrot.slane %v12489_v14, 5  ;;  %v4299_v35 = vrot.slane %v12516_v57, 5  ;;  %v4296_v50 = vsel %vm12182_vm11, %v4294_v27, %v4295_v10  ;;  %v12543_v27 = vld [vmem:[%s11236_s27 + $0x38] sm:$0xf] }
 0x1c7   : > { %14510 = vst [vmem:[#allocation24_spill] sm:$0xff] %v12474_v38  ;;  %v12480_v18 = vpop.f32.mrb[11].mxu1  ;;  %9680 = vmatprep.subr.bf16.mxu0 %v12298_v1  ;;  %9443 = vmatmul.mubr.bf16.gmra.mrb[44].mxu1 %v8321_v31  ;;  %v12532_v31 = vld [vmem:[%s11236_s27 + $0x94] sm:$0xf]  ;;  %v8341_v10 = vrot.slane %v8328_v46, 9  ;;  %14524 = vst [vmem:[#allocation38_spill] sm:$0xff] %v12757_v24 }
 0x1c8   : > { %14511 = vst [vmem:[#allocation25_spill] sm:$0xff] %v12480_v18  ;;  %9459 = vmatpush3.bf16.msra.mxu1 %v12491_v44  ;;  %9462 = vmatprep.mubr.bf16.mxu1 %v8346_v53  ;;  %v4306_v42 = vrot.slane %v12532_v31, 5  ;;  %v6174_v53 = vrot.slane %v6119_v37, 5  ;;  %v6180_v14 = vrot.slane %v6178_v4, 4  ;;  %v4301_v59 = vrot.slane %v4299_v35, 4 }
 0x1c9   : > { %9460 = vmatprep.subr.bf16.mxu1 %v12522_v23  ;;  %v8342_v37 = vrot.slane %v8330_v45, 9  ;;  %v6123_v46 = vld [vmem:[%s11236_s27 + $0x34] sm:$0xe]  ;;  %v4300_v45 = vsel %vm12182_vm11, %v8341_v10, %v4299_v35  ;;  %v6136_v38 = vld [vmem:[%s11236_s27 + $0x78] sm:$0xf] }
 0x1ca   : > { %9681 = vmatpush3.bf16.msra.mxu0 %v12298_v1  ;;  %v8348_v1 = vcombine.low %v4293_v40, %v4296_v50  ;;  %v4308_v58 = vrot.slane %v4306_v42, 4  ;;  %v6175_v8 = vsel %vm12182_vm11, %v6173_v39, %v6174_v53  ;;  %v6179_v40 = vsel %vm12182_vm11, %v8472_v20, %v6178_v4  ;;  %v6125_v50 = vld [vmem:[%s11236_s27 + $0x3c] sm:$0x1]  ;;  %v6128_v4 = vld [vmem:[%s11236_s27 + $0x4c] sm:$0x1] }
 0x1cb   : > { %9682 = vmatprep.subr.bf16.mxu0 %v12315_v5  ;;  %v12575_v39 = vld [vmem:[%s11236_s27 + $0xa4] sm:$0xf]  ;;  %v8479_v32 = vcombine.low %v6172_v49, %v6175_v8  ;;  %v4307_v20 = vsel %vm12182_vm11, %v8342_v37, %v4306_v42  ;;  %v6188_v26 = vrot.slane %v6125_v50, 5  ;;  %v8335_v49 = vld [vmem:[%s11236_s27 + $0xb8] sm:$0x1]  ;;  %v8474_v37 = vrot.slane %v6126_v3, 9 }
 0x1cc   : > { %v12506_v62 = vpop.f32.mrb[12].mxu1  ;;  %9461 = vmatpush3.bf16.msra.mxu1 %v12522_v23  ;;  %v4313_v53 = vrot.slane %v12575_v39, 5  ;;  %v4310_v35 = vsel %vm12182_vm11, %v4308_v58, %v4309_v36  ;;  %v6194_v58 = vrot.slane %v6192_v28, 4  ;;  %v6195_v36 = vrot.slane %v6128_v4, 5  ;;  %v12603_v50 = vld [vmem:[%s11236_s27 + $0x68] sm:$0xf] }
 0x1cd   : > { %14512 = vst [vmem:[#allocation26_spill] sm:$0xff] %v12506_v62  ;;  %v12519_v11 = vpop.f32.mrb[13].mxu1  ;;  %9667 = vmatmul.mubr.bf16.gmra.mrb[28].mxu0 %v8469_v55  ;;  %9478 = vmatprep.subr.bf16.mxu1 %v12549_v15  ;;  %v6185_v55 = vrot.slane %v12543_v27, 5  ;;  %v12588_v27 = vld [vmem:[%s11236_s27 + $0xb4] sm:$0xf]  ;;  %v4323_v4 = vrot.slane %v8335_v49, 5 }
 0x1ce   : > { %14513 = vst [vmem:[#allocation27_spill] sm:$0xff] %v12519_v11  ;;  %v12535_v22 = vpop.f32.mrb[14].mxu1  ;;  %9683 = vmatpush3.bf16.msra.mxu0 %v12315_v5  ;;  %9686 = vmatprep.mubr.bf16.mxu0 %v8478_v56  ;;  %v6182_v5 = vsel %vm12182_vm11, %v6180_v14, %v6181_v25  ;;  %v4303_v56 = vsel %vm12182_vm11, %v4301_v59, %v4302_v61  ;;  %v8333_v14 = vld [vmem:[%s11236_s27 + $0xa8] sm:$0x1]  ;;  %v8334_v25 = vld [vmem:[%s11236_s27 + $0xb0] sm:$0xe] }
 0x1cf   : > { %14514 = vst [vmem:[#allocation28_spill] sm:$0xff] %v12535_v22  ;;  %v12539_v7 = vpop.f32.mrb[15].mxu1  ;;  %9684 = vmatprep.subr.bf16.mxu0 %v12332_v29  ;;  %9463 = vmatmul.mubr.bf16.vlgmr.msra.gmra.mrb[32].mxu1 %v8347_v63  ;;  %v12578_v63 = vld [vmem:[#allocation5 + $0x148] sm:$0xff]   ;;  %v8480_v10 = vcombine.low %v6179_v40, %v6182_v5  ;;  %v8473_v59 = vrot.slane %v6123_v46, 9  ;;  %v6187_v61 = vrot.slane %v6185_v55, 4  ;;  %v8349_v42 = vcombine.low %v4300_v45, %v4303_v56  ;;  %v12607_v45 = vld [vmem:[#allocation5 + $0x150] sm:$0xff]  }
 0x1d0   : > { %14515 = vst [vmem:[#allocation29_spill] sm:$0xff] %v12539_v7  ;;  %9479 = vmatpush3.bf16.msra.mxu1 %v12549_v15  ;;  %9466 = vmatprep.mubr.bf16.mxu1 %v8348_v1  ;;  %v4320_v1 = vrot.slane %v12588_v27, 5  ;;  %v12597_v7 = vld [vmem:[%s11236_s27 + $0x58] sm:$0xf]  ;;  %v8343_v46 = vrot.slane %v8332_v21, 9  ;;  %v4315_v40 = vrot.slane %v4313_v53, 4 }
 0x1d1   : > { %9480 = vmatprep.subr.bf16.mxu1 %v12578_v63  ;;  %v4316_v5 = vrot.slane %v8333_v14, 5  ;;  %v8344_v3 = vrot.slane %v8334_v25, 9  ;;  %v6186_v21 = vsel %vm12182_vm11, %v8473_v59, %v6185_v55  ;;  %v6129_v14 = vld [vmem:[%s11236_s27 + $0x54] sm:$0xe]  ;;  %v6131_v25 = vld [vmem:[%s11236_s27 + $0x5c] sm:$0x1] }
 0x1d2   : > { %9685 = vmatpush3.bf16.msra.mxu0 %v12332_v29  ;;  %v8350_v29 = vcombine.low %v4307_v20, %v4310_v35  ;;  %v4322_v56 = vrot.slane %v4320_v1, 4  ;;  %v6199_v20 = vrot.slane %v12597_v7, 5  ;;  %v6193_v35 = vsel %vm12182_vm11, %v8474_v37, %v6192_v28  ;;  %v6132_v59 = vld [vmem:[%s11236_s27 + $0x64] sm:$0xe]  ;;  %v6134_v28 = vld [vmem:[%s11236_s27 + $0x6c] sm:$0x1] }
 0x1d3   : > { %9702 = vmatprep.subr.bf16.mxu0 %v12351_v6  ;;  %v6206_v55 = vrot.slane %v12603_v50, 5  ;;  %v4314_v7 = vsel %vm12182_vm11, %v8343_v46, %v4313_v53  ;;  %v4321_v37 = vsel %vm12182_vm11, %v8344_v3, %v4320_v1  ;;  %v8475_v46 = vrot.slane %v6129_v14, 9  ;;  %v6135_v14 = vld [vmem:[%s11236_s27 + $0x74] sm:$0xe] }
 0x1d4   : > { %9481 = vmatpush3.bf16.msra.mxu1 %v12578_v63  ;;  %v4324_v53 = vsel %vm12182_vm11, %v4322_v56, %v4323_v4  ;;  %v6209_v18 = vrot.slane %v6134_v28, 5  ;;  %v12650_v4 = vld [vmem:[#allocation5 + $0x160] sm:$0xff]  }
 0x1d5   : > { %v12593_v8 = vpop.f32.mrb[16].mxu1  ;;  %9687 = vmatmul.mubr.bf16.vlgmr.msra.gmra.mrb[16].mxu0 %v8479_v32  ;;  %9482 = vmatprep.subr.bf16.mxu1 %v12607_v45  ;;  %v6189_v32 = vsel %vm12182_vm11, %v6187_v61, %v6188_v26  ;;  %v12634_v61 = vld [vmem:[%s11236_s27 + $0xc4] sm:$0xf]  ;;  %v8352_v1 = vcombine.low %v4321_v37, %v4324_v53  ;;  %v12678_v37 = vld [vmem:[%s11236_s27 + $0x58] sm:$0xf] }
 0x1d6   : > { %14516 = vst [vmem:[#allocation30_spill] sm:$0xff] %v12593_v8  ;;  %v12599_v22 = vpop.f32.mrb[17].mxu1  ;;  %9703 = vmatpush3.bf16.msra.mxu0 %v12351_v6  ;;  %9690 = vmatprep.mubr.bf16.mxu0 %v8480_v10  ;;  %v6196_v6 = vsel %vm12182_vm11, %v6194_v58, %v6195_v36  ;;  %v4317_v10 = vsel %vm12182_vm11, %v4315_v40, %v4316_v5  ;;  %v4327_v26 = vrot.slane %v12634_v61, 5  ;;  %v8336_v58 = vld [vmem:[%s11236_s27 + $0xc0] sm:$0xe]  ;;  %v6201_v40 = vrot.slane %v6199_v20, 4 }
 0x1d7   : > { %14517 = vst [vmem:[#allocation31_spill] sm:$0xff] %v12599_v22  ;;  %v12605_v11 = vpop.f32.mrb[18].mxu1  ;;  %9704 = vmatprep.subr.bf16.mxu0 %v12387_v9  ;;  %9467 = vmatmul.mubr.bf16.gmra.mrb[36].mxu1 %v8349_v42  ;;  %v8481_v49 = vcombine.low %v6186_v21, %v6189_v32  ;;  %v12637_v42 = vld [vmem:[#allocation5 + $0x158] sm:$0xff]   ;;  %v8337_v36 = vld [vmem:[%s11236_s27 + $0xc8] sm:$0x1]  ;;  %v6202_v5 = vrot.slane %v6131_v25, 5  ;;  %v8351_v50 = vcombine.low %v4314_v7, %v4317_v10 }
 0x1d8   : > { %14518 = vst [vmem:[#allocation32_spill] sm:$0xff] %v12605_v11  ;;  %v12610_v62 = vpop.f32.mrb[19].mxu1  ;;  %9483 = vmatpush3.bf16.msra.mxu1 %v12607_v45  ;;  %9470 = vmatprep.mubr.bf16.mxu1 %v8350_v29  ;;  %v8482_v29 = vcombine.low %v6193_v35, %v6196_v6  ;;  %v8476_v21 = vrot.slane %v6132_v59, 9  ;;  %v6208_v32 = vrot.slane %v6206_v55, 4  ;;  %v8345_v3 = vrot.slane %v8336_v58, 9 }
 0x1d9   : > { %14519 = vst [vmem:[#allocation33_spill] sm:$0xff] %v12610_v62  ;;  %9484 = vmatprep.subr.bf16.mxu1 %v12637_v42  ;;  %v4329_v56 = vrot.slane %v4327_v26, 4  ;;  %v6200_v35 = vsel %vm12182_vm11, %v8475_v46, %v6199_v20  ;;  %v6203_v6 = vsel %vm12182_vm11, %v6201_v40, %v6202_v5  ;;  %v6213_v25 = vrot.slane %v6136_v38, 5  ;;  %v6137_v10 = vld [vmem:[%s11236_s27 + $0x7c] sm:$0x1] }
 0x1da   : > { %9705 = vmatpush3.bf16.msra.mxu0 %v12387_v9  ;;  %v4330_v9 = vrot.slane %v8337_v36, 5  ;;  %v6207_v7 = vsel %vm12182_vm11, %v8476_v21, %v6206_v55  ;;  %v12666_v59 = vld [vmem:[%s11236_s27 + $0x84] sm:$0xf]  ;;  %v4328_v38 = vsel %vm12182_vm11, %v8345_v3, %v4327_v26  ;;  %v8483_v28 = vcombine.low %v6200_v35, %v6203_v6  ;;  %v12673_v55 = vld [vmem:[#allocation5 + $0x168] sm:$0xff]   ;;  %v12689_v40 = vld [vmem:[%s11236_s27 + $0x94] sm:$0xf] }
 0x1db   : > { %9706 = vmatprep.subr.bf16.mxu0 %v12402_v12  ;;  %v6215_v53 = vrot.slane %v6213_v25, 4  ;;  %v6216_v58 = vrot.slane %v6137_v10, 5  ;;  %v12682_v36 = vld [vmem:[%s11236_s27 + $0x68] sm:$0xf]  ;;  %v4708_v46 = vrot.slane %v12666_v59, 5 }
 0x1dc   : > { %9485 = vmatpush3.bf16.msra.mxu1 %v12637_v42  ;;  %v4331_v20 = vsel %vm12182_vm11, %v4329_v56, %v4330_v9  ;;  %v8374_v21 = vld [vmem:[%s11236_s27 + $0x88] sm:$0x1]  ;;  %v12701_v3 = vld [vmem:[%s11236_s27 + $0x5c] sm:$0x1]  ;;  %v6606_v56 = vrot.slane %v12678_v37, 5  ;;  %v12704_v9 = vld [vmem:[#allocation5 + $0x170] sm:$0xff]  }
 0x1dd   : > { %9691 = vmatmul.mubr.bf16.gmra.mrb[20].mxu0 %v8481_v49  ;;  %9486 = vmatprep.subr.bf16.mxu1 %v12650_v4  ;;  %v8354_v49 = vld [vmem:[%s11236_s27 + $0x58] sm:$0xf]  ;;  %v8353_v5 = vcombine.low %v4328_v38, %v4331_v20  ;;  %14520 = vst [vmem:[#allocation34_spill] sm:$0xff] %v12704_v9  ;;  %v12725_v10 = vld [vmem:[%s11236_s27 + $0xa8] sm:$0xf] }
 0x1de   : > { %9707 = vmatpush3.bf16.msra.mxu0 %v12402_v12  ;;  %9694 = vmatprep.mubr.bf16.mxu0 %v8482_v29  ;;  %v6210_v12 = vsel %vm12182_vm11, %v6208_v32, %v6209_v18  ;;  %v8477_v18 = vrot.slane %v6135_v14, 9  ;;  %v12685_v29 = vld [vmem:[%s11236_s27 + $0x78] sm:$0xf]  ;;  %v8362_v32 = vcombine.low %v12422_v54, %v8354_v49  ;;  %v12715_v54 = vld [vmem:[%s11236_s27 + $0x90] sm:$0xe] }
 0x1df   : > { %9708 = vmatprep.subr.bf16.mxu0 %v12417_v52  ;;  %9471 = vmatmul.mubr.bf16.gmra.mrb[40].mxu1 %v8351_v50  ;;  %v8484_v26 = vcombine.low %v6207_v7, %v6210_v12  ;;  %v12693_v50 = vld [vmem:[%s11236_s27 + $0x88] sm:$0xf]  ;;  %v12712_v6 = vld [vmem:[%s11236_s27 + $0x98] sm:$0xf]  ;;  %v6217_v12 = vsel %vm12182_vm11, %v6215_v53, %v6216_v58  ;;  %v8513_v53 = vld [vmem:[%s11236_s27 + $0x64] sm:$0xe] }
 0x1e0   : > { %9487 = vmatpush3.bf16.msra.mxu1 %v12650_v4  ;;  %9474 = vmatprep.mubr.bf16.mxu1 %v8352_v1  ;;  %v8510_v1 = vld [vmem:[%s11236_s27 + $0x54] sm:$0xe]  ;;  %v12709_v35 = vsel %vm12182_vm11, %v8477_v18, %v6213_v25  ;;  %v12719_v7 = vld [vmem:[%s11236_s27 + $0x68] sm:$0xf]  ;;  %v12728_v25 = vld [vmem:[%s11236_s27 + $0xb8] sm:$0xf] }
 0x1e1   : > { %9488 = vmatprep.subr.bf16.mxu1 %v12673_v55  ;;  %v12731_v38 = vld [vmem:[%s11236_s27 + $0xc8] sm:$0xf]  ;;  %v4711_v18 = vrot.slane %v8374_v21, 5  ;;  %v8377_v49 = vld [vmem:[%s11236_s27 + $0x98] sm:$0x1]  ;;  %v6608_v21 = vrot.slane %v6606_v56, 4  ;;  %v8485_v33 = vcombine.low %v12709_v35, %v6217_v12 }
 0x1e2   : > { %9709 = vmatpush3.bf16.msra.mxu0 %v12417_v52  ;;  %v8372_v52 = vld [vmem:[%s11236_s27 + $0x80] sm:$0xe]  ;;  %v12741_v58 = vld [vmem:[%s11236_s27 + $0x6c] sm:$0x1]  ;;  %v12805_v35 = vld [vmem:[%s11236_s27 + $0x88] sm:$0xf] }
 0x1e3   : > { %9710 = vmatprep.subr.bf16.mxu0 %v12440_v2  ;;  %v8396_v20 = vrot.slane %v8372_v52, 9  ;;  %v10471_v52 = vld [vmem:[%s11236_s27 + $0x50] sm:$0xff]  }
 0x1e4   : > { %9489 = vmatpush3.bf16.msra.mxu1 %v12673_v55 }
 0x1e5   : > { %9695 = vmatmul.mubr.bf16.gmra.mrb[24].mxu0 %v8483_v28  ;;  %9490 = vmatprep.subr.bf16.mxu1 %v12704_v9  ;;  %v4710_v28 = vrot.slane %v4708_v46, 4  ;;  %v12773_v12 = vsel %vm12182_vm11, %v8396_v20, %v4708_v46 }
 0x1e6   : > { %9711 = vmatpush3.bf16.msra.mxu0 %v12440_v2  ;;  %9698 = vmatprep.mubr.bf16.mxu0 %v8484_v26  ;;  %v8363_v2 = vcombine.low %v12455_v43, %v12682_v36  ;;  %v8534_v26 = vrot.slane %v8510_v1, 9  ;;  %v6609_v43 = vrot.slane %v12701_v3, 5  ;;  %v6613_v36 = vrot.slane %v12719_v7, 5  ;;  %v12752_v1 = vld [vmem:[%s11236_s27 + $0xa4] sm:$0xf] }
 0x1e7   : > { %9712 = vmatprep.subr.bf16.mxu0 %v12461_v16  ;;  %9475 = vmatmul.mubr.bf16.gmra.mrb[44].mxu1 %v8353_v5  ;;  %14522 = vst [vmem:[#allocation36_spill] sm:$0xff] %v12752_v1  ;;  %v14525_v5 = vrot.slane %v12689_v40, 5  ;;  %v4718_v3 = vrot.slane %v8377_v49, 5  ;;  %v12764_v7 = vld [vmem:[%s11236_s27 + $0x78] sm:$0xf]  ;;  %v8535_v49 = vrot.slane %v8513_v53, 9 }
 0x1e8   : > { %v12743_v14 = vpop.f32.mrb[20].mxu1  ;;  %9491 = vmatpush3.bf16.msra.mxu1 %v12704_v9  ;;  %9494 = vmatprep.mubr.bf16.mxu1 %v8362_v32  ;;  %v8397_v32 = vrot.slane %v12715_v54, 9  ;;  %v12777_v54 = vsel %vm12182_vm11, %v4710_v28, %v4711_v18  ;;  %v12796_v28 = vsel %vm12182_vm11, %v8534_v26, %v6606_v56  ;;  %v12799_v18 = vld [vmem:[%s11236_s27 + $0x74] sm:$0xe]  ;;  %v12810_v46 = vsel %vm12182_vm11, %v6608_v21, %v6609_v43  ;;  %v12815_v26 = vld [vmem:[%s11236_s27 + $0x7c] sm:$0x1] }
 0x1e9   : > { %14521 = vst [vmem:[#allocation35_spill] sm:$0xff] %v12743_v14  ;;  %v12754_v37 = vpop.f32.mrb[21].mxu1  ;;  %9492 = vmatprep.subr.bf16.mxu1 %v12757_v24  ;;  %v4717_v47 = vrot.slane %v14525_v5, 4  ;;  %14527 = vst [vmem:[#allocation40_spill] sm:$0xff] %v12777_v54  ;;  %v12780_v5 = vld [vmem:[%s11236_s27 + $0xa0] sm:$0xe]  ;;  %v12843_v21 = vsel %vm12182_vm11, %v8535_v49, %v6613_v36 }
 0x1ea   : > { %14523 = vst [vmem:[#allocation37_spill] sm:$0xff] %v12754_v37  ;;  %v12766_v51 = vpop.f32.mrb[22].mxu1  ;;  %9713 = vmatpush3.bf16.msra.mxu0 %v12461_v16  ;;  %14529 = vst [vmem:[#allocation42_spill] sm:$0xff] %v12796_v28  ;;  %v12802_v53 = vld [vmem:[%s11236_s27 + $0xb4] sm:$0xf]  ;;  %v6615_v20 = vrot.slane %v6613_v36, 4 }
 0x1eb   : > { %14526 = vst [vmem:[#allocation39_spill] sm:$0xff] %v12766_v51  ;;  %v12785_v51 = vpop.f32.mrb[23].mxu1  ;;  %9714 = vmatprep.subr.bf16.mxu0 %v12491_v44  ;;  %14530 = vst [vmem:[#allocation43_spill] sm:$0xff] %v12802_v53  ;;  %v6616_v16 = vrot.slane %v12741_v58, 5  ;;  %v4722_v56 = vrot.slane %v12752_v1, 5  ;;  %v12820_v37 = vld [vmem:[#allocation5 + $0x180] sm:$0xff]  }
 0x1ec   : > { %14528 = vst [vmem:[#allocation41_spill] sm:$0xff] %v12785_v51  ;;  %9493 = vmatpush3.bf16.msra.mxu1 %v12757_v24  ;;  %14531 = vst [vmem:[#allocation44_spill] sm:$0xff] %v12810_v46  ;;  %v12818_v51 = vld [vmem:[%s11236_s27 + $0xc4] sm:$0xf]  ;;  %v14534_v43 = vrot.slane %v12689_v40, 5  ;;  %v12833_v24 = vsel %vm12182_vm11, %v4717_v47, %v4718_v3  ;;  %v6627_v47 = vrot.slane %v12805_v35, 5  ;;  %v14537_v35 = vcombine.low %v12471_v48, %v12685_v29 }
 0x1ed   : > { %14532 = vst [vmem:[#allocation45_spill] sm:$0xff] %v12818_v51  ;;  %9699 = vmatmul.mubr.bf16.gmra.mrb[28].mxu0 %v8485_v33  ;;  %14533 = vst [vmem:[#allocation46_spill] sm:$0xff] %v12820_v37  ;;  %9510 = vmatprep.subr.bf16.mxu1 %v12820_v37  ;;  %v8381_v1 = vld [vmem:[%s11236_s27 + $0xb0] sm:$0xe]  ;;  %v12837_v33 = vld [vmem:[%s11236_s27 + $0xb8] sm:$0x1] }
 0x1ee   : > { %v12829_v58 = vsel %vm12182_vm11, %v8397_v32, %v14534_v43  ;;  %14536 = vst [vmem:[#allocation48_spill] sm:$0xff] %v12833_v24  ;;  %9715 = vmatpush3.bf16.msra.mxu0 %v12491_v44  ;;  %9718 = vmatprep.mubr.bf16.mxu0 %v10471_v52  ;;  %v6620_v32 = vrot.slane %v12764_v7, 5  ;;  %v4729_v43 = vrot.slane %v12802_v53, 5  ;;  %v8521_v14 = vld [vmem:[%s11236_s27 + $0x8c] sm:$0x1]  ;;  %v10473_v3 = vld [vmem:[%s11236_s27 + $0x60] sm:$0xff]  }
 0x1ef   : > { %14535 = vst [vmem:[#allocation47_spill] sm:$0xff] %v12829_v58  ;;  %9716 = vmatprep.subr.bf16.mxu0 %v12522_v23  ;;  %9495 = vmatmul.mubr.bf16.vlgmr.msra.gmra.mrb[32].mxu1 %v8363_v2  ;;  %v8398_v52 = vrot.slane %v12780_v5, 9  ;;  %v4725_v36 = vrot.slane %v12783_v41, 5  ;;  %v4736_v7 = vrot.slane %v12818_v51, 5  ;;  %v12857_v49 = vld [vmem:[%s11236_s27 + $0x98] sm:$0xf]  ;;  %v12868_v5 = vsel %vm12182_vm11, %v6615_v20, %v6616_v16 }
 0x1f0   : > { %9511 = vmatpush3.bf16.msra.mxu1 %v12820_v37  ;;  %9498 = vmatprep.mubr.bf16.mxu1 %v14537_v35  ;;  %v10475_v2 = vld [vmem:[%s11236_s27 + $0x70] sm:$0xff]   ;;  %v4724_v41 = vrot.slane %v4722_v56, 4  ;;  %v8536_v44 = vrot.slane %v12799_v18, 9  ;;  %v8384_v51 = vld [vmem:[%s11236_s27 + $0xc0] sm:$0xe]  ;;  %v12873_v28 = vld [vmem:[#allocation5 + $0x188] sm:$0xff]  }
 0x1f1   : > { %v8386_v46 = vld [vmem:[%s11236_s27 + $0xc8] sm:$0x1]  ;;  %9512 = vmatprep.subr.bf16.mxu1 %v12873_v28  ;;  %v6623_v48 = vrot.slane %v12815_v26, 5  ;;  %v8399_v29 = vrot.slane %v8381_v1, 9  ;;  %v4732_v35 = vrot.slane %v12837_v33, 5  ;;  %v8537_v53 = vrot.slane %v8519_v13, 9 }
 0x1f2   : > { %v12879_v37 = vld [vmem:[%s11236_s27 + $0xd4] sm:$0xf]  ;;  %9717 = vmatpush3.bf16.msra.mxu0 %v12522_v23  ;;  %v6622_v16 = vrot.slane %v6620_v32, 4  ;;  %v4731_v20 = vrot.slane %v4729_v43, 4  ;;  %v6629_v18 = vrot.slane %v6627_v47, 4  ;;  %v6630_v24 = vrot.slane %v8521_v14, 5 }
 0x1f3   : > { %14538 = vst [vmem:[#allocation49_spill] sm:$0xff] %v12879_v37  ;;  %v12883_v58 = vld [vmem:[%s11236_s27 + $0xa8] sm:$0xf]  ;;  %9734 = vmatprep.subr.bf16.mxu0 %v12549_v15  ;;  %v8400_v26 = vrot.slane %v8384_v51, 9  ;;  %v4738_v33 = vrot.slane %v4736_v7, 4  ;;  %v4739_v13 = vrot.slane %v8386_v46, 5  ;;  %v12892_v23 = vsel %vm12182_vm11, %v8398_v52, %v4722_v56 }
 0x1f4   : > { %9513 = vmatpush3.bf16.msra.mxu1 %v12873_v28  ;;  %v12896_v14 = vsel %vm12182_vm11, %v4724_v41, %v4725_v36  ;;  %v6634_v9 = vrot.slane %v12857_v49, 5  ;;  %v8387_v54 = vld [vmem:[%s11236_s27 + $0xd0] sm:$0xe]  ;;  %v4743_v51 = vrot.slane %v12879_v37, 5  ;;  %v8525_v1 = vld [vmem:[%s11236_s27 + $0xa4] sm:$0xe]  ;;  %v12907_v56 = vsel %vm12182_vm11, %v8536_v44, %v6620_v32 }
 0x1f5   : > { %9719 = vmatmul.mubr.bf16.vlgmr.msra.gmra.mrb[16].mxu0 %v10473_v3  ;;  %v12902_v46 = vld [vmem:[#allocation5 + $0x190] sm:$0xff]   ;;  %v12911_v52 = vsel %vm12182_vm11, %v8399_v29, %v4729_v43  ;;  %v12915_v36 = vsel %vm12182_vm11, %v8537_v53, %v6627_v47  ;;  %v8524_v49 = vld [vmem:[%s11236_s27 + $0x9c] sm:$0x1]  ;;  %v8389_v41 = vld [vmem:[%s11236_s27 + $0xd8] sm:$0x1]  ;;  %v6641_v3 = vrot.slane %v12883_v58, 5  ;;  %v12923_v32 = vsel %vm12182_vm11, %v6622_v16, %v6623_v48 }
 0x1f6   : > { %14539 = vst [vmem:[#allocation50_spill] sm:$0xff] %v12902_v46  ;;  %9514 = vmatprep.subr.bf16.mxu1 %v12902_v46  ;;  %14540 = vst [vmem:[#allocation51_spill] sm:$0xff] %v12915_v36  ;;  %9735 = vmatpush3.bf16.msra.mxu0 %v12549_v15  ;;  %v12927_v43 = vsel %vm12182_vm11, %v4731_v20, %v4732_v35  ;;  %v12931_v53 = vsel %vm12182_vm11, %v6629_v18, %v6630_v24  ;;  %v8538_v47 = vrot.slane %v8522_v30, 9  ;;  %v8527_v44 = vld [vmem:[%s11236_s27 + $0xac] sm:$0x1]  ;;  %v10477_v58 = vld [vmem:[%s11236_s27 + $0x80] sm:$0xff]  }
 0x1f7   : > { %9722 = vmatprep.mubr.bf16.mxu0 %v10475_v2  ;;  %14541 = vst [vmem:[#allocation52_spill] sm:$0xff] %v12931_v53  ;;  %9736 = vmatprep.subr.bf16.mxu0 %v12578_v63  ;;  %v14542_v15 = vcombine.low %v12516_v57, %v12693_v50  ;;  %v12941_v2 = vsel %vm12182_vm11, %v8400_v26, %v4736_v7  ;;  %v8401_v24 = vrot.slane %v8387_v54, 9  ;;  %v8539_v29 = vrot.slane %v8525_v1, 9  ;;  %v8390_v30 = vld [vmem:[%s11236_s27 + $0xe0] sm:$0xe]  ;;  %v12958_v54 = vld [vmem:[#allocation5 + $0x198] sm:$0xff]  }
 0x1f8   : > { %v12945_v48 = vsel %vm12182_vm11, %v4738_v33, %v4739_v13  ;;  %v12949_v35 = vld [vmem:[%s11236_s27 + $0xe4] sm:$0xf]  ;;  %9515 = vmatpush3.bf16.msra.mxu1 %v12902_v46  ;;  %v14544_v57 = vcombine.low %v12532_v31, %v12712_v6  ;;  %v6636_v50 = vrot.slane %v6634_v9, 4  ;;  %v6637_v7 = vrot.slane %v8524_v49, 5  ;;  %v12956_v18 = vld [vmem:[%s11236_s27 + $0xe8] sm:$0x1] }
 0x1f9   : > { %9499 = vmatmul.mubr.bf16.gmra.mrb[36].mxu1 %v14542_v15  ;;  %14543 = vst [vmem:[#allocation53_spill] sm:$0xff] %v12949_v35  ;;  %v4745_v16 = vrot.slane %v4743_v51, 4  ;;  %v4746_v20 = vrot.slane %v8389_v41, 5  ;;  %14545 = vst [vmem:[#allocation54_spill] sm:$0xff] %v12958_v54  ;;  %9516 = vmatprep.subr.bf16.mxu1 %v12958_v54  ;;  %v6643_v6 = vrot.slane %v6641_v3, 4  ;;  %v6644_v26 = vrot.slane %v8527_v44, 5 }
 0x1fa   : > { %9502 = vmatprep.mubr.bf16.mxu1 %v14544_v57  ;;  %v12966_v33 = vld [vmem:[%s11236_s27 + $0xb4] sm:$0xe]  ;;  %v12969_v13 = vld [vmem:[%s11236_s27 + $0xb8] sm:$0xf]  ;;  %9737 = vmatpush3.bf16.msra.mxu0 %v12578_v63  ;;  %v8402_v31 = vrot.slane %v8390_v30, 9  ;;  %v12989_v63 = vsel %vm12182_vm11, %v8538_v47, %v6634_v9  ;;  %v12993_v41 = vsel %vm12182_vm11, %v8401_v24, %v4743_v51  ;;  %v12997_v15 = vsel %vm12182_vm11, %v8539_v29, %v6641_v3 }
 0x1fb   : > { %v10479_v49 = vld [vmem:[%s11236_s27 + $0x90] sm:$0xff]   ;;  %v12980_v44 = vld [vmem:[%s11236_s27 + $0xbc] sm:$0x1]  ;;  %v8412_v37 = vld [vmem:[%s11236_s27 + $0x80] sm:$0xc]  ;;  %9738 = vmatprep.subr.bf16.mxu0 %v12607_v45  ;;  %v4750_v30 = vrot.slane %v12949_v35, 5  ;;  %v13011_v9 = vsel %vm12182_vm11, %v6636_v50, %v6637_v7  ;;  %v13015_v51 = vsel %vm12182_vm11, %v4745_v16, %v4746_v20  ;;  %v13027_v50 = vsel %vm12182_vm11, %v6643_v6, %v6644_v26 }
 0x1fc   : > { %v12983_v1 = vld [vmem:[%s11236_s27 + $0xf4] sm:$0xf]  ;;  %v13001_v57 = vld [vmem:[%s11236_s27 + $0xf0] sm:$0xe]  ;;  %v13004_v53 = vld [vmem:[%s11236_s27 + $0xc8] sm:$0xf]  ;;  %9517 = vmatpush3.bf16.msra.mxu1 %v12958_v54 }
 0x1fd   : > { %14546 = vst [vmem:[#allocation55_spill] sm:$0xff] %v12983_v1  ;;  %v13006_v36 = vpop.f32.mrb[24].mxu1  ;;  %v4753_v3 = vrot.slane %v12956_v18, 5  ;;  %v6648_v47 = vrot.slane %v12969_v13, 5  ;;  %v8395_v24 = vld [vmem:[%s11236_s27 + $0xf8] sm:$0x1]  ;;  %9723 = vmatmul.mubr.bf16.gmra.mrb[20].mxu0 %v10477_v58  ;;  %v13036_v58 = vsel %vm12182_vm11, %v8402_v31, %v4750_v30 }
 0x1fe   : > { %14547 = vst [vmem:[#allocation56_spill] sm:$0xff] %v13006_v36  ;;  %v13020_v29 = vpop.f32.mrb[25].mxu1  ;;  %v13022_v35 = vld [vmem:[#allocation5 + $0x1a0] sm:$0xff]   ;;  %v4757_v7 = vrot.slane %v12983_v1, 5  ;;  %v4924_v20 = vshrl.u32 %v8412_v37, 16  ;;  %v4927_v18 = vshll.u32 %v8412_v37, 16  ;;  %9739 = vmatpush3.bf16.msra.mxu0 %v12607_v45  ;;  %9726 = vmatprep.mubr.bf16.mxu0 %v10479_v49  ;;  %v14552_v45 = vcombine.low %v12575_v39, %v12725_v10 }
 0x1ff   : > { %14548 = vst [vmem:[#allocation57_spill] sm:$0xff] %v13020_v29  ;;  %14549 = vst [vmem:[#allocation58_spill] sm:$0xff] %v13022_v35  ;;  %9518 = vmatprep.subr.bf16.mxu1 %v13022_v35  ;;  %v8531_v16 = vld [vmem:[%s11236_s27 + $0xc4] sm:$0xe]  ;;  %v13031_v54 = vpop.f32.mrb[26].mxu1  ;;  %v8540_v13 = vrot.slane %v12966_v33, 9  ;;  %9740 = vmatprep.subr.bf16.mxu0 %v12637_v42  ;;  %v13058_v10 = vadd.f32 %v12593_v8, %v12385_v0 }
 0x200   : > { %14550 = vst [vmem:[#allocation59_spill] sm:$0xff] %v13031_v54  ;;  %v6655_v6 = vrot.slane %v13004_v53, 5  ;;  %v4933_v26 = vshrl.u32 %v12666_v59, 16  ;;  %v13041_v1 = vpop.f32.mrb[27].mxu1  ;;  %v4752_v37 = vrot.slane %v4750_v30, 4  ;;  %v6651_v31 = vrot.slane %v12980_v44, 5  ;;  %9519 = vmatpush3.bf16.msra.mxu1 %v13022_v35 }
 0x201   : > { %14551 = vst [vmem:[#allocation60_spill] sm:$0xff] %v13041_v1  ;;  %9503 = vmatmul.mubr.bf16.gmra.mrb[40].mxu1 %v14552_v45  ;;  %v8403_v49 = vrot.slane %v13001_v57, 9  ;;  %v8533_v33 = vld [vmem:[%s11236_s27 + $0xcc] sm:$0x1]  ;;  %v4936_v46 = vshll.u32 %v12666_v59, 16  ;;  %v14553_v53 = vcombine.low %v12588_v27, %v12728_v25  ;;  %v6650_v1 = vrot.slane %v6648_v47, 4 }
 0x202   : > { %v4760_v54 = vrot.slane %v8395_v24, 5  ;;  %v8541_v29 = vrot.slane %v8531_v16, 9  ;;  %v8413_v39 = vld [vmem:[%s11236_s27 + $0x88] sm:$0x7]  ;;  %v10481_v44 = vld [vmem:[%s11236_s27 + $0xa0] sm:$0xff]   ;;  %v4759_v59 = vrot.slane %v4757_v7, 4  ;;  %v13066_v27 = vadd.f32 %v12599_v22, %v12391_v34  ;;  %9741 = vmatpush3.bf16.msra.mxu0 %v12637_v42 }
 0x203   : > { %9506 = vmatprep.mubr.bf16.mxu1 %v14553_v53  ;;  %v13061_v57 = vld [vmem:[#allocation5 + $0x1a8] sm:$0xff]   ;;  %v4926_v30 = vrot.slane %v4924_v20, 6  ;;  %v4929_v45 = vrot.slane %v4927_v18, 7  ;;  %v10483_v25 = vld [vmem:[%s11236_s27 + $0xb0] sm:$0xff]   ;;  %v6657_v24 = vrot.slane %v6655_v6, 4  ;;  %v6658_v16 = vrot.slane %v8533_v33, 5  ;;  %9742 = vmatprep.subr.bf16.mxu0 %v12650_v4 }
 0x204   : > { %9520 = vmatprep.subr.bf16.mxu1 %v13061_v57  ;;  %v4935_v0 = vrot.slane %v4933_v26, 6  ;;  %v13072_v53 = vadd.f32 %v12605_v11, %v12395_v60  ;;  %v4938_v8 = vrot.slane %v4936_v46, 7  ;;  %v4943_v35 = vshrl.u32 %v8413_v39, 16  ;;  %v8414_v18 = vld [vmem:[%s11236_s27 + $0x90] sm:$0xc]  ;;  %v14558_v33 = vld [vmem:[#allocation40_spill] sm:$0xff] }
 0x205   : > { %v4946_v20 = vshll.u32 %v8413_v39, 16  ;;  %v13078_v34 = vadd.f32 %v12610_v62, %v12398_v17  ;;  %9521 = vmatpush3.bf16.msra.mxu1 %v13061_v57  ;;  %v13083_v42 = vsel %vm12182_vm11, %v4752_v37, %v4753_v3  ;;  %v13087_v60 = vsel %vm12182_vm11, %v8540_v13, %v6648_v47  ;;  %9727 = vmatmul.mubr.bf16.gmra.mrb[24].mxu0 %v10481_v44  ;;  %v13097_v17 = vld [vmem:[#allocation5 + $0x1b0] sm:$0xff]   ;;  %v8417_v11 = vld [vmem:[%s11236_s27 + $0xa8] sm:$0x7] }
 0x206   : > { %v13091_v46 = vsel %vm12182_vm11, %v8403_v49, %v4757_v7  ;;  %v13095_v26 = vsel %vm12182_vm11, %v8541_v29, %v6655_v6  ;;  %14555 = vst [vmem:[#allocation62_spill] sm:$0xff] %v13097_v17  ;;  %9522 = vmatprep.subr.bf16.mxu1 %v13097_v17  ;;  %v13102_v3 = vsel %vm12182_vm11, %v6650_v1, %v6651_v31  ;;  %v4952_v7 = vshrl.u32 %v8414_v18, 16 }
 0x207   : > { %14554 = vst [vmem:[#allocation61_spill] sm:$0xff] %v13095_v26  ;;  %v13106_v47 = vsel %vm12182_vm11, %v4759_v59, %v4760_v54  ;;  %v4930_v13 = vor.u32 %v4929_v45, %v4926_v30  ;;  %9743 = vmatpush3.bf16.msra.mxu0 %v12650_v4  ;;  %9730 = vmatprep.mubr.bf16.mxu0 %v10483_v25  ;;  %v4955_v6 = vshll.u32 %v8414_v18, 16  ;;  %v4961_v37 = vshrl.u32 %v12689_v40, 16  ;;  %v8415_v45 = vld [vmem:[%s11236_s27 + $0x98] sm:$0x7]  ;;  %v14561_v18 = vld [vmem:[#allocation34_spill] sm:$0xff] }
 0x208   : > { %v13111_v29 = vsel %vm12182_vm11, %v6657_v24, %v6658_v16  ;;  %9744 = vmatprep.subr.bf16.mxu0 %v12673_v55  ;;  %v14557_v1 = vcombine.low %v12634_v61, %v12731_v38  ;;  %v13118_v54 = vor.u32 %v4938_v8, %v4935_v0  ;;  %v4945_v4 = vrot.slane %v4943_v35, 6  ;;  %v10485_v38 = vld [vmem:[%s11236_s27 + $0xc0] sm:$0xff]   ;;  %v13132_v35 = vld [vmem:[#allocation5 + $0x1b8] sm:$0xff]   ;;  %v8418_v59 = vld [vmem:[%s11236_s27 + $0xb0] sm:$0xc] }
 0x209   : > { %14556 = vst [vmem:[#allocation63_spill] sm:$0xff] %v13111_v29  ;;  %v4948_v31 = vrot.slane %v4946_v20, 7  ;;  %v4964_v49 = vshll.u32 %v12689_v40, 16  ;;  %9523 = vmatpush3.bf16.msra.mxu1 %v13097_v17  ;;  %v14559_v39 = vcombine.low %v12773_v12, %v14558_v33  ;;  %14560 = vst [vmem:[#allocation40_spill] sm:$0xff] %v13132_v35  ;;  %v13141_v30 = vrot.slane %v4930_v13, 4  ;;  %v14562_v13 = vld [vmem:[#allocation18_spill] sm:$0xff] }
 0x20a   : > { %9507 = vmatmul.mubr.bf16.gmra.mrb[44].mxu1 %v14557_v1  ;;  %9524 = vmatprep.subr.bf16.mxu1 %v13132_v35  ;;  %v8416_v25 = vld [vmem:[%s11236_s27 + $0xa0] sm:$0xc]  ;;  %v13148_v16 = vrot.slane %v4952_v7, 6  ;;  %v4957_v0 = vrot.slane %v4955_v6, 7  ;;  %v4963_v20 = vrot.slane %v4961_v37, 6  ;;  %v4941_v1 = vrot.slane %v13118_v54, 4 }
 0x20b   : > { %9526 = vmatprep.mubr.bf16.mxu1 %v14559_v39  ;;  %9745 = vmatpush3.bf16.msra.mxu0 %v12673_v55  ;;  %v4949_v33 = vor.u32 %v4948_v31, %v4945_v4  ;;  %v4966_v39 = vrot.slane %v4964_v49, 7  ;;  %v14563_v12 = vld [vmem:[#allocation35_spill] sm:$0xff]  ;;  %v4971_v55 = vshrl.u32 %v8415_v45, 16  ;;  %v4974_v24 = vshll.u32 %v8415_v45, 16  ;;  %v14565_v6 = vld [vmem:[#allocation37_spill] sm:$0xff]  ;;  %v13162_v61 = vld [vmem:[#allocation5 + $0x1c0] sm:$0xff]  }
 0x20c   : > { %9746 = vmatprep.subr.bf16.mxu0 %v14561_v18  ;;  %v13155_v8 = vadd.f32 %v14563_v12, %v14562_v13  ;;  %v4980_v7 = vshrl.u32 %v8416_v25, 16  ;;  %v14564_v40 = vld [vmem:[#allocation19_spill] sm:$0xff]  ;;  %14567 = vst [vmem:[#allocation18_spill] sm:$0xff] %v13162_v61  ;;  %v4983_v49 = vshll.u32 %v8416_v25, 16  ;;  %v14569_v13 = vld [vmem:[#allocation36_spill] sm:$0xff]  ;;  %v5008_v19 = vshrl.u32 %v8418_v59, 16 }
 0x20d   : > { %9525 = vmatpush3.bf16.msra.mxu1 %v13132_v35  ;;  %v13160_v37 = vadd.f32 %v14565_v6, %v14564_v40  ;;  %9731 = vmatmul.mubr.bf16.gmra.mrb[28].mxu0 %v10485_v38  ;;  %v4989_v44 = vshrl.u32 %v14569_v13, 16  ;;  %v14570_v45 = vld [vmem:[#allocation20_spill] sm:$0xff]  ;;  %v14571_v12 = vld [vmem:[#allocation39_spill] sm:$0xff]  ;;  %v14573_v38 = vld [vmem:[#allocation42_spill] sm:$0xff]  ;;  %v4992_v22 = vshll.u32 %v14569_v13, 16  ;;  %v5011_v35 = vshll.u32 %v8418_v59, 16 }
 0x20e   : > { %9542 = vmatprep.subr.bf16.mxu1 %v13162_v61  ;;  %v13172_v62 = vadd.f32 %v14571_v12, %v14570_v45  ;;  %v14574_v40 = vld [vmem:[#allocation44_spill] sm:$0xff]  ;;  %v14576_v29 = vld [vmem:[#allocation21_spill] sm:$0xff]  ;;  %v14579_v26 = vld [vmem:[#allocation38_spill] sm:$0xff] }
 0x20f   : > { %14566 = vst [vmem:[#allocation34_spill] sm:$0xff] %v13160_v37  ;;  %9747 = vmatpush3.bf16.msra.mxu0 %v14561_v18  ;;  %v14575_v6 = vcombine.low %v14573_v38, %v14574_v40  ;;  %v14577_v31 = vld [vmem:[#allocation41_spill] sm:$0xff]  ;;  %v14580_v45 = vld [vmem:[#allocation47_spill] sm:$0xff]  ;;  %v14581_v12 = vld [vmem:[#allocation48_spill] sm:$0xff]  ;;  %v13190_v18 = vsel %vm11269_vm5, %v4941_v1, %v4949_v33  ;;  %v13206_v1 = vrot.slane %v4974_v24, 7  ;;  %v5010_v24 = vrot.slane %v5008_v19, 6 }
 0x210   : > { %14572 = vst [vmem:[#allocation19_spill] sm:$0xff] %v13172_v62  ;;  %v13182_v25 = vadd.f32 %v14577_v31, %v14576_v29  ;;  %9748 = vmatprep.subr.bf16.mxu0 %v14579_v26  ;;  %v14582_v17 = vcombine.low %v14580_v45, %v14581_v12  ;;  %v8419_v13 = vld [vmem:[%s11236_s27 + $0xb8] sm:$0x7]  ;;  %v13196_v29 = vpop.f32.mrb[28].mxu1  ;;  %v14585_v31 = vcombine.low %v12892_v23, %v12896_v14  ;;  %v13204_v12 = vrot.slane %v4971_v55, 6  ;;  %v13213_v45 = vld [vmem:[#allocation5 + $0x1c8] sm:$0xff]  }
 0x211   : > { %9750 = vmatprep.mubr.bf16.mxu0 %v14575_v6  ;;  %v4958_v6 = vor.u32 %v4957_v0, %v13148_v16  ;;  %v14583_v38 = vld [vmem:[#allocation43_spill] sm:$0xff]  ;;  %14584 = vst [vmem:[#allocation36_spill] sm:$0xff] %v13196_v29  ;;  %v13208_v16 = vrot.slane %v4980_v7, 6  ;;  %v13210_v0 = vpop.f32.mrb[29].mxu1  ;;  %v8420_v33 = vld [vmem:[%s11236_s27 + $0xc0] sm:$0xc] }
 0x212   : > { %14578 = vst [vmem:[#allocation16_spill] sm:$0xff] %v13182_v25  ;;  %9527 = vmatmul.mubr.bf16.vlgmr.msra.gmra.mrb[32].mxu1 %v14582_v17  ;;  %v5017_v59 = vshrl.u32 %v14583_v38, 16  ;;  %v5020_v40 = vshll.u32 %v14583_v38, 16  ;;  %v13202_v17 = vor.u32 %v4966_v39, %v4963_v20  ;;  %14586 = vst [vmem:[#allocation20_spill] sm:$0xff] %v13210_v0  ;;  %v4985_v38 = vrot.slane %v4983_v49, 7  ;;  %v13216_v14 = vpop.f32.mrb[30].mxu1 }
 0x213   : > { %9543 = vmatpush3.bf16.msra.mxu1 %v13162_v61  ;;  %9530 = vmatprep.mubr.bf16.mxu1 %v14585_v31  ;;  %14587 = vst [vmem:[#allocation42_spill] sm:$0xff] %v13213_v45  ;;  %v4991_v61 = vrot.slane %v4989_v44, 6  ;;  %v4999_v25 = vshrl.u32 %v8417_v11, 16  ;;  %v5002_v23 = vshll.u32 %v8417_v11, 16  ;;  %14588 = vst [vmem:[#allocation44_spill] sm:$0xff] %v13216_v14  ;;  %v4994_v20 = vrot.slane %v4992_v22, 7 }
 0x214   : > { %9544 = vmatprep.subr.bf16.mxu1 %v13213_v45  ;;  %9749 = vmatpush3.bf16.msra.mxu0 %v14579_v26  ;;  %v5013_v39 = vrot.slane %v5011_v35, 7  ;;  %v5027_v55 = vshrl.u32 %v8419_v13, 16  ;;  %v13219_v7 = vpop.f32.mrb[31].mxu1  ;;  %v14590_v31 = vld [vmem:[#allocation46_spill] sm:$0xff]  ;;  %v5019_v62 = vrot.slane %v5017_v59, 6  ;;  %v5022_v0 = vrot.slane %v5020_v40, 7 }
 0x215   : > { %14589 = vst [vmem:[#allocation21_spill] sm:$0xff] %v13219_v7  ;;  %9766 = vmatprep.subr.bf16.mxu0 %v14590_v31  ;;  %v5030_v37 = vshll.u32 %v8419_v13, 16  ;;  %v5036_v49 = vshrl.u32 %v8420_v33, 16  ;;  %v13223_v11 = vrot.slane %v4958_v6, 4  ;;  %v4969_v44 = vrot.slane %v13202_v17, 4  ;;  %v13231_v35 = vld [vmem:[#allocation5 + $0x1d0] sm:$0xff]  }
 0x216   : > { %v4977_v19 = vor.u32 %v13206_v1, %v13204_v12  ;;  %v5039_v22 = vshll.u32 %v8420_v33, 16  ;;  %v14591_v26 = vcombine.low %v12843_v21, %v12868_v5  ;;  %v4986_v13 = vor.u32 %v4985_v38, %v13208_v16  ;;  %v8421_v6 = vld [vmem:[%s11236_s27 + $0xc8] sm:$0x7] }
 0x217   : > { %9545 = vmatpush3.bf16.msra.mxu1 %v13213_v45  ;;  %v13235_v59 = vrot.slane %v4999_v25, 6  ;;  %v14592_v40 = vld [vmem:[#allocation45_spill] sm:$0xff]  ;;  %v14593_v12 = vcombine.low %v12907_v56, %v12923_v32  ;;  %v13244_v21 = vor.u32 %v4994_v20, %v4991_v61  ;;  %v5004_v5 = vrot.slane %v5002_v23, 7 }
 0x218   : > { %9751 = vmatmul.mubr.bf16.vlgmr.msra.gmra.mrb[16].mxu0 %v14591_v26  ;;  %9546 = vmatprep.subr.bf16.mxu1 %v13231_v35  ;;  %v5045_v45 = vshrl.u32 %v14592_v40, 16  ;;  %v5048_v7 = vshll.u32 %v14592_v40, 16  ;;  %v5014_v1 = vor.u32 %v5013_v39, %v5010_v24  ;;  %v13246_v33 = vrot.slane %v5027_v55, 6  ;;  %v14595_v26 = vld [vmem:[#allocation22_spill] sm:$0xff]  ;;  %v14599_v55 = vld [vmem:[#allocation24_spill] sm:$0xff] }
 0x219   : > { %9767 = vmatpush3.bf16.msra.mxu0 %v14590_v31  ;;  %9754 = vmatprep.mubr.bf16.mxu0 %v14593_v12  ;;  %v14594_v25 = vcombine.low %v12911_v52, %v12927_v43  ;;  %v13252_v16 = vor.u32 %v5022_v0, %v5019_v62  ;;  %v5032_v38 = vrot.slane %v5030_v37, 7  ;;  %v5038_v31 = vrot.slane %v5036_v49, 6  ;;  %v14597_v52 = vld [vmem:[#allocation23_spill] sm:$0xff]  ;;  %v14598_v43 = vld [vmem:[#allocation57_spill] sm:$0xff]  ;;  %v8422_v39 = vld [vmem:[%s11236_s27 + $0xd0] sm:$0xc] }
 0x21a   : > { %9768 = vmatprep.subr.bf16.mxu0 %v12873_v28  ;;  %v13256_v56 = vadd.f32 %v13006_v36, %v14595_v26  ;;  %v14596_v32 = vcombine.low %v12941_v2, %v12945_v48  ;;  %v5041_v61 = vrot.slane %v5039_v22, 7  ;;  %v5055_v23 = vshrl.u32 %v8421_v6, 16  ;;  %v13266_v62 = vld [vmem:[#allocation5 + $0x1d8] sm:$0xff]   ;;  %v14601_v2 = vld [vmem:[#allocation25_spill] sm:$0xff]  ;;  %v14602_v48 = vld [vmem:[#allocation60_spill] sm:$0xff] }
 0x21b   : > { %9531 = vmatmul.mubr.bf16.gmra.mrb[36].mxu1 %v14594_v25  ;;  %v5058_v20 = vshll.u32 %v8421_v6, 16  ;;  %v13264_v24 = vadd.f32 %v14598_v43, %v14597_v52  ;;  %v5047_v37 = vrot.slane %v5045_v45, 6  ;;  %v5050_v0 = vrot.slane %v5048_v7, 7  ;;  %v14600_v49 = vld [vmem:[#allocation59_spill] sm:$0xff]  ;;  %v14604_v26 = vld [vmem:[#allocation50_spill] sm:$0xff] }
 0x21c   : > { %9547 = vmatpush3.bf16.msra.mxu1 %v13231_v35  ;;  %9534 = vmatprep.mubr.bf16.mxu1 %v14596_v32  ;;  %v13272_v40 = vadd.f32 %v14600_v49, %v14599_v55  ;;  %v13276_v22 = vadd.f32 %v14602_v48, %v14601_v2  ;;  %v14603_v6 = vsel %vm11269_vm5, %v13141_v30, %v13118_v54  ;;  %v4987_v25 = vrot.slane %v4986_v13, 4  ;;  %v8424_v2 = vld [vmem:[%s11236_s27 + $0xe0] sm:$0xc]  ;;  %v14629_v48 = vld [vmem:[#allocation61_spill] sm:$0xff] }
 0x21d   : > { %9548 = vmatprep.subr.bf16.mxu1 %v13266_v62  ;;  %9769 = vmatpush3.bf16.msra.mxu0 %v12873_v28  ;;  %v13285_v45 = vcombine.low %v14603_v6, %v13190_v18  ;;  %v4968_v7 = vsel %vm11269_vm5, %v13223_v11, %v13202_v17  ;;  %v4978_v12 = vsel %vm11269_vm5, %v4969_v44, %v4977_v19  ;;  %v4997_v28 = vrot.slane %v13244_v21, 4  ;;  %v9336_v11 = vpop.f32.mrb[0].mxu0  ;;  %v14605_v44 = vld [vmem:[#allocation51_spill] sm:$0xff]  ;;  %v14606_v19 = vld [vmem:[#allocation52_spill] sm:$0xff] }
 0x21e   : > { %9770 = vmatprep.subr.bf16.mxu0 %v14604_v26  ;;  %v5005_v32 = vor.u32 %v5004_v5, %v13235_v59  ;;  %v5015_v52 = vrot.slane %v5014_v1, 4  ;;  %v5033_v54 = vor.u32 %v5032_v38, %v13246_v33  ;;  %v5025_v30 = vrot.slane %v13252_v16, 4  ;;  %v13303_v6 = vld [vmem:[#allocation5 + $0x1e0] sm:$0xff]   ;;  %v3261_v38 = vpop.f32.mrb[1].mxu0 }
 0x21f   : > { %v5042_v18 = vor.u32 %v5041_v61, %v5038_v31  ;;  %v5057_v55 = vrot.slane %v5055_v23, 6  ;;  %v5064_v17 = vshrl.u32 %v8422_v39, 16  ;;  %v14607_v13 = vcombine.low %v14605_v44, %v14606_v19  ;;  %v14609_v23 = vld [vmem:[#allocation49_spill] sm:$0xff] }
 0x220   : > { %9549 = vmatpush3.bf16.msra.mxu1 %v13266_v62  ;;  %v13306_v59 = vor.u32 %v5050_v0, %v5047_v37  ;;  %v5060_v5 = vrot.slane %v5058_v20, 7  ;;  %v5067_v1 = vshll.u32 %v8422_v39, 16  ;;  %v13309_v33 = vadd.f32 %v13058_v10, %v9336_v11  ;;  %v9337_v10 = vpop.f32.mrb[2].mxu0  ;;  %v14610_v0 = vld [vmem:[#allocation54_spill] sm:$0xff] }
 0x221   : > { %9755 = vmatmul.mubr.bf16.gmra.mrb[20].mxu0 %v14607_v13  ;;  %9550 = vmatprep.subr.bf16.mxu1 %v13303_v6  ;;  %v14608_v31 = vcombine.low %v12989_v63, %v13011_v9  ;;  %v4996_v61 = vsel %vm11269_vm5, %v4987_v25, %v13244_v21  ;;  %v5073_v44 = vshrl.u32 %v14609_v23, 16  ;;  %v5076_v37 = vshll.u32 %v14609_v23, 16  ;;  %v8423_v9 = vld [vmem:[%s11236_s27 + $0xd8] sm:$0x7]  ;;  %v3264_v25 = vpop.f32.mrb[3].mxu0 }
 0x222   : > { %9771 = vmatpush3.bf16.msra.mxu0 %v14604_v26  ;;  %v13321_v20 = vadd.f32 %v13066_v27, %v3261_v38  ;;  %v14611_v39 = vcombine.low %v12993_v41, %v13015_v51  ;;  %v5006_v63 = vsel %vm11269_vm5, %v4997_v28, %v5005_v32  ;;  %v13331_v21 = vadd.f32 %v13072_v53, %v9337_v10  ;;  %v13347_v32 = vld [vmem:[#allocation5 + $0x1e8] sm:$0xff]  }
 0x223   : > { %9758 = vmatprep.mubr.bf16.mxu0 %v14608_v31  ;;  %9772 = vmatprep.subr.bf16.mxu0 %v14610_v0  ;;  %v5092_v26 = vshrl.u32 %v8424_v2, 16  ;;  %v5095_v11 = vshll.u32 %v8424_v2, 16  ;;  %v14612_v27 = vcombine.low %v13036_v58, %v13083_v42  ;;  %v5024_v41 = vsel %vm11269_vm5, %v5015_v52, %v13252_v16  ;;  %v8425_v16 = vld [vmem:[%s11236_s27 + $0xe8] sm:$0x7] }
 0x224   : > { %9535 = vmatmul.mubr.bf16.gmra.mrb[40].mxu1 %v14611_v39  ;;  %v5034_v51 = vsel %vm11269_vm5, %v5025_v30, %v5033_v54  ;;  %v13342_v28 = vrot.slane %v5042_v18, 4  ;;  %v13345_v53 = vadd.f32 %v13078_v34, %v3264_v25  ;;  %v5053_v2 = vrot.slane %v13306_v59, 4  ;;  %v14613_v18 = vld [vmem:[#allocation58_spill] sm:$0xff]  ;;  %v14614_v31 = vld [vmem:[#allocation53_spill] sm:$0xff] }
 0x225   : > { %9551 = vmatpush3.bf16.msra.mxu1 %v13303_v6  ;;  %9538 = vmatprep.mubr.bf16.mxu1 %v14612_v27  ;;  %v5061_v58 = vor.u32 %v5060_v5, %v5057_v55  ;;  %v13351_v42 = vrot.slane %v5064_v17, 6  ;;  %v13353_v19 = vrot.slane %v5067_v1, 7  ;;  %v5075_v52 = vrot.slane %v5073_v44, 6 }
 0x226   : > { %9552 = vmatprep.subr.bf16.mxu1 %v13347_v32  ;;  %9773 = vmatpush3.bf16.msra.mxu0 %v14610_v0  ;;  %v5078_v54 = vrot.slane %v5076_v37, 7  ;;  %v5083_v30 = vshrl.u32 %v8423_v9, 16  ;;  %v5086_v34 = vshll.u32 %v8423_v9, 16  ;;  %v13358_v13 = vrot.slane %v5092_v26, 6  ;;  %v8426_v37 = vld [vmem:[%s11236_s27 + $0xf0] sm:$0xc] }
 0x227   : > { %9774 = vmatprep.subr.bf16.mxu0 %v14613_v18  ;;  %v13360_v38 = vrot.slane %v5095_v11, 7  ;;  %v5101_v55 = vshrl.u32 %v14614_v31, 16  ;;  %v5104_v17 = vshll.u32 %v14614_v31, 16  ;;  %v13365_v5 = vcombine.low %v4968_v7, %v4978_v12  ;;  %v13375_v0 = vld [vmem:[#allocation5 + $0x1f0] sm:$0xff]   ;;  %v14621_v31 = vld [vmem:[#allocation27_spill] sm:$0xff] }
 0x228   : > { %v13367_v1 = vcombine.low %v4996_v61, %v5006_v63  ;;  %v13369_v23 = vcombine.low %v5024_v41, %v5034_v51  ;;  %v5111_v44 = vshrl.u32 %v8425_v16, 16  ;;  %v14615_v10 = vcombine.low %v12997_v15, %v13027_v50  ;;  %v9340_v27 = vpop.f32.mrb[4].mxu0  ;;  %v8576_v41 = vld [vmem:[%s11236_s27 + $0xa0] sm:$0xc] }
 0x229   : > { %9553 = vmatpush3.bf16.msra.mxu1 %v13347_v32  ;;  %v13384_v12 = vsel %vm11269_vm5, %v5053_v2, %v5061_v58  ;;  %v14616_v15 = vcombine.low %v13087_v60, %v13102_v3  ;;  %v13392_v50 = vor.u32 %v5078_v54, %v5075_v52  ;;  %v13394_v39 = vrot.slane %v5083_v30, 6  ;;  %v13410_v2 = vld [vmem:[%s11236_s27 + $0xf8] sm:$0x7]  ;;  %v3277_v58 = vpop.f32.mrb[5].mxu0 }
 0x22a   : > { %9759 = vmatmul.mubr.bf16.gmra.mrb[24].mxu0 %v14615_v10  ;;  %9554 = vmatprep.subr.bf16.mxu1 %v13375_v0  ;;  %v13396_v63 = vrot.slane %v5086_v34, 7  ;;  %v5114_v9 = vshll.u32 %v8425_v16, 16  ;;  %v14617_v25 = vcombine.low %v13091_v46, %v13106_v47  ;;  %v5098_v26 = vor.u32 %v13360_v38, %v13358_v13  ;;  %v14618_v16 = vld [vmem:[#allocation26_spill] sm:$0xff]  ;;  %v13419_v54 = vld [vmem:[#allocation5 + $0x1f8] sm:$0xff]   ;;  %v9341_v38 = vpop.f32.mrb[6].mxu0 }
 0x22b   : > { %9775 = vmatpush3.bf16.msra.mxu0 %v14613_v18  ;;  %9762 = vmatprep.mubr.bf16.mxu0 %v14616_v15  ;;  %v5103_v11 = vrot.slane %v5101_v55, 6  ;;  %v5106_v60 = vrot.slane %v5104_v17, 7  ;;  %v5120_v3 = vshrl.u32 %v8426_v37, 16  ;;  %v13407_v51 = vrot.slane %v5111_v44, 6  ;;  %v14619_v30 = vld [vmem:[#allocation55_spill] sm:$0xff]  ;;  %v14620_v18 = vld [vmem:[#allocation34_spill] sm:$0xff] }
 0x22c   : > { %9776 = vmatprep.subr.bf16.mxu0 %v13061_v57  ;;  %9539 = vmatmul.mubr.bf16.gmra.mrb[44].mxu1 %v14617_v25  ;;  %v5123_v46 = vshll.u32 %v8426_v37, 16  ;;  %v13413_v47 = vadd.f32 %v13155_v8, %v9340_v27  ;;  %v13417_v52 = vadd.f32 %v13196_v29, %v14618_v16  ;;  %v5132_v34 = vshll.u32 %v14619_v30, 16  ;;  %v8577_v8 = vld [vmem:[%s11236_s27 + $0xa4] sm:$0xf]  ;;  %v14623_v37 = vld [vmem:[#allocation19_spill] sm:$0xff]  ;;  %v3280_v15 = vpop.f32.mrb[7].mxu0 }
 0x22d   : > { %9555 = vmatpush3.bf16.msra.mxu1 %v13375_v0  ;;  %9558 = vmatprep.mubr.bf16.mxu1 %v13285_v45  ;;  %v5129_v45 = vshrl.u32 %v14619_v30, 16  ;;  %v13425_v13 = vadd.f32 %v14620_v18, %v3277_v58  ;;  %v14622_v55 = vld [vmem:[#allocation20_spill] sm:$0xff]  ;;  %v13435_v10 = vadd.f32 %v14623_v37, %v9341_v38  ;;  %v7011_v25 = vshrl.u32 %v8576_v41, 16  ;;  %v14625_v58 = vld [vmem:[#allocation62_spill] sm:$0xff]  ;;  %v14628_v38 = vld [vmem:[#allocation21_spill] sm:$0xff] }
 0x22e   : > { %9556 = vmatprep.subr.bf16.mxu1 %v13419_v54  ;;  %v13430_v17 = vadd.f32 %v14622_v55, %v14621_v31  ;;  %v10486_v44 = vld [vmem:[%s11236_s27 + $0xa0] sm:$0xff]   ;;  %v7014_v27 = vshll.u32 %v8576_v41, 16  ;;  %v13442_v18 = vor.u32 %v5106_v60, %v5103_v11  ;;  %v13444_v7 = vrot.slane %v5114_v9, 7  ;;  %v14627_v55 = vld [vmem:[#allocation29_spill] sm:$0xff]  ;;  %v14630_v11 = vld [vmem:[#allocation63_spill] sm:$0xff] }
 0x22f   : > { %9777 = vmatpush3.bf16.msra.mxu0 %v13061_v57  ;;  %v14624_v16 = vld [vmem:[#allocation28_spill] sm:$0xff]  ;;  %v8578_v57 = vld [vmem:[%s11236_s27 + $0xa8] sm:$0x7]  ;;  %v13452_v37 = vadd.f32 %v14628_v38, %v14627_v55  ;;  %v5122_v41 = vrot.slane %v5120_v3, 6  ;;  %v7023_v29 = vshll.u32 %v8577_v8, 16  ;;  %v14631_v60 = vcombine.low %v14629_v48, %v14630_v11 }
 0x230   : > { %v13439_v30 = vadd.f32 %v13216_v14, %v14624_v16  ;;  %9778 = vmatprep.subr.bf16.mxu0 %v14625_v58  ;;  %v14626_v31 = vld [vmem:[#allocation16_spill] sm:$0xff]  ;;  %v5139_v16 = vshrl.u32 %v13410_v2, 16  ;;  %v7020_v14 = vshrl.u32 %v8577_v8, 16  ;;  %v5134_v55 = vrot.slane %v5132_v34, 7 }
 0x231   : > { %v13447_v61 = vadd.f32 %v14626_v31, %v3280_v15  ;;  %9557 = vmatpush3.bf16.msra.mxu1 %v13419_v54  ;;  %v13459_v9 = vld [vmem:[#allocation5 + $0x200] sm:$0xff]   ;;  %v5125_v15 = vrot.slane %v5123_v46, 7  ;;  %v5131_v31 = vrot.slane %v5129_v45, 6  ;;  %v5142_v38 = vshll.u32 %v13410_v2, 16 }
 0x232   : > { %9763 = vmatmul.mubr.bf16.gmra.mrb[28].mxu0 %v14631_v60  ;;  %9574 = vmatprep.subr.bf16.mxu1 %v13459_v9  ;;  %v7013_v3 = vrot.slane %v7011_v25, 6  ;;  %v7016_v49 = vrot.slane %v7014_v27, 7  ;;  %v7030_v8 = vshrl.u32 %v8578_v57, 16  ;;  %v7033_v48 = vshll.u32 %v8578_v57, 16  ;;  %v14632_v11 = vld [vmem:[#allocation40_spill] sm:$0xff]  ;;  %v10487_v57 = vld [vmem:[%s11236_s27 + $0xb0] sm:$0xff]  }
 0x233   : > { %9779 = vmatpush3.bf16.msra.mxu0 %v14625_v58  ;;  %9782 = vmatprep.mubr.bf16.mxu0 %v10486_v44  ;;  %v14633_v46 = vor.u32 %v13353_v19, %v13351_v42  ;;  %v5081_v2 = vrot.slane %v13392_v50, 4  ;;  %v5089_v34 = vor.u32 %v13396_v63, %v13394_v39  ;;  %v13474_v44 = vrot.slane %v5098_v26, 4  ;;  %v8579_v25 = vld [vmem:[%s11236_s27 + $0xb0] sm:$0xc]  ;;  %v8580_v58 = vld [vmem:[%s11236_s27 + $0xb4] sm:$0xf] }
 0x234   : > { %9780 = vmatprep.subr.bf16.mxu0 %v14632_v11  ;;  %9559 = vmatmul.mubr.bf16.vlgmr.msra.gmra.mrb[32].mxu1 %v13365_v5  ;;  %v5109_v5 = vrot.slane %v13442_v18, 4  ;;  %v5117_v42 = vor.u32 %v13444_v7, %v13407_v51  ;;  %v7022_v19 = vrot.slane %v7020_v14, 6  ;;  %v7025_v27 = vrot.slane %v7023_v29, 7  ;;  %v13484_v60 = vld [vmem:[#allocation5 + $0x208] sm:$0xff]  }
 0x235   : > { %v13469_v45 = vrot.slane %v14633_v46, 4  ;;  %9575 = vmatpush3.bf16.msra.mxu1 %v13459_v9  ;;  %9562 = vmatprep.mubr.bf16.mxu1 %v13367_v1  ;;  %v5126_v39 = vor.u32 %v5125_v15, %v5122_v41  ;;  %v13487_v63 = vor.u32 %v5134_v55, %v5131_v31  ;;  %v5141_v26 = vrot.slane %v5139_v16, 6  ;;  %v10488_v1 = vld [vmem:[%s11236_s27 + $0xc0] sm:$0xff]   ;;  %v14635_v41 = vld [vmem:[#allocation18_spill] sm:$0xff]  ;;  %v13507_v16 = vld [vmem:[%s11236_s27 + $0xb8] sm:$0x7] }
 0x236   : > { %9576 = vmatprep.subr.bf16.mxu1 %v13484_v60  ;;  %v5144_v46 = vrot.slane %v5142_v38, 7  ;;  %v14634_v29 = vsel %vm11269_vm5, %v13342_v28, %v13306_v59  ;;  %v7017_v7 = vor.u32 %v7016_v49, %v7013_v3  ;;  %v13497_v51 = vrot.slane %v7030_v8, 6 }
 0x237   : > { %9781 = vmatpush3.bf16.msra.mxu0 %v14632_v11  ;;  %v8432_v14 = vcombine.low %v14634_v29, %v13384_v12  ;;  %v13499_v43 = vrot.slane %v7033_v48, 7  ;;  %v5080_v38 = vsel %vm11269_vm5, %v13469_v45, %v13392_v50  ;;  %v7039_v15 = vshrl.u32 %v8579_v25, 16  ;;  %v13518_v50 = vld [vmem:[#allocation5 + $0x210] sm:$0xff]   ;;  %v9344_v45 = vpop.f32.mrb[8].mxu0 }
 0x238   : > { %9798 = vmatprep.subr.bf16.mxu0 %v14635_v41  ;;  %v7042_v31 = vshll.u32 %v8579_v25, 16  ;;  %v7048_v55 = vshrl.u32 %v8580_v58, 16  ;;  %v5090_v49 = vsel %vm11269_vm5, %v5081_v2, %v5089_v34  ;;  %v5108_v59 = vsel %vm11269_vm5, %v13474_v44, %v13442_v18  ;;  %v3293_v25 = vpop.f32.mrb[9].mxu0 }
 0x239   : > { %9577 = vmatpush3.bf16.msra.mxu1 %v13484_v60  ;;  %v13516_v28 = vor.u32 %v7025_v27, %v7022_v19  ;;  %v7051_v12 = vshll.u32 %v8580_v58, 16  ;;  %v5118_v3 = vsel %vm11269_vm5, %v5109_v5, %v5117_v42  ;;  %v5127_v8 = vrot.slane %v5126_v39, 4  ;;  %v8582_v5 = vld [vmem:[%s11236_s27 + $0xc0] sm:$0xc]  ;;  %v14636_v42 = vld [vmem:[#allocation42_spill] sm:$0xff] }
 0x23a   : > { %9783 = vmatmul.mubr.bf16.vlgmr.msra.gmra.mrb[16].mxu0 %v10487_v57  ;;  %9578 = vmatprep.subr.bf16.mxu1 %v13518_v50  ;;  %v5137_v48 = vrot.slane %v13487_v63, 4  ;;  %v5145_v11 = vor.u32 %v5144_v46, %v5141_v26  ;;  %v13525_v18 = vrot.slane %v7017_v7, 4  ;;  %v7036_v2 = vor.u32 %v13499_v43, %v13497_v51  ;;  %v9345_v57 = vpop.f32.mrb[10].mxu0  ;;  %v8583_v39 = vld [vmem:[%s11236_s27 + $0xc4] sm:$0xf]  ;;  %v13554_v7 = vld [vmem:[#allocation5 + $0x218] sm:$0xff]  }
 0x23b   : > { %9799 = vmatpush3.bf16.msra.mxu0 %v14635_v41  ;;  %9786 = vmatprep.mubr.bf16.mxu0 %v10488_v1  ;;  %v7058_v34 = vshrl.u32 %v13507_v16, 16  ;;  %v13531_v44 = vadd.f32 %v13256_v56, %v9344_v45  ;;  %v13536_v19 = vrot.slane %v7039_v15, 6  ;;  %v13538_v27 = vrot.slane %v7042_v31, 7  ;;  %v13546_v56 = vld [vmem:[%s11236_s27 + $0x88] sm:$0xf]  ;;  %v3296_v29 = vpop.f32.mrb[11].mxu0 }
 0x23c   : > { %9800 = vmatprep.subr.bf16.mxu0 %v14636_v42  ;;  %9563 = vmatmul.mubr.bf16.gmra.mrb[36].mxu1 %v13369_v23  ;;  %v7050_v58 = vrot.slane %v7048_v55, 6  ;;  %v13541_v43 = vadd.f32 %v13264_v24, %v3293_v25  ;;  %v7028_v23 = vrot.slane %v13516_v28, 4  ;;  %v7053_v26 = vrot.slane %v7051_v12, 7  ;;  %v10489_v24 = vld [vmem:[%s11236_s27 + $0xd0] sm:$0xff]   ;;  %v10490_v51 = vld [vmem:[%s11236_s27 + $0xe0] sm:$0xff]  }
 0x23d   : > { %9579 = vmatpush3.bf16.msra.mxu1 %v13518_v50  ;;  %9566 = vmatprep.mubr.bf16.mxu1 %v8432_v14  ;;  %v7061_v46 = vshll.u32 %v13507_v16, 16  ;;  %v13551_v1 = vadd.f32 %v13272_v40, %v9345_v57  ;;  %v8433_v14 = vcombine.low %v5080_v38, %v5090_v49  ;;  %v5136_v41 = vsel %vm11269_vm5, %v5127_v8, %v13487_v63  ;;  %v13564_v16 = vld [vmem:[%s11236_s27 + $0x98] sm:$0xf]  ;;  %v8584_v31 = vld [vmem:[%s11236_s27 + $0xc8] sm:$0x7]  ;;  %v13594_v57 = vld [vmem:[#allocation5 + $0x220] sm:$0xff]  }
 0x23e   : > { %9580 = vmatprep.subr.bf16.mxu1 %v13554_v7  ;;  %v5146_v15 = vsel %vm11269_vm5, %v5137_v48, %v5145_v11  ;;  %v13567_v40 = vadd.f32 %v13276_v22, %v3296_v29  ;;  %v7067_v55 = vshrl.u32 %v8582_v5, 16  ;;  %v7070_v12 = vshll.u32 %v8582_v5, 16  ;;  %v13573_v8 = vld [vmem:[%s11236_s27 + $0x84] sm:$0xf]  ;;  %v8585_v5 = vld [vmem:[%s11236_s27 + $0xd0] sm:$0xc] }
 0x23f   : > { %9801 = vmatpush3.bf16.msra.mxu0 %v14636_v42  ;;  %v7076_v38 = vshrl.u32 %v8583_v39, 16  ;;  %v7079_v49 = vshll.u32 %v8583_v39, 16  ;;  %v8434_v63 = vcombine.low %v5108_v59, %v5118_v3  ;;  %v7027_v22 = vsel %vm11269_vm5, %v13525_v18, %v13516_v28  ;;  %v8586_v42 = vld [vmem:[%s11236_s27 + $0xd4] sm:$0xf] }
 0x240   : > { %14637 = vst [vmem:[#allocation38_spill] sm:$0xff] %v13567_v40  ;;  %9802 = vmatprep.subr.bf16.mxu0 %v13231_v35  ;;  %v13581_v11 = vrot.slane %v7058_v34, 6  ;;  %v7037_v45 = vsel %vm11269_vm5, %v7028_v23, %v7036_v2  ;;  %v7045_v59 = vor.u32 %v13538_v27, %v13536_v19  ;;  %v13588_v3 = vor.u32 %v7053_v26, %v7050_v58  ;;  %v13600_v18 = vld [vmem:[%s11236_s27 + $0x94] sm:$0xf]  ;;  %v8588_v26 = vld [vmem:[%s11236_s27 + $0xe0] sm:$0xc] }
 0x241   : > { %9581 = vmatpush3.bf16.msra.mxu1 %v13554_v7  ;;  %v13590_v25 = vrot.slane %v7061_v46, 7  ;;  %v13597_v28 = vcombine.low %v5136_v41, %v5146_v15  ;;  %v7086_v34 = vshrl.u32 %v8584_v31, 16  ;;  %v7089_v19 = vshll.u32 %v8584_v31, 16  ;;  %v8589_v15 = vld [vmem:[%s11236_s27 + $0xe4] sm:$0xf] }
 0x242   : > { %9787 = vmatmul.mubr.bf16.gmra.mrb[20].mxu0 %v10489_v24  ;;  %9582 = vmatprep.subr.bf16.mxu1 %v13594_v57  ;;  %v13605_v27 = vrot.slane %v7067_v55, 6  ;;  %v13607_v58 = vrot.slane %v7070_v12, 7  ;;  %v7078_v39 = vrot.slane %v7076_v38, 6  ;;  %v7081_v23 = vrot.slane %v7079_v49, 7  ;;  %v13621_v12 = vld [vmem:[#allocation5 + $0x228] sm:$0xff]  }
 0x243   : > { %9803 = vmatpush3.bf16.msra.mxu0 %v13231_v35  ;;  %9790 = vmatprep.mubr.bf16.mxu0 %v10490_v51  ;;  %v13611_v46 = vcombine.low %v7027_v22, %v7037_v45  ;;  %v7095_v29 = vshrl.u32 %v8585_v5, 16  ;;  %v7098_v24 = vshll.u32 %v8585_v5, 16  ;;  %v7104_v41 = vshrl.u32 %v8586_v42, 16  ;;  %v10491_v35 = vld [vmem:[%s11236_s27 + $0xf0] sm:$0xff]   ;;  %v8587_v22 = vld [vmem:[%s11236_s27 + $0xd8] sm:$0x7] }
 0x244   : > { %9804 = vmatprep.subr.bf16.mxu0 %v13266_v62  ;;  %9567 = vmatmul.mubr.bf16.gmra.mrb[40].mxu1 %v8433_v14  ;;  %v13616_v51 = vrot.slane %v7045_v59, 4  ;;  %v7056_v31 = vrot.slane %v13588_v3, 4  ;;  %v7064_v14 = vor.u32 %v13590_v25, %v13581_v11  ;;  %v7107_v55 = vshll.u32 %v8586_v42, 16  ;;  %v10492_v59 = vld [vmem:[%s11236_s27 + $0x100] sm:$0xff]   ;;  %v9348_v25 = vpop.f32.mrb[12].mxu0 }
 0x245   : > { %9583 = vmatpush3.bf16.msra.mxu1 %v13594_v57  ;;  %9570 = vmatprep.mubr.bf16.mxu1 %v8434_v63  ;;  %v13624_v38 = vrot.slane %v7086_v34, 6  ;;  %v13626_v49 = vrot.slane %v7089_v19, 7  ;;  %v7123_v45 = vshrl.u32 %v8588_v26, 16  ;;  %v7126_v63 = vshll.u32 %v8588_v26, 16  ;;  %v8590_v42 = vld [vmem:[%s11236_s27 + $0xe8] sm:$0x7] }
 0x246   : > { %9584 = vmatprep.subr.bf16.mxu1 %v13621_v12  ;;  %v7073_v5 = vor.u32 %v13607_v58, %v13605_v27  ;;  %v13633_v11 = vor.u32 %v7081_v23, %v7078_v39  ;;  %v7132_v2 = vshrl.u32 %v8589_v15, 16  ;;  %v7135_v48 = vshll.u32 %v8589_v15, 16  ;;  %v13646_v27 = vld [vmem:[%s11236_s27 + $0xa8] sm:$0xf] }
 0x247   : > { %9805 = vmatpush3.bf16.msra.mxu0 %v13266_v62  ;;  %v13637_v34 = vrot.slane %v7095_v29, 6  ;;  %v13639_v19 = vrot.slane %v7098_v24, 7  ;;  %v7106_v26 = vrot.slane %v7104_v41, 6  ;;  %v13642_v36 = vadd.f32 %v13417_v52, %v9348_v25  ;;  %v3309_v62 = vpop.f32.mrb[13].mxu0  ;;  %v13651_v29 = vld [vmem:[#allocation5 + $0x230] sm:$0xff]  }
 0x248   : > { %9806 = vmatprep.subr.bf16.mxu0 %v13303_v6  ;;  %v7109_v58 = vrot.slane %v7107_v55, 7  ;;  %v7114_v39 = vshrl.u32 %v8587_v22, 16  ;;  %v7117_v23 = vshll.u32 %v8587_v22, 16  ;;  %v13649_v15 = vadd.f32 %v13430_v17, %v3309_v62  ;;  %v9349_v40 = vpop.f32.mrb[14].mxu0 }
 0x249   : > { %9585 = vmatpush3.bf16.msra.mxu1 %v13621_v12  ;;  %v13655_v52 = vadd.f32 %v13439_v30, %v9349_v40  ;;  %v3312_v24 = vpop.f32.mrb[15].mxu0  ;;  %v7125_v41 = vrot.slane %v7123_v45, 6  ;;  %v7128_v25 = vrot.slane %v7126_v63, 7  ;;  %v7142_v55 = vshrl.u32 %v8590_v42, 16  ;;  %v10811_v30 = vld [vmem:[%s11236_s27 + $0xa4] sm:$0xf] }
 0x24a   : > { %9791 = vmatmul.mubr.bf16.gmra.mrb[24].mxu0 %v10491_v35  ;;  %9586 = vmatprep.subr.bf16.mxu1 %v13651_v29  ;;  %v13659_v17 = vadd.f32 %v13452_v37, %v3312_v24  ;;  %v7134_v35 = vrot.slane %v7132_v2, 6  ;;  %v7137_v22 = vrot.slane %v7135_v48, 7  ;;  %v7145_v62 = vshll.u32 %v8590_v42, 16  ;;  %v8591_v37 = vld [vmem:[%s11236_s27 + $0xf0] sm:$0xc]  ;;  %v13687_v42 = vld [vmem:[#allocation5 + $0x238] sm:$0xff]  }
 0x24b   : > { %9807 = vmatpush3.bf16.msra.mxu0 %v13303_v6  ;;  %9794 = vmatprep.mubr.bf16.mxu0 %v10492_v59  ;;  %v8446_v40 = vcombine.low %v10811_v30, %v13646_v27  ;;  %v13665_v45 = vrot.slane %v7073_v5, 4  ;;  %v7084_v63 = vrot.slane %v13633_v11, 4  ;;  %v7092_v6 = vor.u32 %v13626_v49, %v13624_v38  ;;  %v10493_v48 = vld [vmem:[%s11236_s27 + $0x110] sm:$0xff]  }
 0x24c   : > { %9808 = vmatprep.subr.bf16.mxu0 %v13347_v32  ;;  %9571 = vmatmul.mubr.bf16.gmra.mrb[44].mxu1 %v13597_v28  ;;  %v14638_v2 = vcombine.low %v13573_v8, %v13546_v56  ;;  %v7055_v28 = vsel %vm11269_vm5, %v13616_v51, %v13588_v3  ;;  %v7065_v59 = vsel %vm11269_vm5, %v7056_v31, %v7064_v14  ;;  %v13684_v49 = vrot.slane %v7114_v39, 6  ;;  %v8592_v5 = vld [vmem:[%s11236_s27 + $0xf4] sm:$0xf]  ;;  %v8594_v3 = vld [vmem:[%s11236_s27 + $0x100] sm:$0xc] }
 0x24d   : > { %9587 = vmatpush3.bf16.msra.mxu1 %v13651_v29  ;;  %v7101_v38 = vor.u32 %v13639_v19, %v13637_v34  ;;  %v13690_v56 = vor.u32 %v7109_v58, %v7106_v26  ;;  %v7119_v8 = vrot.slane %v7117_v23, 7  ;;  %v7129_v27 = vor.u32 %v7128_v25, %v7125_v41  ;;  %v8595_v51 = vld [vmem:[%s11236_s27 + $0x104] sm:$0xf] }
 0x24e   : > { %9590 = vmatprep.mubr.bf16.mxu1 %v14638_v2  ;;  %9588 = vmatprep.subr.bf16.mxu1 %v13687_v42  ;;  %v13692_v24 = vrot.slane %v7142_v55, 6  ;;  %v13697_v31 = vor.u32 %v7137_v22, %v7134_v35  ;;  %v7147_v14 = vrot.slane %v7145_v62, 7  ;;  %v7151_v34 = vshrl.u32 %v8591_v37, 16  ;;  %v8439_v22 = vld [vmem:[%s11236_s27 + $0xb8] sm:$0xf] }
 0x24f   : > { %9809 = vmatpush3.bf16.msra.mxu0 %v13347_v32  ;;  %v7154_v19 = vshll.u32 %v8591_v37, 16  ;;  %v7083_v26 = vsel %vm11269_vm5, %v13665_v45, %v13633_v11  ;;  %v7093_v58 = vsel %vm11269_vm5, %v7084_v63, %v7092_v6  ;;  %v7160_v39 = vshrl.u32 %v8592_v5, 16  ;;  %v8593_v32 = vld [vmem:[%s11236_s27 + $0xf8] sm:$0x7]  ;;  %v8596_v2 = vld [vmem:[%s11236_s27 + $0x108] sm:$0x7] }
 0x250   : > { %9810 = vmatprep.subr.bf16.mxu0 %v13375_v0  ;;  %v7163_v23 = vshll.u32 %v8592_v5, 16  ;;  %v7179_v41 = vshrl.u32 %v8594_v3, 16  ;;  %v7182_v25 = vshll.u32 %v8594_v3, 16  ;;  %v7188_v55 = vshrl.u32 %v8595_v51, 16 }
 0x251   : > { %9589 = vmatpush3.bf16.msra.mxu1 %v13687_v42  ;;  %v7191_v35 = vshll.u32 %v8595_v51, 16  ;;  %v7102_v62 = vrot.slane %v7101_v38, 4  ;;  %v7112_v11 = vrot.slane %v13690_v56, 4  ;;  %v7120_v30 = vor.u32 %v7119_v8, %v13684_v49  ;;  %v8440_v49 = vld [vmem:[%s11236_s27 + $0xc8] sm:$0xf] }
 0x252   : > { %9795 = vmatmul.mubr.bf16.gmra.mrb[28].mxu0 %v10493_v48  ;;  %9862 = vmatprep.subr.bf16.mxu1 %v13459_v9  ;;  %v7130_v45 = vrot.slane %v7129_v27, 4  ;;  %v7140_v63 = vrot.slane %v13697_v31, 4  ;;  %v7148_v6 = vor.u32 %v7147_v14, %v13692_v24  ;;  %v7153_v37 = vrot.slane %v7151_v34, 6  ;;  %v10813_v34 = vld [vmem:[%s11236_s27 + $0xb4] sm:$0xf] }
 0x253   : > { %9811 = vmatpush3.bf16.msra.mxu0 %v13375_v0  ;;  %9814 = vmatprep.mubr.bf16.mxu0 %v13611_v46  ;;  %v7156_v48 = vrot.slane %v7154_v19, 7  ;;  %v14639_v38 = vcombine.low %v13600_v18, %v13564_v16  ;;  %v7162_v5 = vrot.slane %v7160_v39, 6  ;;  %v7165_v8 = vrot.slane %v7163_v23, 7 }
 0x254   : > { %9812 = vmatprep.subr.bf16.mxu0 %v13419_v54  ;;  %v7170_v0 = vshrl.u32 %v8593_v32, 16  ;;  %v7173_v27 = vshll.u32 %v8593_v32, 16  ;;  %v7181_v46 = vrot.slane %v7179_v41, 6  ;;  %v7184_v24 = vrot.slane %v7182_v25, 7  ;;  %v10814_v32 = vld [vmem:[%s11236_s27 + $0xc4] sm:$0xf] }
 0x255   : > { %9591 = vmatmul.mubr.bf16.vlgmr.msra.gmra.mrb[32].mxu1 %v14639_v38  ;;  %v7190_v3 = vrot.slane %v7188_v55, 6  ;;  %v7193_v51 = vrot.slane %v7191_v35, 7  ;;  %v8601_v14 = vcombine.low %v7055_v28, %v7065_v59  ;;  %v8447_v16 = vcombine.low %v10813_v34, %v8439_v22  ;;  %v8597_v28 = vld [vmem:[%s11236_s27 + $0x110] sm:$0xc]  ;;  %v8598_v25 = vld [vmem:[%s11236_s27 + $0x114] sm:$0xf] }
 0x256   : > { %9870 = vmatpush3.bf16.msra.mxu1 %v13459_v9  ;;  %9594 = vmatprep.mubr.bf16.mxu1 %v8446_v40  ;;  %v7198_v18 = vshrl.u32 %v8596_v2, 16  ;;  %v7201_v19 = vshll.u32 %v8596_v2, 16  ;;  %v8602_v39 = vcombine.low %v7083_v26, %v7093_v58  ;;  %v7111_v40 = vsel %vm11269_vm5, %v7102_v62, %v13690_v56  ;;  %v8441_v2 = vld [vmem:[%s11236_s27 + $0xd8] sm:$0xf] }
 0x257   : > { %9863 = vmatprep.subr.bf16.mxu1 %v13484_v60  ;;  %9813 = vmatpush3.bf16.msra.mxu0 %v13419_v54  ;;  %v7121_v23 = vsel %vm11269_vm5, %v7112_v11, %v7120_v30  ;;  %v8448_v41 = vcombine.low %v10814_v32, %v8440_v49  ;;  %v7139_v59 = vsel %vm11269_vm5, %v7130_v45, %v13697_v31  ;;  %v7172_v56 = vrot.slane %v7170_v0, 6  ;;  %v8599_v49 = vld [vmem:[%s11236_s27 + $0x118] sm:$0x7] }
 0x258   : > { %9830 = vmatprep.subr.bf16.mxu0 %v13459_v9  ;;  %v7149_v54 = vsel %vm11269_vm5, %v7140_v63, %v7148_v6  ;;  %v7157_v26 = vor.u32 %v7156_v48, %v7153_v37  ;;  %v13739_v58 = vor.u32 %v7165_v8, %v7162_v5  ;;  %v7175_v55 = vrot.slane %v7173_v27, 7  ;;  %v13748_v6 = vld [vmem:[%s11236_s27 + $0xe8] sm:$0xf] }
 0x259   : > { %v7185_v35 = vor.u32 %v7184_v24, %v7181_v46  ;;  %v13743_v22 = vor.u32 %v7193_v51, %v7190_v3  ;;  %v7200_v31 = vrot.slane %v7198_v18, 6  ;;  %v7203_v62 = vrot.slane %v7201_v19, 7  ;;  %v8442_v8 = vld [vmem:[%s11236_s27 + $0xe8] sm:$0xf]  ;;  %v8620_v51 = vld [vmem:[%s11236_s27 + $0xe4] sm:$0xe] }
 0x25a   : > { %9871 = vmatpush3.bf16.msra.mxu1 %v13484_v60  ;;  %9815 = vmatmul.mubr.bf16.vlgmr.msra.gmra.mrb[16].mxu0 %v8601_v14  ;;  %v7207_v11 = vshrl.u32 %v8597_v28, 16  ;;  %v7210_v30 = vshll.u32 %v8597_v28, 16  ;;  %v7216_v45 = vshrl.u32 %v8598_v25, 16  ;;  %v7219_v63 = vshll.u32 %v8598_v25, 16 }
 0x25b   : > { %9864 = vmatprep.subr.bf16.mxu1 %v13518_v50  ;;  %9831 = vmatpush3.bf16.msra.mxu0 %v13459_v9  ;;  %v8603_v37 = vcombine.low %v7111_v40, %v7121_v23  ;;  %v8604_v48 = vcombine.low %v7139_v59, %v7149_v54  ;;  %v7158_v38 = vrot.slane %v7157_v26, 4  ;;  %v7168_v9 = vrot.slane %v13739_v58, 4  ;;  %v10815_v40 = vld [vmem:[%s11236_s27 + $0xd4] sm:$0xf]  ;;  %v13775_v54 = vld [vmem:[%s11236_s27 + $0xa8] sm:$0xf] }
 0x25c   : > { %9818 = vmatprep.mubr.bf16.mxu0 %v8602_v39  ;;  %9832 = vmatprep.subr.bf16.mxu0 %v13484_v60  ;;  %v7176_v5 = vor.u32 %v7175_v55, %v7172_v56  ;;  %v7186_v0 = vrot.slane %v7185_v35, 4  ;;  %v7196_v27 = vrot.slane %v13743_v22, 4  ;;  %v7204_v46 = vor.u32 %v7203_v62, %v7200_v31  ;;  %v8622_v39 = vld [vmem:[%s11236_s27 + $0xec] sm:$0x1]  ;;  %v13781_v55 = vld [vmem:[%s11236_s27 + $0xf8] sm:$0xf] }
 0x25d   : > { %9595 = vmatmul.mubr.bf16.gmra.mrb[36].mxu1 %v8447_v16  ;;  %v7209_v24 = vrot.slane %v7207_v11, 6  ;;  %v7212_v3 = vrot.slane %v7210_v30, 7  ;;  %v7457_v14 = vrot.slane %v13748_v6, 5  ;;  %v7218_v34 = vrot.slane %v7216_v45, 6  ;;  %v8443_v11 = vld [vmem:[%s11236_s27 + $0xf8] sm:$0xf] }
 0x25e   : > { %9872 = vmatpush3.bf16.msra.mxu1 %v13518_v50  ;;  %9598 = vmatprep.mubr.bf16.mxu1 %v8448_v41  ;;  %v7221_v16 = vrot.slane %v7219_v63, 7  ;;  %v7226_v18 = vshrl.u32 %v8599_v49, 16  ;;  %v7229_v19 = vshll.u32 %v8599_v49, 16  ;;  %v8449_v23 = vcombine.low %v10815_v40, %v8441_v2  ;;  %v8627_v45 = vld [vmem:[%s11236_s27 + $0x108] sm:$0xf] }
 0x25f   : > { %9865 = vmatprep.subr.bf16.mxu1 %v13554_v7  ;;  %9833 = vmatpush3.bf16.msra.mxu0 %v13484_v60  ;;  %v7167_v32 = vsel %vm11269_vm5, %v7158_v38, %v13739_v58  ;;  %v7177_v41 = vsel %vm11269_vm5, %v7168_v9, %v7176_v5  ;;  %v10816_v60 = vld [vmem:[%s11236_s27 + $0xe4] sm:$0xf]  ;;  %v7195_v59 = vsel %vm11269_vm5, %v7186_v0, %v13743_v22  ;;  %v8636_v58 = vrot.slane %v8620_v51, 9  ;;  %v8610_v63 = vld [vmem:[%s11236_s27 + $0xac] sm:$0x1] }
 0x260   : > { %9834 = vmatprep.subr.bf16.mxu0 %v13518_v50  ;;  %v8450_v28 = vcombine.low %v10816_v60, %v8442_v8  ;;  %v7205_v26 = vsel %vm11269_vm5, %v7196_v27, %v7204_v46  ;;  %v7459_v25 = vrot.slane %v7457_v14, 4  ;;  %v7460_v56 = vrot.slane %v8622_v39, 5  ;;  %v8623_v9 = vld [vmem:[%s11236_s27 + $0xf4] sm:$0xe]  ;;  %v8625_v5 = vld [vmem:[%s11236_s27 + $0xfc] sm:$0x1] }
 0x261   : > { %v7213_v35 = vor.u32 %v7212_v3, %v7209_v24  ;;  %v13784_v22 = vor.u32 %v7221_v16, %v7218_v34  ;;  %v7228_v31 = vrot.slane %v7226_v18, 6  ;;  %v7231_v62 = vrot.slane %v7229_v19, 7  ;;  %v8626_v8 = vld [vmem:[%s11236_s27 + $0x104] sm:$0xe]  ;;  %v8628_v24 = vld [vmem:[%s11236_s27 + $0x10c] sm:$0x1] }
 0x262   : > { %9873 = vmatpush3.bf16.msra.mxu1 %v13554_v7  ;;  %9819 = vmatmul.mubr.bf16.gmra.mrb[20].mxu0 %v8603_v37  ;;  %v7429_v30 = vrot.slane %v13775_v54, 5  ;;  %v7464_v6 = vrot.slane %v13781_v55, 5  ;;  %v8605_v37 = vcombine.low %v7167_v32, %v7177_v41  ;;  %v7458_v38 = vsel %vm12182_vm11, %v8636_v58, %v7457_v14  ;;  %v10817_v51 = vld [vmem:[%s11236_s27 + $0xf4] sm:$0xf]  ;;  %v8612_v19 = vld [vmem:[%s11236_s27 + $0xb8] sm:$0xf] }
 0x263   : > { %9866 = vmatprep.subr.bf16.mxu1 %v13594_v57  ;;  %9835 = vmatpush3.bf16.msra.mxu0 %v13518_v50  ;;  %v8608_v50 = vld [vmem:[%s11236_s27 + $0xa4] sm:$0xe]  ;;  %v7461_v49 = vsel %vm12182_vm11, %v7459_v25, %v7460_v56  ;;  %v7214_v0 = vrot.slane %v7213_v35, 4  ;;  %v7224_v27 = vrot.slane %v13784_v22, 4  ;;  %v7232_v46 = vor.u32 %v7231_v62, %v7228_v31  ;;  %v8615_v32 = vld [vmem:[%s11236_s27 + $0xc8] sm:$0xf] }
 0x264   : > { %9822 = vmatprep.mubr.bf16.mxu0 %v8604_v48  ;;  %9836 = vmatprep.subr.bf16.mxu0 %v13554_v7  ;;  %v8606_v48 = vcombine.low %v7195_v59, %v7205_v26  ;;  %v7471_v3 = vrot.slane %v8627_v45, 5  ;;  %v8451_v14 = vcombine.low %v10817_v51, %v8443_v11  ;;  %v8632_v34 = vrot.slane %v8608_v50, 9  ;;  %v8630_v59 = vld [vmem:[%s11236_s27 + $0x118] sm:$0xf]  ;;  %v8611_v56 = vld [vmem:[%s11236_s27 + $0xb4] sm:$0xe] }
 0x265   : > { %9599 = vmatmul.mubr.bf16.gmra.mrb[40].mxu1 %v8449_v23  ;;  %v7431_v16 = vrot.slane %v7429_v30, 4  ;;  %v7432_v18 = vrot.slane %v8610_v63, 5  ;;  %v8644_v39 = vcombine.low %v7458_v38, %v7461_v49  ;;  %v7466_v40 = vrot.slane %v7464_v6, 4  ;;  %v8613_v55 = vld [vmem:[%s11236_s27 + $0xbc] sm:$0x1] }
 0x266   : > { %9874 = vmatpush3.bf16.msra.mxu1 %v13594_v57  ;;  %9602 = vmatprep.mubr.bf16.mxu1 %v8450_v28  ;;  %v7467_v23 = vrot.slane %v8625_v5, 5  ;;  %v8638_v41 = vrot.slane %v8626_v8, 9  ;;  %v7473_v60 = vrot.slane %v7471_v3, 4  ;;  %v7474_v28 = vrot.slane %v8628_v24, 5  ;;  %v8614_v31 = vld [vmem:[%s11236_s27 + $0xc4] sm:$0xe] }
 0x267   : > { %9867 = vmatprep.subr.bf16.mxu1 %v13621_v12  ;;  %9837 = vmatpush3.bf16.msra.mxu0 %v13554_v7  ;;  %v8637_v7 = vrot.slane %v8623_v9, 9  ;;  %v7223_v54 = vsel %vm11269_vm5, %v7214_v0, %v13784_v22  ;;  %v7233_v26 = vsel %vm11269_vm5, %v7224_v27, %v7232_v46  ;;  %v7436_v58 = vrot.slane %v8612_v19, 5  ;;  %v8616_v62 = vld [vmem:[%s11236_s27 + $0xcc] sm:$0x1]  ;;  %v8629_v63 = vld [vmem:[%s11236_s27 + $0x114] sm:$0xe] }
 0x268   : > { %9838 = vmatprep.subr.bf16.mxu0 %v13594_v57  ;;  %v7430_v25 = vsel %vm12182_vm11, %v8632_v34, %v7429_v30  ;;  %v7443_v35 = vrot.slane %v8615_v32, 5  ;;  %v7468_v22 = vsel %vm12182_vm11, %v7466_v40, %v7467_v23  ;;  %v7478_v11 = vrot.slane %v8630_v59, 5  ;;  %v8618_v27 = vld [vmem:[%s11236_s27 + $0xd8] sm:$0xf]  ;;  %v8617_v19 = vld [vmem:[%s11236_s27 + $0xd4] sm:$0xe] }
 0x269   : > { %v7465_v4 = vsel %vm12182_vm11, %v8637_v7, %v7464_v6  ;;  %v8607_v30 = vcombine.low %v7223_v54, %v7233_v26  ;;  %v7472_v45 = vsel %vm12182_vm11, %v8638_v41, %v7471_v3  ;;  %v7475_v50 = vsel %vm12182_vm11, %v7473_v60, %v7474_v28 }
 0x26a   : > { %9875 = vmatpush3.bf16.msra.mxu1 %v13621_v12  ;;  %9823 = vmatmul.mubr.bf16.gmra.mrb[24].mxu0 %v8605_v37  ;;  %v8631_v37 = vld [vmem:[%s11236_s27 + $0x11c] sm:$0x1]  ;;  %v7438_v38 = vrot.slane %v7436_v58, 4  ;;  %v7439_v49 = vrot.slane %v8613_v55, 5  ;;  %v8645_v9 = vcombine.low %v7465_v4, %v7468_v22  ;;  %v8634_v5 = vrot.slane %v8614_v31, 9 }
 0x26b   : > { %9868 = vmatprep.subr.bf16.mxu1 %v13651_v29  ;;  %9839 = vmatpush3.bf16.msra.mxu0 %v13594_v57  ;;  %v7433_v57 = vsel %vm12182_vm11, %v7431_v16, %v7432_v18  ;;  %v7445_v8 = vrot.slane %v7443_v35, 4  ;;  %v7446_v0 = vrot.slane %v8616_v62, 5  ;;  %v8646_v46 = vcombine.low %v7472_v45, %v7475_v50 }
 0x26c   : > { %9826 = vmatprep.mubr.bf16.mxu0 %v8606_v48  ;;  %9840 = vmatprep.subr.bf16.mxu0 %v13621_v12  ;;  %v8640_v6 = vcombine.low %v7430_v25, %v7433_v57  ;;  %v8633_v48 = vrot.slane %v8611_v56, 9  ;;  %v8639_v24 = vrot.slane %v8629_v63, 9  ;;  %v7480_v3 = vrot.slane %v7478_v11, 4 }
 0x26d   : > { %9603 = vmatmul.mubr.bf16.gmra.mrb[44].mxu1 %v8451_v14  ;;  %v7481_v51 = vrot.slane %v8631_v37, 5  ;;  %v7440_v14 = vsel %vm12182_vm11, %v7438_v38, %v7439_v49  ;;  %v7450_v34 = vrot.slane %v8618_v27, 5  ;;  %v7444_v16 = vsel %vm12182_vm11, %v8634_v5, %v7443_v35  ;;  %v14641_v37 = vld [vmem:[#allocation38_spill] sm:$0xff] }
 0x26e   : > { %9876 = vmatpush3.bf16.msra.mxu1 %v13651_v29  ;;  %9854 = vmatprep.mubr.bf16.mxu1 %v8644_v39  ;;  %v7447_v18 = vsel %vm12182_vm11, %v7445_v8, %v7446_v0  ;;  %v8619_v39 = vld [vmem:[%s11236_s27 + $0xdc] sm:$0x1]  ;;  %v8635_v32 = vrot.slane %v8617_v19, 9 }
 0x26f   : > { %9869 = vmatprep.subr.bf16.mxu1 %v13687_v42  ;;  %9841 = vmatpush3.bf16.msra.mxu0 %v13621_v12  ;;  %v7437_v12 = vsel %vm12182_vm11, %v8633_v48, %v7436_v58  ;;  %v7482_v7 = vsel %vm12182_vm11, %v7480_v3, %v7481_v51  ;;  %v8642_v23 = vcombine.low %v7444_v16, %v7447_v18  ;;  %v7452_v41 = vrot.slane %v7450_v34, 4 }
 0x270   : > { %9842 = vmatprep.subr.bf16.mxu0 %v13651_v29  ;;  %v8641_v40 = vcombine.low %v7437_v12, %v7440_v14  ;;  %v7453_v60 = vrot.slane %v8619_v39, 5  ;;  %v7451_v59 = vsel %vm12182_vm11, %v8635_v32, %v7450_v34 }
 0x272   : > { %9877 = vmatpush3.bf16.msra.mxu1 %v13687_v42  ;;  %9827 = vmatmul.mubr.bf16.gmra.mrb[28].mxu0 %v8607_v30  ;;  %v7454_v54 = vsel %vm12182_vm11, %v7452_v41, %v7453_v60 }
 0x273   : > { %9843 = vmatpush3.bf16.msra.mxu0 %v13651_v29  ;;  %9846 = vmatprep.mubr.bf16.mxu0 %v8640_v6  ;;  %v7479_v29 = vsel %vm12182_vm11, %v8639_v24, %v7478_v11  ;;  %v8643_v26 = vcombine.low %v7451_v59, %v7454_v54 }
 0x274   : > { %9844 = vmatprep.subr.bf16.mxu0 %v13687_v42  ;;  %v8647_v28 = vcombine.low %v7479_v29, %v7482_v7 }
 0x275   : > { %9855 = vmatmul.mubr.bf16.vlgmr.msra.gmra.mrb[48].mxu1 %v8645_v9 }
 0x276   : > { %9858 = vmatprep.mubr.bf16.mxu1 %v8646_v46 }
 0x277   : > { %9845 = vmatpush3.bf16.msra.mxu0 %v13687_v42  ;;  %v13867_v42 = vld [vmem:[%s14391_s2] ss:$0 sm:$0xff] }
 0x278   : > { %v13871_v58 = vadd.f32 %v13309_v33, %v13867_v42  ;;  %v13875_v25 = vadd.f32 %v13321_v20, %v13867_v42  ;;  %v13879_v2 = vadd.f32 %v13331_v21, %v13867_v42  ;;  %v13883_v57 = vadd.f32 %v13345_v53, %v13867_v42 }
 0x279   : > { %v13888_v55 = vadd.f32 %v13413_v47, %v13867_v42  ;;  %v13893_v20 = vadd.f32 %v13425_v13, %v13867_v42  ;;  %v13898_v21 = vadd.f32 %v13435_v10, %v13867_v42  ;;  %v13904_v47 = vadd.f32 %v13447_v61, %v13867_v42 }
 0x27a   : > { %9847 = vmatmul.mubr.bf16.vlgmr.msra.gmra.mrb[16].mxu0 %v8641_v40  ;;  %v3364_v56 = vsub.f32 0.0, %v13871_v58  ;;  %v3362_v33 = vsub.f32 0.0, %v13875_v25  ;;  %v3365_v35 = vsub.f32 0.0, %v13879_v2  ;;  %v3363_v53 = vsub.f32 0.0, %v13883_v57 }
 0x27b   : > { %9850 = vmatprep.mubr.bf16.mxu0 %v8642_v23  ;;  %v3368_v22 = vsub.f32 0.0, %v13888_v55  ;;  %v3366_v62 = vsub.f32 0.0, %v13893_v20  ;;  %v13909_v13 = vadd.f32 %v13531_v44, %v13867_v42  ;;  %v3369_v10 = vsub.f32 0.0, %v13898_v21 }
 0x27c   : > { %v3382_v4 = vmul.f32 1.442695, %v3364_v56  ;;  %v3378_v31 = vmul.f32 1.442695, %v3362_v33  ;;  %v3384_v11 = vmul.f32 1.442695, %v3365_v35  ;;  %v13914_v30 = vadd.f32 %v13541_v43, %v13867_v42 }
 0x27d   : > { %9859 = vmatmul.mubr.bf16.gmra.mrb[52].mxu1 %v8647_v28  ;;  %v3380_v45 = vmul.f32 1.442695, %v3363_v53  ;;  %v13918_v50 = vadd.f32 %v13551_v1, %v13867_v42  ;;  %v3390_v61 = vmul.f32 1.442695, %v3368_v22  ;;  %v3367_v63 = vsub.f32 0.0, %v13904_v47 }
 0x27e   : > { %10502 = vpow2.f32 %v3382_v4  ;;  %v13923_v44 = vadd.f32 %v14641_v37, %v13867_v42  ;;  %v3386_v6 = vmul.f32 1.442695, %v3366_v62  ;;  %v3372_v48 = vsub.f32 0.0, %v13909_v13 }
 0x27f   : > { %10504 = vpow2.f32 %v3378_v31  ;;  %v13928_v43 = vadd.f32 %v13642_v36, %v13867_v42  ;;  %v3392_v38 = vmul.f32 1.442695, %v3369_v10  ;;  %v3370_v1 = vsub.f32 0.0, %v13914_v30 }
 0x280   : > { %10506 = vpow2.f32 %v3384_v11  ;;  %v13933_v49 = vadd.f32 %v13649_v15, %v13867_v42  ;;  %v3373_v9 = vsub.f32 0.0, %v13918_v50  ;;  %v3388_v5 = vmul.f32 1.442695, %v3367_v63 }
 0x281   : > { %10508 = vpow2.f32 %v3380_v45  ;;  %v3371_v8 = vsub.f32 0.0, %v13923_v44  ;;  %v13939_v0 = vadd.f32 %v13655_v52, %v13867_v42  ;;  %v3398_v36 = vmul.f32 1.442695, %v3372_v48  ;;  %v14643_v48 = vld [vmem:[#allocation30_spill] sm:$0xff] }
 0x282   : > { %9851 = vmatmul.mubr.bf16.gmra.mrb[20].mxu0 %v8643_v26  ;;  %10510 = vpow2.f32 %v3390_v61  ;;  %v3376_v27 = vsub.f32 0.0, %v13928_v43  ;;  %v3394_v46 = vmul.f32 1.442695, %v3370_v1  ;;  %v3374_v15 = vsub.f32 0.0, %v13933_v49 }
 0x283   : > { %10512 = vpow2.f32 %v3386_v6  ;;  %v3400_v24 = vmul.f32 1.442695, %v3373_v9  ;;  %v3396_v3 = vmul.f32 1.442695, %v3371_v8  ;;  %v3377_v51 = vsub.f32 0.0, %v13939_v0  ;;  %v14644_v8 = vld [vmem:[#allocation31_spill] sm:$0xff] }
 0x284   : > { %10514 = vpow2.f32 %v3392_v38  ;;  %v3406_v12 = vmul.f32 1.442695, %v3376_v27  ;;  %v3402_v34 = vmul.f32 1.442695, %v3374_v15  ;;  %v13946_v19 = vadd.f32 %v13659_v17, %v13867_v42 }
 0x285   : > { %10516 = vpow2.f32 %v3388_v5  ;;  %v3408_v18 = vmul.f32 1.442695, %v3377_v51 }
 0x286   : > { %10518 = vpow2.f32 %v3398_v36  ;;  %14642 = vst [vmem:[#allocation47_spill] sm:$0xff] %v13946_v19  ;;  %v3375_v28 = vsub.f32 0.0, %v13946_v19 }
 0x287   : > { %10520 = vpow2.f32 %v3394_v46 }
 0x288   : > { %v10503_v14 = vpop.eup %10502  ;;  %10522 = vpow2.f32 %v3400_v24  ;;  %v3404_v35 = vmul.f32 1.442695, %v3375_v28  ;;  %v14645_v24 = vld [vmem:[#allocation32_spill] sm:$0xff] }
 0x289   : > { %v10505_v52 = vpop.eup %10504  ;;  %10524 = vpow2.f32 %v3396_v3  ;;  %v3412_v29 = vadd.f32 1.0, %v10503_v14 }
 0x28a   : > { %v10507_v16 = vpop.eup %10506  ;;  %10526 = vpow2.f32 %v3406_v12  ;;  %v3410_v40 = vadd.f32 1.0, %v10505_v52  ;;  %v14646_v52 = vld [vmem:[#allocation33_spill] sm:$0xff] }
 0x28b   : > { %v10509_v39 = vpop.eup %10508  ;;  %10528 = vpow2.f32 %v3402_v34  ;;  %v3413_v32 = vadd.f32 1.0, %v10507_v16 }
 0x28c   : > { %v10511_v7 = vpop.eup %10510  ;;  %v3411_v60 = vadd.f32 1.0, %v10509_v39  ;;  %10530 = vpow2.f32 %v3408_v18 }
 0x28d   : > { %v10513_v23 = vpop.eup %10512  ;;  %10532 = vrcp.f32 %v3412_v29  ;;  %v3416_v59 = vadd.f32 1.0, %v10511_v7 }
 0x28e   : > { %v10515_v41 = vpop.eup %10514  ;;  %10534 = vrcp.f32 %v3410_v40  ;;  %v3414_v26 = vadd.f32 1.0, %v10513_v23 }
 0x28f   : > { %v10517_v54 = vpop.eup %10516  ;;  %10536 = vrcp.f32 %v3413_v32  ;;  %v3417_v56 = vadd.f32 1.0, %v10515_v41 }
 0x290   : > { %v10519_v17 = vpop.eup %10518  ;;  %10538 = vrcp.f32 %v3411_v60  ;;  %v3415_v4 = vadd.f32 1.0, %v10517_v54 }
 0x291   : > { %v10521_v33 = vpop.eup %10520  ;;  %10540 = vrcp.f32 %v3416_v59  ;;  %v3420_v31 = vadd.f32 1.0, %v10519_v17 }
 0x292   : > { %v10523_v53 = vpop.eup %10522  ;;  %10542 = vrcp.f32 %v3414_v26  ;;  %v3418_v11 = vadd.f32 1.0, %v10521_v33 }
 0x293   : > { %v10525_v22 = vpop.eup %10524  ;;  %10544 = vrcp.f32 %v3417_v56  ;;  %v3421_v45 = vadd.f32 1.0, %v10523_v53  ;;  %v14647_v53 = vld [vmem:[#allocation35_spill] sm:$0xff] }
 0x294   : > { %v10527_v62 = vpop.eup %10526  ;;  %10546 = vpow2.f32 %v3404_v35  ;;  %v3419_v61 = vadd.f32 1.0, %v10525_v22 }
 0x295   : > { %v10529_v10 = vpop.eup %10528  ;;  %10548 = vrcp.f32 %v3415_v4  ;;  %v3424_v6 = vadd.f32 1.0, %v10527_v62 }
 0x296   : > { %v10531_v37 = vpop.eup %10530  ;;  %10550 = vrcp.f32 %v3420_v31  ;;  %v3422_v5 = vadd.f32 1.0, %v10529_v10 }
 0x297   : > { %v10533_v9 = vpop.eup %10532  ;;  %10552 = vrcp.f32 %v3418_v11  ;;  %v3425_v14 = vadd.f32 1.0, %v10531_v37  ;;  %v14648_v11 = vld [vmem:[#allocation37_spill] sm:$0xff]  ;;  %v14649_v37 = vld [vmem:[#allocation39_spill] sm:$0xff] }
 0x298   : > { %v10535_v46 = vpop.eup %10534  ;;  %10554 = vrcp.f32 %v3421_v45  ;;  %v13969_v59 = vmul.f32 %v10533_v9, %v13871_v58 }
 0x299   : > { %v10537_v12 = vpop.eup %10536  ;;  %10556 = vrcp.f32 %v3419_v61  ;;  %v13973_v33 = vmul.f32 %v10535_v46, %v13875_v25 }
 0x29a   : > { %v10539_v18 = vpop.eup %10538  ;;  %10558 = vrcp.f32 %v3424_v6  ;;  %v13977_v62 = vmul.f32 %v10537_v12, %v13879_v2 }
 0x29b   : > { %v10541_v7 = vpop.eup %10540  ;;  %10560 = vrcp.f32 %v3422_v5  ;;  %v14650_v5 = vld [vmem:[#allocation41_spill] sm:$0xff] }
 0x29c   : > { %v10543_v32 = vpop.eup %10542  ;;  %10562 = vrcp.f32 %v3425_v14  ;;  %v13992_v46 = vmul.f32 %v10541_v7, %v13888_v55 }
 0x29d   : > { %v10545_v28 = vpop.eup %10544 }
 0x29e   : > { %v10547_v56 = vpop.eup %10546  ;;  %v14002_v14 = vmul.f32 %v10545_v28, %v13898_v21 }
 0x29f   : > { %v10549_v31 = vpop.eup %10548  ;;  %v3423_v9 = vadd.f32 1.0, %v10547_v56 }
 0x2a0   : > { %v10551_v61 = vpop.eup %10550 }
 0x328   : > { %v9592_v63 = vpop.f32.mrb[32].mxu1 }
 0x329   : > { %v9910_v38 = vadd.f32 %v9592_v63, %v14643_v48  ;;  %v5374_v1 = vpop.f32.mrb[33].mxu1  ;;  %v13981_v63 = vmul.f32 %v10539_v18, %v13883_v57  ;;  %v13995_v57 = vmul.f32 %v10543_v32, %v13893_v20  ;;  %v14012_v20 = vmul.f32 %v10551_v61, %v13909_v13 }
 0x32a   : > { %v9911_v36 = vadd.f32 %v5374_v1, %v14644_v8  ;;  %v9593_v27 = vpop.f32.mrb[34].mxu1  ;;  %v10553_v1 = vpop.eup %10552 }
 0x32b   : > { %v13952_v15 = vadd.f32 %v9910_v38, %v13867_v42  ;;  %v9912_v3 = vadd.f32 %v9593_v27, %v14645_v24  ;;  %v5377_v51 = vpop.f32.mrb[35].mxu1  ;;  %v10555_v27 = vpop.eup %10554  ;;  %v14015_v7 = vmul.f32 %v10553_v1, %v13914_v30 }
 0x32c   : > { %v13956_v34 = vadd.f32 %v9911_v36, %v13867_v42  ;;  %v9913_v16 = vadd.f32 %v5377_v51, %v14646_v52  ;;  %v10557_v12 = vpop.eup %10556 }
 0x32d   : > { %v5471_v39 = vsub.f32 0.0, %v13952_v15  ;;  %v13961_v29 = vadd.f32 %v9912_v3, %v13867_v42 }
 0x32e   : > { %v5469_v40 = vsub.f32 0.0, %v13956_v34  ;;  %v13965_v23 = vadd.f32 %v9913_v16, %v13867_v42  ;;  %v14005_v16 = vmul.f32 %v10549_v31, %v13904_v47 }
 0x32f   : > { %v5489_v41 = vmul.f32 1.442695, %v5471_v39  ;;  %v5472_v60 = vsub.f32 0.0, %v13961_v29  ;;  %v10559_v39 = vpop.eup %10558 }
 0x330   : > { %v5485_v54 = vmul.f32 1.442695, %v5469_v40  ;;  %v5470_v26 = vsub.f32 0.0, %v13965_v23  ;;  %v9596_v17 = vpop.f32.mrb[36].mxu1  ;;  %v10561_v21 = vpop.eup %10560 }
 0x331   : > { %10564 = vpow2.f32 %v5489_v41  ;;  %v5491_v35 = vmul.f32 1.442695, %v5472_v60  ;;  %v9914_v4 = vadd.f32 %v9596_v17, %v14647_v53  ;;  %v5390_v22 = vpop.f32.mrb[37].mxu1  ;;  %v14019_v41 = vmul.f32 %v10555_v27, %v13918_v50  ;;  %v10563_v56 = vpop.eup %10562 }
 0x332   : > { %10566 = vpow2.f32 %v5485_v54  ;;  %v5487_v58 = vmul.f32 1.442695, %v5470_v26  ;;  %v9915_v10 = vadd.f32 %v5390_v22, %v14648_v11  ;;  %v9597_v45 = vpop.f32.mrb[38].mxu1  ;;  %v14023_v54 = vmul.f32 %v10557_v12, %v13923_v44  ;;  %v14651_v26 = vld [vmem:[#allocation56_spill] sm:$0xff] }
 0x333   : > { %10568 = vpow2.f32 %v5491_v35  ;;  %v13984_v25 = vadd.f32 %v9914_v4, %v13867_v42  ;;  %v9916_v6 = vadd.f32 %v9597_v45, %v14649_v37  ;;  %v5393_v38 = vpop.f32.mrb[39].mxu1  ;;  %v14027_v35 = vmul.f32 %v10559_v39, %v13928_v43  ;;  %v14652_v4 = vld [vmem:[#allocation57_spill] sm:$0xff]  ;;  %v14654_v45 = vld [vmem:[#allocation59_spill] sm:$0xff] }
 0x334   : > { %10570 = vpow2.f32 %v5487_v58  ;;  %v13988_v2 = vadd.f32 %v9915_v10, %v13867_v42  ;;  %v9917_v36 = vadd.f32 %v5393_v38, %v14650_v5  ;;  %v14031_v10 = vmul.f32 %v10561_v21, %v13933_v49 }
 0x335   : > { %v5475_v3 = vsub.f32 0.0, %v13984_v25  ;;  %v13999_v51 = vadd.f32 %v9916_v6, %v13867_v42  ;;  %10572 = vrcp.f32 %v3423_v9  ;;  %v14655_v9 = vld [vmem:[#allocation60_spill] sm:$0xff] }
 0x336   : > { %v5473_v18 = vsub.f32 0.0, %v13988_v2  ;;  %v14009_v55 = vadd.f32 %v9917_v36, %v13867_v42  ;;  %14653 = vst [vmem:[#allocation48_spill] sm:$0xff] %v14031_v10 }
 0x337   : > { %v5497_v40 = vmul.f32 1.442695, %v5475_v3  ;;  %v5476_v32 = vsub.f32 0.0, %v13999_v51  ;;  %v14042_v3 = vmul.f32 %v10563_v56, %v13939_v0 }
 0x338   : > { %v5493_v47 = vmul.f32 1.442695, %v5473_v18  ;;  %v5474_v60 = vsub.f32 0.0, %v14009_v55  ;;  %v9600_v28 = vpop.f32.mrb[40].mxu1 }
 0x339   : > { %10574 = vpow2.f32 %v5497_v40  ;;  %v5499_v13 = vmul.f32 1.442695, %v5476_v32  ;;  %v9918_v30 = vadd.f32 %v9600_v28, %v14651_v26  ;;  %v5406_v17 = vpop.f32.mrb[41].mxu1  ;;  %14656 = vst [vmem:[#allocation43_spill] sm:$0xff] %v14042_v3 }
 0x33a   : > { %10576 = vpow2.f32 %v5493_v47  ;;  %v5495_v50 = vmul.f32 1.442695, %v5474_v60  ;;  %v9919_v22 = vadd.f32 %v5406_v17, %v14652_v4  ;;  %v9601_v31 = vpop.f32.mrb[42].mxu1 }
 0x33b   : > { %v10565_v58 = vpop.eup %10564  ;;  %10578 = vpow2.f32 %v5499_v13  ;;  %v14034_v44 = vadd.f32 %v9918_v30, %v13867_v42  ;;  %v9920_v61 = vadd.f32 %v9601_v31, %v14654_v45  ;;  %v5409_v6 = vpop.f32.mrb[43].mxu1 }
 0x33c   : > { %v10567_v38 = vpop.eup %10566  ;;  %v5519_v1 = vadd.f32 1.0, %v10565_v58  ;;  %10580 = vpow2.f32 %v5495_v50  ;;  %v14038_v43 = vadd.f32 %v9919_v22, %v13867_v42  ;;  %v9921_v36 = vadd.f32 %v5409_v6, %v14655_v9  ;;  %v14657_v6 = vld [vmem:[#allocation36_spill] sm:$0xff] }
 0x33d   : > { %v10569_v27 = vpop.eup %10568  ;;  %v5517_v49 = vadd.f32 1.0, %v10567_v38  ;;  %v5479_v12 = vsub.f32 0.0, %v14034_v44  ;;  %v14046_v18 = vadd.f32 %v9920_v61, %v13867_v42  ;;  %v9824_v32 = vpop.f32.mrb[24].mxu0 }
 0x33e   : > { %v10571_v39 = vpop.eup %10570  ;;  %10582 = vrcp.f32 %v5519_v1  ;;  %v5520_v40 = vadd.f32 1.0, %v10569_v27  ;;  %v5477_v21 = vsub.f32 0.0, %v14038_v43  ;;  %v14050_v47 = vadd.f32 %v9921_v36, %v13867_v42  ;;  %v7332_v13 = vpop.f32.mrb[25].mxu0  ;;  %v14659_v27 = vld [vmem:[#allocation20_spill] sm:$0xff] }
 0x33f   : > { %10584 = vrcp.f32 %v5517_v49  ;;  %v5518_v60 = vadd.f32 1.0, %v10571_v39  ;;  %v5505_v28 = vmul.f32 1.442695, %v5479_v12  ;;  %v14053_v0 = vadd.f32 %v9824_v32, %v14651_v26  ;;  %v9825_v50 = vpop.f32.mrb[26].mxu0  ;;  %v14064_v1 = vpop.eup %10572  ;;  %v14660_v32 = vld [vmem:[#allocation44_spill] sm:$0xff] }
 0x340   : > { %10586 = vrcp.f32 %v5520_v40  ;;  %v5501_v30 = vmul.f32 1.442695, %v5477_v21  ;;  %v14056_v17 = vadd.f32 %v7332_v13, %v14652_v4  ;;  %v5480_v56 = vsub.f32 0.0, %v14046_v18  ;;  %v9604_v22 = vpop.f32.mrb[44].mxu1  ;;  %v7335_v61 = vpop.f32.mrb[27].mxu0  ;;  %14658 = vst [vmem:[#allocation46_spill] sm:$0xff] %v14064_v1 }
 0x341   : > { %10588 = vrcp.f32 %v5518_v60  ;;  %v14060_v31 = vadd.f32 %v9825_v50, %v14654_v45  ;;  %v5478_v58 = vsub.f32 0.0, %v14050_v47  ;;  %v9922_v26 = vadd.f32 %v9604_v22, %v14657_v6  ;;  %v5422_v38 = vpop.f32.mrb[45].mxu1 }
 0x342   : > { %10590 = vpow2.f32 %v5505_v28  ;;  %v5507_v36 = vmul.f32 1.442695, %v5480_v56  ;;  %v14067_v4 = vadd.f32 %v7335_v61, %v14655_v9  ;;  %v9923_v49 = vadd.f32 %v5422_v38, %v14659_v27  ;;  %v9605_v12 = vpop.f32.mrb[46].mxu1  ;;  %v14661_v9 = vld [vmem:[#allocation21_spill] sm:$0xff] }
 0x343   : > { %v10575_v39 = vpop.eup %10574  ;;  %10592 = vpow2.f32 %v5501_v30  ;;  %v5503_v45 = vmul.f32 1.442695, %v5478_v58  ;;  %v14071_v40 = vadd.f32 %v9922_v26, %v13867_v42  ;;  %v9924_v21 = vadd.f32 %v9605_v12, %v14660_v32  ;;  %v5425_v60 = vpop.f32.mrb[47].mxu1 }
 0x344   : > { %v10577_v13 = vpop.eup %10576  ;;  %v5523_v50 = vadd.f32 1.0, %v10575_v39  ;;  %10594 = vpow2.f32 %v5507_v36  ;;  %v14075_v28 = vadd.f32 %v9923_v49, %v13867_v42  ;;  %v9925_v56 = vadd.f32 %v5425_v60, %v14661_v9 }
 0x345   : > { %v10579_v22 = vpop.eup %10578  ;;  %v5521_v61 = vadd.f32 1.0, %v10577_v13  ;;  %10596 = vpow2.f32 %v5503_v45  ;;  %v5483_v30 = vsub.f32 0.0, %v14071_v40  ;;  %v14080_v58 = vadd.f32 %v9924_v21, %v13867_v42  ;;  %v9828_v12 = vpop.f32.mrb[28].mxu0 }
 0x346   : > { %v10581_v26 = vpop.eup %10580  ;;  %10598 = vrcp.f32 %v5523_v50  ;;  %v5524_v38 = vadd.f32 1.0, %v10579_v22  ;;  %v5481_v39 = vsub.f32 0.0, %v14075_v28  ;;  %v14084_v36 = vadd.f32 %v9925_v56, %v13867_v42  ;;  %v7348_v45 = vpop.f32.mrb[29].mxu0 }
 0x347   : > { %10600 = vrcp.f32 %v5521_v61  ;;  %v5522_v49 = vadd.f32 1.0, %v10581_v26  ;;  %v5513_v60 = vmul.f32 1.442695, %v5483_v30  ;;  %v14087_v13 = vadd.f32 %v9828_v12, %v14657_v6  ;;  %v9829_v22 = vpop.f32.mrb[30].mxu0 }
 0x348   : > { %v10583_v5 = vpop.eup %10582  ;;  %10602 = vrcp.f32 %v5524_v38  ;;  %v5509_v21 = vmul.f32 1.442695, %v5481_v39  ;;  %v14090_v3 = vadd.f32 %v7348_v45, %v14659_v27  ;;  %v5484_v50 = vsub.f32 0.0, %v14080_v58  ;;  %v9856_v10 = vpop.f32.mrb[48].mxu1 }
 0x349   : > { %v10585_v1 = vpop.eup %10584  ;;  %v5551_v56 = vmul.f32 %v10583_v5, %v13952_v15  ;;  %10604 = vrcp.f32 %v5522_v49  ;;  %v14095_v61 = vadd.f32 %v9829_v22, %v14660_v32  ;;  %v5482_v6 = vsub.f32 0.0, %v14084_v36  ;;  %v7351_v30 = vpop.f32.mrb[31].mxu0 }
 0x34a   : > { %v7581_v26 = vpop.f32.mrb[49].mxu1  ;;  %v10587_v38 = vpop.eup %10586  ;;  %v5549_v12 = vmul.f32 %v10585_v1, %v13956_v34  ;;  %10606 = vpow2.f32 %v5513_v60  ;;  %v5515_v27 = vmul.f32 1.442695, %v5484_v50  ;;  %v14100_v39 = vadd.f32 %v7351_v30, %v14661_v9 }
 0x34b   : > { %14662 = vst [vmem:[#allocation45_spill] sm:$0xff] %v14095_v61  ;;  %v9857_v45 = vpop.f32.mrb[50].mxu1  ;;  %v10589_v19 = vpop.eup %10588  ;;  %v14103_v15 = vadd.f32 %v5551_v56, %v13969_v59  ;;  %v5552_v5 = vmul.f32 %v10587_v38, %v13961_v29  ;;  %10608 = vpow2.f32 %v5509_v21  ;;  %v5511_v32 = vmul.f32 1.442695, %v5482_v6 }
 0x34c   : > { %v14106_v49 = vpop.f32.mrb[51].mxu1  ;;  %v10591_v22 = vpop.eup %10590  ;;  %v14109_v61 = vadd.f32 %v5549_v12, %v13973_v33  ;;  %v5550_v34 = vmul.f32 %v10589_v19, %v13965_v23  ;;  %10610 = vpow2.f32 %v5515_v27  ;;  %v9935_v1 = vadd.f32 %v14053_v0, %v9856_v10 }
 0x34d   : > { %v10593_v9 = vpop.eup %10592  ;;  %v14114_v60 = vadd.f32 %v5552_v5, %v13977_v62  ;;  %v5527_v59 = vadd.f32 1.0, %v10591_v22  ;;  %10612 = vpow2.f32 %v5511_v32  ;;  %v9937_v29 = vadd.f32 %v14056_v17, %v7581_v26  ;;  %v9848_v33 = vpop.f32.mrb[16].mxu0 }
 0x34e   : > { %v10595_v21 = vpop.eup %10594  ;;  %v14118_v50 = vadd.f32 %v5550_v34, %v13981_v63  ;;  %v5525_v56 = vadd.f32 1.0, %v10593_v9  ;;  %v14121_v6 = vadd.f32 %v9935_v1, %v13867_v42  ;;  %v9939_v19 = vadd.f32 %v14060_v31, %v9857_v45  ;;  %v7549_v0 = vpop.f32.mrb[17].mxu0 }
 0x34f   : > { %v10597_v23 = vpop.eup %10596  ;;  %10614 = vrcp.f32 %v5527_v59  ;;  %v5528_v10 = vadd.f32 1.0, %v10595_v21  ;;  %v9926_v62 = vadd.f32 %v9848_v33, %v14643_v48  ;;  %v14126_v30 = vadd.f32 %v9937_v29, %v13867_v42  ;;  %v9849_v12 = vpop.f32.mrb[18].mxu0 }
 0x350   : > { %v10599_v17 = vpop.eup %10598  ;;  %10616 = vrcp.f32 %v5525_v56  ;;  %v5526_v63 = vadd.f32 1.0, %v10597_v23  ;;  %v7654_v26 = vsub.f32 0.0, %v14121_v6  ;;  %v9927_v38 = vadd.f32 %v7549_v0, %v14644_v8  ;;  %v14130_v27 = vpop.f32.mrb[52].mxu1 }
 0x351   : > { %v10601_v31 = vpop.eup %10600  ;;  %v5555_v45 = vmul.f32 %v10599_v17, %v13984_v25  ;;  %10618 = vrcp.f32 %v5528_v10  ;;  %v14134_v48 = vadd.f32 %v9926_v62, %v13867_v42  ;;  %v7652_v5 = vsub.f32 0.0, %v14126_v30  ;;  %v7552_v32 = vpop.f32.mrb[19].mxu0 }
 0x352   : > { %v14137_v22 = vpop.f32.mrb[53].mxu1  ;;  %v10603_v34 = vpop.eup %10602  ;;  %v5553_v1 = vmul.f32 %v10601_v31, %v13988_v2  ;;  %10620 = vrcp.f32 %v5526_v63  ;;  %v7680_v8 = vmul.f32 1.442695, %v7654_v26  ;;  %v14141_v9 = vadd.f32 %v9927_v38, %v13867_v42 }
 0x353   : > { %v14143_v59 = vpop.f32.mrb[54].mxu1  ;;  %v10605_v25 = vpop.eup %10604  ;;  %v14146_v29 = vadd.f32 %v5555_v45, %v13992_v46  ;;  %v5556_v21 = vmul.f32 %v10603_v34, %v13999_v51  ;;  %v7646_v56 = vsub.f32 0.0, %v14134_v48  ;;  %v7676_v33 = vmul.f32 1.442695, %v7652_v5 }
 0x354   : > { %v14150_v23 = vpop.f32.mrb[55].mxu1  ;;  %v10607_v10 = vpop.eup %10606  ;;  %v14153_v2 = vadd.f32 %v5553_v1, %v13995_v57  ;;  %v5554_v62 = vmul.f32 %v10605_v25, %v14009_v55  ;;  %10622 = vpow2.f32 %v7680_v8  ;;  %v7644_v0 = vsub.f32 0.0, %v14141_v9 }
 0x355   : > { %v10609_v17 = vpop.eup %10608  ;;  %v14158_v46 = vadd.f32 %v5556_v21, %v14002_v14  ;;  %v5531_v63 = vadd.f32 1.0, %v10607_v10  ;;  %v7664_v51 = vmul.f32 1.442695, %v7646_v56  ;;  %10624 = vpow2.f32 %v7676_v33  ;;  %v9852_v5 = vpop.f32.mrb[20].mxu0 }
 0x356   : > { %v10611_v26 = vpop.eup %10610  ;;  %v14161_v38 = vadd.f32 %v5554_v62, %v14005_v16  ;;  %v5529_v31 = vadd.f32 1.0, %v10609_v17  ;;  %v7660_v45 = vmul.f32 1.442695, %v7644_v0  ;;  %v9928_v57 = vadd.f32 %v9849_v12, %v14645_v24  ;;  %v7565_v8 = vpop.f32.mrb[21].mxu0 }
 0x357   : > { %v10613_v55 = vpop.eup %10612  ;;  %10626 = vrcp.f32 %v5531_v63  ;;  %v5532_v34 = vadd.f32 1.0, %v10611_v26  ;;  %v14165_v1 = vadd.f32 %v9939_v19, %v13867_v42  ;;  %v9929_v14 = vadd.f32 %v7552_v32, %v14646_v52  ;;  %v9853_v56 = vpop.f32.mrb[22].mxu0 }
 0x358   : > { %10628 = vrcp.f32 %v5529_v31  ;;  %v5530_v25 = vadd.f32 1.0, %v10613_v55  ;;  %v14169_v21 = vadd.f32 %v9928_v57, %v13867_v42  ;;  %v9941_v16 = vadd.f32 %v14067_v4, %v14106_v49  ;;  %v14178_v52 = vpop.f32.mrb[23].mxu0 }
 0x359   : > { %v10615_v24 = vpop.eup %10614  ;;  %10630 = vrcp.f32 %v5532_v34  ;;  %v7655_v12 = vsub.f32 0.0, %v14165_v1  ;;  %v14175_v33 = vadd.f32 %v9929_v14, %v13867_v42  ;;  %v9930_v19 = vadd.f32 %v9852_v5, %v14647_v53 }
 0x35a   : > { %v10617_v32 = vpop.eup %10616  ;;  %v5559_v10 = vmul.f32 %v10615_v24, %v14034_v44  ;;  %10632 = vrcp.f32 %v5530_v25  ;;  %v7647_v62 = vsub.f32 0.0, %v14169_v21  ;;  %v14183_v4 = vadd.f32 %v9941_v16, %v13867_v42 }
 0x35b   : > { %v10619_v49 = vpop.eup %10618  ;;  %v5557_v0 = vmul.f32 %v10617_v32, %v14038_v43  ;;  %10634 = vpow2.f32 %v7664_v51  ;;  %v7682_v17 = vmul.f32 1.442695, %v7655_v12  ;;  %v7645_v63 = vsub.f32 0.0, %v14175_v33 }
 0x35c   : > { %v10621_v26 = vpop.eup %10620  ;;  %v14188_v53 = vadd.f32 %v5559_v10, %v14012_v20  ;;  %v5560_v31 = vmul.f32 %v10619_v49, %v14046_v18  ;;  %10636 = vpow2.f32 %v7660_v45  ;;  %v7666_v44 = vmul.f32 1.442695, %v7647_v62 }
 0x35d   : > { %v14192_v57 = vadd.f32 %v5557_v0, %v14015_v7  ;;  %v5558_v5 = vmul.f32 %v10621_v26, %v14050_v47  ;;  %10638 = vpow2.f32 %v7682_v17  ;;  %v7662_v55 = vmul.f32 1.442695, %v7645_v63  ;;  %v14663_v0 = vld [vmem:[#allocation47_spill] sm:$0xff]  ;;  %v14664_v17 = vld [vmem:[#allocation46_spill] sm:$0xff]  ;;  %v14665_v63 = vld [vmem:[#allocation48_spill] sm:$0xff] }
 0x35e   : > { %v10623_v43 = vpop.eup %10622  ;;  %v14196_v51 = vadd.f32 %v5560_v31, %v14019_v41  ;;  %10640 = vpow2.f32 %v7666_v44  ;;  %v7653_v34 = vsub.f32 0.0, %v14183_v4  ;;  %v14200_v20 = vadd.f32 %v9930_v19, %v13867_v42 }
 0x35f   : > { %v10625_v18 = vpop.eup %10624  ;;  %v14203_v45 = vadd.f32 %v5558_v5, %v14023_v54  ;;  %v7702_v7 = vadd.f32 1.0, %v10623_v43  ;;  %10642 = vpow2.f32 %v7662_v55  ;;  %v9943_v47 = vadd.f32 %v14087_v13, %v14130_v27  ;;  %v14666_v55 = vld [vmem:[#allocation43_spill] sm:$0xff] }
 0x360   : > { %v7700_v14 = vadd.f32 1.0, %v10625_v18  ;;  %v7678_v25 = vmul.f32 1.442695, %v7653_v34  ;;  %v7650_v41 = vsub.f32 0.0, %v14200_v20  ;;  %v9931_v16 = vadd.f32 %v7565_v8, %v14648_v11 }
 0x361   : > { %v10627_v24 = vpop.eup %10626  ;;  %10644 = vrcp.f32 %v7702_v7  ;;  %v14210_v12 = vadd.f32 %v9943_v47, %v13867_v42  ;;  %v9945_v54 = vadd.f32 %v14090_v3, %v14137_v22  ;;  %v9932_v19 = vadd.f32 %v9853_v56, %v14649_v37 }
 0x362   : > { %v10629_v32 = vpop.eup %10628  ;;  %v5563_v10 = vmul.f32 %v10627_v24, %v14071_v40  ;;  %10646 = vrcp.f32 %v7700_v14  ;;  %v7672_v13 = vmul.f32 1.442695, %v7650_v41  ;;  %v14217_v27 = vadd.f32 %v9931_v16, %v13867_v42  ;;  %v14667_v16 = vld [vmem:[#allocation45_spill] sm:$0xff] }
 0x363   : > { %v10631_v62 = vpop.eup %10630  ;;  %v5561_v11 = vmul.f32 %v10629_v32, %v14075_v28  ;;  %10648 = vpow2.f32 %v7678_v25  ;;  %v7658_v8 = vsub.f32 0.0, %v14210_v12  ;;  %v14222_v49 = vadd.f32 %v9945_v54, %v13867_v42  ;;  %v14668_v32 = vld [vmem:[#allocation41_spill] sm:$0xff] }
 0x364   : > { %v10633_v3 = vpop.eup %10632  ;;  %v14225_v37 = vadd.f32 %v5563_v10, %v14027_v35  ;;  %v5564_v40 = vmul.f32 %v10631_v62, %v14080_v58  ;;  %10650 = vpow2.f32 %v7672_v13  ;;  %v7648_v22 = vsub.f32 0.0, %v14217_v27 }
 0x365   : > { %v10635_v56 = vpop.eup %10634  ;;  %v3455_v28 = vmul.f32 %v14664_v17, %v14663_v0  ;;  %v14232_v26 = vadd.f32 %v5561_v11, %v14665_v63  ;;  %v5562_v31 = vmul.f32 %v10633_v3, %v14084_v36  ;;  %v7688_v44 = vmul.f32 1.442695, %v7658_v8 }
 0x366   : > { %v10637_v5 = vpop.eup %10636  ;;  %v14236_v35 = vadd.f32 %v5564_v40, %v14666_v55  ;;  %v7694_v43 = vadd.f32 1.0, %v10635_v56  ;;  %v7656_v58 = vsub.f32 0.0, %v14222_v49  ;;  %v14240_v34 = vadd.f32 %v9932_v19, %v13867_v42 }
 0x367   : > { %v10639_v18 = vpop.eup %10638  ;;  %v14242_v7 = vadd.f32 %v5562_v31, %v3455_v28  ;;  %v7692_v47 = vadd.f32 1.0, %v10637_v5  ;;  %10652 = vpow2.f32 %v7688_v44  ;;  %v7668_v14 = vmul.f32 1.442695, %v7648_v22 }
 0x368   : > { %v10641_v36 = vpop.eup %10640  ;;  %10654 = vrcp.f32 %v7694_v43  ;;  %v7703_v25 = vadd.f32 1.0, %v10639_v18  ;;  %v7651_v41 = vsub.f32 0.0, %v14240_v34  ;;  %v9947_v24 = vadd.f32 %v14667_v16, %v14143_v59 }
 0x369   : > { %v10643_v54 = vpop.eup %10642  ;;  %10656 = vrcp.f32 %v7692_v47  ;;  %v7695_v19 = vadd.f32 1.0, %v10641_v36  ;;  %v9933_v10 = vadd.f32 %v14178_v52, %v14668_v32  ;;  %v9949_v13 = vadd.f32 %v14100_v39, %v14150_v23 }
 0x36a   : > { %10658 = vrcp.f32 %v7703_v25  ;;  %v7693_v62 = vadd.f32 1.0, %v10643_v54  ;;  %v7684_v11 = vmul.f32 1.442695, %v7656_v58  ;;  %v14255_v8 = vadd.f32 %v9947_v24, %v13867_v42 }
 0x36b   : > { %v10645_v3 = vpop.eup %10644  ;;  %10660 = vrcp.f32 %v7695_v19  ;;  %v7674_v59 = vmul.f32 1.442695, %v7651_v41  ;;  %v14258_v40 = vadd.f32 %v9933_v10, %v13867_v42  ;;  %v14261_v22 = vadd.f32 %v9949_v13, %v13867_v42 }
 0x36c   : > { %v10647_v52 = vpop.eup %10646  ;;  %v7734_v39 = vmul.f32 %v10645_v3, %v14121_v6  ;;  %10662 = vrcp.f32 %v7693_v62  ;;  %v7659_v23 = vsub.f32 0.0, %v14255_v8 }
 0x36d   : > { %v10649_v56 = vpop.eup %10648  ;;  %v7732_v0 = vmul.f32 %v10647_v52, %v14126_v30  ;;  %10664 = vpow2.f32 %v7668_v14  ;;  %v7649_v17 = vsub.f32 0.0, %v14258_v40  ;;  %v7657_v28 = vsub.f32 0.0, %v14261_v22 }
 0x36e   : > { %v10651_v63 = vpop.eup %10650  ;;  %v7750_v31 = vadd.f32 %v7734_v39, %v14188_v53  ;;  %v7701_v44 = vadd.f32 1.0, %v10649_v56  ;;  %10666 = vpow2.f32 %v7684_v11  ;;  %v7690_v42 = vmul.f32 1.442695, %v7659_v23 }
 0x36f   : > { %v7748_v5 = vadd.f32 %v7732_v0, %v14192_v57  ;;  %v7698_v6 = vadd.f32 1.0, %v10651_v63  ;;  %10668 = vpow2.f32 %v7674_v59  ;;  %v7670_v55 = vmul.f32 1.442695, %v7649_v17 }
 0x370   : > { %7766 = vst [vmem:[%s14270_s26 + $0x50] sm:$0xff] %v7750_v31  ;;  %10670 = vrcp.f32 %v7701_v44  ;;  %v7686_v43 = vmul.f32 1.442695, %v7657_v28 }
 0x371   : > { %v10653_v30 = vpop.eup %10652  ;;  %7764 = vst [vmem:[%s14270_s26 + $0x40] sm:$0xff] %v7748_v5  ;;  %10672 = vrcp.f32 %v7698_v6 }
 0x372   : > { %v10655_v58 = vpop.eup %10654  ;;  %v7706_v53 = vadd.f32 1.0, %v10653_v30  ;;  %10674 = vpow2.f32 %v7690_v42 }
 0x373   : > { %v10657_v18 = vpop.eup %10656  ;;  %v7726_v57 = vmul.f32 %v10655_v58, %v14134_v48  ;;  %10676 = vpow2.f32 %v7670_v55 }
 0x374   : > { %v10659_v47 = vpop.eup %10658  ;;  %v7724_v14 = vmul.f32 %v10657_v18, %v14141_v9  ;;  %10678 = vrcp.f32 %v7706_v53 }
 0x375   : > { %v10661_v36 = vpop.eup %10660  ;;  %v7742_v25 = vadd.f32 %v7726_v57, %v14103_v15  ;;  %v7735_v41 = vmul.f32 %v10659_v47, %v14165_v1  ;;  %10680 = vpow2.f32 %v7686_v43 }
 0x376   : > { %v10663_v16 = vpop.eup %10662  ;;  %v7740_v24 = vadd.f32 %v7724_v14, %v14109_v61  ;;  %v7727_v54 = vmul.f32 %v10661_v36, %v14169_v21 }
 0x377   : > { %v10665_v48 = vpop.eup %10664  ;;  %7758 = vst [vmem:[%s14270_s26 + $0x10] sm:$0xff] %v7742_v25  ;;  %v7751_v19 = vadd.f32 %v7735_v41, %v14196_v51  ;;  %v7725_v9 = vmul.f32 %v10663_v16, %v14175_v33 }
 0x378   : > { %v10667_v32 = vpop.eup %10666  ;;  %7756 = vst [vmem:[%s14270_s26] sm:$0xff] %v7740_v24  ;;  %v7743_v15 = vadd.f32 %v7727_v54, %v14114_v60  ;;  %v7696_v10 = vadd.f32 1.0, %v10665_v48 }
 0x379   : > { %v10669_v1 = vpop.eup %10668  ;;  %7767 = vst [vmem:[%s14270_s26 + $0x58] sm:$0xff] %v7751_v19  ;;  %v7741_v13 = vadd.f32 %v7725_v9, %v14118_v50  ;;  %v7704_v62 = vadd.f32 1.0, %v10667_v32 }
 0x37a   : > { %v10671_v61 = vpop.eup %10670  ;;  %7759 = vst [vmem:[%s14270_s26 + $0x18] sm:$0xff] %v7743_v15  ;;  %10682 = vrcp.f32 %v7696_v10  ;;  %v7699_v21 = vadd.f32 1.0, %v10669_v1 }
 0x37b   : > { %v10673_v11 = vpop.eup %10672  ;;  %7757 = vst [vmem:[%s14270_s26 + $0x8] sm:$0xff] %v7741_v13  ;;  %v7733_v33 = vmul.f32 %v10671_v61, %v14183_v4  ;;  %10684 = vrcp.f32 %v7704_v62 }
 0x37c   : > { %v10675_v51 = vpop.eup %10674  ;;  %v7730_v60 = vmul.f32 %v10673_v11, %v14200_v20  ;;  %10686 = vrcp.f32 %v7699_v21 }
 0x37d   : > { %v10677_v3 = vpop.eup %10676  ;;  %v7749_v50 = vadd.f32 %v7733_v33, %v14203_v45  ;;  %v7707_v59 = vadd.f32 1.0, %v10675_v51 }
 0x37e   : > { %v10679_v52 = vpop.eup %10678  ;;  %v7746_v39 = vadd.f32 %v7730_v60, %v14146_v29  ;;  %v7697_v23 = vadd.f32 1.0, %v10677_v3 }
 0x37f   : > { %v10681_v56 = vpop.eup %10680  ;;  %7765 = vst [vmem:[%s14270_s26 + $0x48] sm:$0xff] %v7749_v50  ;;  %v7738_v4 = vmul.f32 %v10679_v52, %v14210_v12  ;;  %10688 = vrcp.f32 %v7707_v59 }
 0x380   : > { %7762 = vst [vmem:[%s14270_s26 + $0x30] sm:$0xff] %v7746_v39  ;;  %10690 = vrcp.f32 %v7697_v23  ;;  %v7705_v20 = vadd.f32 1.0, %v10681_v56 }
 0x381   : > { %v7754_v0 = vadd.f32 %v7738_v4, %v14225_v37 }
 0x382   : > { %10692 = vrcp.f32 %v7705_v20 }
 0x383   : > { %7770 = vst [vmem:[%s14270_s26 + $0x70] sm:$0xff] %v7754_v0 }
 0x384   : > { %v10683_v45 = vpop.eup %10682 }
 0x385   : > { %v10685_v17 = vpop.eup %10684  ;;  %v7728_v29 = vmul.f32 %v10683_v45, %v14217_v27 }
 0x386   : > { %v10687_v28 = vpop.eup %10686  ;;  %v7736_v12 = vmul.f32 %v10685_v17, %v14222_v49 }
 0x387   : > { %v7744_v63 = vadd.f32 %v7728_v29, %v14153_v2  ;;  %v7731_v31 = vmul.f32 %v10687_v28, %v14240_v34 }
 0x388   : > { %v7752_v37 = vadd.f32 %v7736_v12, %v14232_v26 }
 0x389   : > { %v10689_v44 = vpop.eup %10688  ;;  %7760 = vst [vmem:[%s14270_s26 + $0x20] sm:$0xff] %v7744_v63  ;;  %v7747_v42 = vadd.f32 %v7731_v31, %v14158_v46 }
 0x38a   : > { %v10691_v27 = vpop.eup %10690  ;;  %7768 = vst [vmem:[%s14270_s26 + $0x60] sm:$0xff] %v7752_v37  ;;  %v7739_v5 = vmul.f32 %v10689_v44, %v14255_v8 }
 0x38b   : > { %7763 = vst [vmem:[%s14270_s26 + $0x38] sm:$0xff] %v7747_v42  ;;  %v7729_v2 = vmul.f32 %v10691_v27, %v14258_v40 }
 0x38c   : > { %v10693_v49 = vpop.eup %10692  ;;  %v7755_v26 = vadd.f32 %v7739_v5, %v14236_v35 }
 0x38d   : > { %v7745_v34 = vadd.f32 %v7729_v2, %v14161_v38  ;;  %v7737_v6 = vmul.f32 %v10693_v49, %v14261_v22 }
 0x38e   : > { %7771 = vst [vmem:[%s14270_s26 + $0x78] sm:$0xff] %v7755_v26 }
 0x38f   : > { %7761 = vst [vmem:[%s14270_s26 + $0x28] sm:$0xff] %v7745_v34  ;;  %v7753_v46 = vadd.f32 %v7737_v6, %v14242_v7 }
 0x391   : > { %7769 = vst [vmem:[%s14270_s26 + $0x68] sm:$0xff] %v7753_v46 }
 0x392   : > { %10889 = shalt.err (!%p10886_p5)
}
 0x393   : > { %s10890_s27 = scalar_lea.hbm %s14319_s12, 2048  ;;  %s10894_s11 = scalar_lea.hbm %s14392_s3, 8192 }
 0x394   : > { %p10891_p8 = scmp.ne.s32.totalorder %s14319_s12, %s10890_s27  ;;  %p10895_p6 = scmp.lt.u32.totalorder %s14319_s12, %s14392_s3 }
 0x395   : > { %p10896_p10 = scmp.lt.u32.totalorder %s10894_s11, %s10890_s27  ;;  %p10898_p4 = scmp.lt.u32.totalorder %s10890_s27, %s14319_s12 }
 0x396   : > { %p10892_p12 = pnand %p10891_p8, %p14669_p7 }
 0x397   : > { %p10897_p3 = por %p10896_p10, %p10895_p6 }
 0x398   : > { %p10893_p1 = pneg %p10892_p12 }
 0x399   : > { %p10899_p9 = por %p10898_p4, %p10897_p3 }
 0x39b   : > { %p10900_p11 = pnand %p10899_p9, %p10893_p1 }
 0x39d   : > { %10903 = shalt.err (!%p10900_p11)
}
 0x39e   : > { %s11009_s23 = smov 128   ;;  %s11010_s24 = smov 8  }
 0x39f   : > { %10271 = dma.vmem_to_hbm [thread:$0]  (%p14669_p7), %s14321_s19, 2048, %s14319_s12, %s14328_s10, %s11009_s23, %s11009_s23, %s11010_s24  }
 0x3a0 PF: > { %s14670_s8 = sld [smem:[#allocation11_spill]]  ;;  %s14671_s18 = sld [smem:[#allocation13_spill]] }
 0x3a1   : > { %p10288_p13 = scmp.ge.s32.totalorder %s11002_s22, 2 }
 0x3a6   : > { %s7803_s9 = sand.u32 1, %s14670_s8   ;;  %p14672_p0 = scmp.ne.s32.totalorder %s14671_s18, 0 }
 0x3a7   : > { %s7804_s20 = scalar_lea.sflag [#allocation4], %s7803_s9 }
 0x3a8   : > { %p10282_p2 = pnand %p10288_p13, %p14672_p0 }
 0x3aa   : > { %10957 = dma.done.wait (!%p10282_p2), %s7804_s20, 2048  }
 0x3ab   : > { %10959 = vsyncadd (!%p10282_p2), %s7804_s20, 4294965248  ;;  %s20_s22 = sadd.s32 1, %s11002_s22   ;;  %s14673_s18 = sld [smem:[#allocation12_spill]] }
 0x3ac   : > { %p17_p5 = scmp.ge.s32.totalorder %s20_s22, 6   ;;  %s14674_s20 = sld [smem:[#allocation14_spill]] }
 0x3ad   : > { %s14675_s28 = sld [smem:[#allocation15_spill]]  ;;  %s14676_s12 = smov %s10966_s13 }
 0x3ae   : > { %s14677_s13 = smov %s10970_s14  ;;  %s14678_s14 = smov %s11171_s1 }
 0x3af   : > { %s14679_s15 = smov %s10978_s16  ;;  %s14680_s16 = smov %s10982_s17 }
 0x3b0   : > { %s14681_s17 = smov %s11166_s7  ;;  %s14682_s19 = smov %s10998_s21 }
 0x3b1   :  { %19 = sbr.rel (!%p17_p5) target bundleno = 12 (0xc), region = 88 }
 0x3b3   : > { %s14683_s21 = smov %s14675_s28 }
 0x3b8   :  { %7809 = vsyncpa [#allocation3], 1 }
 0x3b9   :  { %7811 = vsyncpa [#allocation3 + $0x1], 1 }
 0x3ba   :  { %7812 = vsyncpa [#allocation6], 1 }
 0x3bb   :  { %7813 = vsyncpa [#allocation4], 1 }
 0x3bc   :  { %7815 = vsyncpa [#allocation4 + $0x1], 1 }

</bundles_post_ra>
